<compile_context>
chip_gen: v7x
topology: tpu7x:2x2x1
jax: 0.10.0
libtpu: 0.0.40
codegen_flags: <defaults>
</compile_context>

<pallas_src>
import functools

import numpy as np
import jax
import jax.numpy as jnp
from jax import lax
from jax.experimental import pallas as pl
from jax.experimental.pallas import tpu as pltpu

LEAK = 0.2
BN_EPS = 1e-5


# ---------------------------------------------------------------------------
# Constant operands (built once per shape, become jit constants)
# ---------------------------------------------------------------------------
@functools.lru_cache(maxsize=None)
def _tap_selectors(h, w, n):
    """9 block-diagonal 0/1 matrices: flat [N*H*W] input pixels -> flat [N*Ho*Wo]
    output pixels of a 3x3 / stride-2 / pad-1 conv (zeros encode the padding)."""
    ho, wo = h // 2, w // 2
    sel = np.zeros((9, n * ho * wo, n * h * w), np.float32)
    for di in range(3):
        for dj in range(3):
            t = di * 3 + dj
            for i in range(ho):
                r = 2 * i + di - 1
                if not 0 <= r < h:
                    continue
                for j in range(wo):
                    s = 2 * j + dj - 1
                    if not 0 <= s < w:
                        continue
                    for b in range(n):
                        sel[t, b * ho * wo + i * wo + j, b * h * w + r * w + s] = 1.0
    return jnp.asarray(sel, dtype=jnp.bfloat16)


@functools.lru_cache(maxsize=None)
def _batch_pool(n, rows_per_batch):
    """[N, N*rows] 0/1 matrix that sums each batch's rows (used for the FC reduce)."""
    pool = np.zeros((n, n * rows_per_batch), np.float32)
    for b in range(n):
        pool[b, b * rows_per_batch:(b + 1) * rows_per_batch] = 1.0
    return jnp.asarray(pool)


# ---------------------------------------------------------------------------
# The fused kernel
# ---------------------------------------------------------------------------
def _dcdisc_fused_kernel(x1_ref, sel1_ref, w1_ref, b1_ref,
                         sel2_ref, w2_ref, b2_ref, g2_ref, be2_ref,
                         sel3_ref, w3_ref, b3_ref, g3_ref, be3_ref,
                         wfc_ref, pool_ref, bfc_ref, o_ref):
    f32 = jnp.float32
    bf16 = jnp.bfloat16

    def leaky(v):
        return jnp.where(v >= 0, v, LEAK * v)

    def batchnorm(z, gamma, beta):
        # training-mode BatchNorm: batch statistics over all (N, H, W) rows, biased var
        mean = jnp.mean(z, axis=0, keepdims=True)
        var = jnp.mean((z - mean) ** 2, axis=0, keepdims=True)
        return (z - mean) * (lax.rsqrt(var + BN_EPS) * gamma) + beta

    # ---- conv1 (Cin = 1) + LeakyReLU --------------------------------------
    # Each tap value comes from one MXU matmul against a 0/1 selection matrix;
    # the per-output-channel weight is applied as a cheap f32 VPU broadcast.
    x1 = x1_ref[...]                                              # [N*H*W, 128] bf16
    acc1 = jnp.zeros((sel1_ref.shape[1], w1_ref.shape[2]), f32)   # [N*Ho*Wo, 128]
    for t in range(9):
        taps = jnp.dot(sel1_ref[t], x1, preferred_element_type=f32)
        col = jnp.sum(taps, axis=1, keepdims=True)                # [N*Ho*Wo, 1]
        acc1 = acc1 + col * w1_ref[t]                             # bcast with [1, 128]
    a1 = leaky(acc1 + b1_ref[...]).astype(bf16)                   # [N*64, 128]

    # ---- conv2 + BatchNorm(train) + LeakyReLU ------------------------------
    acc2 = jnp.zeros((sel2_ref.shape[1], w2_ref.shape[2]), f32)   # [N*16, 256]
    for t in range(9):
        patch = jnp.dot(sel2_ref[t], a1, preferred_element_type=f32)
        acc2 = acc2 + jnp.dot(patch.astype(bf16), w2_ref[t],
                              preferred_element_type=f32)
    a2 = leaky(batchnorm(acc2 + b2_ref[...], g2_ref[...], be2_ref[...])
               ).astype(bf16)                                     # [N*16, 256]

    # ---- conv3 + BatchNorm(train) + LeakyReLU ------------------------------
    acc3 = jnp.zeros((sel3_ref.shape[1], w3_ref.shape[2]), f32)   # [N*4, 512]
    for t in range(9):
        patch = jnp.dot(sel3_ref[t], a2, preferred_element_type=f32)
        acc3 = acc3 + jnp.dot(patch.astype(bf16), w3_ref[t],
                              preferred_element_type=f32)
    a3 = leaky(batchnorm(acc3 + b3_ref[...], g3_ref[...], be3_ref[...]))  # f32

    # ---- FC + sigmoid (NCHW flatten folded into the pre-permuted weight) ---
    prod = a3 * wfc_ref[...]                                      # [N*4, 512] f32
    per_batch = jnp.dot(pool_ref[...], prod,
                        preferred_element_type=f32)               # [N, 512]
    logits = jnp.sum(per_batch, axis=1, keepdims=True) + bfc_ref[...]   # [N, 1]
    o_ref[...] = 1.0 / (1.0 + jnp.exp(-logits))


def dc_discriminator_forward(img_nchw, params):
    n, cin, h, w = img_nchw.shape
    assert cin == 1, "fused kernel implements the default input_channel=1"
    # TODO(synk): for input_channel > 1, route conv1 through the conv2-style
    # (selection-matmul, weight-matmul) tap pair instead of the broadcast trick.
    assert h == w and h % 8 == 0
    ff = (h // 8) * (h // 8)                                      # fc_size ** 2

    sel1 = _tap_selectors(h, w, n)
    sel2 = _tap_selectors(h // 2, w // 2, n)
    sel3 = _tap_selectors(h // 4, w // 4, n)
    pool = _batch_pool(n, ff)

    # conv1 input, block-diagonal over batch: row block b holds batch b's pixels,
    # with the value placed in lane column b (all other lanes zero).
    lane_sel = jnp.eye(n, 128, dtype=jnp.bfloat16)
    x_flat = img_nchw.reshape(n, h * w).astype(jnp.bfloat16)
    x1bd = (x_flat[:, :, None] * lane_sel[:, None, :]).reshape(n * h * w, 128)

    wfc_tiled = jnp.tile(params["k_wfc"], (n, 1))                 # [N*ff, 512]

    return pl.pallas_call(
        _dcdisc_fused_kernel,
        out_shape=jax.ShapeDtypeStruct((n, 1), jnp.float32),
        compiler_params=pltpu.CompilerParams(vmem_limit_bytes=32 * 1024 * 1024),
    )(x1bd, sel1, params["k_w1"], params["k_b1"],
      sel2, params["k_w2"], params["k_b2"], params["k_g2"], params["k_be2"],
      sel3, params["k_w3"], params["k_b3"], params["k_g3"], params["k_be3"],
      wfc_tiled, pool, params["k_bfc"])


# ---------------------------------------------------------------------------
# Parameter setup (raw params + kernel-ready repacked forms, done once)
# ---------------------------------------------------------------------------
def init_params(key, image_size=16, input_channel=1):
    fs = image_size // 8
    ks = jax.random.split(key, 10)

    def conv_w(k, cout, cin):
        return 0.02 * jax.random.normal(k, (cout, cin, 3, 3), jnp.float32)

    p = {
        "conv1_w": conv_w(ks[0], 128, input_channel),
        "conv1_b": 0.01 * jax.random.normal(ks[1], (128,), jnp.float32),
        "conv2_w": conv_w(ks[2], 256, 128),
        "conv2_b": 0.01 * jax.random.normal(ks[3], (256,), jnp.float32),
        "bn2_gamma": 1.0 + 0.02 * jax.random.normal(ks[4], (256,), jnp.float32),
        "bn2_beta": jnp.zeros((256,), jnp.float32),
        "conv3_w": conv_w(ks[5], 512, 256),
        "conv3_b": 0.01 * jax.random.normal(ks[6], (512,), jnp.float32),
        "bn3_gamma": 1.0 + 0.02 * jax.random.normal(ks[7], (512,), jnp.float32),
        "bn3_beta": jnp.zeros((512,), jnp.float32),
        "fc_w": 0.02 * jax.random.normal(ks[8], (1, 512 * fs * fs), jnp.float32),
        "fc_b": 0.01 * jax.random.normal(ks[9], (1,), jnp.float32),
    }

    def taps(w_oihw, dtype):
        cout, cin = w_oihw.shape[0], w_oihw.shape[1]
        return jnp.transpose(w_oihw, (2, 3, 1, 0)).reshape(9, cin, cout).astype(dtype)

    # Kernel-ready forms, computed once (not per forward call):
    p["k_w1"] = taps(p["conv1_w"], jnp.float32)          # [9, 1, 128]  (f32 VPU path)
    p["k_b1"] = p["conv1_b"].reshape(1, -1)
    p["k_w2"] = taps(p["conv2_w"], jnp.bfloat16)         # [9, 128, 256]
    p["k_b2"] = p["conv2_b"].reshape(1, -1)
    p["k_g2"] = p["bn2_gamma"].reshape(1, -1)
    p["k_be2"] = p["bn2_beta"].reshape(1, -1)
    p["k_w3"] = taps(p["conv3_w"], jnp.bfloat16)         # [9, 256, 512]
    p["k_b3"] = p["conv3_b"].reshape(1, -1)
    p["k_g3"] = p["bn3_gamma"].reshape(1, -1)
    p["k_be3"] = p["bn3_beta"].reshape(1, -1)
    # FC weight pre-permuted so the kernel's [h*w, c] activation layout matches the
    # PyTorch NCHW flatten (out.view(N, -1)) without transposing the activation.
    p["k_wfc"] = p["fc_w"].reshape(512, fs, fs).transpose(1, 2, 0).reshape(fs * fs, 512)
    p["k_bfc"] = p["fc_b"].reshape(1, 1)
    return p


# ---------------------------------------------------------------------------
# Pure-JAX reference (correctness verification only)
# ---------------------------------------------------------------------------
def reference_forward(img_nchw, params):
    x = jnp.transpose(img_nchw, (0, 2, 3, 1)).astype(jnp.float32)

    def conv(x, w, b):
        w_hwio = jnp.transpose(w, (2, 3, 1, 0))
        y = lax.conv_general_dilated(
            x, w_hwio, (2, 2), ((1, 1), (1, 1)),
            dimension_numbers=("NHWC", "HWIO", "NHWC"))
        return y + b

    def bn(x, gamma, beta):
        mean = x.mean(axis=(0, 1, 2))
        var = x.var(axis=(0, 1, 2))
        return (x - mean) * lax.rsqrt(var + BN_EPS) * gamma + beta

    lrelu = lambda v: jnp.where(v >= 0, v, LEAK * v)

    x = lrelu(conv(x, params["conv1_w"], params["conv1_b"]))
    x = lrelu(bn(conv(x, params["conv2_w"], params["conv2_b"]),
                 params["bn2_gamma"], params["bn2_beta"]))
    x = lrelu(bn(conv(x, params["conv3_w"], params["conv3_b"]),
                 params["bn3_gamma"], params["bn3_beta"]))
    flat = jnp.transpose(x, (0, 3, 1, 2)).reshape(x.shape[0], -1)
    return jax.nn.sigmoid(flat @ params["fc_w"].T + params["fc_b"])


# ---------------------------------------------------------------------------
if __name__ == "__main__":
    key = jax.random.PRNGKey(0)
    k_img, k_par = jax.random.split(key)

    batch, input_channel, image_size = 2, 1, 16      # fc_size = 2
    img = jax.random.normal(
        k_img, (batch, input_channel, image_size, image_size), jnp.float32)
    params = init_params(k_par, image_size=image_size,
                         input_channel=input_channel)

    fwd = jax.jit(dc_discriminator_forward)
    out = jax.block_until_ready(fwd(img, params))
    ref = jax.block_until_ready(reference_forward(img, params))

    assert out.shape == (batch, 1), out.shape
    # bf16 MXU operands / bf16 in-kernel activations vs f32 reference -> loosened tol.
    if not jnp.allclose(out, ref, rtol=3e-2, atol=3e-2):
        raise AssertionError(
            f"mismatch vs reference, max abs diff = {jnp.max(jnp.abs(out - ref))}")

    print("KERNEL_OK")
</pallas_src>

<mosaic_0001>
module attributes {stable_mosaic.version = 11 : i64} {
  func.func @_dcdisc_fused_kernel(%arg0: memref<512x128xbf16, #tpu.memory_space<vmem>>, %arg1: memref<9x128x512xbf16, #tpu.memory_space<vmem>>, %arg2: memref<9x1x128xf32, #tpu.memory_space<vmem>>, %arg3: memref<1x128xf32, #tpu.memory_space<vmem>>, %arg4: memref<9x32x128xbf16, #tpu.memory_space<vmem>>, %arg5: memref<9x128x256xbf16, #tpu.memory_space<vmem>>, %arg6: memref<1x256xf32, #tpu.memory_space<vmem>>, %arg7: memref<1x256xf32, #tpu.memory_space<vmem>>, %arg8: memref<1x256xf32, #tpu.memory_space<vmem>>, %arg9: memref<9x8x32xbf16, #tpu.memory_space<vmem>>, %arg10: memref<9x256x512xbf16, #tpu.memory_space<vmem>>, %arg11: memref<1x512xf32, #tpu.memory_space<vmem>>, %arg12: memref<1x512xf32, #tpu.memory_space<vmem>>, %arg13: memref<1x512xf32, #tpu.memory_space<vmem>>, %arg14: memref<8x512xf32, #tpu.memory_space<vmem>>, %arg15: memref<2x8xf32, #tpu.memory_space<vmem>>, %arg16: memref<1x1xf32, #tpu.memory_space<vmem>>, %arg17: memref<2x1xf32, #tpu.memory_space<vmem>>) attributes {dimension_semantics = [], scalar_prefetch = 0 : i64, scratch_operands = 0 : i64, tpu.core_type = #tpu.core_type<tc>} {
    %c0 = arith.constant 0 : index
    %c0_0 = arith.constant 0 : index
    %0 = vector.load %arg0[%c0, %c0_0] : memref<512x128xbf16, #tpu.memory_space<vmem>>, vector<512x128xbf16>
    %cst = arith.constant 0.000000e+00 : f32
    %1 = vector.broadcast %cst : f32 to vector<128x128xf32>
    %c0_1 = arith.constant 0 : index
    %c0_2 = arith.constant 0 : index
    %c0_3 = arith.constant 0 : index
    %2 = vector.load %arg1[%c0_1, %c0_2, %c0_3] : memref<9x128x512xbf16, #tpu.memory_space<vmem>>, vector<1x128x512xbf16>
    %3 = vector.shape_cast %2 : vector<1x128x512xbf16> to vector<128x512xbf16>
    %cst_4 = arith.constant dense<0.000000e+00> : vector<128x128xf32>
    %4 = tpu.matmul %3, %0, %cst_4 {dimension_numbers = #tpu.dot_dimension_numbers<[1], [0], [0], [1], [0, 0, 1, 1], [], []>} : vector<128x512xbf16>, vector<512x128xbf16>, vector<128x128xf32> -> vector<128x128xf32>
    %cst_5 = arith.constant dense<0.000000e+00> : vector<128xf32>
    %5 = vector.multi_reduction <add>, %4, %cst_5 [1] : vector<128x128xf32> to vector<128xf32>
    %6 = vector.shape_cast %5 : vector<128xf32> to vector<128x1xf32>
    %c0_6 = arith.constant 0 : index
    %c0_7 = arith.constant 0 : index
    %c0_8 = arith.constant 0 : index
    %7 = vector.load %arg2[%c0_6, %c0_7, %c0_8] : memref<9x1x128xf32, #tpu.memory_space<vmem>>, vector<1x1x128xf32>
    %8 = vector.shape_cast %7 : vector<1x1x128xf32> to vector<1x128xf32>
    %9 = vector.broadcast %6 : vector<128x1xf32> to vector<128x128xf32>
    %10 = vector.broadcast %8 : vector<1x128xf32> to vector<128x128xf32>
    %11 = arith.mulf %9, %10 : vector<128x128xf32>
    %12 = arith.addf %1, %11 : vector<128x128xf32>
    %c1 = arith.constant 1 : index
    %c0_9 = arith.constant 0 : index
    %c0_10 = arith.constant 0 : index
    %13 = vector.load %arg1[%c1, %c0_9, %c0_10] : memref<9x128x512xbf16, #tpu.memory_space<vmem>>, vector<1x128x512xbf16>
    %14 = vector.shape_cast %13 : vector<1x128x512xbf16> to vector<128x512xbf16>
    %cst_11 = arith.constant dense<0.000000e+00> : vector<128x128xf32>
    %15 = tpu.matmul %14, %0, %cst_11 {dimension_numbers = #tpu.dot_dimension_numbers<[1], [0], [0], [1], [0, 0, 1, 1], [], []>} : vector<128x512xbf16>, vector<512x128xbf16>, vector<128x128xf32> -> vector<128x128xf32>
    %cst_12 = arith.constant dense<0.000000e+00> : vector<128xf32>
    %16 = vector.multi_reduction <add>, %15, %cst_12 [1] : vector<128x128xf32> to vector<128xf32>
    %17 = vector.shape_cast %16 : vector<128xf32> to vector<128x1xf32>
    %c1_13 = arith.constant 1 : index
    %c0_14 = arith.constant 0 : index
    %c0_15 = arith.constant 0 : index
    %18 = vector.load %arg2[%c1_13, %c0_14, %c0_15] : memref<9x1x128xf32, #tpu.memory_space<vmem>>, vector<1x1x128xf32>
    %19 = vector.shape_cast %18 : vector<1x1x128xf32> to vector<1x128xf32>
    %20 = vector.broadcast %17 : vector<128x1xf32> to vector<128x128xf32>
    %21 = vector.broadcast %19 : vector<1x128xf32> to vector<128x128xf32>
    %22 = arith.mulf %20, %21 : vector<128x128xf32>
    %23 = arith.addf %12, %22 : vector<128x128xf32>
    %c2 = arith.constant 2 : index
    %c0_16 = arith.constant 0 : index
    %c0_17 = arith.constant 0 : index
    %24 = vector.load %arg1[%c2, %c0_16, %c0_17] : memref<9x128x512xbf16, #tpu.memory_space<vmem>>, vector<1x128x512xbf16>
    %25 = vector.shape_cast %24 : vector<1x128x512xbf16> to vector<128x512xbf16>
    %cst_18 = arith.constant dense<0.000000e+00> : vector<128x128xf32>
    %26 = tpu.matmul %25, %0, %cst_18 {dimension_numbers = #tpu.dot_dimension_numbers<[1], [0], [0], [1], [0, 0, 1, 1], [], []>} : vector<128x512xbf16>, vector<512x128xbf16>, vector<128x128xf32> -> vector<128x128xf32>
    %cst_19 = arith.constant dense<0.000000e+00> : vector<128xf32>
    %27 = vector.multi_reduction <add>, %26, %cst_19 [1] : vector<128x128xf32> to vector<128xf32>
    %28 = vector.shape_cast %27 : vector<128xf32> to vector<128x1xf32>
    %c2_20 = arith.constant 2 : index
    %c0_21 = arith.constant 0 : index
    %c0_22 = arith.constant 0 : index
    %29 = vector.load %arg2[%c2_20, %c0_21, %c0_22] : memref<9x1x128xf32, #tpu.memory_space<vmem>>, vector<1x1x128xf32>
    %30 = vector.shape_cast %29 : vector<1x1x128xf32> to vector<1x128xf32>
    %31 = vector.broadcast %28 : vector<128x1xf32> to vector<128x128xf32>
    %32 = vector.broadcast %30 : vector<1x128xf32> to vector<128x128xf32>
    %33 = arith.mulf %31, %32 : vector<128x128xf32>
    %34 = arith.addf %23, %33 : vector<128x128xf32>
    %c3 = arith.constant 3 : index
    %c0_23 = arith.constant 0 : index
    %c0_24 = arith.constant 0 : index
    %35 = vector.load %arg1[%c3, %c0_23, %c0_24] : memref<9x128x512xbf16, #tpu.memory_space<vmem>>, vector<1x128x512xbf16>
    %36 = vector.shape_cast %35 : vector<1x128x512xbf16> to vector<128x512xbf16>
    %cst_25 = arith.constant dense<0.000000e+00> : vector<128x128xf32>
    %37 = tpu.matmul %36, %0, %cst_25 {dimension_numbers = #tpu.dot_dimension_numbers<[1], [0], [0], [1], [0, 0, 1, 1], [], []>} : vector<128x512xbf16>, vector<512x128xbf16>, vector<128x128xf32> -> vector<128x128xf32>
    %cst_26 = arith.constant dense<0.000000e+00> : vector<128xf32>
    %38 = vector.multi_reduction <add>, %37, %cst_26 [1] : vector<128x128xf32> to vector<128xf32>
    %39 = vector.shape_cast %38 : vector<128xf32> to vector<128x1xf32>
    %c3_27 = arith.constant 3 : index
    %c0_28 = arith.constant 0 : index
    %c0_29 = arith.constant 0 : index
    %40 = vector.load %arg2[%c3_27, %c0_28, %c0_29] : memref<9x1x128xf32, #tpu.memory_space<vmem>>, vector<1x1x128xf32>
    %41 = vector.shape_cast %40 : vector<1x1x128xf32> to vector<1x128xf32>
    %42 = vector.broadcast %39 : vector<128x1xf32> to vector<128x128xf32>
    %43 = vector.broadcast %41 : vector<1x128xf32> to vector<128x128xf32>
    %44 = arith.mulf %42, %43 : vector<128x128xf32>
    %45 = arith.addf %34, %44 : vector<128x128xf32>
    %c4 = arith.constant 4 : index
    %c0_30 = arith.constant 0 : index
    %c0_31 = arith.constant 0 : index
    %46 = vector.load %arg1[%c4, %c0_30, %c0_31] : memref<9x128x512xbf16, #tpu.memory_space<vmem>>, vector<1x128x512xbf16>
    %47 = vector.shape_cast %46 : vector<1x128x512xbf16> to vector<128x512xbf16>
    %cst_32 = arith.constant dense<0.000000e+00> : vector<128x128xf32>
    %48 = tpu.matmul %47, %0, %cst_32 {dimension_numbers = #tpu.dot_dimension_numbers<[1], [0], [0], [1], [0, 0, 1, 1], [], []>} : vector<128x512xbf16>, vector<512x128xbf16>, vector<128x128xf32> -> vector<128x128xf32>
    %cst_33 = arith.constant dense<0.000000e+00> : vector<128xf32>
    %49 = vector.multi_reduction <add>, %48, %cst_33 [1] : vector<128x128xf32> to vector<128xf32>
    %50 = vector.shape_cast %49 : vector<128xf32> to vector<128x1xf32>
    %c4_34 = arith.constant 4 : index
    %c0_35 = arith.constant 0 : index
    %c0_36 = arith.constant 0 : index
    %51 = vector.load %arg2[%c4_34, %c0_35, %c0_36] : memref<9x1x128xf32, #tpu.memory_space<vmem>>, vector<1x1x128xf32>
    %52 = vector.shape_cast %51 : vector<1x1x128xf32> to vector<1x128xf32>
    %53 = vector.broadcast %50 : vector<128x1xf32> to vector<128x128xf32>
    %54 = vector.broadcast %52 : vector<1x128xf32> to vector<128x128xf32>
    %55 = arith.mulf %53, %54 : vector<128x128xf32>
    %56 = arith.addf %45, %55 : vector<128x128xf32>
    %c5 = arith.constant 5 : index
    %c0_37 = arith.constant 0 : index
    %c0_38 = arith.constant 0 : index
    %57 = vector.load %arg1[%c5, %c0_37, %c0_38] : memref<9x128x512xbf16, #tpu.memory_space<vmem>>, vector<1x128x512xbf16>
    %58 = vector.shape_cast %57 : vector<1x128x512xbf16> to vector<128x512xbf16>
    %cst_39 = arith.constant dense<0.000000e+00> : vector<128x128xf32>
    %59 = tpu.matmul %58, %0, %cst_39 {dimension_numbers = #tpu.dot_dimension_numbers<[1], [0], [0], [1], [0, 0, 1, 1], [], []>} : vector<128x512xbf16>, vector<512x128xbf16>, vector<128x128xf32> -> vector<128x128xf32>
    %cst_40 = arith.constant dense<0.000000e+00> : vector<128xf32>
    %60 = vector.multi_reduction <add>, %59, %cst_40 [1] : vector<128x128xf32> to vector<128xf32>
    %61 = vector.shape_cast %60 : vector<128xf32> to vector<128x1xf32>
    %c5_41 = arith.constant 5 : index
    %c0_42 = arith.constant 0 : index
    %c0_43 = arith.constant 0 : index
    %62 = vector.load %arg2[%c5_41, %c0_42, %c0_43] : memref<9x1x128xf32, #tpu.memory_space<vmem>>, vector<1x1x128xf32>
    %63 = vector.shape_cast %62 : vector<1x1x128xf32> to vector<1x128xf32>
    %64 = vector.broadcast %61 : vector<128x1xf32> to vector<128x128xf32>
    %65 = vector.broadcast %63 : vector<1x128xf32> to vector<128x128xf32>
    %66 = arith.mulf %64, %65 : vector<128x128xf32>
    %67 = arith.addf %56, %66 : vector<128x128xf32>
    %c6 = arith.constant 6 : index
    %c0_44 = arith.constant 0 : index
    %c0_45 = arith.constant 0 : index
    %68 = vector.load %arg1[%c6, %c0_44, %c0_45] : memref<9x128x512xbf16, #tpu.memory_space<vmem>>, vector<1x128x512xbf16>
    %69 = vector.shape_cast %68 : vector<1x128x512xbf16> to vector<128x512xbf16>
    %cst_46 = arith.constant dense<0.000000e+00> : vector<128x128xf32>
    %70 = tpu.matmul %69, %0, %cst_46 {dimension_numbers = #tpu.dot_dimension_numbers<[1], [0], [0], [1], [0, 0, 1, 1], [], []>} : vector<128x512xbf16>, vector<512x128xbf16>, vector<128x128xf32> -> vector<128x128xf32>
    %cst_47 = arith.constant dense<0.000000e+00> : vector<128xf32>
    %71 = vector.multi_reduction <add>, %70, %cst_47 [1] : vector<128x128xf32> to vector<128xf32>
    %72 = vector.shape_cast %71 : vector<128xf32> to vector<128x1xf32>
    %c6_48 = arith.constant 6 : index
    %c0_49 = arith.constant 0 : index
    %c0_50 = arith.constant 0 : index
    %73 = vector.load %arg2[%c6_48, %c0_49, %c0_50] : memref<9x1x128xf32, #tpu.memory_space<vmem>>, vector<1x1x128xf32>
    %74 = vector.shape_cast %73 : vector<1x1x128xf32> to vector<1x128xf32>
    %75 = vector.broadcast %72 : vector<128x1xf32> to vector<128x128xf32>
    %76 = vector.broadcast %74 : vector<1x128xf32> to vector<128x128xf32>
    %77 = arith.mulf %75, %76 : vector<128x128xf32>
    %78 = arith.addf %67, %77 : vector<128x128xf32>
    %c7 = arith.constant 7 : index
    %c0_51 = arith.constant 0 : index
    %c0_52 = arith.constant 0 : index
    %79 = vector.load %arg1[%c7, %c0_51, %c0_52] : memref<9x128x512xbf16, #tpu.memory_space<vmem>>, vector<1x128x512xbf16>
    %80 = vector.shape_cast %79 : vector<1x128x512xbf16> to vector<128x512xbf16>
    %cst_53 = arith.constant dense<0.000000e+00> : vector<128x128xf32>
    %81 = tpu.matmul %80, %0, %cst_53 {dimension_numbers = #tpu.dot_dimension_numbers<[1], [0], [0], [1], [0, 0, 1, 1], [], []>} : vector<128x512xbf16>, vector<512x128xbf16>, vector<128x128xf32> -> vector<128x128xf32>
    %cst_54 = arith.constant dense<0.000000e+00> : vector<128xf32>
    %82 = vector.multi_reduction <add>, %81, %cst_54 [1] : vector<128x128xf32> to vector<128xf32>
    %83 = vector.shape_cast %82 : vector<128xf32> to vector<128x1xf32>
    %c7_55 = arith.constant 7 : index
    %c0_56 = arith.constant 0 : index
    %c0_57 = arith.constant 0 : index
    %84 = vector.load %arg2[%c7_55, %c0_56, %c0_57] : memref<9x1x128xf32, #tpu.memory_space<vmem>>, vector<1x1x128xf32>
    %85 = vector.shape_cast %84 : vector<1x1x128xf32> to vector<1x128xf32>
    %86 = vector.broadcast %83 : vector<128x1xf32> to vector<128x128xf32>
    %87 = vector.broadcast %85 : vector<1x128xf32> to vector<128x128xf32>
    %88 = arith.mulf %86, %87 : vector<128x128xf32>
    %89 = arith.addf %78, %88 : vector<128x128xf32>
    %c8 = arith.constant 8 : index
    %c0_58 = arith.constant 0 : index
    %c0_59 = arith.constant 0 : index
    %90 = vector.load %arg1[%c8, %c0_58, %c0_59] : memref<9x128x512xbf16, #tpu.memory_space<vmem>>, vector<1x128x512xbf16>
    %91 = vector.shape_cast %90 : vector<1x128x512xbf16> to vector<128x512xbf16>
    %cst_60 = arith.constant dense<0.000000e+00> : vector<128x128xf32>
    %92 = tpu.matmul %91, %0, %cst_60 {dimension_numbers = #tpu.dot_dimension_numbers<[1], [0], [0], [1], [0, 0, 1, 1], [], []>} : vector<128x512xbf16>, vector<512x128xbf16>, vector<128x128xf32> -> vector<128x128xf32>
    %cst_61 = arith.constant dense<0.000000e+00> : vector<128xf32>
    %93 = vector.multi_reduction <add>, %92, %cst_61 [1] : vector<128x128xf32> to vector<128xf32>
    %94 = vector.shape_cast %93 : vector<128xf32> to vector<128x1xf32>
    %c8_62 = arith.constant 8 : index
    %c0_63 = arith.constant 0 : index
    %c0_64 = arith.constant 0 : index
    %95 = vector.load %arg2[%c8_62, %c0_63, %c0_64] : memref<9x1x128xf32, #tpu.memory_space<vmem>>, vector<1x1x128xf32>
    %96 = vector.shape_cast %95 : vector<1x1x128xf32> to vector<1x128xf32>
    %97 = vector.broadcast %94 : vector<128x1xf32> to vector<128x128xf32>
    %98 = vector.broadcast %96 : vector<1x128xf32> to vector<128x128xf32>
    %99 = arith.mulf %97, %98 : vector<128x128xf32>
    %100 = arith.addf %89, %99 : vector<128x128xf32>
    %c0_65 = arith.constant 0 : index
    %c0_66 = arith.constant 0 : index
    %101 = vector.load %arg3[%c0_65, %c0_66] : memref<1x128xf32, #tpu.memory_space<vmem>>, vector<1x128xf32>
    %102 = vector.broadcast %101 : vector<1x128xf32> to vector<128x128xf32>
    %103 = arith.addf %100, %102 : vector<128x128xf32>
    %cst_67 = arith.constant 0.000000e+00 : f32
    %104 = vector.broadcast %cst_67 : f32 to vector<128x128xf32>
    %105 = arith.cmpf oge, %103, %104 : vector<128x128xf32>
    %cst_68 = arith.constant 2.000000e-01 : f32
    %106 = vector.broadcast %cst_68 : f32 to vector<128x128xf32>
    %107 = arith.mulf %106, %103 : vector<128x128xf32>
    %108 = arith.select %105, %103, %107 : vector<128x128xi1>, vector<128x128xf32>
    %109 = arith.truncf %108 : vector<128x128xf32> to vector<128x128xbf16>
    %cst_69 = arith.constant 0.000000e+00 : f32
    %110 = vector.broadcast %cst_69 : f32 to vector<32x256xf32>
    %c0_70 = arith.constant 0 : index
    %c0_71 = arith.constant 0 : index
    %c0_72 = arith.constant 0 : index
    %111 = vector.load %arg4[%c0_70, %c0_71, %c0_72] : memref<9x32x128xbf16, #tpu.memory_space<vmem>>, vector<1x32x128xbf16>
    %112 = vector.shape_cast %111 : vector<1x32x128xbf16> to vector<32x128xbf16>
    %cst_73 = arith.constant dense<0.000000e+00> : vector<32x128xf32>
    %113 = tpu.matmul %112, %109, %cst_73 {dimension_numbers = #tpu.dot_dimension_numbers<[1], [0], [0], [1], [0, 0, 1, 1], [], []>} : vector<32x128xbf16>, vector<128x128xbf16>, vector<32x128xf32> -> vector<32x128xf32>
    %114 = arith.truncf %113 : vector<32x128xf32> to vector<32x128xbf16>
    %c0_74 = arith.constant 0 : index
    %c0_75 = arith.constant 0 : index
    %c0_76 = arith.constant 0 : index
    %115 = vector.load %arg5[%c0_74, %c0_75, %c0_76] : memref<9x128x256xbf16, #tpu.memory_space<vmem>>, vector<1x128x256xbf16>
    %116 = vector.shape_cast %115 : vector<1x128x256xbf16> to vector<128x256xbf16>
    %cst_77 = arith.constant dense<0.000000e+00> : vector<32x256xf32>
    %117 = tpu.matmul %114, %116, %cst_77 {dimension_numbers = #tpu.dot_dimension_numbers<[1], [0], [0], [1], [0, 0, 1, 1], [], []>} : vector<32x128xbf16>, vector<128x256xbf16>, vector<32x256xf32> -> vector<32x256xf32>
    %118 = arith.addf %110, %117 : vector<32x256xf32>
    %c1_78 = arith.constant 1 : index
    %c0_79 = arith.constant 0 : index
    %c0_80 = arith.constant 0 : index
    %119 = vector.load %arg4[%c1_78, %c0_79, %c0_80] : memref<9x32x128xbf16, #tpu.memory_space<vmem>>, vector<1x32x128xbf16>
    %120 = vector.shape_cast %119 : vector<1x32x128xbf16> to vector<32x128xbf16>
    %cst_81 = arith.constant dense<0.000000e+00> : vector<32x128xf32>
    %121 = tpu.matmul %120, %109, %cst_81 {dimension_numbers = #tpu.dot_dimension_numbers<[1], [0], [0], [1], [0, 0, 1, 1], [], []>} : vector<32x128xbf16>, vector<128x128xbf16>, vector<32x128xf32> -> vector<32x128xf32>
    %122 = arith.truncf %121 : vector<32x128xf32> to vector<32x128xbf16>
    %c1_82 = arith.constant 1 : index
    %c0_83 = arith.constant 0 : index
    %c0_84 = arith.constant 0 : index
    %123 = vector.load %arg5[%c1_82, %c0_83, %c0_84] : memref<9x128x256xbf16, #tpu.memory_space<vmem>>, vector<1x128x256xbf16>
    %124 = vector.shape_cast %123 : vector<1x128x256xbf16> to vector<128x256xbf16>
    %cst_85 = arith.constant dense<0.000000e+00> : vector<32x256xf32>
    %125 = tpu.matmul %122, %124, %cst_85 {dimension_numbers = #tpu.dot_dimension_numbers<[1], [0], [0], [1], [0, 0, 1, 1], [], []>} : vector<32x128xbf16>, vector<128x256xbf16>, vector<32x256xf32> -> vector<32x256xf32>
    %126 = arith.addf %118, %125 : vector<32x256xf32>
    %c2_86 = arith.constant 2 : index
    %c0_87 = arith.constant 0 : index
    %c0_88 = arith.constant 0 : index
    %127 = vector.load %arg4[%c2_86, %c0_87, %c0_88] : memref<9x32x128xbf16, #tpu.memory_space<vmem>>, vector<1x32x128xbf16>
    %128 = vector.shape_cast %127 : vector<1x32x128xbf16> to vector<32x128xbf16>
    %cst_89 = arith.constant dense<0.000000e+00> : vector<32x128xf32>
    %129 = tpu.matmul %128, %109, %cst_89 {dimension_numbers = #tpu.dot_dimension_numbers<[1], [0], [0], [1], [0, 0, 1, 1], [], []>} : vector<32x128xbf16>, vector<128x128xbf16>, vector<32x128xf32> -> vector<32x128xf32>
    %130 = arith.truncf %129 : vector<32x128xf32> to vector<32x128xbf16>
    %c2_90 = arith.constant 2 : index
    %c0_91 = arith.constant 0 : index
    %c0_92 = arith.constant 0 : index
    %131 = vector.load %arg5[%c2_90, %c0_91, %c0_92] : memref<9x128x256xbf16, #tpu.memory_space<vmem>>, vector<1x128x256xbf16>
    %132 = vector.shape_cast %131 : vector<1x128x256xbf16> to vector<128x256xbf16>
    %cst_93 = arith.constant dense<0.000000e+00> : vector<32x256xf32>
    %133 = tpu.matmul %130, %132, %cst_93 {dimension_numbers = #tpu.dot_dimension_numbers<[1], [0], [0], [1], [0, 0, 1, 1], [], []>} : vector<32x128xbf16>, vector<128x256xbf16>, vector<32x256xf32> -> vector<32x256xf32>
    %134 = arith.addf %126, %133 : vector<32x256xf32>
    %c3_94 = arith.constant 3 : index
    %c0_95 = arith.constant 0 : index
    %c0_96 = arith.constant 0 : index
    %135 = vector.load %arg4[%c3_94, %c0_95, %c0_96] : memref<9x32x128xbf16, #tpu.memory_space<vmem>>, vector<1x32x128xbf16>
    %136 = vector.shape_cast %135 : vector<1x32x128xbf16> to vector<32x128xbf16>
    %cst_97 = arith.constant dense<0.000000e+00> : vector<32x128xf32>
    %137 = tpu.matmul %136, %109, %cst_97 {dimension_numbers = #tpu.dot_dimension_numbers<[1], [0], [0], [1], [0, 0, 1, 1], [], []>} : vector<32x128xbf16>, vector<128x128xbf16>, vector<32x128xf32> -> vector<32x128xf32>
    %138 = arith.truncf %137 : vector<32x128xf32> to vector<32x128xbf16>
    %c3_98 = arith.constant 3 : index
    %c0_99 = arith.constant 0 : index
    %c0_100 = arith.constant 0 : index
    %139 = vector.load %arg5[%c3_98, %c0_99, %c0_100] : memref<9x128x256xbf16, #tpu.memory_space<vmem>>, vector<1x128x256xbf16>
    %140 = vector.shape_cast %139 : vector<1x128x256xbf16> to vector<128x256xbf16>
    %cst_101 = arith.constant dense<0.000000e+00> : vector<32x256xf32>
    %141 = tpu.matmul %138, %140, %cst_101 {dimension_numbers = #tpu.dot_dimension_numbers<[1], [0], [0], [1], [0, 0, 1, 1], [], []>} : vector<32x128xbf16>, vector<128x256xbf16>, vector<32x256xf32> -> vector<32x256xf32>
    %142 = arith.addf %134, %141 : vector<32x256xf32>
    %c4_102 = arith.constant 4 : index
    %c0_103 = arith.constant 0 : index
    %c0_104 = arith.constant 0 : index
    %143 = vector.load %arg4[%c4_102, %c0_103, %c0_104] : memref<9x32x128xbf16, #tpu.memory_space<vmem>>, vector<1x32x128xbf16>
    %144 = vector.shape_cast %143 : vector<1x32x128xbf16> to vector<32x128xbf16>
    %cst_105 = arith.constant dense<0.000000e+00> : vector<32x128xf32>
    %145 = tpu.matmul %144, %109, %cst_105 {dimension_numbers = #tpu.dot_dimension_numbers<[1], [0], [0], [1], [0, 0, 1, 1], [], []>} : vector<32x128xbf16>, vector<128x128xbf16>, vector<32x128xf32> -> vector<32x128xf32>
    %146 = arith.truncf %145 : vector<32x128xf32> to vector<32x128xbf16>
    %c4_106 = arith.constant 4 : index
    %c0_107 = arith.constant 0 : index
    %c0_108 = arith.constant 0 : index
    %147 = vector.load %arg5[%c4_106, %c0_107, %c0_108] : memref<9x128x256xbf16, #tpu.memory_space<vmem>>, vector<1x128x256xbf16>
    %148 = vector.shape_cast %147 : vector<1x128x256xbf16> to vector<128x256xbf16>
    %cst_109 = arith.constant dense<0.000000e+00> : vector<32x256xf32>
    %149 = tpu.matmul %146, %148, %cst_109 {dimension_numbers = #tpu.dot_dimension_numbers<[1], [0], [0], [1], [0, 0, 1, 1], [], []>} : vector<32x128xbf16>, vector<128x256xbf16>, vector<32x256xf32> -> vector<32x256xf32>
    %150 = arith.addf %142, %149 : vector<32x256xf32>
    %c5_110 = arith.constant 5 : index
    %c0_111 = arith.constant 0 : index
    %c0_112 = arith.constant 0 : index
    %151 = vector.load %arg4[%c5_110, %c0_111, %c0_112] : memref<9x32x128xbf16, #tpu.memory_space<vmem>>, vector<1x32x128xbf16>
    %152 = vector.shape_cast %151 : vector<1x32x128xbf16> to vector<32x128xbf16>
    %cst_113 = arith.constant dense<0.000000e+00> : vector<32x128xf32>
    %153 = tpu.matmul %152, %109, %cst_113 {dimension_numbers = #tpu.dot_dimension_numbers<[1], [0], [0], [1], [0, 0, 1, 1], [], []>} : vector<32x128xbf16>, vector<128x128xbf16>, vector<32x128xf32> -> vector<32x128xf32>
    %154 = arith.truncf %153 : vector<32x128xf32> to vector<32x128xbf16>
    %c5_114 = arith.constant 5 : index
    %c0_115 = arith.constant 0 : index
    %c0_116 = arith.constant 0 : index
    %155 = vector.load %arg5[%c5_114, %c0_115, %c0_116] : memref<9x128x256xbf16, #tpu.memory_space<vmem>>, vector<1x128x256xbf16>
    %156 = vector.shape_cast %155 : vector<1x128x256xbf16> to vector<128x256xbf16>
    %cst_117 = arith.constant dense<0.000000e+00> : vector<32x256xf32>
    %157 = tpu.matmul %154, %156, %cst_117 {dimension_numbers = #tpu.dot_dimension_numbers<[1], [0], [0], [1], [0, 0, 1, 1], [], []>} : vector<32x128xbf16>, vector<128x256xbf16>, vector<32x256xf32> -> vector<32x256xf32>
    %158 = arith.addf %150, %157 : vector<32x256xf32>
    %c6_118 = arith.constant 6 : index
    %c0_119 = arith.constant 0 : index
    %c0_120 = arith.constant 0 : index
    %159 = vector.load %arg4[%c6_118, %c0_119, %c0_120] : memref<9x32x128xbf16, #tpu.memory_space<vmem>>, vector<1x32x128xbf16>
    %160 = vector.shape_cast %159 : vector<1x32x128xbf16> to vector<32x128xbf16>
    %cst_121 = arith.constant dense<0.000000e+00> : vector<32x128xf32>
    %161 = tpu.matmul %160, %109, %cst_121 {dimension_numbers = #tpu.dot_dimension_numbers<[1], [0], [0], [1], [0, 0, 1, 1], [], []>} : vector<32x128xbf16>, vector<128x128xbf16>, vector<32x128xf32> -> vector<32x128xf32>
    %162 = arith.truncf %161 : vector<32x128xf32> to vector<32x128xbf16>
    %c6_122 = arith.constant 6 : index
    %c0_123 = arith.constant 0 : index
    %c0_124 = arith.constant 0 : index
    %163 = vector.load %arg5[%c6_122, %c0_123, %c0_124] : memref<9x128x256xbf16, #tpu.memory_space<vmem>>, vector<1x128x256xbf16>
    %164 = vector.shape_cast %163 : vector<1x128x256xbf16> to vector<128x256xbf16>
    %cst_125 = arith.constant dense<0.000000e+00> : vector<32x256xf32>
    %165 = tpu.matmul %162, %164, %cst_125 {dimension_numbers = #tpu.dot_dimension_numbers<[1], [0], [0], [1], [0, 0, 1, 1], [], []>} : vector<32x128xbf16>, vector<128x256xbf16>, vector<32x256xf32> -> vector<32x256xf32>
    %166 = arith.addf %158, %165 : vector<32x256xf32>
    %c7_126 = arith.constant 7 : index
    %c0_127 = arith.constant 0 : index
    %c0_128 = arith.constant 0 : index
    %167 = vector.load %arg4[%c7_126, %c0_127, %c0_128] : memref<9x32x128xbf16, #tpu.memory_space<vmem>>, vector<1x32x128xbf16>
    %168 = vector.shape_cast %167 : vector<1x32x128xbf16> to vector<32x128xbf16>
    %cst_129 = arith.constant dense<0.000000e+00> : vector<32x128xf32>
    %169 = tpu.matmul %168, %109, %cst_129 {dimension_numbers = #tpu.dot_dimension_numbers<[1], [0], [0], [1], [0, 0, 1, 1], [], []>} : vector<32x128xbf16>, vector<128x128xbf16>, vector<32x128xf32> -> vector<32x128xf32>
    %170 = arith.truncf %169 : vector<32x128xf32> to vector<32x128xbf16>
    %c7_130 = arith.constant 7 : index
    %c0_131 = arith.constant 0 : index
    %c0_132 = arith.constant 0 : index
    %171 = vector.load %arg5[%c7_130, %c0_131, %c0_132] : memref<9x128x256xbf16, #tpu.memory_space<vmem>>, vector<1x128x256xbf16>
    %172 = vector.shape_cast %171 : vector<1x128x256xbf16> to vector<128x256xbf16>
    %cst_133 = arith.constant dense<0.000000e+00> : vector<32x256xf32>
    %173 = tpu.matmul %170, %172, %cst_133 {dimension_numbers = #tpu.dot_dimension_numbers<[1], [0], [0], [1], [0, 0, 1, 1], [], []>} : vector<32x128xbf16>, vector<128x256xbf16>, vector<32x256xf32> -> vector<32x256xf32>
    %174 = arith.addf %166, %173 : vector<32x256xf32>
    %c8_134 = arith.constant 8 : index
    %c0_135 = arith.constant 0 : index
    %c0_136 = arith.constant 0 : index
    %175 = vector.load %arg4[%c8_134, %c0_135, %c0_136] : memref<9x32x128xbf16, #tpu.memory_space<vmem>>, vector<1x32x128xbf16>
    %176 = vector.shape_cast %175 : vector<1x32x128xbf16> to vector<32x128xbf16>
    %cst_137 = arith.constant dense<0.000000e+00> : vector<32x128xf32>
    %177 = tpu.matmul %176, %109, %cst_137 {dimension_numbers = #tpu.dot_dimension_numbers<[1], [0], [0], [1], [0, 0, 1, 1], [], []>} : vector<32x128xbf16>, vector<128x128xbf16>, vector<32x128xf32> -> vector<32x128xf32>
    %178 = arith.truncf %177 : vector<32x128xf32> to vector<32x128xbf16>
    %c8_138 = arith.constant 8 : index
    %c0_139 = arith.constant 0 : index
    %c0_140 = arith.constant 0 : index
    %179 = vector.load %arg5[%c8_138, %c0_139, %c0_140] : memref<9x128x256xbf16, #tpu.memory_space<vmem>>, vector<1x128x256xbf16>
    %180 = vector.shape_cast %179 : vector<1x128x256xbf16> to vector<128x256xbf16>
    %cst_141 = arith.constant dense<0.000000e+00> : vector<32x256xf32>
    %181 = tpu.matmul %178, %180, %cst_141 {dimension_numbers = #tpu.dot_dimension_numbers<[1], [0], [0], [1], [0, 0, 1, 1], [], []>} : vector<32x128xbf16>, vector<128x256xbf16>, vector<32x256xf32> -> vector<32x256xf32>
    %182 = arith.addf %174, %181 : vector<32x256xf32>
    %c0_142 = arith.constant 0 : index
    %c0_143 = arith.constant 0 : index
    %183 = vector.load %arg6[%c0_142, %c0_143] : memref<1x256xf32, #tpu.memory_space<vmem>>, vector<1x256xf32>
    %184 = vector.broadcast %183 : vector<1x256xf32> to vector<32x256xf32>
    %185 = arith.addf %182, %184 : vector<32x256xf32>
    %c0_144 = arith.constant 0 : index
    %c0_145 = arith.constant 0 : index
    %186 = vector.load %arg7[%c0_144, %c0_145] : memref<1x256xf32, #tpu.memory_space<vmem>>, vector<1x256xf32>
    %c0_146 = arith.constant 0 : index
    %c0_147 = arith.constant 0 : index
    %187 = vector.load %arg8[%c0_146, %c0_147] : memref<1x256xf32, #tpu.memory_space<vmem>>, vector<1x256xf32>
    %cst_148 = arith.constant dense<0.000000e+00> : vector<256xf32>
    %188 = vector.multi_reduction <add>, %185, %cst_148 [0] : vector<32x256xf32> to vector<256xf32>
    %189 = vector.shape_cast %188 : vector<256xf32> to vector<1x256xf32>
    %cst_149 = arith.constant 3.200000e+01 : f32
    %190 = vector.broadcast %cst_149 : f32 to vector<1x256xf32>
    %191 = arith.divf %189, %190 : vector<1x256xf32>
    %192 = vector.broadcast %191 : vector<1x256xf32> to vector<32x256xf32>
    %193 = arith.subf %185, %192 : vector<32x256xf32>
    %194 = arith.mulf %193, %193 : vector<32x256xf32>
    %cst_150 = arith.constant dense<0.000000e+00> : vector<256xf32>
    %195 = vector.multi_reduction <add>, %194, %cst_150 [0] : vector<32x256xf32> to vector<256xf32>
    %196 = vector.shape_cast %195 : vector<256xf32> to vector<1x256xf32>
    %cst_151 = arith.constant 3.200000e+01 : f32
    %197 = vector.broadcast %cst_151 : f32 to vector<1x256xf32>
    %198 = arith.divf %196, %197 : vector<1x256xf32>
    %199 = vector.broadcast %191 : vector<1x256xf32> to vector<32x256xf32>
    %200 = arith.subf %185, %199 : vector<32x256xf32>
    %cst_152 = arith.constant 9.99999974E-6 : f32
    %201 = vector.broadcast %cst_152 : f32 to vector<1x256xf32>
    %202 = arith.addf %198, %201 : vector<1x256xf32>
    %203 = math.rsqrt %202 : vector<1x256xf32>
    %204 = arith.mulf %203, %186 : vector<1x256xf32>
    %205 = vector.broadcast %204 : vector<1x256xf32> to vector<32x256xf32>
    %206 = arith.mulf %200, %205 : vector<32x256xf32>
    %207 = vector.broadcast %187 : vector<1x256xf32> to vector<32x256xf32>
    %208 = arith.addf %206, %207 : vector<32x256xf32>
    %cst_153 = arith.constant 0.000000e+00 : f32
    %209 = vector.broadcast %cst_153 : f32 to vector<32x256xf32>
    %210 = arith.cmpf oge, %208, %209 : vector<32x256xf32>
    %cst_154 = arith.constant 2.000000e-01 : f32
    %211 = vector.broadcast %cst_154 : f32 to vector<32x256xf32>
    %212 = arith.mulf %211, %208 : vector<32x256xf32>
    %213 = arith.select %210, %208, %212 : vector<32x256xi1>, vector<32x256xf32>
    %214 = arith.truncf %213 : vector<32x256xf32> to vector<32x256xbf16>
    %cst_155 = arith.constant 0.000000e+00 : f32
    %215 = vector.broadcast %cst_155 : f32 to vector<8x512xf32>
    %c0_156 = arith.constant 0 : index
    %c0_157 = arith.constant 0 : index
    %c0_158 = arith.constant 0 : index
    %216 = vector.load %arg9[%c0_156, %c0_157, %c0_158] : memref<9x8x32xbf16, #tpu.memory_space<vmem>>, vector<1x8x32xbf16>
    %217 = vector.shape_cast %216 : vector<1x8x32xbf16> to vector<8x32xbf16>
    %cst_159 = arith.constant dense<0.000000e+00> : vector<8x256xf32>
    %218 = tpu.matmul %217, %214, %cst_159 {dimension_numbers = #tpu.dot_dimension_numbers<[1], [0], [0], [1], [0, 0, 1, 1], [], []>} : vector<8x32xbf16>, vector<32x256xbf16>, vector<8x256xf32> -> vector<8x256xf32>
    %219 = arith.truncf %218 : vector<8x256xf32> to vector<8x256xbf16>
    %c0_160 = arith.constant 0 : index
    %c0_161 = arith.constant 0 : index
    %c0_162 = arith.constant 0 : index
    %220 = vector.load %arg10[%c0_160, %c0_161, %c0_162] : memref<9x256x512xbf16, #tpu.memory_space<vmem>>, vector<1x256x512xbf16>
    %221 = vector.shape_cast %220 : vector<1x256x512xbf16> to vector<256x512xbf16>
    %cst_163 = arith.constant dense<0.000000e+00> : vector<8x512xf32>
    %222 = tpu.matmul %219, %221, %cst_163 {dimension_numbers = #tpu.dot_dimension_numbers<[1], [0], [0], [1], [0, 0, 1, 1], [], []>} : vector<8x256xbf16>, vector<256x512xbf16>, vector<8x512xf32> -> vector<8x512xf32>
    %223 = arith.addf %215, %222 : vector<8x512xf32>
    %c1_164 = arith.constant 1 : index
    %c0_165 = arith.constant 0 : index
    %c0_166 = arith.constant 0 : index
    %224 = vector.load %arg9[%c1_164, %c0_165, %c0_166] : memref<9x8x32xbf16, #tpu.memory_space<vmem>>, vector<1x8x32xbf16>
    %225 = vector.shape_cast %224 : vector<1x8x32xbf16> to vector<8x32xbf16>
    %cst_167 = arith.constant dense<0.000000e+00> : vector<8x256xf32>
    %226 = tpu.matmul %225, %214, %cst_167 {dimension_numbers = #tpu.dot_dimension_numbers<[1], [0], [0], [1], [0, 0, 1, 1], [], []>} : vector<8x32xbf16>, vector<32x256xbf16>, vector<8x256xf32> -> vector<8x256xf32>
    %227 = arith.truncf %226 : vector<8x256xf32> to vector<8x256xbf16>
    %c1_168 = arith.constant 1 : index
    %c0_169 = arith.constant 0 : index
    %c0_170 = arith.constant 0 : index
    %228 = vector.load %arg10[%c1_168, %c0_169, %c0_170] : memref<9x256x512xbf16, #tpu.memory_space<vmem>>, vector<1x256x512xbf16>
    %229 = vector.shape_cast %228 : vector<1x256x512xbf16> to vector<256x512xbf16>
    %cst_171 = arith.constant dense<0.000000e+00> : vector<8x512xf32>
    %230 = tpu.matmul %227, %229, %cst_171 {dimension_numbers = #tpu.dot_dimension_numbers<[1], [0], [0], [1], [0, 0, 1, 1], [], []>} : vector<8x256xbf16>, vector<256x512xbf16>, vector<8x512xf32> -> vector<8x512xf32>
    %231 = arith.addf %223, %230 : vector<8x512xf32>
    %c2_172 = arith.constant 2 : index
    %c0_173 = arith.constant 0 : index
    %c0_174 = arith.constant 0 : index
    %232 = vector.load %arg9[%c2_172, %c0_173, %c0_174] : memref<9x8x32xbf16, #tpu.memory_space<vmem>>, vector<1x8x32xbf16>
    %233 = vector.shape_cast %232 : vector<1x8x32xbf16> to vector<8x32xbf16>
    %cst_175 = arith.constant dense<0.000000e+00> : vector<8x256xf32>
    %234 = tpu.matmul %233, %214, %cst_175 {dimension_numbers = #tpu.dot_dimension_numbers<[1], [0], [0], [1], [0, 0, 1, 1], [], []>} : vector<8x32xbf16>, vector<32x256xbf16>, vector<8x256xf32> -> vector<8x256xf32>
    %235 = arith.truncf %234 : vector<8x256xf32> to vector<8x256xbf16>
    %c2_176 = arith.constant 2 : index
    %c0_177 = arith.constant 0 : index
    %c0_178 = arith.constant 0 : index
    %236 = vector.load %arg10[%c2_176, %c0_177, %c0_178] : memref<9x256x512xbf16, #tpu.memory_space<vmem>>, vector<1x256x512xbf16>
    %237 = vector.shape_cast %236 : vector<1x256x512xbf16> to vector<256x512xbf16>
    %cst_179 = arith.constant dense<0.000000e+00> : vector<8x512xf32>
    %238 = tpu.matmul %235, %237, %cst_179 {dimension_numbers = #tpu.dot_dimension_numbers<[1], [0], [0], [1], [0, 0, 1, 1], [], []>} : vector<8x256xbf16>, vector<256x512xbf16>, vector<8x512xf32> -> vector<8x512xf32>
    %239 = arith.addf %231, %238 : vector<8x512xf32>
    %c3_180 = arith.constant 3 : index
    %c0_181 = arith.constant 0 : index
    %c0_182 = arith.constant 0 : index
    %240 = vector.load %arg9[%c3_180, %c0_181, %c0_182] : memref<9x8x32xbf16, #tpu.memory_space<vmem>>, vector<1x8x32xbf16>
    %241 = vector.shape_cast %240 : vector<1x8x32xbf16> to vector<8x32xbf16>
    %cst_183 = arith.constant dense<0.000000e+00> : vector<8x256xf32>
    %242 = tpu.matmul %241, %214, %cst_183 {dimension_numbers = #tpu.dot_dimension_numbers<[1], [0], [0], [1], [0, 0, 1, 1], [], []>} : vector<8x32xbf16>, vector<32x256xbf16>, vector<8x256xf32> -> vector<8x256xf32>
    %243 = arith.truncf %242 : vector<8x256xf32> to vector<8x256xbf16>
    %c3_184 = arith.constant 3 : index
    %c0_185 = arith.constant 0 : index
    %c0_186 = arith.constant 0 : index
    %244 = vector.load %arg10[%c3_184, %c0_185, %c0_186] : memref<9x256x512xbf16, #tpu.memory_space<vmem>>, vector<1x256x512xbf16>
    %245 = vector.shape_cast %244 : vector<1x256x512xbf16> to vector<256x512xbf16>
    %cst_187 = arith.constant dense<0.000000e+00> : vector<8x512xf32>
    %246 = tpu.matmul %243, %245, %cst_187 {dimension_numbers = #tpu.dot_dimension_numbers<[1], [0], [0], [1], [0, 0, 1, 1], [], []>} : vector<8x256xbf16>, vector<256x512xbf16>, vector<8x512xf32> -> vector<8x512xf32>
    %247 = arith.addf %239, %246 : vector<8x512xf32>
    %c4_188 = arith.constant 4 : index
    %c0_189 = arith.constant 0 : index
    %c0_190 = arith.constant 0 : index
    %248 = vector.load %arg9[%c4_188, %c0_189, %c0_190] : memref<9x8x32xbf16, #tpu.memory_space<vmem>>, vector<1x8x32xbf16>
    %249 = vector.shape_cast %248 : vector<1x8x32xbf16> to vector<8x32xbf16>
    %cst_191 = arith.constant dense<0.000000e+00> : vector<8x256xf32>
    %250 = tpu.matmul %249, %214, %cst_191 {dimension_numbers = #tpu.dot_dimension_numbers<[1], [0], [0], [1], [0, 0, 1, 1], [], []>} : vector<8x32xbf16>, vector<32x256xbf16>, vector<8x256xf32> -> vector<8x256xf32>
    %251 = arith.truncf %250 : vector<8x256xf32> to vector<8x256xbf16>
    %c4_192 = arith.constant 4 : index
    %c0_193 = arith.constant 0 : index
    %c0_194 = arith.constant 0 : index
    %252 = vector.load %arg10[%c4_192, %c0_193, %c0_194] : memref<9x256x512xbf16, #tpu.memory_space<vmem>>, vector<1x256x512xbf16>
    %253 = vector.shape_cast %252 : vector<1x256x512xbf16> to vector<256x512xbf16>
    %cst_195 = arith.constant dense<0.000000e+00> : vector<8x512xf32>
    %254 = tpu.matmul %251, %253, %cst_195 {dimension_numbers = #tpu.dot_dimension_numbers<[1], [0], [0], [1], [0, 0, 1, 1], [], []>} : vector<8x256xbf16>, vector<256x512xbf16>, vector<8x512xf32> -> vector<8x512xf32>
    %255 = arith.addf %247, %254 : vector<8x512xf32>
    %c5_196 = arith.constant 5 : index
    %c0_197 = arith.constant 0 : index
    %c0_198 = arith.constant 0 : index
    %256 = vector.load %arg9[%c5_196, %c0_197, %c0_198] : memref<9x8x32xbf16, #tpu.memory_space<vmem>>, vector<1x8x32xbf16>
    %257 = vector.shape_cast %256 : vector<1x8x32xbf16> to vector<8x32xbf16>
    %cst_199 = arith.constant dense<0.000000e+00> : vector<8x256xf32>
    %258 = tpu.matmul %257, %214, %cst_199 {dimension_numbers = #tpu.dot_dimension_numbers<[1], [0], [0], [1], [0, 0, 1, 1], [], []>} : vector<8x32xbf16>, vector<32x256xbf16>, vector<8x256xf32> -> vector<8x256xf32>
    %259 = arith.truncf %258 : vector<8x256xf32> to vector<8x256xbf16>
    %c5_200 = arith.constant 5 : index
    %c0_201 = arith.constant 0 : index
    %c0_202 = arith.constant 0 : index
    %260 = vector.load %arg10[%c5_200, %c0_201, %c0_202] : memref<9x256x512xbf16, #tpu.memory_space<vmem>>, vector<1x256x512xbf16>
    %261 = vector.shape_cast %260 : vector<1x256x512xbf16> to vector<256x512xbf16>
    %cst_203 = arith.constant dense<0.000000e+00> : vector<8x512xf32>
    %262 = tpu.matmul %259, %261, %cst_203 {dimension_numbers = #tpu.dot_dimension_numbers<[1], [0], [0], [1], [0, 0, 1, 1], [], []>} : vector<8x256xbf16>, vector<256x512xbf16>, vector<8x512xf32> -> vector<8x512xf32>
    %263 = arith.addf %255, %262 : vector<8x512xf32>
    %c6_204 = arith.constant 6 : index
    %c0_205 = arith.constant 0 : index
    %c0_206 = arith.constant 0 : index
    %264 = vector.load %arg9[%c6_204, %c0_205, %c0_206] : memref<9x8x32xbf16, #tpu.memory_space<vmem>>, vector<1x8x32xbf16>
    %265 = vector.shape_cast %264 : vector<1x8x32xbf16> to vector<8x32xbf16>
    %cst_207 = arith.constant dense<0.000000e+00> : vector<8x256xf32>
    %266 = tpu.matmul %265, %214, %cst_207 {dimension_numbers = #tpu.dot_dimension_numbers<[1], [0], [0], [1], [0, 0, 1, 1], [], []>} : vector<8x32xbf16>, vector<32x256xbf16>, vector<8x256xf32> -> vector<8x256xf32>
    %267 = arith.truncf %266 : vector<8x256xf32> to vector<8x256xbf16>
    %c6_208 = arith.constant 6 : index
    %c0_209 = arith.constant 0 : index
    %c0_210 = arith.constant 0 : index
    %268 = vector.load %arg10[%c6_208, %c0_209, %c0_210] : memref<9x256x512xbf16, #tpu.memory_space<vmem>>, vector<1x256x512xbf16>
    %269 = vector.shape_cast %268 : vector<1x256x512xbf16> to vector<256x512xbf16>
    %cst_211 = arith.constant dense<0.000000e+00> : vector<8x512xf32>
    %270 = tpu.matmul %267, %269, %cst_211 {dimension_numbers = #tpu.dot_dimension_numbers<[1], [0], [0], [1], [0, 0, 1, 1], [], []>} : vector<8x256xbf16>, vector<256x512xbf16>, vector<8x512xf32> -> vector<8x512xf32>
    %271 = arith.addf %263, %270 : vector<8x512xf32>
    %c7_212 = arith.constant 7 : index
    %c0_213 = arith.constant 0 : index
    %c0_214 = arith.constant 0 : index
    %272 = vector.load %arg9[%c7_212, %c0_213, %c0_214] : memref<9x8x32xbf16, #tpu.memory_space<vmem>>, vector<1x8x32xbf16>
    %273 = vector.shape_cast %272 : vector<1x8x32xbf16> to vector<8x32xbf16>
    %cst_215 = arith.constant dense<0.000000e+00> : vector<8x256xf32>
    %274 = tpu.matmul %273, %214, %cst_215 {dimension_numbers = #tpu.dot_dimension_numbers<[1], [0], [0], [1], [0, 0, 1, 1], [], []>} : vector<8x32xbf16>, vector<32x256xbf16>, vector<8x256xf32> -> vector<8x256xf32>
    %275 = arith.truncf %274 : vector<8x256xf32> to vector<8x256xbf16>
    %c7_216 = arith.constant 7 : index
    %c0_217 = arith.constant 0 : index
    %c0_218 = arith.constant 0 : index
    %276 = vector.load %arg10[%c7_216, %c0_217, %c0_218] : memref<9x256x512xbf16, #tpu.memory_space<vmem>>, vector<1x256x512xbf16>
    %277 = vector.shape_cast %276 : vector<1x256x512xbf16> to vector<256x512xbf16>
    %cst_219 = arith.constant dense<0.000000e+00> : vector<8x512xf32>
    %278 = tpu.matmul %275, %277, %cst_219 {dimension_numbers = #tpu.dot_dimension_numbers<[1], [0], [0], [1], [0, 0, 1, 1], [], []>} : vector<8x256xbf16>, vector<256x512xbf16>, vector<8x512xf32> -> vector<8x512xf32>
    %279 = arith.addf %271, %278 : vector<8x512xf32>
    %c8_220 = arith.constant 8 : index
    %c0_221 = arith.constant 0 : index
    %c0_222 = arith.constant 0 : index
    %280 = vector.load %arg9[%c8_220, %c0_221, %c0_222] : memref<9x8x32xbf16, #tpu.memory_space<vmem>>, vector<1x8x32xbf16>
    %281 = vector.shape_cast %280 : vector<1x8x32xbf16> to vector<8x32xbf16>
    %cst_223 = arith.constant dense<0.000000e+00> : vector<8x256xf32>
    %282 = tpu.matmul %281, %214, %cst_223 {dimension_numbers = #tpu.dot_dimension_numbers<[1], [0], [0], [1], [0, 0, 1, 1], [], []>} : vector<8x32xbf16>, vector<32x256xbf16>, vector<8x256xf32> -> vector<8x256xf32>
    %283 = arith.truncf %282 : vector<8x256xf32> to vector<8x256xbf16>
    %c8_224 = arith.constant 8 : index
    %c0_225 = arith.constant 0 : index
    %c0_226 = arith.constant 0 : index
    %284 = vector.load %arg10[%c8_224, %c0_225, %c0_226] : memref<9x256x512xbf16, #tpu.memory_space<vmem>>, vector<1x256x512xbf16>
    %285 = vector.shape_cast %284 : vector<1x256x512xbf16> to vector<256x512xbf16>
    %cst_227 = arith.constant dense<0.000000e+00> : vector<8x512xf32>
    %286 = tpu.matmul %283, %285, %cst_227 {dimension_numbers = #tpu.dot_dimension_numbers<[1], [0], [0], [1], [0, 0, 1, 1], [], []>} : vector<8x256xbf16>, vector<256x512xbf16>, vector<8x512xf32> -> vector<8x512xf32>
    %287 = arith.addf %279, %286 : vector<8x512xf32>
    %c0_228 = arith.constant 0 : index
    %c0_229 = arith.constant 0 : index
    %288 = vector.load %arg11[%c0_228, %c0_229] : memref<1x512xf32, #tpu.memory_space<vmem>>, vector<1x512xf32>
    %289 = vector.broadcast %288 : vector<1x512xf32> to vector<8x512xf32>
    %290 = arith.addf %287, %289 : vector<8x512xf32>
    %c0_230 = arith.constant 0 : index
    %c0_231 = arith.constant 0 : index
    %291 = vector.load %arg12[%c0_230, %c0_231] : memref<1x512xf32, #tpu.memory_space<vmem>>, vector<1x512xf32>
    %c0_232 = arith.constant 0 : index
    %c0_233 = arith.constant 0 : index
    %292 = vector.load %arg13[%c0_232, %c0_233] : memref<1x512xf32, #tpu.memory_space<vmem>>, vector<1x512xf32>
    %cst_234 = arith.constant dense<0.000000e+00> : vector<512xf32>
    %293 = vector.multi_reduction <add>, %290, %cst_234 [0] : vector<8x512xf32> to vector<512xf32>
    %294 = vector.shape_cast %293 : vector<512xf32> to vector<1x512xf32>
    %cst_235 = arith.constant 8.000000e+00 : f32
    %295 = vector.broadcast %cst_235 : f32 to vector<1x512xf32>
    %296 = arith.divf %294, %295 : vector<1x512xf32>
    %297 = vector.broadcast %296 : vector<1x512xf32> to vector<8x512xf32>
    %298 = arith.subf %290, %297 : vector<8x512xf32>
    %299 = arith.mulf %298, %298 : vector<8x512xf32>
    %cst_236 = arith.constant dense<0.000000e+00> : vector<512xf32>
    %300 = vector.multi_reduction <add>, %299, %cst_236 [0] : vector<8x512xf32> to vector<512xf32>
    %301 = vector.shape_cast %300 : vector<512xf32> to vector<1x512xf32>
    %cst_237 = arith.constant 8.000000e+00 : f32
    %302 = vector.broadcast %cst_237 : f32 to vector<1x512xf32>
    %303 = arith.divf %301, %302 : vector<1x512xf32>
    %304 = vector.broadcast %296 : vector<1x512xf32> to vector<8x512xf32>
    %305 = arith.subf %290, %304 : vector<8x512xf32>
    %cst_238 = arith.constant 9.99999974E-6 : f32
    %306 = vector.broadcast %cst_238 : f32 to vector<1x512xf32>
    %307 = arith.addf %303, %306 : vector<1x512xf32>
    %308 = math.rsqrt %307 : vector<1x512xf32>
    %309 = arith.mulf %308, %291 : vector<1x512xf32>
    %310 = vector.broadcast %309 : vector<1x512xf32> to vector<8x512xf32>
    %311 = arith.mulf %305, %310 : vector<8x512xf32>
    %312 = vector.broadcast %292 : vector<1x512xf32> to vector<8x512xf32>
    %313 = arith.addf %311, %312 : vector<8x512xf32>
    %cst_239 = arith.constant 0.000000e+00 : f32
    %314 = vector.broadcast %cst_239 : f32 to vector<8x512xf32>
    %315 = arith.cmpf oge, %313, %314 : vector<8x512xf32>
    %cst_240 = arith.constant 2.000000e-01 : f32
    %316 = vector.broadcast %cst_240 : f32 to vector<8x512xf32>
    %317 = arith.mulf %316, %313 : vector<8x512xf32>
    %318 = arith.select %315, %313, %317 : vector<8x512xi1>, vector<8x512xf32>
    %c0_241 = arith.constant 0 : index
    %c0_242 = arith.constant 0 : index
    %319 = vector.load %arg14[%c0_241, %c0_242] : memref<8x512xf32, #tpu.memory_space<vmem>>, vector<8x512xf32>
    %320 = arith.mulf %318, %319 : vector<8x512xf32>
    %c0_243 = arith.constant 0 : index
    %c0_244 = arith.constant 0 : index
    %321 = vector.load %arg15[%c0_243, %c0_244] : memref<2x8xf32, #tpu.memory_space<vmem>>, vector<2x8xf32>
    %cst_245 = arith.constant dense<0.000000e+00> : vector<2x512xf32>
    %322 = tpu.matmul %321, %320, %cst_245 {dimension_numbers = #tpu.dot_dimension_numbers<[1], [0], [0], [1], [0, 0, 1, 1], [], []>} : vector<2x8xf32>, vector<8x512xf32>, vector<2x512xf32> -> vector<2x512xf32>
    %cst_246 = arith.constant dense<0.000000e+00> : vector<2xf32>
    %323 = vector.multi_reduction <add>, %322, %cst_246 [1] : vector<2x512xf32> to vector<2xf32>
    %324 = vector.shape_cast %323 : vector<2xf32> to vector<2x1xf32>
    %c0_247 = arith.constant 0 : index
    %c0_248 = arith.constant 0 : index
    %325 = vector.load %arg16[%c0_247, %c0_248] : memref<1x1xf32, #tpu.memory_space<vmem>>, vector<1x1xf32>
    %326 = vector.broadcast %325 : vector<1x1xf32> to vector<2x1xf32>
    %327 = arith.addf %324, %326 : vector<2x1xf32>
    %cst_249 = arith.constant 0.000000e+00 : f32
    %328 = vector.broadcast %cst_249 : f32 to vector<2x1xf32>
    %329 = arith.subf %328, %327 : vector<2x1xf32>
    %330 = math.exp %329 : vector<2x1xf32>
    %cst_250 = arith.constant 1.000000e+00 : f32
    %331 = vector.broadcast %cst_250 : f32 to vector<2x1xf32>
    %332 = arith.addf %331, %330 : vector<2x1xf32>
    %cst_251 = arith.constant 1.000000e+00 : f32
    %333 = vector.broadcast %cst_251 : f32 to vector<2x1xf32>
    %334 = arith.divf %333, %332 : vector<2x1xf32>
    %c0_252 = arith.constant 0 : index
    %c0_253 = arith.constant 0 : index
    %335 = vector.load %arg17[%c0_252, %c0_253] : memref<2x1xf32, #tpu.memory_space<vmem>>, vector<2x1xf32>
    tpu.vector_store %arg17[%c0_252, %c0_253], %334 {strides = array<i32>} : memref<2x1xf32, #tpu.memory_space<vmem>>, vector<2x1xf32>,
    return
  }
}

</mosaic_0001>

<bundles_post_ra>
// kernel: tile.9
= control target key start
LH: loop header
LB: loop body
LE: loop exit
PB: predicated region body
PF: predicated region fallthrough
CT: control target
= control target key end

     0   :  { %s148_s0 = inlined_call_operand.vmem [shape: f32[2,4,512], index: 0, kind: input, shape index: {}]   ;;  %s149_s1 = inlined_call_operand.vmem [shape: f32[8,512], index: 1, kind: output, shape index: {}]  }
   0x1   :  { %v76_v0 = vld [vmem:[%s148_s0 + $0x1c] sm:$0xf]  ;;  %v77_v1 = vld [vmem:[%s148_s0 + $0x18] sm:$0xf]  ;;  %v78_v2 = vld [vmem:[%s148_s0 + $0x14] sm:$0xf] }
   0x2   :  { %8 = vst [vmem:[#allocation0 + $0x38] sm:$0xf] %v76_v0  ;;  %13 = vst [vmem:[#allocation0 + $0x30] sm:$0xf] %v77_v1  ;;  %v79_v3 = vld [vmem:[%s148_s0 + $0x10] sm:$0xf] }
   0x3   :  { %18 = vst [vmem:[#allocation0 + $0x28] sm:$0xf] %v78_v2  ;;  %v80_v4 = vld [vmem:[%s148_s0 + $0xc] sm:$0xf]  ;;  %v81_v5 = vld [vmem:[%s148_s0 + $0x8] sm:$0xf] }
   0x4   :  { %23 = vst [vmem:[#allocation0 + $0x20] sm:$0xf] %v79_v3  ;;  %28 = vst [vmem:[#allocation0 + $0x18] sm:$0xf] %v80_v4  ;;  %v82_v6 = vld [vmem:[%s148_s0 + $0x4] sm:$0xf] }
   0x5   :  { %33 = vst [vmem:[#allocation0 + $0x10] sm:$0xf] %v81_v5  ;;  %v38_v7 = vld [vmem:[%s148_s0] sm:$0xf]  ;;  %37 = vst [vmem:[#allocation0 + $0x8] sm:$0xf] %v82_v6 }
   0x6   :  { %39 = vst [vmem:[#allocation0] sm:$0xf] %v38_v7 }
   0x9   :  { %v63_v9 = vld [vmem:[#allocation0 + $0x30] sm:$0xf]   ;;  %v67_v10 = vld [vmem:[#allocation0 + $0x38] sm:$0xf]  }
   0xa   :  { %v59_v8 = vld [vmem:[#allocation0 + $0x28] sm:$0xf]   ;;  %88 = vst [vmem:[%s149_s1 + $0x14] sm:$0xf] %v63_v9   ;;  %89 = vst [vmem:[%s149_s1 + $0x1c] sm:$0xf] %v67_v10  }
   0xb   :  { %v51_v12 = vld [vmem:[#allocation0 + $0x18] sm:$0xf]   ;;  %v55_v13 = vld [vmem:[#allocation0 + $0x20] sm:$0xf]   ;;  %87 = vst [vmem:[%s149_s1 + $0xc] sm:$0xf] %v59_v8  }
   0xc   :  { %v47_v11 = vld [vmem:[#allocation0 + $0x10] sm:$0xf]   ;;  %v43_v15 = vld [vmem:[#allocation0 + $0x8] sm:$0xf]   ;;  %85 = vst [vmem:[%s149_s1 + $0x18] sm:$0xf] %v51_v12  }
   0xd   :  { %v40_v14 = vld [vmem:[#allocation0] sm:$0xf]   ;;  %84 = vst [vmem:[%s149_s1 + $0x10] sm:$0xf] %v47_v11   ;;  %86 = vst [vmem:[%s149_s1 + $0x4] sm:$0xf] %v55_v13  }
   0xe   :  { %41 = vst [vmem:[%s149_s1] sm:$0xf] %v40_v14   ;;  %83 = vst [vmem:[%s149_s1 + $0x8] sm:$0xf] %v43_v15  }

// kernel: dc_discriminator_forward.1
= control target key start
LH: loop header
LB: loop body
LE: loop exit
PB: predicated region body
PF: predicated region fallthrough
CT: control target
= control target key end

     0   :  { %s21522_s0 = inlined_call_operand.vmem [shape: bf16[512,128], index: 0, kind: input, shape index: {}]   ;;  %s21523_s1 = inlined_call_operand.vmem [shape: bf16[9,128,512], index: 1, kind: input, shape index: {}]   ;;  %s21524_s2 = inlined_call_operand.vmem [shape: f32[9,1,128], index: 2, kind: input, shape index: {}]   ;;  %s21525_s3 = inlined_call_operand.vmem [shape: f32[1,128], index: 3, kind: input, shape index: {}]   ;;  %s21526_s4 = inlined_call_operand.vmem [shape: bf16[9,32,128], index: 4, kind: input, shape index: {}]   ;;  %s21527_s5 = inlined_call_operand.hbm [shape: bf16[9,128,256], index: 5, kind: input, shape index: {}]   ;;  %s21528_s6 = inlined_call_operand.vmem [shape: f32[1,256], index: 6, kind: input, shape index: {}]   ;;  %s21529_s7 = inlined_call_operand.vmem [shape: f32[1,256], index: 7, kind: input, shape index: {}]   ;;  %s21530_s8 = inlined_call_operand.vmem [shape: f32[1,256], index: 8, kind: input, shape index: {}]   ;;  %s21531_s9 = inlined_call_operand.vmem [shape: bf16[9,8,32], index: 9, kind: input, shape index: {}]   ;;  %s21532_s10 = inlined_call_operand.vmem [shape: bf16[9,256,512], index: 10, kind: input, shape index: {}]   ;;  %s21533_s11 = inlined_call_operand.vmem [shape: f32[1,512], index: 11, kind: input, shape index: {}]   ;;  %s21534_s12 = inlined_call_operand.vmem [shape: f32[1,512], index: 12, kind: input, shape index: {}]   ;;  %s21535_s13 = inlined_call_operand.vmem [shape: f32[1,512], index: 13, kind: input, shape index: {}]   ;;  %s21536_s14 = inlined_call_operand.vmem [shape: f32[8,512], index: 14, kind: input, shape index: {}]   ;;  %s21537_s15 = inlined_call_operand.vmem [shape: f32[2,8], index: 15, kind: input, shape index: {}]   ;;  %s21538_s16 = inlined_call_operand.<no memory space> [shape: f32[1,1], index: 16, kind: input, shape index: {}]   ;;  %s21539_s17 = inlined_call_operand.vmem [shape: f32[2,1], index: 17, kind: output, shape index: {}]  }
   0x1   :  { %21542 = sst [smem:[#allocation24_spill]] %s21522_s0  ;;  %v22_v0 = vstv %s21538_s16 }
   0x2   :  { %21543 = sst [smem:[#allocation25_spill]] %s21523_s1  ;;  %23 = vst [vmem:[#allocation2] sm:$0x1] %v22_v0 }
   0x3   :  { %24 = vsyncpa [#allocation4], 0  ;;  %s16828_s26 = smov [#allocation3]   ;;  %s16804_s0 = scalar_lea.hbm %s21527_s5, 18432 }
   0x4   :  { %s40_s27 = sshll.u32 %s16828_s26, 4  ;;  %p16805_p0 = scmp.ne.s32.totalorder %s21527_s5, %s16804_s0  ;;  %s41_s27 = int_to_ptr.vmem [resolvable:$true] %s40_s27 }
   0x5   :  { %p16808_p1 = scmp.lt.u32.totalorder %s16804_s0, %s21527_s5 }
   0x7   :  { %p16810_p2 = pnand %p16808_p1, %p16805_p0 }
   0x9   :  { %16813 = shalt.err (!%p16810_p2)
}
   0xa   :  { %s16814_s16 = scalar_lea.vmem %s41_s27, 18432  ;;  %p16819_p4 = scmp.lt.s32.totalorder %s41_s27, %s41_s27 }
   0xb   :  { %p16815_p3 = scmp.ne.s32.totalorder %s41_s27, %s16814_s16  ;;  %p16820_p5 = scmp.lt.s32.totalorder %s16814_s16, %s16814_s16 }
   0xd   :  { %p16821_p6 = por %p16820_p5, %p16819_p4 }
   0xf   :  { %p16822_p7 = pnand %p16821_p6, %p16815_p3 }
  0x11   :  { %16825 = shalt.err (!%p16822_p7)
}
  0x12   :  { %s16829_s20 = smov 128   ;;  %s16830_s21 = smov 8  }
  0x13   :  { %46 = dma.hbm_to_vmem [thread:$0]  %s21527_s5, 18432, %s41_s27, [#allocation4], %s16829_s20, %s16829_s20, %s16830_s21  }
  0x14   :  { %16826 = dma.done.wait [#allocation4], 18432  }
  0x15   :  { %16827 = vsyncadd [#allocation4], 4294948864  ;;  %s21544_s26 = sld [smem:[#allocation24_spill]]  ;;  %s21545_s28 = sld [smem:[#allocation25_spill]] }
  0x1b   :  { %v16941_v1 = vld [vmem:[%s21544_s26 + $0x40] sm:$0xff]   ;;  %v16964_v5 = vld [vmem:[%s21544_s26 + $0x48] sm:$0xff]   ;;  %v16988_v9 = vld [vmem:[%s21544_s26 + $0x50] sm:$0xff]  }
  0x1c   :  { %v16946_v2 = vld [vmem:[%s21544_s26 + $0xc0] sm:$0xff]   ;;  %13639 = vmatprep.subr.bf16.mxu0 %v16941_v1  ;;  %v16970_v6 = vld [vmem:[%s21544_s26 + $0xc8] sm:$0xff]   ;;  %v16994_v10 = vld [vmem:[%s21544_s26 + $0xd0] sm:$0xff]  }
  0x1d   :  { %v16952_v3 = vld [vmem:[%s21544_s26] sm:$0xff]   ;;  %13703 = vmatprep.subr.bf16.mxu1 %v16946_v2  ;;  %v16976_v7 = vld [vmem:[%s21544_s26 + $0x8] sm:$0xff]   ;;  %v17000_v11 = vld [vmem:[%s21544_s26 + $0x10] sm:$0xff]  }
  0x1e   :  { %v16958_v4 = vld [vmem:[%s21544_s26 + $0x80] sm:$0xff]   ;;  %13640 = vmatpush3.bf16.msra.mxu0 %v16952_v3  ;;  %v16982_v8 = vld [vmem:[%s21544_s26 + $0x88] sm:$0xff]   ;;  %v17006_v12 = vld [vmem:[%s21544_s26 + $0x90] sm:$0xff]  }
  0x1f   :  { %13704 = vmatpush3.bf16.msra.mxu1 %v16958_v4  ;;  %13641 = vmatprep.subr.bf16.mxu0 %v16964_v5  ;;  %v17012_v13 = vld [vmem:[%s21544_s26 + $0x58] sm:$0xff]   ;;  %v17036_v17 = vld [vmem:[%s21544_s26 + $0x60] sm:$0xff]   ;;  %v17060_v21 = vld [vmem:[%s21544_s26 + $0x68] sm:$0xff]  }
  0x20   :  { %13705 = vmatprep.subr.bf16.mxu1 %v16970_v6  ;;  %v17018_v14 = vld [vmem:[%s21544_s26 + $0xd8] sm:$0xff]   ;;  %v17042_v18 = vld [vmem:[%s21544_s26 + $0xe0] sm:$0xff]   ;;  %v17066_v22 = vld [vmem:[%s21544_s26 + $0xe8] sm:$0xff]  }
  0x21   :  { %v17024_v15 = vld [vmem:[%s21544_s26 + $0x18] sm:$0xff]   ;;  %v17048_v19 = vld [vmem:[%s21544_s26 + $0x20] sm:$0xff]   ;;  %v17072_v23 = vld [vmem:[%s21544_s26 + $0x28] sm:$0xff]  }
  0x22   :  { %13642 = vmatpush3.bf16.msra.mxu0 %v16976_v7  ;;  %v17030_v16 = vld [vmem:[%s21544_s26 + $0x98] sm:$0xff]   ;;  %v17054_v20 = vld [vmem:[%s21544_s26 + $0xa0] sm:$0xff]   ;;  %v17078_v24 = vld [vmem:[%s21544_s26 + $0xa8] sm:$0xff]  }
  0x23   :  { %13706 = vmatpush3.bf16.msra.mxu1 %v16982_v8  ;;  %13643 = vmatprep.subr.bf16.mxu0 %v16988_v9  ;;  %v17084_v25 = vld [vmem:[%s21544_s26 + $0x70] sm:$0xff]   ;;  %v17108_v29 = vld [vmem:[%s21544_s26 + $0x78] sm:$0xff]  }
  0x24   :  { %13707 = vmatprep.subr.bf16.mxu1 %v16994_v10  ;;  %v17090_v26 = vld [vmem:[%s21544_s26 + $0xf0] sm:$0xff]   ;;  %v17114_v30 = vld [vmem:[%s21544_s26 + $0xf8] sm:$0xff]  }
  0x25   :  { %v17096_v27 = vld [vmem:[%s21544_s26 + $0x30] sm:$0xff]   ;;  %v17120_v31 = vld [vmem:[%s21544_s26 + $0x38] sm:$0xff]  }
  0x26   :  { %13644 = vmatpush3.bf16.msra.mxu0 %v17000_v11  ;;  %v17102_v28 = vld [vmem:[%s21544_s26 + $0xb0] sm:$0xff]   ;;  %v17126_v32 = vld [vmem:[%s21544_s26 + $0xb8] sm:$0xff]  }
  0x27   :  { %13708 = vmatpush3.bf16.msra.mxu1 %v17006_v12  ;;  %13645 = vmatprep.subr.bf16.mxu0 %v17012_v13  ;;  %v15162_v33 = vld [vmem:[%s21545_s28] ss:$16 sps:$4 sm:$0xff]   ;;  %v15164_v34 = vld [vmem:[%s21545_s28 + $0x4] ss:$16 sps:$4 sm:$0xff]   ;;  %v15165_v35 = vld [vmem:[%s21545_s28 + $0x8] ss:$16 sps:$4 sm:$0xff]  }
  0x28   :  { %13709 = vmatprep.subr.bf16.mxu1 %v17018_v14  ;;  %v15167_v36 = vld [vmem:[%s21545_s28 + $0xc] ss:$16 sps:$4 sm:$0xff]   ;;  %553 = vmatprep.mubr.bf16.mxu0 %v15164_v34  ;;  %v15168_v37 = vld [vmem:[%s21545_s28 + $0x24] ss:$16 sps:$4 sm:$0xff]   ;;  %v15172_v39 = vld [vmem:[%s21545_s28 + $0x20] ss:$16 sps:$4 sm:$0xff]  }
  0x29   :  { %650 = vmatprep.mubr.bf16.mxu1 %v15167_v36  ;;  %v15170_v38 = vld [vmem:[%s21545_s28 + $0x2c] ss:$16 sps:$4 sm:$0xff]   ;;  %v15173_v40 = vld [vmem:[%s21545_s28 + $0x28] ss:$16 sps:$4 sm:$0xff]   ;;  %v15174_v41 = vld [vmem:[%s21545_s28 + $0x44] ss:$16 sps:$4 sm:$0xff]  }
  0x2a   :  { %13646 = vmatpush3.bf16.msra.mxu0 %v17024_v15  ;;  %v15176_v42 = vld [vmem:[%s21545_s28 + $0x4c] ss:$16 sps:$4 sm:$0xff]   ;;  %v15178_v43 = vld [vmem:[%s21545_s28 + $0x40] ss:$16 sps:$4 sm:$0xff]   ;;  %v15179_v44 = vld [vmem:[%s21545_s28 + $0x48] ss:$16 sps:$4 sm:$0xff]  }
  0x2b   :  { %13710 = vmatpush3.bf16.msra.mxu1 %v17030_v16  ;;  %13647 = vmatprep.subr.bf16.mxu0 %v17036_v17  ;;  %v15180_v45 = vld [vmem:[%s21545_s28 + $0x64] ss:$16 sps:$4 sm:$0xff]   ;;  %v15182_v46 = vld [vmem:[%s21545_s28 + $0x6c] ss:$16 sps:$4 sm:$0xff]   ;;  %v15184_v47 = vld [vmem:[%s21545_s28 + $0x60] ss:$16 sps:$4 sm:$0xff]  }
  0x2c   :  { %13711 = vmatprep.subr.bf16.mxu1 %v17042_v18  ;;  %v15185_v48 = vld [vmem:[%s21545_s28 + $0x68] ss:$16 sps:$4 sm:$0xff]   ;;  %v15186_v49 = vld [vmem:[%s21545_s28 + $0x84] ss:$16 sps:$4 sm:$0xff]   ;;  %v15188_v50 = vld [vmem:[%s21545_s28 + $0x8c] ss:$16 sps:$4 sm:$0xff]  }
  0x2d   :  { %v15190_v51 = vld [vmem:[%s21545_s28 + $0x80] ss:$16 sps:$4 sm:$0xff]   ;;  %v15191_v52 = vld [vmem:[%s21545_s28 + $0x88] ss:$16 sps:$4 sm:$0xff]   ;;  %v15192_v53 = vld [vmem:[%s21545_s28 + $0xa4] ss:$16 sps:$4 sm:$0xff]  }
  0x2e   :  { %13648 = vmatpush3.bf16.msra.mxu0 %v17048_v19  ;;  %v15194_v54 = vld [vmem:[%s21545_s28 + $0xac] ss:$16 sps:$4 sm:$0xff]   ;;  %v15196_v55 = vld [vmem:[%s21545_s28 + $0xa0] ss:$16 sps:$4 sm:$0xff]   ;;  %v15197_v56 = vld [vmem:[%s21545_s28 + $0xa8] ss:$16 sps:$4 sm:$0xff]  }
  0x2f   :  { %13712 = vmatpush3.bf16.msra.mxu1 %v17054_v20  ;;  %13649 = vmatprep.subr.bf16.mxu0 %v17060_v21  ;;  %v15198_v57 = vld [vmem:[%s21545_s28 + $0xc4] ss:$16 sps:$4 sm:$0xff]   ;;  %v15200_v58 = vld [vmem:[%s21545_s28 + $0xcc] ss:$16 sps:$4 sm:$0xff]   ;;  %v15202_v59 = vld [vmem:[%s21545_s28 + $0xc0] ss:$16 sps:$4 sm:$0xff]  }
  0x30   :  { %13713 = vmatprep.subr.bf16.mxu1 %v17066_v22  ;;  %v15203_v60 = vld [vmem:[%s21545_s28 + $0xc8] ss:$16 sps:$4 sm:$0xff]   ;;  %v15204_v61 = vld [vmem:[%s21545_s28 + $0xe4] ss:$16 sps:$4 sm:$0xff]   ;;  %v15206_v62 = vld [vmem:[%s21545_s28 + $0xec] ss:$16 sps:$4 sm:$0xff]  }
  0x31   :  { %v15208_v63 = vld [vmem:[%s21545_s28 + $0xe0] ss:$16 sps:$4 sm:$0xff]   ;;  %v15209_v0 = vld [vmem:[%s21545_s28 + $0xe8] ss:$16 sps:$4 sm:$0xff]   ;;  %v15215_v34 = vld [vmem:[%s21545_s28 + $0x10c] ss:$16 sps:$4 sm:$0xff]  }
  0x32   :  { %13650 = vmatpush3.bf16.msra.mxu0 %v17072_v23  ;;  %v15213_v36 = vld [vmem:[%s21545_s28 + $0x108] ss:$16 sps:$4 sm:$0xff]  }
  0x33   :  { %13714 = vmatpush3.bf16.msra.mxu1 %v17078_v24  ;;  %13651 = vmatprep.subr.bf16.mxu0 %v17084_v25 }
  0x34   :  { %13715 = vmatprep.subr.bf16.mxu1 %v17090_v26 }
  0x36   :  { %13652 = vmatpush3.bf16.msra.mxu0 %v17096_v27 }
  0x37   :  { %13716 = vmatpush3.bf16.msra.mxu1 %v17102_v28  ;;  %13653 = vmatprep.subr.bf16.mxu0 %v17108_v29 }
  0x38   :  { %13717 = vmatprep.subr.bf16.mxu1 %v17114_v30 }
  0x3a   :  { %13654 = vmatpush3.bf16.msra.mxu0 %v17120_v31 }
  0x3b   :  { %13718 = vmatpush3.bf16.msra.mxu1 %v17126_v32  ;;  %13767 = vmatprep.subr.bf16.mxu0 %v16941_v1 }
  0x3c   :  { %13831 = vmatprep.subr.bf16.mxu1 %v16946_v2 }
  0x3d   :  { %554 = vmatmul.mubr.bf16.vlgmr.msra.gmra.mrb[0].mxu0 %v15162_v33  ;;  %v15212_v33 = vld [vmem:[%s21545_s28 + $0x104] ss:$16 sps:$4 sm:$0xff]  }
  0x3e   :  { %651 = vmatmul.mubr.bf16.vlgmr.msra.gmra.mrb[0].mxu1 %v15165_v35  ;;  %561 = vmatprep.mubr.bf16.mxu0 %v15168_v37  ;;  %v15210_v35 = vld [vmem:[%s21545_s28 + $0x100] ss:$16 sps:$4 sm:$0xff]   ;;  %v15216_v37 = vld [vmem:[%s21545_s28 + $0x124] ss:$16 sps:$4 sm:$0xff]  }
  0x3f   :  { %658 = vmatprep.mubr.bf16.mxu1 %v15170_v38  ;;  %13768 = vmatpush3.bf16.msra.mxu0 %v16952_v3  ;;  %v15218_v38 = vld [vmem:[%s21545_s28 + $0x12c] ss:$16 sps:$4 sm:$0xff]  }
  0x40   :  { %13832 = vmatpush3.bf16.msra.mxu1 %v16958_v4  ;;  %13769 = vmatprep.subr.bf16.mxu0 %v16964_v5 }
  0x41   :  { %13833 = vmatprep.subr.bf16.mxu1 %v16970_v6 }
  0x43   :  { %13770 = vmatpush3.bf16.msra.mxu0 %v16976_v7 }
  0x44   :  { %13834 = vmatpush3.bf16.msra.mxu1 %v16982_v8  ;;  %13771 = vmatprep.subr.bf16.mxu0 %v16988_v9 }
  0x45   :  { %562 = vmatmul.mubr.bf16.gmra.mrb[4].mxu0 %v15172_v39  ;;  %13835 = vmatprep.subr.bf16.mxu1 %v16994_v10  ;;  %v15220_v39 = vld [vmem:[%s21545_s28 + $0x120] ss:$16 sps:$4 sm:$0xff]  }
  0x46   :  { %659 = vmatmul.mubr.bf16.gmra.mrb[4].mxu1 %v15173_v40  ;;  %569 = vmatprep.mubr.bf16.mxu0 %v15174_v41  ;;  %v15221_v40 = vld [vmem:[%s21545_s28 + $0x128] ss:$16 sps:$4 sm:$0xff]   ;;  %v15222_v41 = vld [vmem:[%s21545_s28 + $0x144] ss:$16 sps:$4 sm:$0xff]  }
  0x47   :  { %666 = vmatprep.mubr.bf16.mxu1 %v15176_v42  ;;  %13772 = vmatpush3.bf16.msra.mxu0 %v17000_v11  ;;  %v15269_v42 = vld [vmem:[%s21545_s28 + $0x228] ss:$16 sps:$4 sm:$0xff]  }
  0x48   :  { %13836 = vmatpush3.bf16.msra.mxu1 %v17006_v12  ;;  %13773 = vmatprep.subr.bf16.mxu0 %v17012_v13 }
  0x49   :  { %13837 = vmatprep.subr.bf16.mxu1 %v17018_v14 }
  0x4b   :  { %13774 = vmatpush3.bf16.msra.mxu0 %v17024_v15 }
  0x4c   :  { %13838 = vmatpush3.bf16.msra.mxu1 %v17030_v16  ;;  %13775 = vmatprep.subr.bf16.mxu0 %v17036_v17 }
  0x4d   :  { %570 = vmatmul.mubr.bf16.gmra.mrb[8].mxu0 %v15178_v43  ;;  %13839 = vmatprep.subr.bf16.mxu1 %v17042_v18  ;;  %v17427_v43 = vld [vmem:[%s21544_s26 + $0x48] sm:$0xff]  }
  0x4e   :  { %667 = vmatmul.mubr.bf16.gmra.mrb[8].mxu1 %v15179_v44  ;;  %577 = vmatprep.mubr.bf16.mxu0 %v15180_v45  ;;  %v15270_v44 = vld [vmem:[%s21545_s28 + $0x244] ss:$16 sps:$4 sm:$0xff]   ;;  %v17436_v45 = vld [vmem:[%s21544_s26 + $0xc8] sm:$0xff]  }
  0x4f   :  { %674 = vmatprep.mubr.bf16.mxu1 %v15182_v46  ;;  %13776 = vmatpush3.bf16.msra.mxu0 %v17048_v19  ;;  %v15272_v46 = vld [vmem:[%s21545_s28 + $0x24c] ss:$16 sps:$4 sm:$0xff]  }
  0x50   :  { %13840 = vmatpush3.bf16.msra.mxu1 %v17054_v20  ;;  %13777 = vmatprep.subr.bf16.mxu0 %v17060_v21 }
  0x51   :  { %13841 = vmatprep.subr.bf16.mxu1 %v17066_v22 }
  0x53   :  { %13778 = vmatpush3.bf16.msra.mxu0 %v17072_v23 }
  0x54   :  { %13842 = vmatpush3.bf16.msra.mxu1 %v17078_v24  ;;  %13779 = vmatprep.subr.bf16.mxu0 %v17084_v25 }
  0x55   :  { %578 = vmatmul.mubr.bf16.gmra.mrb[12].mxu0 %v15184_v47  ;;  %13843 = vmatprep.subr.bf16.mxu1 %v17090_v26  ;;  %v17445_v47 = vld [vmem:[%s21544_s26 + $0x8] sm:$0xff]  }
  0x56   :  { %675 = vmatmul.mubr.bf16.gmra.mrb[12].mxu1 %v15185_v48  ;;  %585 = vmatprep.mubr.bf16.mxu0 %v15186_v49  ;;  %v17451_v48 = vld [vmem:[%s21544_s26 + $0x88] sm:$0xff]   ;;  %v17457_v49 = vld [vmem:[%s21544_s26 + $0x50] sm:$0xff]  }
  0x57   :  { %682 = vmatprep.mubr.bf16.mxu1 %v15188_v50  ;;  %13780 = vmatpush3.bf16.msra.mxu0 %v17096_v27  ;;  %v17463_v50 = vld [vmem:[%s21544_s26 + $0xd0] sm:$0xff]  }
  0x58   :  { %13844 = vmatpush3.bf16.msra.mxu1 %v17102_v28  ;;  %13781 = vmatprep.subr.bf16.mxu0 %v17108_v29 }
  0x59   :  { %13845 = vmatprep.subr.bf16.mxu1 %v17114_v30 }
  0x5b   :  { %13782 = vmatpush3.bf16.msra.mxu0 %v17120_v31 }
  0x5c   :  { %13846 = vmatpush3.bf16.msra.mxu1 %v17126_v32  ;;  %13895 = vmatprep.subr.bf16.mxu0 %v16941_v1 }
  0x5d   :  { %586 = vmatmul.mubr.bf16.gmra.mrb[16].mxu0 %v15190_v51  ;;  %13959 = vmatprep.subr.bf16.mxu1 %v16946_v2  ;;  %v15274_v51 = vld [vmem:[%s21545_s28 + $0x240] ss:$16 sps:$4 sm:$0xff]  }
  0x5e   :  { %683 = vmatmul.mubr.bf16.gmra.mrb[16].mxu1 %v15191_v52  ;;  %593 = vmatprep.mubr.bf16.mxu0 %v15192_v53  ;;  %v17472_v52 = vld [vmem:[%s21544_s26 + $0x10] sm:$0xff]   ;;  %v15275_v53 = vld [vmem:[%s21545_s28 + $0x248] ss:$16 sps:$4 sm:$0xff]  }
  0x5f   :  { %690 = vmatprep.mubr.bf16.mxu1 %v15194_v54  ;;  %v15276_v54 = vld [vmem:[%s21545_s28 + $0x264] ss:$16 sps:$4 sm:$0xff]  }
  0x65   :  { %594 = vmatmul.mubr.bf16.gmra.mrb[20].mxu0 %v15196_v55  ;;  %v17484_v55 = vld [vmem:[%s21544_s26 + $0x90] sm:$0xff]  }
  0x66   :  { %691 = vmatmul.mubr.bf16.gmra.mrb[20].mxu1 %v15197_v56  ;;  %601 = vmatprep.mubr.bf16.mxu0 %v15198_v57  ;;  %v17490_v56 = vld [vmem:[%s21544_s26 + $0x58] sm:$0xff]  }
  0x67   :  { %698 = vmatprep.mubr.bf16.mxu1 %v15200_v58  ;;  %v17496_v57 = vld [vmem:[%s21544_s26 + $0xd8] sm:$0xff]  }
  0x68   :  { %v15278_v58 = vld [vmem:[%s21545_s28 + $0x26c] ss:$16 sps:$4 sm:$0xff]  }
  0x6d   :  { %602 = vmatmul.mubr.bf16.gmra.mrb[24].mxu0 %v15202_v59  ;;  %v17505_v59 = vld [vmem:[%s21544_s26 + $0x18] sm:$0xff]  }
  0x6e   :  { %699 = vmatmul.mubr.bf16.gmra.mrb[24].mxu1 %v15203_v60  ;;  %609 = vmatprep.mubr.bf16.mxu0 %v15204_v61  ;;  %v17511_v60 = vld [vmem:[%s21544_s26 + $0x98] sm:$0xff]   ;;  %v17517_v61 = vld [vmem:[%s21544_s26 + $0x60] sm:$0xff]  }
  0x6f   :  { %706 = vmatprep.mubr.bf16.mxu1 %v15206_v62  ;;  %v17523_v62 = vld [vmem:[%s21544_s26 + $0xe0] sm:$0xff]  }
  0x75   :  { %610 = vmatmul.mubr.bf16.gmra.mrb[28].mxu0 %v15208_v63  ;;  %v15280_v63 = vld [vmem:[%s21545_s28 + $0x260] ss:$16 sps:$4 sm:$0xff]  }
  0x76   :  { %707 = vmatmul.mubr.bf16.gmra.mrb[28].mxu1 %v15209_v0  ;;  %1011 = vmatprep.mubr.bf16.mxu0 %v15212_v33  ;;  %v17532_v0 = vld [vmem:[%s21544_s26 + $0x20] sm:$0xff]   ;;  %v15281_v33 = vld [vmem:[%s21545_s28 + $0x268] ss:$16 sps:$4 sm:$0xff]  }
  0x77   :  { %1108 = vmatprep.mubr.bf16.mxu1 %v15215_v34  ;;  %v15282_v34 = vld [vmem:[%s21545_s28 + $0x284] ss:$16 sps:$4 sm:$0xff]  }
  0x7d   :  { %1012 = vmatmul.mubr.bf16.vlgmr.msra.gmra.mrb[32].mxu0 %v15210_v35  ;;  %v17544_v35 = vld [vmem:[%s21544_s26 + $0xa0] sm:$0xff]  }
  0x7e   :  { %1109 = vmatmul.mubr.bf16.vlgmr.msra.gmra.mrb[32].mxu1 %v15213_v36  ;;  %1019 = vmatprep.mubr.bf16.mxu0 %v15216_v37  ;;  %v17550_v36 = vld [vmem:[%s21544_s26 + $0x68] sm:$0xff]  }
  0x7f   :  { %1116 = vmatprep.mubr.bf16.mxu1 %v15218_v38  ;;  %13896 = vmatpush3.bf16.msra.mxu0 %v16952_v3  ;;  %v15224_v3 = vld [vmem:[%s21545_s28 + $0x14c] ss:$16 sps:$4 sm:$0xff]  }
  0x80   :  { %13960 = vmatpush3.bf16.msra.mxu1 %v16958_v4  ;;  %13897 = vmatprep.subr.bf16.mxu0 %v16964_v5  ;;  %v15226_v4 = vld [vmem:[%s21545_s28 + $0x140] ss:$16 sps:$4 sm:$0xff]   ;;  %v15227_v5 = vld [vmem:[%s21545_s28 + $0x148] ss:$16 sps:$4 sm:$0xff]   ;;  %v15284_v38 = vld [vmem:[%s21545_s28 + $0x28c] ss:$16 sps:$4 sm:$0xff]  }
  0x81   :  { %13961 = vmatprep.subr.bf16.mxu1 %v16970_v6  ;;  %v15228_v6 = vld [vmem:[%s21545_s28 + $0x164] ss:$16 sps:$4 sm:$0xff]   ;;  %v17556_v37 = vld [vmem:[%s21544_s26 + $0xe8] sm:$0xff]  }
  0x83   :  { %13898 = vmatpush3.bf16.msra.mxu0 %v16976_v7  ;;  %v15230_v7 = vld [vmem:[%s21545_s28 + $0x16c] ss:$16 sps:$4 sm:$0xff]  }
  0x84   :  { %13962 = vmatpush3.bf16.msra.mxu1 %v16982_v8  ;;  %13899 = vmatprep.subr.bf16.mxu0 %v16988_v9  ;;  %v15232_v8 = vld [vmem:[%s21545_s28 + $0x160] ss:$16 sps:$4 sm:$0xff]   ;;  %v15233_v9 = vld [vmem:[%s21545_s28 + $0x168] ss:$16 sps:$4 sm:$0xff]  }
  0x85   :  { %1020 = vmatmul.mubr.bf16.gmra.mrb[36].mxu0 %v15220_v39  ;;  %13963 = vmatprep.subr.bf16.mxu1 %v16994_v10  ;;  %v15234_v10 = vld [vmem:[%s21545_s28 + $0x184] ss:$16 sps:$4 sm:$0xff]   ;;  %v17565_v39 = vld [vmem:[%s21544_s26 + $0x28] sm:$0xff]  }
  0x86   :  { %1117 = vmatmul.mubr.bf16.gmra.mrb[36].mxu1 %v15221_v40  ;;  %1027 = vmatprep.mubr.bf16.mxu0 %v15222_v41  ;;  %v17571_v40 = vld [vmem:[%s21544_s26 + $0xa8] sm:$0xff]   ;;  %v17577_v41 = vld [vmem:[%s21544_s26 + $0x70] sm:$0xff]  }
  0x87   :  { %1124 = vmatprep.mubr.bf16.mxu1 %v15224_v3  ;;  %13900 = vmatpush3.bf16.msra.mxu0 %v17000_v11  ;;  %v15236_v11 = vld [vmem:[%s21545_s28 + $0x18c] ss:$16 sps:$4 sm:$0xff]   ;;  %v17583_v3 = vld [vmem:[%s21544_s26 + $0xf0] sm:$0xff]  }
  0x88   :  { %13964 = vmatpush3.bf16.msra.mxu1 %v17006_v12  ;;  %13901 = vmatprep.subr.bf16.mxu0 %v17012_v13  ;;  %v15238_v12 = vld [vmem:[%s21545_s28 + $0x180] ss:$16 sps:$4 sm:$0xff]   ;;  %v15239_v13 = vld [vmem:[%s21545_s28 + $0x188] ss:$16 sps:$4 sm:$0xff]  }
  0x89   :  { %13965 = vmatprep.subr.bf16.mxu1 %v17018_v14  ;;  %v15240_v14 = vld [vmem:[%s21545_s28 + $0x1a4] ss:$16 sps:$4 sm:$0xff]  }
  0x8b   :  { %13902 = vmatpush3.bf16.msra.mxu0 %v17024_v15  ;;  %v15242_v15 = vld [vmem:[%s21545_s28 + $0x1ac] ss:$16 sps:$4 sm:$0xff]  }
  0x8c   :  { %13966 = vmatpush3.bf16.msra.mxu1 %v17030_v16  ;;  %13903 = vmatprep.subr.bf16.mxu0 %v17036_v17  ;;  %v15244_v16 = vld [vmem:[%s21545_s28 + $0x1a0] ss:$16 sps:$4 sm:$0xff]   ;;  %v15245_v17 = vld [vmem:[%s21545_s28 + $0x1a8] ss:$16 sps:$4 sm:$0xff]  }
  0x8d   :  { %1028 = vmatmul.mubr.bf16.gmra.mrb[40].mxu0 %v15226_v4  ;;  %13967 = vmatprep.subr.bf16.mxu1 %v17042_v18  ;;  %v15246_v18 = vld [vmem:[%s21545_s28 + $0x1c4] ss:$16 sps:$4 sm:$0xff]   ;;  %v15286_v4 = vld [vmem:[%s21545_s28 + $0x280] ss:$16 sps:$4 sm:$0xff]  }
  0x8e   :  { %1125 = vmatmul.mubr.bf16.gmra.mrb[40].mxu1 %v15227_v5  ;;  %1035 = vmatprep.mubr.bf16.mxu0 %v15228_v6  ;;  %v17592_v5 = vld [vmem:[%s21544_s26 + $0x30] sm:$0xff]   ;;  %v15287_v6 = vld [vmem:[%s21545_s28 + $0x288] ss:$16 sps:$4 sm:$0xff]  }
  0x8f   :  { %1132 = vmatprep.mubr.bf16.mxu1 %v15230_v7  ;;  %13904 = vmatpush3.bf16.msra.mxu0 %v17048_v19  ;;  %v15251_v19 = vld [vmem:[%s21545_s28 + $0x1c8] ss:$16 sps:$4 sm:$0xff]   ;;  %v15288_v7 = vld [vmem:[%s21545_s28 + $0x2a4] ss:$16 sps:$4 sm:$0xff]  }
  0x90   :  { %13968 = vmatpush3.bf16.msra.mxu1 %v17054_v20  ;;  %13905 = vmatprep.subr.bf16.mxu0 %v17060_v21  ;;  %v15252_v20 = vld [vmem:[%s21545_s28 + $0x1e4] ss:$16 sps:$4 sm:$0xff]   ;;  %v15254_v21 = vld [vmem:[%s21545_s28 + $0x1ec] ss:$16 sps:$4 sm:$0xff]  }
  0x91   :  { %13969 = vmatprep.subr.bf16.mxu1 %v17066_v22  ;;  %v15256_v22 = vld [vmem:[%s21545_s28 + $0x1e0] ss:$16 sps:$4 sm:$0xff]  }
  0x93   :  { %13906 = vmatpush3.bf16.msra.mxu0 %v17072_v23  ;;  %v15257_v23 = vld [vmem:[%s21545_s28 + $0x1e8] ss:$16 sps:$4 sm:$0xff]  }
  0x94   :  { %13970 = vmatpush3.bf16.msra.mxu1 %v17078_v24  ;;  %13907 = vmatprep.subr.bf16.mxu0 %v17084_v25  ;;  %v15260_v24 = vld [vmem:[%s21545_s28 + $0x204] ss:$16 sps:$4 sm:$0xff]   ;;  %v15263_v25 = vld [vmem:[%s21545_s28 + $0x20c] ss:$16 sps:$4 sm:$0xff]  }
  0x95   :  { %1036 = vmatmul.mubr.bf16.gmra.mrb[44].mxu0 %v15232_v8  ;;  %13971 = vmatprep.subr.bf16.mxu1 %v17090_v26  ;;  %v15258_v26 = vld [vmem:[%s21545_s28 + $0x200] ss:$16 sps:$4 sm:$0xff]  }
  0x96   :  { %1133 = vmatmul.mubr.bf16.gmra.mrb[44].mxu1 %v15233_v9  ;;  %1043 = vmatprep.mubr.bf16.mxu0 %v15234_v10  ;;  %v17604_v8 = vld [vmem:[%s21544_s26 + $0xb0] sm:$0xff]   ;;  %v17610_v9 = vld [vmem:[%s21544_s26 + $0x78] sm:$0xff]  }
  0x97   :  { %1140 = vmatprep.mubr.bf16.mxu1 %v15236_v11  ;;  %13908 = vmatpush3.bf16.msra.mxu0 %v17096_v27  ;;  %v15261_v27 = vld [vmem:[%s21545_s28 + $0x208] ss:$16 sps:$4 sm:$0xff]   ;;  %v15290_v11 = vld [vmem:[%s21545_s28 + $0x2ac] ss:$16 sps:$4 sm:$0xff]  }
  0x98   :  { %13972 = vmatpush3.bf16.msra.mxu1 %v17102_v28  ;;  %13909 = vmatprep.subr.bf16.mxu0 %v17108_v29  ;;  %v15264_v28 = vld [vmem:[%s21545_s28 + $0x224] ss:$16 sps:$4 sm:$0xff]   ;;  %v15266_v29 = vld [vmem:[%s21545_s28 + $0x22c] ss:$16 sps:$4 sm:$0xff]  }
  0x99   :  { %13973 = vmatprep.subr.bf16.mxu1 %v17114_v30  ;;  %v17409_v30 = vld [vmem:[%s21544_s26] sm:$0xff]   ;;  %v17616_v10 = vld [vmem:[%s21544_s26 + $0xf8] sm:$0xff]  }
  0x9b   :  { %13910 = vmatpush3.bf16.msra.mxu0 %v17120_v31  ;;  %v15268_v31 = vld [vmem:[%s21545_s28 + $0x220] ss:$16 sps:$4 sm:$0xff]  }
  0x9c   :  { %13974 = vmatpush3.bf16.msra.mxu1 %v17126_v32  ;;  %14023 = vmatprep.subr.bf16.mxu0 %v16941_v1  ;;  %v15248_v1 = vld [vmem:[%s21545_s28 + $0x1cc] ss:$16 sps:$4 sm:$0xff]   ;;  %v17418_v32 = vld [vmem:[%s21544_s26 + $0x80] sm:$0xff]  }
  0x9d   :  { %1044 = vmatmul.mubr.bf16.gmra.mrb[48].mxu0 %v15238_v12  ;;  %14087 = vmatprep.subr.bf16.mxu1 %v16946_v2  ;;  %v15250_v2 = vld [vmem:[%s21545_s28 + $0x1c0] ss:$16 sps:$4 sm:$0xff]   ;;  %v17625_v12 = vld [vmem:[%s21544_s26 + $0x38] sm:$0xff]  }
  0x9e   :  { %1141 = vmatmul.mubr.bf16.gmra.mrb[48].mxu1 %v15239_v13  ;;  %1051 = vmatprep.mubr.bf16.mxu0 %v15240_v14  ;;  %v17631_v13 = vld [vmem:[%s21544_s26 + $0xb8] sm:$0xff]   ;;  %v17637_v14 = vld [vmem:[%s21544_s26 + $0x40] sm:$0xff]  }
  0x9f   :  { %1148 = vmatprep.mubr.bf16.mxu1 %v15242_v15  ;;  %v17643_v15 = vld [vmem:[%s21544_s26 + $0xc0] sm:$0xff]  }
  0xa5   :  { %1052 = vmatmul.mubr.bf16.gmra.mrb[52].mxu0 %v15244_v16  ;;  %v15292_v16 = vld [vmem:[%s21545_s28 + $0x2a0] ss:$16 sps:$4 sm:$0xff]  }
  0xa6   :  { %1149 = vmatmul.mubr.bf16.gmra.mrb[52].mxu1 %v15245_v17  ;;  %1059 = vmatprep.mubr.bf16.mxu0 %v15246_v18  ;;  %v15293_v17 = vld [vmem:[%s21545_s28 + $0x2a8] ss:$16 sps:$4 sm:$0xff]   ;;  %v15294_v18 = vld [vmem:[%s21545_s28 + $0x2c4] ss:$16 sps:$4 sm:$0xff]  }
  0xa7   :  { %1156 = vmatprep.mubr.bf16.mxu1 %v15248_v1  ;;  %v15296_v1 = vld [vmem:[%s21545_s28 + $0x2cc] ss:$16 sps:$4 sm:$0xff]  }
  0xad   :  { %1060 = vmatmul.mubr.bf16.gmra.mrb[56].mxu0 %v15250_v2  ;;  %v15298_v2 = vld [vmem:[%s21545_s28 + $0x2c0] ss:$16 sps:$4 sm:$0xff]  }
  0xae   :  { %1157 = vmatmul.mubr.bf16.gmra.mrb[56].mxu1 %v15251_v19  ;;  %1067 = vmatprep.mubr.bf16.mxu0 %v15252_v20  ;;  %v15299_v19 = vld [vmem:[%s21545_s28 + $0x2c8] ss:$16 sps:$4 sm:$0xff]   ;;  %v15300_v20 = vld [vmem:[%s21545_s28 + $0x2e4] ss:$16 sps:$4 sm:$0xff]  }
  0xaf   :  { %1164 = vmatprep.mubr.bf16.mxu1 %v15254_v21  ;;  %v15302_v21 = vld [vmem:[%s21545_s28 + $0x2ec] ss:$16 sps:$4 sm:$0xff]  }
  0xb5   :  { %1068 = vmatmul.mubr.bf16.gmra.mrb[60].mxu0 %v15256_v22  ;;  %v15304_v22 = vld [vmem:[%s21545_s28 + $0x2e0] ss:$16 sps:$4 sm:$0xff]  }
  0xb6   :  { %1165 = vmatmul.mubr.bf16.gmra.mrb[60].mxu1 %v15257_v23  ;;  %1470 = vmatprep.mubr.bf16.mxu0 %v15260_v24  ;;  %v15305_v23 = vld [vmem:[%s21545_s28 + $0x2e8] ss:$16 sps:$4 sm:$0xff]   ;;  %v15308_v24 = vld [vmem:[%s21545_s28 + $0x304] ss:$16 sps:$4 sm:$0xff]  }
  0xb7   :  { %1567 = vmatprep.mubr.bf16.mxu1 %v15263_v25  ;;  %v15311_v25 = vld [vmem:[%s21545_s28 + $0x30c] ss:$16 sps:$4 sm:$0xff]  }
  0xbd   :  { %1471 = vmatmul.mubr.bf16.vlgmr.msra.gmra.mrb[64].mxu0 %v15258_v26  ;;  %v15306_v26 = vld [vmem:[%s21545_s28 + $0x300] ss:$16 sps:$4 sm:$0xff]  }
  0xbe   :  { %1568 = vmatmul.mubr.bf16.vlgmr.msra.gmra.mrb[64].mxu1 %v15261_v27  ;;  %1478 = vmatprep.mubr.bf16.mxu0 %v15264_v28  ;;  %v15309_v27 = vld [vmem:[%s21545_s28 + $0x308] ss:$16 sps:$4 sm:$0xff]   ;;  %v15312_v28 = vld [vmem:[%s21545_s28 + $0x324] ss:$16 sps:$4 sm:$0xff]  }
  0xbf   :  { %1575 = vmatprep.mubr.bf16.mxu1 %v15266_v29  ;;  %14024 = vmatpush3.bf16.msra.mxu0 %v17409_v30  ;;  %v15314_v29 = vld [vmem:[%s21545_s28 + $0x32c] ss:$16 sps:$4 sm:$0xff]  }
  0xc0   :  { %14088 = vmatpush3.bf16.msra.mxu1 %v17418_v32  ;;  %14025 = vmatprep.subr.bf16.mxu0 %v17427_v43 }
  0xc1   :  { %14089 = vmatprep.subr.bf16.mxu1 %v17436_v45 }
  0xc3   :  { %14026 = vmatpush3.bf16.msra.mxu0 %v17445_v47 }
  0xc4   :  { %14090 = vmatpush3.bf16.msra.mxu1 %v17451_v48  ;;  %14027 = vmatprep.subr.bf16.mxu0 %v17457_v49 }
  0xc5   :  { %1479 = vmatmul.mubr.bf16.gmra.mrb[68].mxu0 %v15268_v31  ;;  %14091 = vmatprep.subr.bf16.mxu1 %v17463_v50  ;;  %v15316_v31 = vld [vmem:[%s21545_s28 + $0x320] ss:$16 sps:$4 sm:$0xff]  }
  0xc6   :  { %1576 = vmatmul.mubr.bf16.gmra.mrb[68].mxu1 %v15269_v42  ;;  %1486 = vmatprep.mubr.bf16.mxu0 %v15270_v44  ;;  %v15317_v42 = vld [vmem:[%s21545_s28 + $0x328] ss:$16 sps:$4 sm:$0xff]   ;;  %v15318_v44 = vld [vmem:[%s21545_s28 + $0x344] ss:$16 sps:$4 sm:$0xff]  }
  0xc7   :  { %1583 = vmatprep.mubr.bf16.mxu1 %v15272_v46  ;;  %14028 = vmatpush3.bf16.msra.mxu0 %v17472_v52  ;;  %v15326_v46 = vld [vmem:[%s21545_s28 + $0x36c] ss:$16 sps:$4 sm:$0xff]  }
  0xc8   :  { %14092 = vmatpush3.bf16.msra.mxu1 %v17484_v55  ;;  %14029 = vmatprep.subr.bf16.mxu0 %v17490_v56 }
  0xc9   :  { %14093 = vmatprep.subr.bf16.mxu1 %v17496_v57 }
  0xcb   :  { %14030 = vmatpush3.bf16.msra.mxu0 %v17505_v59 }
  0xcc   :  { %14094 = vmatpush3.bf16.msra.mxu1 %v17511_v60  ;;  %14031 = vmatprep.subr.bf16.mxu0 %v17517_v61 }
  0xcd   :  { %1487 = vmatmul.mubr.bf16.gmra.mrb[72].mxu0 %v15274_v51  ;;  %14095 = vmatprep.subr.bf16.mxu1 %v17523_v62 }
  0xce   :  { %1584 = vmatmul.mubr.bf16.gmra.mrb[72].mxu1 %v15275_v53  ;;  %1494 = vmatprep.mubr.bf16.mxu0 %v15276_v54 }
  0xcf   :  { %1591 = vmatprep.mubr.bf16.mxu1 %v15278_v58  ;;  %14032 = vmatpush3.bf16.msra.mxu0 %v17532_v0 }
  0xd0   :  { %14096 = vmatpush3.bf16.msra.mxu1 %v17544_v35  ;;  %14033 = vmatprep.subr.bf16.mxu0 %v17550_v36 }
  0xd1   :  { %14097 = vmatprep.subr.bf16.mxu1 %v17556_v37 }
  0xd3   :  { %14034 = vmatpush3.bf16.msra.mxu0 %v17565_v39 }
  0xd4   :  { %14098 = vmatpush3.bf16.msra.mxu1 %v17571_v40  ;;  %14035 = vmatprep.subr.bf16.mxu0 %v17577_v41 }
  0xd5   :  { %1495 = vmatmul.mubr.bf16.gmra.mrb[76].mxu0 %v15280_v63  ;;  %14099 = vmatprep.subr.bf16.mxu1 %v17583_v3 }
  0xd6   :  { %1592 = vmatmul.mubr.bf16.gmra.mrb[76].mxu1 %v15281_v33  ;;  %1502 = vmatprep.mubr.bf16.mxu0 %v15282_v34  ;;  %v15334_v33 = vld [vmem:[%s21545_s28 + $0x380] ss:$16 sps:$4 sm:$0xff]  }
  0xd7   :  { %1599 = vmatprep.mubr.bf16.mxu1 %v15284_v38  ;;  %14036 = vmatpush3.bf16.msra.mxu0 %v17592_v5 }
  0xd8   :  { %14100 = vmatpush3.bf16.msra.mxu1 %v17604_v8  ;;  %14037 = vmatprep.subr.bf16.mxu0 %v17610_v9 }
  0xd9   :  { %14101 = vmatprep.subr.bf16.mxu1 %v17616_v10 }
  0xdb   :  { %14038 = vmatpush3.bf16.msra.mxu0 %v17625_v12 }
  0xdc   :  { %14102 = vmatpush3.bf16.msra.mxu1 %v17631_v13  ;;  %14151 = vmatprep.subr.bf16.mxu0 %v17637_v14 }
  0xdd   :  { %1503 = vmatmul.mubr.bf16.gmra.mrb[80].mxu0 %v15286_v4  ;;  %14215 = vmatprep.subr.bf16.mxu1 %v17643_v15 }
  0xde   :  { %1600 = vmatmul.mubr.bf16.gmra.mrb[80].mxu1 %v15287_v6  ;;  %1510 = vmatprep.mubr.bf16.mxu0 %v15288_v7  ;;  %v15338_v7 = vld [vmem:[%s21545_s28 + $0x3ac] ss:$16 sps:$4 sm:$0xff]  }
  0xdf   :  { %1607 = vmatprep.mubr.bf16.mxu1 %v15290_v11 }
  0xe5   :  { %1511 = vmatmul.mubr.bf16.gmra.mrb[84].mxu0 %v15292_v16  ;;  %v15340_v16 = vld [vmem:[%s21545_s28 + $0x3a0] ss:$16 sps:$4 sm:$0xff]  }
  0xe6   :  { %1608 = vmatmul.mubr.bf16.gmra.mrb[84].mxu1 %v15293_v17  ;;  %1518 = vmatprep.mubr.bf16.mxu0 %v15294_v18 }
  0xe7   :  { %1615 = vmatprep.mubr.bf16.mxu1 %v15296_v1 }
  0xed   :  { %1519 = vmatmul.mubr.bf16.gmra.mrb[88].mxu0 %v15298_v2 }
  0xee   :  { %1616 = vmatmul.mubr.bf16.gmra.mrb[88].mxu1 %v15299_v19  ;;  %1526 = vmatprep.mubr.bf16.mxu0 %v15300_v20 }
  0xef   :  { %1623 = vmatprep.mubr.bf16.mxu1 %v15302_v21 }
  0xf5   :  { %1527 = vmatmul.mubr.bf16.gmra.mrb[92].mxu0 %v15304_v22 }
  0xf6   :  { %1624 = vmatmul.mubr.bf16.gmra.mrb[92].mxu1 %v15305_v23  ;;  %1929 = vmatprep.mubr.bf16.mxu0 %v15308_v24  ;;  %v15344_v23 = vld [vmem:[%s21545_s28 + $0x3cc] ss:$16 sps:$4 sm:$0xff]  }
  0xf7   :  { %2026 = vmatprep.mubr.bf16.mxu1 %v15311_v25 }
  0xfd   :  { %1930 = vmatmul.mubr.bf16.vlgmr.msra.gmra.mrb[96].mxu0 %v15306_v26 }
  0xfe   :  { %2027 = vmatmul.mubr.bf16.vlgmr.msra.gmra.mrb[96].mxu1 %v15309_v27  ;;  %1937 = vmatprep.mubr.bf16.mxu0 %v15312_v28  ;;  %v15346_v28 = vld [vmem:[%s21545_s28 + $0x3c0] ss:$16 sps:$4 sm:$0xff]  }
  0xff   :  { %2034 = vmatprep.mubr.bf16.mxu1 %v15314_v29  ;;  %14152 = vmatpush3.bf16.msra.mxu0 %v17409_v30  ;;  %v15320_v30 = vld [vmem:[%s21545_s28 + $0x34c] ss:$16 sps:$4 sm:$0xff]  }
 0x100   :  { %14216 = vmatpush3.bf16.msra.mxu1 %v17418_v32  ;;  %14153 = vmatprep.subr.bf16.mxu0 %v17427_v43  ;;  %v15322_v32 = vld [vmem:[%s21545_s28 + $0x340] ss:$16 sps:$4 sm:$0xff]   ;;  %v15323_v43 = vld [vmem:[%s21545_s28 + $0x348] ss:$16 sps:$4 sm:$0xff]  }
 0x101   :  { %14217 = vmatprep.subr.bf16.mxu1 %v17436_v45  ;;  %v15324_v45 = vld [vmem:[%s21545_s28 + $0x364] ss:$16 sps:$4 sm:$0xff]  }
 0x103   :  { %14154 = vmatpush3.bf16.msra.mxu0 %v17445_v47  ;;  %v15328_v47 = vld [vmem:[%s21545_s28 + $0x360] ss:$16 sps:$4 sm:$0xff]  }
 0x104   :  { %14218 = vmatpush3.bf16.msra.mxu1 %v17451_v48  ;;  %14155 = vmatprep.subr.bf16.mxu0 %v17457_v49  ;;  %v15329_v49 = vld [vmem:[%s21545_s28 + $0x368] ss:$16 sps:$4 sm:$0xff]  }
 0x105   :  { %1938 = vmatmul.mubr.bf16.gmra.mrb[100].mxu0 %v15316_v31  ;;  %14219 = vmatprep.subr.bf16.mxu1 %v17463_v50  ;;  %v15330_v50 = vld [vmem:[%s21545_s28 + $0x384] ss:$16 sps:$4 sm:$0xff]   ;;  %v15347_v31 = vld [vmem:[%s21545_s28 + $0x3c8] ss:$16 sps:$4 sm:$0xff]  }
 0x106   :  { %2035 = vmatmul.mubr.bf16.gmra.mrb[100].mxu1 %v15317_v42  ;;  %1945 = vmatprep.mubr.bf16.mxu0 %v15318_v44  ;;  %v15348_v42 = vld [vmem:[%s21545_s28 + $0x3e4] ss:$16 sps:$4 sm:$0xff]  }
 0x107   :  { %2042 = vmatprep.mubr.bf16.mxu1 %v15320_v30  ;;  %14156 = vmatpush3.bf16.msra.mxu0 %v17472_v52 }
 0x108   :  { %14220 = vmatpush3.bf16.msra.mxu1 %v17484_v55  ;;  %14157 = vmatprep.subr.bf16.mxu0 %v17490_v56 }
 0x109   :  { %14221 = vmatprep.subr.bf16.mxu1 %v17496_v57 }
 0x10b   :  { %14158 = vmatpush3.bf16.msra.mxu0 %v17505_v59  ;;  %v15332_v59 = vld [vmem:[%s21545_s28 + $0x38c] ss:$16 sps:$4 sm:$0xff]  }
 0x10c   :  { %14222 = vmatpush3.bf16.msra.mxu1 %v17511_v60  ;;  %14159 = vmatprep.subr.bf16.mxu0 %v17517_v61 }
 0x10d   :  { %1946 = vmatmul.mubr.bf16.gmra.mrb[104].mxu0 %v15322_v32  ;;  %14223 = vmatprep.subr.bf16.mxu1 %v17523_v62 }
 0x10e   :  { %2043 = vmatmul.mubr.bf16.gmra.mrb[104].mxu1 %v15323_v43  ;;  %1953 = vmatprep.mubr.bf16.mxu0 %v15324_v45 }
 0x10f   :  { %2050 = vmatprep.mubr.bf16.mxu1 %v15326_v46  ;;  %14160 = vmatpush3.bf16.msra.mxu0 %v17532_v0 }
 0x110   :  { %v13655_v48 = vpop.f32.mrb[0].mxu0  ;;  %14224 = vmatpush3.bf16.msra.mxu1 %v17544_v35  ;;  %14161 = vmatprep.subr.bf16.mxu0 %v17550_v36  ;;  %v15335_v35 = vld [vmem:[%s21545_s28 + $0x388] ss:$16 sps:$4 sm:$0xff]   ;;  %v15336_v36 = vld [vmem:[%s21545_s28 + $0x3a4] ss:$16 sps:$4 sm:$0xff]  }
 0x111   :  { %v13719_v51 = vpop.f32.mrb[0].mxu1  ;;  %v13656_v52 = vpop.f32.mrb[1].mxu0  ;;  %14225 = vmatprep.subr.bf16.mxu1 %v17556_v37 }
 0x112   :  { %v13720_v53 = vpop.f32.mrb[1].mxu1  ;;  %v13658_v54 = vpop.f32.mrb[2].mxu0  ;;  %v13657_v55 = vadd.f32 %v13656_v52, %v13655_v48 }
 0x113   :  { %v13722_v56 = vpop.f32.mrb[2].mxu1  ;;  %v13659_v57 = vpop.f32.mrb[3].mxu0  ;;  %v13721_v58 = vadd.f32 %v13720_v53, %v13719_v51  ;;  %14162 = vmatpush3.bf16.msra.mxu0 %v17565_v39 }
 0x114   :  { %v13723_v60 = vpop.f32.mrb[3].mxu1  ;;  %v13660_v61 = vadd.f32 %v13659_v57, %v13658_v54  ;;  %14226 = vmatpush3.bf16.msra.mxu1 %v17571_v40  ;;  %14163 = vmatprep.subr.bf16.mxu0 %v17577_v41  ;;  %v15353_v57 = vld [vmem:[%s21545_s28 + $0x3e8] ss:$16 sps:$4 sm:$0xff]  }
 0x115   :  { %1954 = vmatmul.mubr.bf16.gmra.mrb[108].mxu0 %v15328_v47  ;;  %v653_v62 = vadd.f32 %v13721_v58, %v13657_v55  ;;  %v13724_v63 = vadd.f32 %v13723_v60, %v13722_v56  ;;  %14227 = vmatprep.subr.bf16.mxu1 %v17583_v3  ;;  %v15352_v55 = vld [vmem:[%s21545_s28 + $0x3e0] ss:$16 sps:$4 sm:$0xff]   ;;  %v15356_v58 = vld [vmem:[%s21545_s28 + $0x404] ss:$16 sps:$4 sm:$0xff]  }
 0x116   :  { %2051 = vmatmul.mubr.bf16.gmra.mrb[108].mxu1 %v15329_v49  ;;  %1961 = vmatprep.mubr.bf16.mxu0 %v15330_v50  ;;  %v15350_v49 = vld [vmem:[%s21545_s28 + $0x3ec] ss:$16 sps:$4 sm:$0xff]  }
 0x117   :  { %715 = vadd.xlane.f32.xlu0 %v653_v62  ;;  %v656_v0 = vadd.f32 %v13724_v63, %v13660_v61  ;;  %2058 = vmatprep.mubr.bf16.mxu1 %v15332_v59 }
 0x118   :  { %v13661_v34 = vpop.f32.mrb[4].mxu0  ;;  %14164 = vmatpush3.bf16.msra.mxu0 %v17592_v5  ;;  %14228 = vmatpush3.bf16.msra.mxu1 %v17604_v8 }
 0x119   :  { %v13725_v37 = vpop.f32.mrb[4].mxu1  ;;  %v13662_v38 = vpop.f32.mrb[5].mxu0  ;;  %14165 = vmatprep.subr.bf16.mxu0 %v17610_v9  ;;  %14229 = vmatprep.subr.bf16.mxu1 %v17616_v10 }
 0x11a   :  { %v13726_v39 = vpop.f32.mrb[5].mxu1  ;;  %v13664_v40 = vpop.f32.mrb[6].mxu0  ;;  %v13663_v41 = vadd.f32 %v13662_v38, %v13661_v34 }
 0x11b   :  { %v13728_v3 = vpop.f32.mrb[6].mxu1  ;;  %717 = vadd.xlane.f32.xlu0 %v656_v0  ;;  %v13665_v4 = vpop.f32.mrb[7].mxu0  ;;  %v13727_v6 = vadd.f32 %v13726_v39, %v13725_v37 }
 0x11c   :  { %v13729_v5 = vpop.f32.mrb[7].mxu1  ;;  %v13666_v11 = vadd.f32 %v13665_v4, %v13664_v40  ;;  %14166 = vmatpush3.bf16.msra.mxu0 %v17625_v12  ;;  %14230 = vmatpush3.bf16.msra.mxu1 %v17631_v13  ;;  %v15341_v12 = vld [vmem:[%s21545_s28 + $0x3a8] ss:$16 sps:$4 sm:$0xff]   ;;  %v15342_v13 = vld [vmem:[%s21545_s28 + $0x3c4] ss:$16 sps:$4 sm:$0xff]  }
 0x11d   :  { %1962 = vmatmul.mubr.bf16.gmra.mrb[112].mxu0 %v15334_v33  ;;  %v661_v8 = vadd.f32 %v13727_v6, %v13663_v41  ;;  %v13730_v9 = vadd.f32 %v13729_v5, %v13728_v3  ;;  %14279 = vmatprep.subr.bf16.mxu0 %v17637_v14  ;;  %v15354_v41 = vld [vmem:[%s21545_s28 + $0x400] ss:$16 sps:$4 sm:$0xff]   ;;  %v15357_v4 = vld [vmem:[%s21545_s28 + $0x408] ss:$16 sps:$4 sm:$0xff]   ;;  %v15360_v6 = vld [vmem:[%s21545_s28 + $0x424] ss:$16 sps:$4 sm:$0xff]  }
 0x11e   :  { %2059 = vmatmul.mubr.bf16.gmra.mrb[112].mxu1 %v15335_v35  ;;  %1969 = vmatprep.mubr.bf16.mxu0 %v15336_v36  ;;  %v15359_v35 = vld [vmem:[%s21545_s28 + $0x40c] ss:$16 sps:$4 sm:$0xff]  }
 0x11f   :  { %719 = vadd.xlane.f32.xlu0 %v661_v8  ;;  %v664_v10 = vadd.f32 %v13730_v9, %v13666_v11  ;;  %2066 = vmatprep.mubr.bf16.mxu1 %v15338_v7 }
 0x120   :  { %v13667_v17 = vpop.f32.mrb[8].mxu0  ;;  %14343 = vmatprep.subr.bf16.mxu1 %v17643_v15 }
 0x121   :  { %v13731_v14 = vpop.f32.mrb[8].mxu1  ;;  %721 = vadd.xlane.f32.xlu1 %v664_v10  ;;  %v13668_v18 = vpop.f32.mrb[9].mxu0 }
 0x122   :  { %v13732_v1 = vpop.f32.mrb[9].mxu1  ;;  %v13670_v2 = vpop.f32.mrb[10].mxu0  ;;  %v13669_v19 = vadd.f32 %v13668_v18, %v13667_v17 }
 0x123   :  { %v13734_v20 = vpop.f32.mrb[10].mxu1  ;;  %v13671_v21 = vpop.f32.mrb[11].mxu0  ;;  %v13733_v22 = vadd.f32 %v13732_v1, %v13731_v14 }
 0x124   :  { %v13735_v24 = vpop.f32.mrb[11].mxu1  ;;  %v13672_v25 = vadd.f32 %v13671_v21, %v13670_v2  ;;  %v17828_v21 = vld [vmem:[%s21544_s26] sm:$0xff]  }
 0x125   :  { %1970 = vmatmul.mubr.bf16.gmra.mrb[116].mxu0 %v15340_v16  ;;  %v669_v26 = vadd.f32 %v13733_v22, %v13669_v19  ;;  %v13736_v27 = vadd.f32 %v13735_v24, %v13734_v20  ;;  %v15364_v19 = vld [vmem:[%s21545_s28 + $0x420] ss:$16 sps:$4 sm:$0xff]   ;;  %v15366_v24 = vld [vmem:[%s21545_s28 + $0x444] ss:$16 sps:$4 sm:$0xff]  }
 0x126   :  { %2067 = vmatmul.mubr.bf16.gmra.mrb[116].mxu1 %v15341_v12  ;;  %1977 = vmatprep.mubr.bf16.mxu0 %v15342_v13  ;;  %v15362_v12 = vld [vmem:[%s21545_s28 + $0x42c] ss:$16 sps:$4 sm:$0xff]   ;;  %v17834_v22 = vld [vmem:[%s21544_s26 + $0x80] sm:$0xff]  }
 0x127   :  { %723 = vadd.xlane.f32.xlu0 %v669_v26  ;;  %v672_v15 = vadd.f32 %v13736_v27, %v13672_v25  ;;  %2074 = vmatprep.mubr.bf16.mxu1 %v15344_v23  ;;  %v15365_v23 = vld [vmem:[%s21545_s28 + $0x428] ss:$16 sps:$4 sm:$0xff]  }
 0x128   :  { %v13673_v29 = vpop.f32.mrb[12].mxu0  ;;  %v17846_v27 = vld [vmem:[%s21544_s26 + $0x48] sm:$0xff]  }
 0x129   :  { %v13737_v44 = vpop.f32.mrb[12].mxu1  ;;  %725 = vadd.xlane.f32.xlu1 %v672_v15  ;;  %v13674_v30 = vpop.f32.mrb[13].mxu0 }
 0x12a   :  { %v13738_v32 = vpop.f32.mrb[13].mxu1  ;;  %v13676_v43 = vpop.f32.mrb[14].mxu0  ;;  %v13675_v45 = vadd.f32 %v13674_v30, %v13673_v29 }
 0x12b   :  { %v13740_v46 = vpop.f32.mrb[14].mxu1  ;;  %v13677_v47 = vpop.f32.mrb[15].mxu0  ;;  %v13739_v48 = vadd.f32 %v13738_v32, %v13737_v44  ;;  %v15368_v32 = vld [vmem:[%s21545_s28 + $0x44c] ss:$16 sps:$4 sm:$0xff]  }
 0x12c   :  { %v13741_v50 = vpop.f32.mrb[15].mxu1  ;;  %v13678_v51 = vadd.f32 %v13677_v47, %v13676_v43  ;;  %v17867_v47 = vld [vmem:[%s21544_s26 + $0x88] sm:$0xff]  }
 0x12d   :  { %1978 = vmatmul.mubr.bf16.gmra.mrb[120].mxu0 %v15346_v28  ;;  %v677_v52 = vadd.f32 %v13739_v48, %v13675_v45  ;;  %v13742_v53 = vadd.f32 %v13741_v50, %v13740_v46  ;;  %v17861_v46 = vld [vmem:[%s21544_s26 + $0x8] sm:$0xff]   ;;  %v17873_v50 = vld [vmem:[%s21544_s26 + $0x50] sm:$0xff]  }
 0x12e   :  { %2075 = vmatmul.mubr.bf16.gmra.mrb[120].mxu1 %v15347_v31  ;;  %1985 = vmatprep.mubr.bf16.mxu0 %v15348_v42  ;;  %v17852_v31 = vld [vmem:[%s21544_s26 + $0xc8] sm:$0xff]  }
 0x12f   :  { %727 = vadd.xlane.f32.xlu0 %v677_v52  ;;  %v680_v54 = vadd.f32 %v13742_v53, %v13678_v51  ;;  %2082 = vmatprep.mubr.bf16.mxu1 %v15350_v49  ;;  %v15370_v52 = vld [vmem:[%s21545_s28 + $0x440] ss:$16 sps:$4 sm:$0xff]  }
 0x130   :  { %v13679_v56 = vpop.f32.mrb[16].mxu0 }
 0x131   :  { %v13743_v59 = vpop.f32.mrb[16].mxu1  ;;  %729 = vadd.xlane.f32.xlu1 %v680_v54  ;;  %v13680_v60 = vpop.f32.mrb[17].mxu0  ;;  %v15371_v54 = vld [vmem:[%s21545_s28 + $0x448] ss:$16 sps:$4 sm:$0xff]  }
 0x132   :  { %v13744_v61 = vpop.f32.mrb[17].mxu1  ;;  %v13682_v62 = vpop.f32.mrb[18].mxu0  ;;  %v13681_v63 = vadd.f32 %v13680_v60, %v13679_v56  ;;  %v15372_v56 = vld [vmem:[%s21545_s28 + $0x464] ss:$16 sps:$4 sm:$0xff]  }
 0x133   :  { %v13746_v0 = vpop.f32.mrb[18].mxu1  ;;  %v13683_v33 = vpop.f32.mrb[19].mxu0  ;;  %v13745_v34 = vadd.f32 %v13744_v61, %v13743_v59  ;;  %v17900_v60 = vld [vmem:[%s21544_s26 + $0x90] sm:$0xff]  }
 0x134   :  { %v13747_v36 = vpop.f32.mrb[19].mxu1  ;;  %v13684_v37 = vadd.f32 %v13683_v33, %v13682_v62  ;;  %v17912_v33 = vld [vmem:[%s21544_s26 + $0xd8] sm:$0xff]  }
 0x135   :  { %1986 = vmatmul.mubr.bf16.gmra.mrb[124].mxu0 %v15352_v55  ;;  %v685_v38 = vadd.f32 %v13745_v34, %v13681_v63  ;;  %v13748_v39 = vadd.f32 %v13747_v36, %v13746_v0  ;;  %v17885_v55 = vld [vmem:[%s21544_s26 + $0xd0] sm:$0xff]   ;;  %v17906_v0 = vld [vmem:[%s21544_s26 + $0x58] sm:$0xff]  }
 0x136   :  { %2083 = vmatmul.mubr.bf16.gmra.mrb[124].mxu1 %v15353_v57  ;;  %2388 = vmatprep.mubr.bf16.mxu0 %v15356_v58  ;;  %v17894_v57 = vld [vmem:[%s21544_s26 + $0x10] sm:$0xff]  }
 0x137   :  { %731 = vadd.xlane.f32.xlu0 %v685_v38  ;;  %v688_v40 = vadd.f32 %v13748_v39, %v13684_v37  ;;  %2485 = vmatprep.mubr.bf16.mxu1 %v15359_v35  ;;  %v15374_v37 = vld [vmem:[%s21545_s28 + $0x46c] ss:$16 sps:$4 sm:$0xff]  }
 0x138   :  { %v13685_v3 = vpop.f32.mrb[20].mxu0 }
 0x139   :  { %v13749_v7 = vpop.f32.mrb[20].mxu1  ;;  %733 = vadd.xlane.f32.xlu1 %v688_v40  ;;  %v13686_v5 = vpop.f32.mrb[21].mxu0  ;;  %v17921_v40 = vld [vmem:[%s21544_s26 + $0x18] sm:$0xff]  }
 0x13a   :  { %v13750_v11 = vpop.f32.mrb[21].mxu1  ;;  %v13688_v8 = vpop.f32.mrb[22].mxu0  ;;  %v13687_v9 = vadd.f32 %v13686_v5, %v13685_v3 }
 0x13b   :  { %v13752_v10 = vpop.f32.mrb[22].mxu1  ;;  %v13689_v16 = vpop.f32.mrb[23].mxu0  ;;  %v13751_v17 = vadd.f32 %v13750_v11, %v13749_v7  ;;  %v15376_v7 = vld [vmem:[%s21545_s28 + $0x460] ss:$16 sps:$4 sm:$0xff]   ;;  %v15377_v11 = vld [vmem:[%s21545_s28 + $0x468] ss:$16 sps:$4 sm:$0xff]  }
 0x13c   :  { %v13753_v13 = vpop.f32.mrb[23].mxu1  ;;  %v13690_v14 = vadd.f32 %v13689_v16, %v13688_v8  ;;  %v15378_v8 = vld [vmem:[%s21545_s28 + $0x484] ss:$16 sps:$4 sm:$0xff]  }
 0x13d   :  { %2389 = vmatmul.mubr.bf16.vlgmr.msra.gmra.mrb[128].mxu0 %v15354_v41  ;;  %v693_v18 = vadd.f32 %v13751_v17, %v13687_v9  ;;  %v13754_v1 = vadd.f32 %v13753_v13, %v13752_v10  ;;  %v17942_v9 = vld [vmem:[%s21544_s26 + $0x60] sm:$0xff]  }
 0x13e   :  { %2486 = vmatmul.mubr.bf16.vlgmr.msra.gmra.mrb[128].mxu1 %v15357_v4  ;;  %2396 = vmatprep.mubr.bf16.mxu0 %v15360_v6  ;;  %v17927_v4 = vld [vmem:[%s21544_s26 + $0x98] sm:$0xff]   ;;  %v17948_v10 = vld [vmem:[%s21544_s26 + $0xe0] sm:$0xff]  }
 0x13f   :  { %735 = vadd.xlane.f32.xlu0 %v693_v18  ;;  %v696_v2 = vadd.f32 %v13754_v1, %v13690_v14  ;;  %2493 = vmatprep.mubr.bf16.mxu1 %v15362_v12  ;;  %v17954_v12 = vld [vmem:[%s21544_s26 + $0x20] sm:$0xff]  }
 0x140   :  { %v13691_v20 = vpop.f32.mrb[24].mxu0  ;;  %14280 = vmatpush3.bf16.msra.mxu0 %v17828_v21  ;;  %14344 = vmatpush3.bf16.msra.mxu1 %v17834_v22  ;;  %v17960_v1 = vld [vmem:[%s21544_s26 + $0xa0] sm:$0xff]  }
 0x141   :  { %v13755_v25 = vpop.f32.mrb[24].mxu1  ;;  %737 = vadd.xlane.f32.xlu1 %v696_v2  ;;  %v13692_v26 = vpop.f32.mrb[25].mxu0  ;;  %14281 = vmatprep.subr.bf16.mxu0 %v17846_v27  ;;  %v17966_v2 = vld [vmem:[%s21544_s26 + $0x68] sm:$0xff]  }
 0x142   :  { %v13756_v15 = vpop.f32.mrb[25].mxu1  ;;  %v13694_v28 = vpop.f32.mrb[26].mxu0  ;;  %v13693_v29 = vadd.f32 %v13692_v26, %v13691_v20  ;;  %14345 = vmatprep.subr.bf16.mxu1 %v17852_v31 }
 0x143   :  { %v13758_v42 = vpop.f32.mrb[26].mxu1  ;;  %v13695_v44 = vpop.f32.mrb[27].mxu0  ;;  %v13757_v30 = vadd.f32 %v13756_v15, %v13755_v25  ;;  %v17975_v25 = vld [vmem:[%s21544_s26 + $0xe8] sm:$0xff]  }
 0x144   :  { %v13759_v43 = vpop.f32.mrb[27].mxu1  ;;  %v13696_v45 = vadd.f32 %v13695_v44, %v13694_v28  ;;  %14282 = vmatpush3.bf16.msra.mxu0 %v17861_v46  ;;  %14346 = vmatpush3.bf16.msra.mxu1 %v17867_v47  ;;  %v15382_v44 = vld [vmem:[%s21545_s28 + $0x480] ss:$16 sps:$4 sm:$0xff]  }
 0x145   :  { %2397 = vmatmul.mubr.bf16.gmra.mrb[132].mxu0 %v15364_v19  ;;  %v701_v48 = vadd.f32 %v13757_v30, %v13693_v29  ;;  %v13760_v49 = vadd.f32 %v13759_v43, %v13758_v42  ;;  %14283 = vmatprep.subr.bf16.mxu0 %v17873_v50  ;;  %v15384_v43 = vld [vmem:[%s21545_s28 + $0x4a4] ss:$16 sps:$4 sm:$0xff]  }
 0x146   :  { %2494 = vmatmul.mubr.bf16.gmra.mrb[132].mxu1 %v15365_v23  ;;  %2404 = vmatprep.mubr.bf16.mxu0 %v15366_v24  ;;  %v15380_v24 = vld [vmem:[%s21545_s28 + $0x48c] ss:$16 sps:$4 sm:$0xff]  }
 0x147   :  { %739 = vadd.xlane.f32.xlu0 %v701_v48  ;;  %v704_v51 = vadd.f32 %v13760_v49, %v13696_v45  ;;  %2501 = vmatprep.mubr.bf16.mxu1 %v15368_v32  ;;  %v15383_v32 = vld [vmem:[%s21545_s28 + $0x488] ss:$16 sps:$4 sm:$0xff]  }
 0x148   :  { %v13697_v53 = vpop.f32.mrb[28].mxu0  ;;  %14347 = vmatprep.subr.bf16.mxu1 %v17885_v55  ;;  %14284 = vmatpush3.bf16.msra.mxu0 %v17894_v57  ;;  %v17990_v45 = vld [vmem:[%s21544_s26 + $0x28] sm:$0xff]  }
 0x149   :  { %v13761_v58 = vpop.f32.mrb[28].mxu1  ;;  %741 = vadd.xlane.f32.xlu1 %v704_v51  ;;  %v13698_v59 = vpop.f32.mrb[29].mxu0  ;;  %14348 = vmatpush3.bf16.msra.mxu1 %v17900_v60  ;;  %v17996_v48 = vld [vmem:[%s21544_s26 + $0xa8] sm:$0xff]  }
 0x14a   :  { %v13762_v61 = vpop.f32.mrb[29].mxu1  ;;  %v13700_v62 = vpop.f32.mrb[30].mxu0  ;;  %v13699_v63 = vadd.f32 %v13698_v59, %v13697_v53  ;;  %14285 = vmatprep.subr.bf16.mxu0 %v17906_v0  ;;  %14349 = vmatprep.subr.bf16.mxu1 %v17912_v33  ;;  %v18008_v53 = vld [vmem:[%s21544_s26 + $0xf0] sm:$0xff]  }
 0x14b   :  { %v13764_v34 = vpop.f32.mrb[30].mxu1  ;;  %v13701_v35 = vpop.f32.mrb[31].mxu0  ;;  %v13763_v36 = vadd.f32 %v13762_v61, %v13761_v58 }
 0x14c   :  { %v13765_v38 = vpop.f32.mrb[31].mxu1  ;;  %v13702_v39 = vadd.f32 %v13701_v35, %v13700_v62  ;;  %14286 = vmatpush3.bf16.msra.mxu0 %v17921_v40 }
 0x14d   :  { %2405 = vmatmul.mubr.bf16.gmra.mrb[136].mxu0 %v15370_v52  ;;  %v709_v41 = vadd.f32 %v13763_v36, %v13699_v63  ;;  %v13766_v3 = vadd.f32 %v13765_v38, %v13764_v34  ;;  %14350 = vmatpush3.bf16.msra.mxu1 %v17927_v4  ;;  %v18002_v52 = vld [vmem:[%s21544_s26 + $0x70] sm:$0xff]   ;;  %v15386_v63 = vld [vmem:[%s21545_s28 + $0x4ac] ss:$16 sps:$4 sm:$0xff]  }
 0x14e   :  { %2502 = vmatmul.mubr.bf16.gmra.mrb[136].mxu1 %v15371_v54  ;;  %2412 = vmatprep.mubr.bf16.mxu0 %v15372_v56  ;;  %v18017_v36 = vld [vmem:[%s21544_s26 + $0x30] sm:$0xff]  }
 0x14f   :  { %743 = vadd.xlane.f32.xlu0 %v709_v41  ;;  %v712_v6 = vadd.f32 %v13766_v3, %v13702_v39  ;;  %2509 = vmatprep.mubr.bf16.mxu1 %v15374_v37  ;;  %v18023_v37 = vld [vmem:[%s21544_s26 + $0xb0] sm:$0xff]   ;;  %v18029_v41 = vld [vmem:[%s21544_s26 + $0x78] sm:$0xff]  }
 0x150   :  { %v13783_v5 = vpop.f32.mrb[32].mxu0  ;;  %14287 = vmatprep.subr.bf16.mxu0 %v17942_v9  ;;  %14351 = vmatprep.subr.bf16.mxu1 %v17948_v10 }
 0x151   :  { %v13847_v16 = vpop.f32.mrb[32].mxu1  ;;  %745 = vadd.xlane.f32.xlu1 %v712_v6  ;;  %v13784_v17 = vpop.f32.mrb[33].mxu0  ;;  %14288 = vmatpush3.bf16.msra.mxu0 %v17954_v12  ;;  %v15388_v6 = vld [vmem:[%s21545_s28 + $0x4a0] ss:$16 sps:$4 sm:$0xff]  }
 0x152   :  { %v13848_v13 = vpop.f32.mrb[33].mxu1  ;;  %v13786_v14 = vpop.f32.mrb[34].mxu0  ;;  %v13785_v18 = vadd.f32 %v13784_v17, %v13783_v5  ;;  %14352 = vmatpush3.bf16.msra.mxu1 %v17960_v1  ;;  %14289 = vmatprep.subr.bf16.mxu0 %v17966_v2  ;;  %v15389_v5 = vld [vmem:[%s21545_s28 + $0x4a8] ss:$16 sps:$4 sm:$0xff]  }
 0x153   :  { %v13850_v19 = vpop.f32.mrb[34].mxu1  ;;  %v13787_v20 = vpop.f32.mrb[35].mxu0  ;;  %v13849_v23 = vadd.f32 %v13848_v13, %v13847_v16  ;;  %14353 = vmatprep.subr.bf16.mxu1 %v17975_v25  ;;  %v18050_v16 = vld [vmem:[%s21544_s26 + $0x38] sm:$0xff]  }
 0x154   :  { %v13851_v26 = vpop.f32.mrb[35].mxu1  ;;  %v13788_v15 = vadd.f32 %v13787_v20, %v13786_v14  ;;  %v18056_v14 = vld [vmem:[%s21544_s26 + $0xb8] sm:$0xff]  }
 0x155   :  { %2413 = vmatmul.mubr.bf16.gmra.mrb[140].mxu0 %v15376_v7  ;;  %v1111_v28 = vadd.f32 %v13849_v23, %v13785_v18  ;;  %v13852_v29 = vadd.f32 %v13851_v26, %v13850_v19  ;;  %v18062_v23 = vld [vmem:[%s21544_s26 + $0x40] sm:$0xff]  }
 0x156   :  { %2510 = vmatmul.mubr.bf16.gmra.mrb[140].mxu1 %v15377_v11  ;;  %2420 = vmatprep.mubr.bf16.mxu0 %v15378_v8  ;;  %v15390_v11 = vld [vmem:[%s21545_s28 + $0x4c4] ss:$16 sps:$4 sm:$0xff]   ;;  %v18044_v8 = vld [vmem:[%s21544_s26 + $0xf8] sm:$0xff]  }
 0x157   :  { %1173 = vadd.xlane.f32.xlu1 %v1111_v28  ;;  %v1114_v42 = vadd.f32 %v13852_v29, %v13788_v15  ;;  %2517 = vmatprep.mubr.bf16.mxu1 %v15380_v24  ;;  %v18068_v24 = vld [vmem:[%s21544_s26 + $0xc0] sm:$0xff]   ;;  %v15392_v29 = vld [vmem:[%s21545_s28 + $0x4cc] ss:$16 sps:$4 sm:$0xff]  }
 0x158   :  { %v13789_v30 = vpop.f32.mrb[36].mxu0  ;;  %14290 = vmatpush3.bf16.msra.mxu0 %v17990_v45  ;;  %14354 = vmatpush3.bf16.msra.mxu1 %v17996_v48 }
 0x159   :  { %v13853_v49 = vpop.f32.mrb[36].mxu1  ;;  %v13790_v51 = vpop.f32.mrb[37].mxu0  ;;  %14291 = vmatprep.subr.bf16.mxu0 %v18002_v52  ;;  %14355 = vmatprep.subr.bf16.mxu1 %v18008_v53 }
 0x15a   :  { %v13854_v54 = vpop.f32.mrb[37].mxu1  ;;  %v13792_v56 = vpop.f32.mrb[38].mxu0  ;;  %v13791_v58 = vadd.f32 %v13790_v51, %v13789_v30 }
 0x15b   :  { %v13856_v59 = vpop.f32.mrb[38].mxu1  ;;  %1175 = vadd.xlane.f32.xlu1 %v1114_v42  ;;  %v13793_v61 = vpop.f32.mrb[39].mxu0  ;;  %v13855_v62 = vadd.f32 %v13854_v54, %v13853_v49  ;;  %v15394_v49 = vld [vmem:[%s21545_s28 + $0x4c0] ss:$16 sps:$4 sm:$0xff]   ;;  %v15395_v54 = vld [vmem:[%s21545_s28 + $0x4c8] ss:$16 sps:$4 sm:$0xff]  }
 0x15c   :  { %v13857_v34 = vpop.f32.mrb[39].mxu1  ;;  %v13794_v35 = vadd.f32 %v13793_v61, %v13792_v56  ;;  %14292 = vmatpush3.bf16.msra.mxu0 %v18017_v36  ;;  %14356 = vmatpush3.bf16.msra.mxu1 %v18023_v37  ;;  %v15396_v56 = vld [vmem:[%s21545_s28 + $0x4e4] ss:$16 sps:$4 sm:$0xff]  }
 0x15d   :  { %2421 = vmatmul.mubr.bf16.gmra.mrb[144].mxu0 %v15382_v44  ;;  %v1119_v38 = vadd.f32 %v13855_v62, %v13791_v58  ;;  %v13858_v39 = vadd.f32 %v13857_v34, %v13856_v59  ;;  %14293 = vmatprep.subr.bf16.mxu0 %v18029_v41 }
 0x15e   :  { %2518 = vmatmul.mubr.bf16.gmra.mrb[144].mxu1 %v15383_v32  ;;  %2428 = vmatprep.mubr.bf16.mxu0 %v15384_v43 }
 0x15f   :  { %1177 = vadd.xlane.f32.xlu0 %v1119_v38  ;;  %v1122_v3 = vadd.f32 %v13858_v39, %v13794_v35  ;;  %2525 = vmatprep.mubr.bf16.mxu1 %v15386_v63  ;;  %v15398_v39 = vld [vmem:[%s21545_s28 + $0x4ec] ss:$16 sps:$4 sm:$0xff]  }
 0x160   :  { %v13795_v7 = vpop.f32.mrb[40].mxu0  ;;  %14357 = vmatprep.subr.bf16.mxu1 %v18044_v8  ;;  %14294 = vmatpush3.bf16.msra.mxu0 %v18050_v16 }
 0x161   :  { %v13859_v17 = vpop.f32.mrb[40].mxu1  ;;  %1179 = vadd.xlane.f32.xlu1 %v1122_v3  ;;  %v13796_v13 = vpop.f32.mrb[41].mxu0  ;;  %14358 = vmatpush3.bf16.msra.mxu1 %v18056_v14 }
 0x162   :  { %v13860_v18 = vpop.f32.mrb[41].mxu1  ;;  %v13798_v19 = vpop.f32.mrb[42].mxu0  ;;  %v13797_v20 = vadd.f32 %v13796_v13, %v13795_v7  ;;  %14407 = vmatprep.subr.bf16.mxu0 %v18062_v23  ;;  %14471 = vmatprep.subr.bf16.mxu1 %v18068_v24 }
 0x163   :  { %v13862_v26 = vpop.f32.mrb[42].mxu1  ;;  %v13799_v15 = vpop.f32.mrb[43].mxu0  ;;  %v13861_v28 = vadd.f32 %v13860_v18, %v13859_v17  ;;  %v15400_v17 = vld [vmem:[%s21545_s28 + $0x4e0] ss:$16 sps:$4 sm:$0xff]   ;;  %v15401_v18 = vld [vmem:[%s21545_s28 + $0x4e8] ss:$16 sps:$4 sm:$0xff]  }
 0x164   :  { %v13863_v42 = vpop.f32.mrb[43].mxu1  ;;  %v13800_v44 = vadd.f32 %v13799_v15, %v13798_v19  ;;  %v15404_v19 = vld [vmem:[%s21545_s28 + $0x504] ss:$16 sps:$4 sm:$0xff]  }
 0x165   :  { %2429 = vmatmul.mubr.bf16.gmra.mrb[148].mxu0 %v15388_v6  ;;  %v1127_v30 = vadd.f32 %v13861_v28, %v13797_v20  ;;  %v13864_v32 = vadd.f32 %v13863_v42, %v13862_v26 }
 0x166   :  { %2526 = vmatmul.mubr.bf16.gmra.mrb[148].mxu1 %v15389_v5  ;;  %2436 = vmatprep.mubr.bf16.mxu0 %v15390_v11 }
 0x167   :  { %1181 = vadd.xlane.f32.xlu0 %v1127_v30  ;;  %v1130_v43 = vadd.f32 %v13864_v32, %v13800_v44  ;;  %2533 = vmatprep.mubr.bf16.mxu1 %v15392_v29  ;;  %v15407_v32 = vld [vmem:[%s21545_s28 + $0x50c] ss:$16 sps:$4 sm:$0xff]  }
 0x168   :  { %v13801_v51 = vpop.f32.mrb[44].mxu0 }
 0x169   :  { %v13865_v58 = vpop.f32.mrb[44].mxu1  ;;  %1183 = vadd.xlane.f32.xlu1 %v1130_v43  ;;  %v13802_v59 = vpop.f32.mrb[45].mxu0 }
 0x16a   :  { %v13866_v61 = vpop.f32.mrb[45].mxu1  ;;  %v13804_v62 = vpop.f32.mrb[46].mxu0  ;;  %v13803_v63 = vadd.f32 %v13802_v59, %v13801_v51 }
 0x16b   :  { %v13868_v34 = vpop.f32.mrb[46].mxu1  ;;  %v13805_v35 = vpop.f32.mrb[47].mxu0  ;;  %v13867_v38 = vadd.f32 %v13866_v61, %v13865_v58  ;;  %v15402_v58 = vld [vmem:[%s21545_s28 + $0x500] ss:$16 sps:$4 sm:$0xff]   ;;  %v15405_v61 = vld [vmem:[%s21545_s28 + $0x508] ss:$16 sps:$4 sm:$0xff]  }
 0x16c   :  { %v13869_v3 = vpop.f32.mrb[47].mxu1  ;;  %v13806_v6 = vadd.f32 %v13805_v35, %v13804_v62  ;;  %v15408_v62 = vld [vmem:[%s21545_s28 + $0x524] ss:$16 sps:$4 sm:$0xff]  }
 0x16d   :  { %2437 = vmatmul.mubr.bf16.gmra.mrb[152].mxu0 %v15394_v49  ;;  %v1135_v7 = vadd.f32 %v13867_v38, %v13803_v63  ;;  %v13870_v5 = vadd.f32 %v13869_v3, %v13868_v34 }
 0x16e   :  { %2534 = vmatmul.mubr.bf16.gmra.mrb[152].mxu1 %v15395_v54  ;;  %2444 = vmatprep.mubr.bf16.mxu0 %v15396_v56 }
 0x16f   :  { %1185 = vadd.xlane.f32.xlu0 %v1135_v7  ;;  %v1138_v11 = vadd.f32 %v13870_v5, %v13806_v6  ;;  %2541 = vmatprep.mubr.bf16.mxu1 %v15398_v39  ;;  %v15410_v5 = vld [vmem:[%s21545_s28 + $0x52c] ss:$16 sps:$4 sm:$0xff]  }
 0x170   :  { %v13807_v13 = vpop.f32.mrb[48].mxu0 }
 0x171   :  { %v13871_v20 = vpop.f32.mrb[48].mxu1  ;;  %1187 = vadd.xlane.f32.xlu1 %v1138_v11  ;;  %v13808_v26 = vpop.f32.mrb[49].mxu0 }
 0x172   :  { %v13872_v15 = vpop.f32.mrb[49].mxu1  ;;  %v13810_v28 = vpop.f32.mrb[50].mxu0  ;;  %v13809_v29 = vadd.f32 %v13808_v26, %v13807_v13 }
 0x173   :  { %v13874_v42 = vpop.f32.mrb[50].mxu1  ;;  %v13811_v44 = vpop.f32.mrb[51].mxu0  ;;  %v13873_v30 = vadd.f32 %v13872_v15, %v13871_v20  ;;  %v15412_v20 = vld [vmem:[%s21545_s28 + $0x520] ss:$16 sps:$4 sm:$0xff]   ;;  %v15413_v15 = vld [vmem:[%s21545_s28 + $0x528] ss:$16 sps:$4 sm:$0xff]  }
 0x174   :  { %v13875_v43 = vpop.f32.mrb[51].mxu1  ;;  %v13812_v49 = vadd.f32 %v13811_v44, %v13810_v28  ;;  %v15414_v28 = vld [vmem:[%s21545_s28 + $0x544] ss:$16 sps:$4 sm:$0xff]  }
 0x175   :  { %2445 = vmatmul.mubr.bf16.gmra.mrb[156].mxu0 %v15400_v17  ;;  %v1143_v51 = vadd.f32 %v13873_v30, %v13809_v29  ;;  %v13876_v54 = vadd.f32 %v13875_v43, %v13874_v42 }
 0x176   :  { %2542 = vmatmul.mubr.bf16.gmra.mrb[156].mxu1 %v15401_v18  ;;  %2847 = vmatprep.mubr.bf16.mxu0 %v15404_v19 }
 0x177   :  { %1189 = vadd.xlane.f32.xlu0 %v1143_v51  ;;  %v1146_v56 = vadd.f32 %v13876_v54, %v13812_v49  ;;  %2944 = vmatprep.mubr.bf16.mxu1 %v15407_v32  ;;  %v15416_v49 = vld [vmem:[%s21545_s28 + $0x54c] ss:$16 sps:$4 sm:$0xff]  }
 0x178   :  { %v13813_v59 = vpop.f32.mrb[52].mxu0 }
 0x179   :  { %v13877_v63 = vpop.f32.mrb[52].mxu1  ;;  %1191 = vadd.xlane.f32.xlu1 %v1146_v56  ;;  %v13814_v34 = vpop.f32.mrb[53].mxu0 }
 0x17a   :  { %v13878_v35 = vpop.f32.mrb[53].mxu1  ;;  %v13816_v38 = vpop.f32.mrb[54].mxu0  ;;  %v13815_v39 = vadd.f32 %v13814_v34, %v13813_v59 }
 0x17b   :  { %v13880_v3 = vpop.f32.mrb[54].mxu1  ;;  %v13817_v6 = vpop.f32.mrb[55].mxu0  ;;  %v13879_v7 = vadd.f32 %v13878_v35, %v13877_v63 }
 0x17c   :  { %v13881_v11 = vpop.f32.mrb[55].mxu1  ;;  %v13818_v17 = vadd.f32 %v13817_v6, %v13816_v38 }
 0x17d   :  { %2848 = vmatmul.mubr.bf16.vlgmr.msra.gmra.mrb[160].mxu0 %v15402_v58  ;;  %v1151_v13 = vadd.f32 %v13879_v7, %v13815_v39  ;;  %v13882_v18 = vadd.f32 %v13881_v11, %v13880_v3  ;;  %v15418_v58 = vld [vmem:[%s21545_s28 + $0x540] ss:$16 sps:$4 sm:$0xff]   ;;  %v15422_v39 = vld [vmem:[%s21545_s28 + $0x56c] ss:$16 sps:$4 sm:$0xff]  }
 0x17e   :  { %2945 = vmatmul.mubr.bf16.vlgmr.msra.gmra.mrb[160].mxu1 %v15405_v61  ;;  %2855 = vmatprep.mubr.bf16.mxu0 %v15408_v62 }
 0x17f   :  { %1193 = vadd.xlane.f32.xlu0 %v1151_v13  ;;  %v1154_v19 = vadd.f32 %v13882_v18, %v13818_v17  ;;  %2952 = vmatprep.mubr.bf16.mxu1 %v15410_v5  ;;  %v15425_v5 = vld [vmem:[%s21545_s28 + $0x568] ss:$16 sps:$4 sm:$0xff]  }
 0x180   :  { %v13819_v26 = vpop.f32.mrb[56].mxu0  ;;  %14408 = vmatpush3.bf16.msra.mxu0 %v17828_v21  ;;  %14472 = vmatpush3.bf16.msra.mxu1 %v17834_v22 }
 0x181   :  { %v13883_v29 = vpop.f32.mrb[56].mxu1  ;;  %1195 = vadd.xlane.f32.xlu1 %v1154_v19  ;;  %v13820_v42 = vpop.f32.mrb[57].mxu0  ;;  %14409 = vmatprep.subr.bf16.mxu0 %v17846_v27 }
 0x182   :  { %v13884_v44 = vpop.f32.mrb[57].mxu1  ;;  %v13822_v30 = vpop.f32.mrb[58].mxu0  ;;  %v13821_v32 = vadd.f32 %v13820_v42, %v13819_v26  ;;  %14473 = vmatprep.subr.bf16.mxu1 %v17852_v31  ;;  %v15431_v42 = vld [vmem:[%s21545_s28 + $0x588] ss:$16 sps:$4 sm:$0xff]  }
 0x183   :  { %v13886_v21 = vpop.f32.mrb[58].mxu1  ;;  %v13823_v22 = vpop.f32.mrb[59].mxu0  ;;  %v13885_v43 = vadd.f32 %v13884_v44, %v13883_v29 }
 0x184   :  { %v13887_v51 = vpop.f32.mrb[59].mxu1  ;;  %v13824_v54 = vadd.f32 %v13823_v22, %v13822_v30  ;;  %14410 = vmatpush3.bf16.msra.mxu0 %v17861_v46  ;;  %14474 = vmatpush3.bf16.msra.mxu1 %v17867_v47  ;;  %v15419_v46 = vld [vmem:[%s21545_s28 + $0x548] ss:$16 sps:$4 sm:$0xff]   ;;  %v15420_v47 = vld [vmem:[%s21545_s28 + $0x564] ss:$16 sps:$4 sm:$0xff]  }
 0x185   :  { %2856 = vmatmul.mubr.bf16.gmra.mrb[164].mxu0 %v15412_v20  ;;  %v1159_v27 = vadd.f32 %v13885_v43, %v13821_v32  ;;  %v13888_v56 = vadd.f32 %v13887_v51, %v13886_v21  ;;  %14411 = vmatprep.subr.bf16.mxu0 %v17873_v50 }
 0x186   :  { %2953 = vmatmul.mubr.bf16.gmra.mrb[164].mxu1 %v15413_v15  ;;  %2863 = vmatprep.mubr.bf16.mxu0 %v15414_v28 }
 0x187   :  { %1197 = vadd.xlane.f32.xlu0 %v1159_v27  ;;  %v1162_v31 = vadd.f32 %v13888_v56, %v13824_v54  ;;  %2960 = vmatprep.mubr.bf16.mxu1 %v15416_v49  ;;  %v15434_v54 = vld [vmem:[%s21545_s28 + $0x5ac] ss:$16 sps:$4 sm:$0xff]   ;;  %v15436_v56 = vld [vmem:[%s21545_s28 + $0x5a0] ss:$16 sps:$4 sm:$0xff]  }
 0x188   :  { %v13825_v59 = vpop.f32.mrb[60].mxu0  ;;  %14475 = vmatprep.subr.bf16.mxu1 %v17885_v55  ;;  %14412 = vmatpush3.bf16.msra.mxu0 %v17894_v57 }
 0x189   :  { %v13889_v50 = vpop.f32.mrb[60].mxu1  ;;  %1199 = vadd.xlane.f32.xlu1 %v1162_v31  ;;  %v13826_v61 = vpop.f32.mrb[61].mxu0  ;;  %14476 = vmatpush3.bf16.msra.mxu1 %v17900_v60 }
 0x18a   :  { %v13890_v62 = vpop.f32.mrb[61].mxu1  ;;  %v13828_v63 = vpop.f32.mrb[62].mxu0  ;;  %v13827_v34 = vadd.f32 %v13826_v61, %v13825_v59  ;;  %14413 = vmatprep.subr.bf16.mxu0 %v17906_v0  ;;  %14477 = vmatprep.subr.bf16.mxu1 %v17912_v33  ;;  %v15424_v33 = vld [vmem:[%s21545_s28 + $0x560] ss:$16 sps:$4 sm:$0xff]  }
 0x18b   :  { %v13892_v35 = vpop.f32.mrb[62].mxu1  ;;  %v13829_v55 = vpop.f32.mrb[63].mxu0  ;;  %v13891_v38 = vadd.f32 %v13890_v62, %v13889_v50 }
 0x18c   :  { %v13893_v57 = vpop.f32.mrb[63].mxu1  ;;  %v13830_v3 = vadd.f32 %v13829_v55, %v13828_v63  ;;  %14414 = vmatpush3.bf16.msra.mxu0 %v17921_v40  ;;  %v15426_v40 = vld [vmem:[%s21545_s28 + $0x584] ss:$16 sps:$4 sm:$0xff]   ;;  %v15443_v55 = vld [vmem:[%s21545_s28 + $0x5c8] ss:$16 sps:$4 sm:$0xff]  }
 0x18d   :  { %2864 = vmatmul.mubr.bf16.gmra.mrb[168].mxu0 %v15418_v58  ;;  %v1167_v60 = vadd.f32 %v13891_v38, %v13827_v34  ;;  %v13894_v6 = vadd.f32 %v13893_v57, %v13892_v35  ;;  %14478 = vmatpush3.bf16.msra.mxu1 %v17927_v4  ;;  %v15444_v38 = vld [vmem:[%s21545_s28 + $0x5e4] ss:$16 sps:$4 sm:$0xff]  }
 0x18e   :  { %2961 = vmatmul.mubr.bf16.gmra.mrb[168].mxu1 %v15419_v46  ;;  %2871 = vmatprep.mubr.bf16.mxu0 %v15420_v47 }
 0x18f   :  { %1201 = vadd.xlane.f32.xlu0 %v1167_v60  ;;  %v1170_v0 = vadd.f32 %v13894_v6, %v13830_v3  ;;  %2968 = vmatprep.mubr.bf16.mxu1 %v15422_v39 }
 0x190   :  { %v13911_v7 = vpop.f32.mrb[64].mxu0  ;;  %14415 = vmatprep.subr.bf16.mxu0 %v17942_v9  ;;  %14479 = vmatprep.subr.bf16.mxu1 %v17948_v10  ;;  %v15428_v9 = vld [vmem:[%s21545_s28 + $0x58c] ss:$16 sps:$4 sm:$0xff]  }
 0x191   :  { %v13975_v4 = vpop.f32.mrb[64].mxu1  ;;  %1203 = vadd.xlane.f32.xlu1 %v1170_v0  ;;  %v13912_v11 = vpop.f32.mrb[65].mxu0  ;;  %14416 = vmatpush3.bf16.msra.mxu0 %v17954_v12 }
 0x192   :  { %v13976_v17 = vpop.f32.mrb[65].mxu1  ;;  %v13914_v13 = vpop.f32.mrb[66].mxu0  ;;  %v13913_v18 = vadd.f32 %v13912_v11, %v13911_v7  ;;  %14480 = vmatpush3.bf16.msra.mxu1 %v17960_v1  ;;  %14417 = vmatprep.subr.bf16.mxu0 %v17966_v2  ;;  %v15430_v2 = vld [vmem:[%s21545_s28 + $0x580] ss:$16 sps:$4 sm:$0xff]  }
 0x193   :  { %v13978_v19 = vpop.f32.mrb[66].mxu1  ;;  %v13915_v20 = vpop.f32.mrb[67].mxu0  ;;  %v13977_v26 = vadd.f32 %v13976_v17, %v13975_v4  ;;  %14481 = vmatprep.subr.bf16.mxu1 %v17975_v25  ;;  %v15432_v25 = vld [vmem:[%s21545_s28 + $0x5a4] ss:$16 sps:$4 sm:$0xff]  }
 0x194   :  { %v13979_v10 = vpop.f32.mrb[67].mxu1  ;;  %v13916_v15 = vadd.f32 %v13915_v20, %v13914_v13  ;;  %v15449_v20 = vld [vmem:[%s21545_s28 + $0x5e8] ss:$16 sps:$4 sm:$0xff]  }
 0x195   :  { %2872 = vmatmul.mubr.bf16.gmra.mrb[172].mxu0 %v15424_v33  ;;  %v1570_v12 = vadd.f32 %v13977_v26, %v13913_v18  ;;  %v13980_v28 = vadd.f32 %v13979_v10, %v13978_v19  ;;  %v15448_v18 = vld [vmem:[%s21545_s28 + $0x5e0] ss:$16 sps:$4 sm:$0xff]   ;;  %v15452_v26 = vld [vmem:[%s21545_s28 + $0x604] ss:$16 sps:$4 sm:$0xff]  }
 0x196   :  { %2969 = vmatmul.mubr.bf16.gmra.mrb[172].mxu1 %v15425_v5  ;;  %2879 = vmatprep.mubr.bf16.mxu0 %v15426_v40  ;;  %v15446_v5 = vld [vmem:[%s21545_s28 + $0x5ec] ss:$16 sps:$4 sm:$0xff]  }
 0x197   :  { %1632 = vadd.xlane.f32.xlu0 %v1570_v12  ;;  %v1573_v1 = vadd.f32 %v13980_v28, %v13916_v15  ;;  %2976 = vmatprep.mubr.bf16.mxu1 %v15428_v9 }
 0x198   :  { %v13917_v29 = vpop.f32.mrb[68].mxu0  ;;  %14418 = vmatpush3.bf16.msra.mxu0 %v17990_v45  ;;  %14482 = vmatpush3.bf16.msra.mxu1 %v17996_v48 }
 0x199   :  { %v13981_v44 = vpop.f32.mrb[68].mxu1  ;;  %1634 = vadd.xlane.f32.xlu1 %v1573_v1  ;;  %v13918_v30 = vpop.f32.mrb[69].mxu0  ;;  %14419 = vmatprep.subr.bf16.mxu0 %v18002_v52 }
 0x19a   :  { %v13982_v32 = vpop.f32.mrb[69].mxu1  ;;  %v13920_v21 = vpop.f32.mrb[70].mxu0  ;;  %v13919_v22 = vadd.f32 %v13918_v30, %v13917_v29  ;;  %14483 = vmatprep.subr.bf16.mxu1 %v18008_v53 }
 0x19b   :  { %v13984_v43 = vpop.f32.mrb[70].mxu1  ;;  %v13921_v49 = vpop.f32.mrb[71].mxu0  ;;  %v13983_v51 = vadd.f32 %v13982_v32, %v13981_v44 }
 0x19c   :  { %v13985_v45 = vpop.f32.mrb[71].mxu1  ;;  %v13922_v27 = vadd.f32 %v13921_v49, %v13920_v21  ;;  %14420 = vmatpush3.bf16.msra.mxu0 %v18017_v36  ;;  %14484 = vmatpush3.bf16.msra.mxu1 %v18023_v37  ;;  %v15437_v36 = vld [vmem:[%s21545_s28 + $0x5a8] ss:$16 sps:$4 sm:$0xff]   ;;  %v15438_v37 = vld [vmem:[%s21545_s28 + $0x5c4] ss:$16 sps:$4 sm:$0xff]  }
 0x19d   :  { %2880 = vmatmul.mubr.bf16.gmra.mrb[176].mxu0 %v15430_v2  ;;  %v1578_v48 = vadd.f32 %v13983_v51, %v13919_v22  ;;  %v13986_v52 = vadd.f32 %v13985_v45, %v13984_v43  ;;  %14421 = vmatprep.subr.bf16.mxu0 %v18029_v41  ;;  %v15450_v22 = vld [vmem:[%s21545_s28 + $0x600] ss:$16 sps:$4 sm:$0xff]   ;;  %v15453_v49 = vld [vmem:[%s21545_s28 + $0x608] ss:$16 sps:$4 sm:$0xff]   ;;  %v15456_v51 = vld [vmem:[%s21545_s28 + $0x624] ss:$16 sps:$4 sm:$0xff]  }
 0x19e   :  { %2977 = vmatmul.mubr.bf16.gmra.mrb[176].mxu1 %v15431_v42  ;;  %2887 = vmatprep.mubr.bf16.mxu0 %v15432_v25  ;;  %v15455_v42 = vld [vmem:[%s21545_s28 + $0x60c] ss:$16 sps:$4 sm:$0xff]  }
 0x19f   :  { %1636 = vadd.xlane.f32.xlu0 %v1578_v48  ;;  %v1581_v53 = vadd.f32 %v13986_v52, %v13922_v27  ;;  %2984 = vmatprep.mubr.bf16.mxu1 %v15434_v54 }
 0x1a0   :  { %v13923_v31 = vpop.f32.mrb[72].mxu0  ;;  %14485 = vmatprep.subr.bf16.mxu1 %v18044_v8  ;;  %14422 = vmatpush3.bf16.msra.mxu0 %v18050_v16  ;;  %v15440_v8 = vld [vmem:[%s21545_s28 + $0x5cc] ss:$16 sps:$4 sm:$0xff]  }
 0x1a1   :  { %v13987_v41 = vpop.f32.mrb[72].mxu1  ;;  %1638 = vadd.xlane.f32.xlu1 %v1581_v53  ;;  %v13924_v58 = vpop.f32.mrb[73].mxu0  ;;  %14486 = vmatpush3.bf16.msra.mxu1 %v18056_v14 }
 0x1a2   :  { %v13988_v59 = vpop.f32.mrb[73].mxu1  ;;  %v13926_v46 = vpop.f32.mrb[74].mxu0  ;;  %v13925_v47 = vadd.f32 %v13924_v58, %v13923_v31  ;;  %14535 = vmatprep.subr.bf16.mxu0 %v18062_v23  ;;  %14599 = vmatprep.subr.bf16.mxu1 %v18068_v24  ;;  %v15442_v23 = vld [vmem:[%s21545_s28 + $0x5c0] ss:$16 sps:$4 sm:$0xff]  }
 0x1a3   :  { %v13990_v50 = vpop.f32.mrb[74].mxu1  ;;  %v13927_v61 = vpop.f32.mrb[75].mxu0  ;;  %v13989_v62 = vadd.f32 %v13988_v59, %v13987_v41 }
 0x1a4   :  { %v13991_v16 = vpop.f32.mrb[75].mxu1  ;;  %v13928_v63 = vadd.f32 %v13927_v61, %v13926_v46  ;;  %v18244_v61 = vld [vmem:[%s21544_s26] sm:$0xff]  }
 0x1a5   :  { %2888 = vmatmul.mubr.bf16.gmra.mrb[180].mxu0 %v15436_v56  ;;  %v1586_v34 = vadd.f32 %v13989_v62, %v13925_v47  ;;  %v13992_v35 = vadd.f32 %v13991_v16, %v13990_v50  ;;  %v15460_v47 = vld [vmem:[%s21545_s28 + $0x620] ss:$16 sps:$4 sm:$0xff]   ;;  %v15462_v16 = vld [vmem:[%s21545_s28 + $0x644] ss:$16 sps:$4 sm:$0xff]  }
 0x1a6   :  { %2985 = vmatmul.mubr.bf16.gmra.mrb[180].mxu1 %v15437_v36  ;;  %2895 = vmatprep.mubr.bf16.mxu0 %v15438_v37  ;;  %v15458_v36 = vld [vmem:[%s21545_s28 + $0x62c] ss:$16 sps:$4 sm:$0xff]   ;;  %v18250_v62 = vld [vmem:[%s21544_s26 + $0x80] sm:$0xff]  }
 0x1a7   :  { %1640 = vadd.xlane.f32.xlu0 %v1586_v34  ;;  %v1589_v14 = vadd.f32 %v13992_v35, %v13928_v63  ;;  %2992 = vmatprep.mubr.bf16.mxu1 %v15440_v8  ;;  %v15461_v8 = vld [vmem:[%s21545_s28 + $0x628] ss:$16 sps:$4 sm:$0xff]  }
 0x1a8   :  { %v13929_v24 = vpop.f32.mrb[76].mxu0  ;;  %v18262_v35 = vld [vmem:[%s21544_s26 + $0x48] sm:$0xff]  }
 0x1a9   :  { %v13993_v39 = vpop.f32.mrb[76].mxu1  ;;  %1642 = vadd.xlane.f32.xlu1 %v1589_v14  ;;  %v13930_v57 = vpop.f32.mrb[77].mxu0 }
 0x1aa   :  { %v13994_v3 = vpop.f32.mrb[77].mxu1  ;;  %v13932_v60 = vpop.f32.mrb[78].mxu0  ;;  %v13931_v6 = vadd.f32 %v13930_v57, %v13929_v24 }
 0x1ab   :  { %v13996_v0 = vpop.f32.mrb[78].mxu1  ;;  %v13933_v33 = vpop.f32.mrb[79].mxu0  ;;  %v13995_v7 = vadd.f32 %v13994_v3, %v13993_v39  ;;  %v15464_v3 = vld [vmem:[%s21545_s28 + $0x64c] ss:$16 sps:$4 sm:$0xff]  }
 0x1ac   :  { %v13997_v40 = vpop.f32.mrb[79].mxu1  ;;  %v13934_v4 = vadd.f32 %v13933_v33, %v13932_v60  ;;  %v18283_v33 = vld [vmem:[%s21544_s26 + $0x88] sm:$0xff]  }
 0x1ad   :  { %2896 = vmatmul.mubr.bf16.gmra.mrb[184].mxu0 %v15442_v23  ;;  %v1594_v11 = vadd.f32 %v13995_v7, %v13931_v6  ;;  %v13998_v17 = vadd.f32 %v13997_v40, %v13996_v0  ;;  %v18277_v0 = vld [vmem:[%s21544_s26 + $0x8] sm:$0xff]   ;;  %v18289_v40 = vld [vmem:[%s21544_s26 + $0x50] sm:$0xff]  }
 0x1ae   :  { %2993 = vmatmul.mubr.bf16.gmra.mrb[184].mxu1 %v15443_v55  ;;  %2903 = vmatprep.mubr.bf16.mxu0 %v15444_v38  ;;  %v18268_v55 = vld [vmem:[%s21544_s26 + $0xc8] sm:$0xff]  }
 0x1af   :  { %1644 = vadd.xlane.f32.xlu0 %v1594_v11  ;;  %v1597_v13 = vadd.f32 %v13998_v17, %v13934_v4  ;;  %3000 = vmatprep.mubr.bf16.mxu1 %v15446_v5  ;;  %v15466_v11 = vld [vmem:[%s21545_s28 + $0x640] ss:$16 sps:$4 sm:$0xff]  }
 0x1b0   :  { %v13935_v19 = vpop.f32.mrb[80].mxu0 }
 0x1b1   :  { %v13999_v9 = vpop.f32.mrb[80].mxu1  ;;  %1646 = vadd.xlane.f32.xlu1 %v1597_v13  ;;  %v13936_v10 = vpop.f32.mrb[81].mxu0  ;;  %v15467_v13 = vld [vmem:[%s21545_s28 + $0x648] ss:$16 sps:$4 sm:$0xff]  }
 0x1b2   :  { %v14000_v15 = vpop.f32.mrb[81].mxu1  ;;  %v13938_v12 = vpop.f32.mrb[82].mxu0  ;;  %v13937_v28 = vadd.f32 %v13936_v10, %v13935_v19  ;;  %v15468_v19 = vld [vmem:[%s21545_s28 + $0x664] ss:$16 sps:$4 sm:$0xff]  }
 0x1b3   :  { %v14002_v1 = vpop.f32.mrb[82].mxu1  ;;  %v13939_v2 = vpop.f32.mrb[83].mxu0  ;;  %v14001_v29 = vadd.f32 %v14000_v15, %v13999_v9  ;;  %v18316_v10 = vld [vmem:[%s21544_s26 + $0x90] sm:$0xff]  }
 0x1b4   :  { %v14003_v25 = vpop.f32.mrb[83].mxu1  ;;  %v13940_v44 = vadd.f32 %v13939_v2, %v13938_v12  ;;  %v18328_v2 = vld [vmem:[%s21544_s26 + $0xd8] sm:$0xff]  }
 0x1b5   :  { %2904 = vmatmul.mubr.bf16.gmra.mrb[188].mxu0 %v15448_v18  ;;  %v1602_v30 = vadd.f32 %v14001_v29, %v13937_v28  ;;  %v14004_v32 = vadd.f32 %v14003_v25, %v14002_v1  ;;  %v18301_v18 = vld [vmem:[%s21544_s26 + $0xd0] sm:$0xff]   ;;  %v18322_v1 = vld [vmem:[%s21544_s26 + $0x58] sm:$0xff]  }
 0x1b6   :  { %3001 = vmatmul.mubr.bf16.gmra.mrb[188].mxu1 %v15449_v20  ;;  %3306 = vmatprep.mubr.bf16.mxu0 %v15452_v26  ;;  %v18310_v20 = vld [vmem:[%s21544_s26 + $0x10] sm:$0xff]  }
 0x1b7   :  { %1648 = vadd.xlane.f32.xlu0 %v1602_v30  ;;  %v1605_v21 = vadd.f32 %v14004_v32, %v13940_v44  ;;  %3403 = vmatprep.mubr.bf16.mxu1 %v15455_v42  ;;  %v15470_v44 = vld [vmem:[%s21545_s28 + $0x66c] ss:$16 sps:$4 sm:$0xff]  }
 0x1b8   :  { %v13941_v43 = vpop.f32.mrb[84].mxu0 }
 0x1b9   :  { %v14005_v54 = vpop.f32.mrb[84].mxu1  ;;  %1650 = vadd.xlane.f32.xlu1 %v1605_v21  ;;  %v13942_v45 = vpop.f32.mrb[85].mxu0  ;;  %v18337_v21 = vld [vmem:[%s21544_s26 + $0x18] sm:$0xff]  }
 0x1ba   :  { %v13943_v27 = vadd.f32 %v13942_v45, %v13941_v43  ;;  %v14006_v48 = vpop.f32.mrb[85].mxu1  ;;  %v13944_v52 = vpop.f32.mrb[86].mxu0 }
 0x1bb   :  { %v14008_v53 = vpop.f32.mrb[86].mxu1  ;;  %v13945_v56 = vpop.f32.mrb[87].mxu0  ;;  %v14007_v31 = vadd.f32 %v14006_v48, %v14005_v54  ;;  %v15472_v54 = vld [vmem:[%s21545_s28 + $0x660] ss:$16 sps:$4 sm:$0xff]   ;;  %v15474_v48 = vld [vmem:[%s21545_s28 + $0x684] ss:$16 sps:$4 sm:$0xff]  }
 0x1bc   :  { %v13946_v37 = vadd.f32 %v13945_v56, %v13944_v52  ;;  %v14009_v41 = vpop.f32.mrb[87].mxu1  ;;  %v18358_v52 = vld [vmem:[%s21544_s26 + $0x60] sm:$0xff]  }
 0x1bd   :  { %3307 = vmatmul.mubr.bf16.vlgmr.msra.gmra.mrb[192].mxu0 %v15450_v22  ;;  %v1610_v58 = vadd.f32 %v14007_v31, %v13943_v27  ;;  %v14010_v59 = vadd.f32 %v14009_v41, %v14008_v53  ;;  %v15473_v27 = vld [vmem:[%s21545_s28 + $0x668] ss:$16 sps:$4 sm:$0xff]   ;;  %v18364_v53 = vld [vmem:[%s21544_s26 + $0xe0] sm:$0xff]  }
 0x1be   :  { %3404 = vmatmul.mubr.bf16.vlgmr.msra.gmra.mrb[192].mxu1 %v15453_v49  ;;  %3314 = vmatprep.mubr.bf16.mxu0 %v15456_v51  ;;  %v18343_v49 = vld [vmem:[%s21544_s26 + $0x98] sm:$0xff]  }
 0x1bf   :  { %1652 = vadd.xlane.f32.xlu0 %v1610_v58  ;;  %v1613_v46 = vadd.f32 %v14010_v59, %v13946_v37  ;;  %3411 = vmatprep.mubr.bf16.mxu1 %v15458_v36  ;;  %v18370_v36 = vld [vmem:[%s21544_s26 + $0x20] sm:$0xff]  }
 0x1c0   :  { %v13947_v50 = vpop.f32.mrb[88].mxu0  ;;  %14536 = vmatpush3.bf16.msra.mxu0 %v18244_v61  ;;  %14600 = vmatpush3.bf16.msra.mxu1 %v18250_v62  ;;  %v18376_v59 = vld [vmem:[%s21544_s26 + $0xa0] sm:$0xff]  }
 0x1c1   :  { %v14011_v63 = vpop.f32.mrb[88].mxu1  ;;  %1654 = vadd.xlane.f32.xlu1 %v1613_v46  ;;  %v13948_v34 = vpop.f32.mrb[89].mxu0  ;;  %14537 = vmatprep.subr.bf16.mxu0 %v18262_v35  ;;  %v18382_v46 = vld [vmem:[%s21544_s26 + $0x68] sm:$0xff]  }
 0x1c2   :  { %v13949_v14 = vadd.f32 %v13948_v34, %v13947_v50  ;;  %v14012_v23 = vpop.f32.mrb[89].mxu1  ;;  %v13950_v24 = vpop.f32.mrb[90].mxu0  ;;  %14601 = vmatprep.subr.bf16.mxu1 %v18268_v55 }
 0x1c3   :  { %v14014_v38 = vpop.f32.mrb[90].mxu1  ;;  %v13951_v39 = vpop.f32.mrb[91].mxu0  ;;  %v14013_v57 = vadd.f32 %v14012_v23, %v14011_v63  ;;  %v18391_v63 = vld [vmem:[%s21544_s26 + $0xe8] sm:$0xff]  }
 0x1c4   :  { %v13952_v60 = vadd.f32 %v13951_v39, %v13950_v24  ;;  %v14015_v6 = vpop.f32.mrb[91].mxu1  ;;  %14538 = vmatpush3.bf16.msra.mxu0 %v18277_v0  ;;  %14602 = vmatpush3.bf16.msra.mxu1 %v18283_v33  ;;  %v15478_v39 = vld [vmem:[%s21545_s28 + $0x680] ss:$16 sps:$4 sm:$0xff]  }
 0x1c5   :  { %3315 = vmatmul.mubr.bf16.gmra.mrb[196].mxu0 %v15460_v47  ;;  %v1618_v7 = vadd.f32 %v14013_v57, %v13949_v14  ;;  %v14016_v5 = vadd.f32 %v14015_v6, %v14014_v38  ;;  %14539 = vmatprep.subr.bf16.mxu0 %v18289_v40  ;;  %v18406_v6 = vld [vmem:[%s21544_s26 + $0x28] sm:$0xff]  }
 0x1c6   :  { %3412 = vmatmul.mubr.bf16.gmra.mrb[196].mxu1 %v15461_v8  ;;  %3322 = vmatprep.mubr.bf16.mxu0 %v15462_v16  ;;  %v15476_v16 = vld [vmem:[%s21545_s28 + $0x68c] ss:$16 sps:$4 sm:$0xff]  }
 0x1c7   :  { %1656 = vadd.xlane.f32.xlu0 %v1618_v7  ;;  %v1621_v4 = vadd.f32 %v14016_v5, %v13952_v60  ;;  %3419 = vmatprep.mubr.bf16.mxu1 %v15464_v3  ;;  %v15479_v3 = vld [vmem:[%s21545_s28 + $0x688] ss:$16 sps:$4 sm:$0xff]   ;;  %v15480_v60 = vld [vmem:[%s21545_s28 + $0x6a4] ss:$16 sps:$4 sm:$0xff]  }
 0x1c8   :  { %v13953_v17 = vpop.f32.mrb[92].mxu0  ;;  %14603 = vmatprep.subr.bf16.mxu1 %v18301_v18  ;;  %14540 = vmatpush3.bf16.msra.mxu0 %v18310_v20  ;;  %v18412_v7 = vld [vmem:[%s21544_s26 + $0xa8] sm:$0xff]  }
 0x1c9   :  { %v14017_v26 = vpop.f32.mrb[92].mxu1  ;;  %1658 = vadd.xlane.f32.xlu1 %v1621_v4  ;;  %v13954_v9 = vpop.f32.mrb[93].mxu0  ;;  %14604 = vmatpush3.bf16.msra.mxu1 %v18316_v10 }
 0x1ca   :  { %v13955_v15 = vadd.f32 %v13954_v9, %v13953_v17  ;;  %v14018_v12 = vpop.f32.mrb[93].mxu1  ;;  %v13956_v28 = vpop.f32.mrb[94].mxu0  ;;  %14541 = vmatprep.subr.bf16.mxu0 %v18322_v1  ;;  %14605 = vmatprep.subr.bf16.mxu1 %v18328_v2 }
 0x1cb   :  { %v14020_v29 = vpop.f32.mrb[94].mxu1  ;;  %v13957_v42 = vpop.f32.mrb[95].mxu0  ;;  %v14019_v25 = vadd.f32 %v14018_v12, %v14017_v26  ;;  %v18424_v26 = vld [vmem:[%s21544_s26 + $0xf0] sm:$0xff]  }
 0x1cc   :  { %v13958_v30 = vadd.f32 %v13957_v42, %v13956_v28  ;;  %v14021_v32 = vpop.f32.mrb[95].mxu1  ;;  %14542 = vmatpush3.bf16.msra.mxu0 %v18337_v21  ;;  %v15482_v28 = vld [vmem:[%s21545_s28 + $0x6ac] ss:$16 sps:$4 sm:$0xff]  }
 0x1cd   :  { %3323 = vmatmul.mubr.bf16.gmra.mrb[200].mxu0 %v15466_v11  ;;  %v1626_v22 = vadd.f32 %v14019_v25, %v13955_v15  ;;  %v14022_v43 = vadd.f32 %v14021_v32, %v14020_v29  ;;  %14606 = vmatpush3.bf16.msra.mxu1 %v18343_v49  ;;  %v18418_v11 = vld [vmem:[%s21544_s26 + $0x70] sm:$0xff]  }
 0x1ce   :  { %3420 = vmatmul.mubr.bf16.gmra.mrb[200].mxu1 %v15467_v13  ;;  %3330 = vmatprep.mubr.bf16.mxu0 %v15468_v19  ;;  %v18433_v25 = vld [vmem:[%s21544_s26 + $0x30] sm:$0xff]  }
 0x1cf   :  { %1660 = vadd.xlane.f32.xlu0 %v1626_v22  ;;  %v1629_v51 = vadd.f32 %v14022_v43, %v13958_v30  ;;  %3427 = vmatprep.mubr.bf16.mxu1 %v15470_v44  ;;  %v18439_v44 = vld [vmem:[%s21544_s26 + $0xb0] sm:$0xff]   ;;  %v18445_v22 = vld [vmem:[%s21544_s26 + $0x78] sm:$0xff]  }
 0x1d0   :  { %v14039_v45 = vpop.f32.mrb[96].mxu0  ;;  %14543 = vmatprep.subr.bf16.mxu0 %v18358_v52  ;;  %14607 = vmatprep.subr.bf16.mxu1 %v18364_v53 }
 0x1d1   :  { %v14103_v56 = vpop.f32.mrb[96].mxu1  ;;  %1662 = vadd.xlane.f32.xlu1 %v1629_v51  ;;  %v14040_v31 = vpop.f32.mrb[97].mxu0  ;;  %14544 = vmatpush3.bf16.msra.mxu0 %v18370_v36  ;;  %v15484_v51 = vld [vmem:[%s21545_s28 + $0x6a0] ss:$16 sps:$4 sm:$0xff]  }
 0x1d2   :  { %v14041_v37 = vadd.f32 %v14040_v31, %v14039_v45  ;;  %v14104_v41 = vpop.f32.mrb[97].mxu1  ;;  %v14042_v58 = vpop.f32.mrb[98].mxu0  ;;  %14608 = vmatpush3.bf16.msra.mxu1 %v18376_v59  ;;  %14545 = vmatprep.subr.bf16.mxu0 %v18382_v46  ;;  %v15485_v45 = vld [vmem:[%s21545_s28 + $0x6a8] ss:$16 sps:$4 sm:$0xff]  }
 0x1d3   :  { %v14106_v47 = vpop.f32.mrb[98].mxu1  ;;  %v14043_v50 = vpop.f32.mrb[99].mxu0  ;;  %v14105_v8 = vadd.f32 %v14104_v41, %v14103_v56  ;;  %14609 = vmatprep.subr.bf16.mxu1 %v18391_v63  ;;  %v18466_v56 = vld [vmem:[%s21544_s26 + $0x38] sm:$0xff]  }
 0x1d4   :  { %v14044_v34 = vadd.f32 %v14043_v50, %v14042_v58  ;;  %v14107_v14 = vpop.f32.mrb[99].mxu1  ;;  %v18472_v41 = vld [vmem:[%s21544_s26 + $0xb8] sm:$0xff]  }
 0x1d5   :  { %3331 = vmatmul.mubr.bf16.gmra.mrb[204].mxu0 %v15472_v54  ;;  %v2029_v23 = vadd.f32 %v14105_v8, %v14041_v37  ;;  %v14108_v24 = vadd.f32 %v14107_v14, %v14106_v47  ;;  %v16802_v8 = vld [vmem:[%s21544_s26 + $0x40] sm:$0xff]  }
 0x1d6   :  { %3428 = vmatmul.mubr.bf16.gmra.mrb[204].mxu1 %v15473_v27  ;;  %3338 = vmatprep.mubr.bf16.mxu0 %v15474_v48  ;;  %v15486_v27 = vld [vmem:[%s21545_s28 + $0x6c4] ss:$16 sps:$4 sm:$0xff]   ;;  %v18460_v48 = vld [vmem:[%s21544_s26 + $0xf8] sm:$0xff]  }
 0x1d7   :  { %2091 = vadd.xlane.f32.xlu0 %v2029_v23  ;;  %v2032_v38 = vadd.f32 %v14108_v24, %v14044_v34  ;;  %3435 = vmatprep.mubr.bf16.mxu1 %v15476_v16  ;;  %v16803_v16 = vld [vmem:[%s21544_s26 + $0xc0] sm:$0xff]   ;;  %v15488_v24 = vld [vmem:[%s21545_s28 + $0x6cc] ss:$16 sps:$4 sm:$0xff]  }
 0x1d8   :  { %v14045_v57 = vpop.f32.mrb[100].mxu0  ;;  %14546 = vmatpush3.bf16.msra.mxu0 %v18406_v6  ;;  %14610 = vmatpush3.bf16.msra.mxu1 %v18412_v7 }
 0x1d9   :  { %v14109_v5 = vpop.f32.mrb[100].mxu1  ;;  %2093 = vadd.xlane.f32.xlu1 %v2032_v38  ;;  %v14046_v4 = vpop.f32.mrb[101].mxu0  ;;  %14547 = vmatprep.subr.bf16.mxu0 %v18418_v11 }
 0x1da   :  { %v14047_v17 = vadd.f32 %v14046_v4, %v14045_v57  ;;  %v14110_v13 = vpop.f32.mrb[101].mxu1  ;;  %v14048_v19 = vpop.f32.mrb[102].mxu0  ;;  %14611 = vmatprep.subr.bf16.mxu1 %v18424_v26 }
 0x1db   :  { %v14112_v9 = vpop.f32.mrb[102].mxu1  ;;  %v14049_v15 = vpop.f32.mrb[103].mxu0  ;;  %v14111_v12 = vadd.f32 %v14110_v13, %v14109_v5  ;;  %v15490_v5 = vld [vmem:[%s21545_s28 + $0x6c0] ss:$16 sps:$4 sm:$0xff]   ;;  %v15492_v13 = vld [vmem:[%s21545_s28 + $0x6e4] ss:$16 sps:$4 sm:$0xff]  }
 0x1dc   :  { %v14050_v29 = vadd.f32 %v14049_v15, %v14048_v19  ;;  %v14113_v42 = vpop.f32.mrb[103].mxu1  ;;  %14548 = vmatpush3.bf16.msra.mxu0 %v18433_v25  ;;  %14612 = vmatpush3.bf16.msra.mxu1 %v18439_v44 }
 0x1dd   :  { %3339 = vmatmul.mubr.bf16.gmra.mrb[208].mxu0 %v15478_v39  ;;  %v2037_v30 = vadd.f32 %v14111_v12, %v14047_v17  ;;  %v14114_v32 = vadd.f32 %v14113_v42, %v14112_v9  ;;  %14549 = vmatprep.subr.bf16.mxu0 %v18445_v22  ;;  %v15491_v17 = vld [vmem:[%s21545_s28 + $0x6c8] ss:$16 sps:$4 sm:$0xff]  }
 0x1de   :  { %3436 = vmatmul.mubr.bf16.gmra.mrb[208].mxu1 %v15479_v3  ;;  %3346 = vmatprep.mubr.bf16.mxu0 %v15480_v60 }
 0x1df   :  { %2095 = vadd.xlane.f32.xlu0 %v2037_v30  ;;  %v2040_v43 = vadd.f32 %v14114_v32, %v14050_v29  ;;  %3443 = vmatprep.mubr.bf16.mxu1 %v15482_v28  ;;  %v15494_v32 = vld [vmem:[%s21545_s28 + $0x6ec] ss:$16 sps:$4 sm:$0xff]  }
 0x1e0   :  { %v14051_v54 = vpop.f32.mrb[104].mxu0  ;;  %14613 = vmatprep.subr.bf16.mxu1 %v18460_v48  ;;  %14550 = vmatpush3.bf16.msra.mxu0 %v18466_v56 }
 0x1e1   :  { %v14115_v31 = vpop.f32.mrb[104].mxu1  ;;  %2097 = vadd.xlane.f32.xlu1 %v2040_v43  ;;  %v14052_v37 = vpop.f32.mrb[105].mxu0  ;;  %14614 = vmatpush3.bf16.msra.mxu1 %v18472_v41 }
 0x1e2   :  { %v14053_v58 = vadd.f32 %v14052_v37, %v14051_v54  ;;  %v14116_v47 = vpop.f32.mrb[105].mxu1  ;;  %v14054_v50 = vpop.f32.mrb[106].mxu0  ;;  %14663 = vmatprep.subr.bf16.mxu0 %v16802_v8  ;;  %14727 = vmatprep.subr.bf16.mxu1 %v16803_v16 }
 0x1e3   :  { %v14118_v34 = vpop.f32.mrb[106].mxu1  ;;  %v14055_v14 = vpop.f32.mrb[107].mxu0  ;;  %v14117_v23 = vadd.f32 %v14116_v47, %v14115_v31  ;;  %v15496_v31 = vld [vmem:[%s21545_s28 + $0x6e0] ss:$16 sps:$4 sm:$0xff]   ;;  %v15497_v47 = vld [vmem:[%s21545_s28 + $0x6e8] ss:$16 sps:$4 sm:$0xff]  }
 0x1e4   :  { %v14056_v38 = vadd.f32 %v14055_v14, %v14054_v50  ;;  %v14119_v39 = vpop.f32.mrb[107].mxu1  ;;  %v18499_v37 = vpop.xlane.xlu0 %715  ;;  %v15500_v50 = vld [vmem:[%s21545_s28 + $0x704] ss:$16 sps:$4 sm:$0xff]  }
 0x1e5   :  { %3347 = vmatmul.mubr.bf16.gmra.mrb[212].mxu0 %v15484_v51  ;;  %v2045_v57 = vadd.f32 %v14117_v23, %v14053_v58  ;;  %v14120_v3 = vadd.f32 %v14119_v39, %v14118_v34 }
 0x1e6   :  { %3444 = vmatmul.mubr.bf16.gmra.mrb[212].mxu1 %v15485_v45  ;;  %3354 = vmatprep.mubr.bf16.mxu0 %v15486_v27 }
 0x1e7   :  { %2099 = vadd.xlane.f32.xlu0 %v2045_v57  ;;  %v2048_v60 = vadd.f32 %v14120_v3, %v14056_v38  ;;  %3451 = vmatprep.mubr.bf16.mxu1 %v15488_v24  ;;  %v15503_v57 = vld [vmem:[%s21545_s28 + $0x70c] ss:$16 sps:$4 sm:$0xff]  }
 0x1e8   :  { %v14057_v4 = vpop.f32.mrb[108].mxu0 }
 0x1e9   :  { %v14121_v19 = vpop.f32.mrb[108].mxu1  ;;  %2101 = vadd.xlane.f32.xlu1 %v2048_v60  ;;  %v14058_v9 = vpop.f32.mrb[109].mxu0 }
 0x1ea   :  { %v14059_v15 = vadd.f32 %v14058_v9, %v14057_v4  ;;  %v14122_v12 = vpop.f32.mrb[109].mxu1  ;;  %v14060_v28 = vpop.f32.mrb[110].mxu0 }
 0x1eb   :  { %v14124_v29 = vpop.f32.mrb[110].mxu1  ;;  %v14061_v42 = vpop.f32.mrb[111].mxu0  ;;  %v14123_v30 = vadd.f32 %v14122_v12, %v14121_v19  ;;  %v15504_v12 = vld [vmem:[%s21545_s28 + $0x724] ss:$16 sps:$4 sm:$0xff]  }
 0x1ec   :  { %v14062_v43 = vadd.f32 %v14061_v42, %v14060_v28  ;;  %v14125_v51 = vpop.f32.mrb[111].mxu1  ;;  %v18513_v19 = vpop.xlane.xlu0 %717  ;;  %v15506_v42 = vld [vmem:[%s21545_s28 + $0x72c] ss:$16 sps:$4 sm:$0xff]  }
 0x1ed   :  { %3355 = vmatmul.mubr.bf16.gmra.mrb[216].mxu0 %v15490_v5  ;;  %v2053_v54 = vadd.f32 %v14123_v30, %v14059_v15  ;;  %v14126_v45 = vadd.f32 %v14125_v51, %v14124_v29  ;;  %v15501_v15 = vld [vmem:[%s21545_s28 + $0x708] ss:$16 sps:$4 sm:$0xff]  }
 0x1ee   :  { %3452 = vmatmul.mubr.bf16.gmra.mrb[216].mxu1 %v15491_v17  ;;  %3362 = vmatprep.mubr.bf16.mxu0 %v15492_v13  ;;  %v15498_v13 = vld [vmem:[%s21545_s28 + $0x700] ss:$16 sps:$4 sm:$0xff]  }
 0x1ef   :  { %2103 = vadd.xlane.f32.xlu0 %v2053_v54  ;;  %v2056_v27 = vadd.f32 %v14126_v45, %v14062_v43  ;;  %3459 = vmatprep.mubr.bf16.mxu1 %v15494_v32 }
 0x1f0   :  { %v14063_v58 = vpop.f32.mrb[112].mxu0 }
 0x1f1   :  { %v14127_v8 = vpop.f32.mrb[112].mxu1  ;;  %2105 = vadd.xlane.f32.xlu1 %v2056_v27  ;;  %v14064_v16 = vpop.f32.mrb[113].mxu0 }
 0x1f2   :  { %v14065_v34 = vadd.f32 %v14064_v16, %v14063_v58  ;;  %v14128_v14 = vpop.f32.mrb[113].mxu1  ;;  %v14066_v23 = vpop.f32.mrb[114].mxu0 }
 0x1f3   :  { %v14130_v24 = vpop.f32.mrb[114].mxu1  ;;  %v14067_v38 = vpop.f32.mrb[115].mxu0  ;;  %v14129_v39 = vadd.f32 %v14128_v14, %v14127_v8 }
 0x1f4   :  { %v14068_v3 = vadd.f32 %v14067_v38, %v14066_v23  ;;  %v14131_v60 = vpop.f32.mrb[115].mxu1  ;;  %v18526_v16 = vpop.xlane.xlu1 %721 }
 0x1f5   :  { %3363 = vmatmul.mubr.bf16.gmra.mrb[220].mxu0 %v15496_v31  ;;  %v2061_v5 = vadd.f32 %v14129_v39, %v14065_v34  ;;  %v14132_v4 = vadd.f32 %v14131_v60, %v14130_v24  ;;  %v15508_v24 = vld [vmem:[%s21545_s28 + $0x720] ss:$16 sps:$4 sm:$0xff]  }
 0x1f6   :  { %3460 = vmatmul.mubr.bf16.gmra.mrb[220].mxu1 %v15497_v47  ;;  %3765 = vmatprep.mubr.bf16.mxu0 %v15500_v50  ;;  %v18524_v50 = vpop.xlane.xlu0 %719 }
 0x1f7   :  { %2107 = vadd.xlane.f32.xlu0 %v2061_v5  ;;  %v2064_v17 = vadd.f32 %v14132_v4, %v14068_v3  ;;  %3862 = vmatprep.mubr.bf16.mxu1 %v15503_v57  ;;  %v15509_v3 = vld [vmem:[%s21545_s28 + $0x728] ss:$16 sps:$4 sm:$0xff]  }
 0x1f8   :  { %v14069_v9 = vpop.f32.mrb[116].mxu0 }
 0x1f9   :  { %v14133_v28 = vpop.f32.mrb[116].mxu1  ;;  %2109 = vadd.xlane.f32.xlu1 %v2064_v17  ;;  %v14070_v29 = vpop.f32.mrb[117].mxu0 }
 0x1fa   :  { %v14071_v30 = vadd.f32 %v14070_v29, %v14069_v9  ;;  %v14134_v32 = vpop.f32.mrb[117].mxu1  ;;  %v14072_v43 = vpop.f32.mrb[118].mxu0 }
 0x1fb   :  { %v14136_v51 = vpop.f32.mrb[118].mxu1  ;;  %v14073_v54 = vpop.f32.mrb[119].mxu0  ;;  %v14135_v45 = vadd.f32 %v14134_v32, %v14133_v28 }
 0x1fc   :  { %v14074_v27 = vadd.f32 %v14073_v54, %v14072_v43  ;;  %v14137_v31 = vpop.f32.mrb[119].mxu1  ;;  %v18544_v4 = vpop.xlane.xlu0 %723  ;;  %v15515_v43 = vld [vmem:[%s21545_s28 + $0x748] ss:$16 sps:$4 sm:$0xff]  }
 0x1fd   :  { %3766 = vmatmul.mubr.bf16.vlgmr.msra.gmra.mrb[224].mxu0 %v15498_v13  ;;  %v2069_v58 = vadd.f32 %v14135_v45, %v14071_v30  ;;  %v14138_v47 = vadd.f32 %v14137_v31, %v14136_v51 }
 0x1fe   :  { %3863 = vmatmul.mubr.bf16.vlgmr.msra.gmra.mrb[224].mxu1 %v15501_v15  ;;  %3773 = vmatprep.mubr.bf16.mxu0 %v15504_v12  ;;  %v18549_v15 = vpop.xlane.xlu1 %725 }
 0x1ff   :  { %2111 = vadd.xlane.f32.xlu0 %v2069_v58  ;;  %v2072_v8 = vadd.f32 %v14138_v47, %v14074_v27  ;;  %3870 = vmatprep.mubr.bf16.mxu1 %v15506_v42 }
 0x200   :  { %v14075_v34 = vpop.f32.mrb[120].mxu0  ;;  %14664 = vmatpush3.bf16.msra.mxu0 %v18244_v61  ;;  %14728 = vmatpush3.bf16.msra.mxu1 %v18250_v62  ;;  %v15510_v61 = vld [vmem:[%s21545_s28 + $0x744] ss:$16 sps:$4 sm:$0xff]   ;;  %v18551_v28 = vpop.xlane.xlu0 %727 }
 0x201   :  { %v14139_v14 = vpop.f32.mrb[120].mxu1  ;;  %2113 = vadd.xlane.f32.xlu1 %v2072_v8  ;;  %v14076_v23 = vpop.f32.mrb[121].mxu0  ;;  %14665 = vmatprep.subr.bf16.mxu0 %v18262_v35  ;;  %v15512_v35 = vld [vmem:[%s21545_s28 + $0x74c] ss:$16 sps:$4 sm:$0xff]  }
 0x202   :  { %v14077_v38 = vadd.f32 %v14076_v23, %v14075_v34  ;;  %v14140_v39 = vpop.f32.mrb[121].mxu1  ;;  %v14078_v57 = vpop.f32.mrb[122].mxu0  ;;  %14729 = vmatprep.subr.bf16.mxu1 %v18268_v55 }
 0x203   :  { %v14142_v62 = vpop.f32.mrb[122].mxu1  ;;  %v14079_v60 = vpop.f32.mrb[123].mxu0  ;;  %v14141_v5 = vadd.f32 %v14140_v39, %v14139_v14  ;;  %v15521_v39 = vld [vmem:[%s21545_s28 + $0x768] ss:$16 sps:$4 sm:$0xff]  }
 0x204   :  { %v14080_v17 = vadd.f32 %v14079_v60, %v14078_v57  ;;  %v14143_v13 = vpop.f32.mrb[123].mxu1  ;;  %14666 = vmatpush3.bf16.msra.mxu0 %v18277_v0  ;;  %14730 = vmatpush3.bf16.msra.mxu1 %v18283_v33  ;;  %v18570_v45 = vpop.xlane.xlu1 %729 }
 0x205   :  { %3774 = vmatmul.mubr.bf16.gmra.mrb[228].mxu0 %v15508_v24  ;;  %v2077_v55 = vadd.f32 %v14141_v5, %v14077_v38  ;;  %v14144_v9 = vadd.f32 %v14143_v13, %v14142_v62  ;;  %14667 = vmatprep.subr.bf16.mxu0 %v18289_v40  ;;  %v15514_v40 = vld [vmem:[%s21545_s28 + $0x740] ss:$16 sps:$4 sm:$0xff]  }
 0x206   :  { %3871 = vmatmul.mubr.bf16.gmra.mrb[228].mxu1 %v15509_v3  ;;  %3781 = vmatprep.mubr.bf16.mxu0 %v15510_v61 }
 0x207   :  { %2115 = vadd.xlane.f32.xlu0 %v2077_v55  ;;  %v2080_v12 = vadd.f32 %v14144_v9, %v14080_v17  ;;  %3878 = vmatprep.mubr.bf16.mxu1 %v15512_v35  ;;  %v15526_v9 = vld [vmem:[%s21545_s28 + $0x780] ss:$16 sps:$4 sm:$0xff]  }
 0x208   :  { %v14081_v29 = vpop.f32.mrb[124].mxu0  ;;  %14731 = vmatprep.subr.bf16.mxu1 %v18301_v18  ;;  %14668 = vmatpush3.bf16.msra.mxu0 %v18310_v20  ;;  %v15516_v18 = vld [vmem:[%s21545_s28 + $0x764] ss:$16 sps:$4 sm:$0xff]   ;;  %v18576_v8 = vpop.xlane.xlu1 %733 }
 0x209   :  { %v14145_v0 = vpop.f32.mrb[124].mxu1  ;;  %2117 = vadd.xlane.f32.xlu1 %v2080_v12  ;;  %v14082_v33 = vpop.f32.mrb[125].mxu0  ;;  %14732 = vmatpush3.bf16.msra.mxu1 %v18316_v10  ;;  %v15518_v10 = vld [vmem:[%s21545_s28 + $0x76c] ss:$16 sps:$4 sm:$0xff]  }
 0x20a   :  { %v14083_v42 = vadd.f32 %v14082_v33, %v14081_v29  ;;  %v14146_v30 = vpop.f32.mrb[125].mxu1  ;;  %v14084_v32 = vpop.f32.mrb[126].mxu0  ;;  %14669 = vmatprep.subr.bf16.mxu0 %v18322_v1  ;;  %14733 = vmatprep.subr.bf16.mxu1 %v18328_v2  ;;  %v15527_v33 = vld [vmem:[%s21545_s28 + $0x788] ss:$16 sps:$4 sm:$0xff]  }
 0x20b   :  { %v14148_v20 = vpop.f32.mrb[126].mxu1  ;;  %v14085_v51 = vpop.f32.mrb[127].mxu0  ;;  %v14147_v54 = vadd.f32 %v14146_v30, %v14145_v0 }
 0x20c   :  { %v14086_v27 = vadd.f32 %v14085_v51, %v14084_v32  ;;  %v14149_v31 = vpop.f32.mrb[127].mxu1  ;;  %14670 = vmatpush3.bf16.msra.mxu0 %v18337_v21  ;;  %v18574_v1 = vpop.xlane.xlu0 %731 }
 0x20d   :  { %3782 = vmatmul.mubr.bf16.gmra.mrb[232].mxu0 %v15514_v40  ;;  %v2085_v58 = vadd.f32 %v14147_v54, %v14083_v42  ;;  %v14150_v47 = vadd.f32 %v14149_v31, %v14148_v20  ;;  %14734 = vmatpush3.bf16.msra.mxu1 %v18343_v49  ;;  %v15520_v49 = vld [vmem:[%s21545_s28 + $0x760] ss:$16 sps:$4 sm:$0xff]   ;;  %v18596_v61 = vpop.xlane.xlu1 %737 }
 0x20e   :  { %3879 = vmatmul.mubr.bf16.gmra.mrb[232].mxu1 %v15515_v43  ;;  %3789 = vmatprep.mubr.bf16.mxu0 %v15516_v18  ;;  %21546 = vst [vmem:[#allocation6_spill] sm:$0xff] %v18596_v61 }
 0x20f   :  { %2119 = vadd.xlane.f32.xlu0 %v2085_v58  ;;  %v2088_v2 = vadd.f32 %v14150_v47, %v14086_v27  ;;  %3886 = vmatprep.mubr.bf16.mxu1 %v15518_v10  ;;  %v15533_v47 = vld [vmem:[%s21545_s28 + $0x7a8] ss:$16 sps:$4 sm:$0xff]  }
 0x210   :  { %v14167_v34 = vpop.f32.mrb[128].mxu0  ;;  %14671 = vmatprep.subr.bf16.mxu0 %v18358_v52  ;;  %14735 = vmatprep.subr.bf16.mxu1 %v18364_v53  ;;  %v15522_v52 = vld [vmem:[%s21545_s28 + $0x784] ss:$16 sps:$4 sm:$0xff]  }
 0x211   :  { %v14231_v21 = vpop.f32.mrb[128].mxu1  ;;  %2121 = vadd.xlane.f32.xlu1 %v2088_v2  ;;  %v14168_v14 = vpop.f32.mrb[129].mxu0  ;;  %14672 = vmatpush3.bf16.msra.mxu0 %v18370_v36  ;;  %v15524_v36 = vld [vmem:[%s21545_s28 + $0x78c] ss:$16 sps:$4 sm:$0xff]  }
 0x212   :  { %v14169_v23 = vadd.f32 %v14168_v14, %v14167_v34  ;;  %v14232_v24 = vpop.f32.mrb[129].mxu1  ;;  %v14170_v38 = vpop.f32.mrb[130].mxu0  ;;  %14736 = vmatpush3.bf16.msra.mxu1 %v18376_v59  ;;  %14673 = vmatprep.subr.bf16.mxu0 %v18382_v46 }
 0x213   :  { %v14234_v53 = vpop.f32.mrb[130].mxu1  ;;  %v14171_v57 = vpop.f32.mrb[131].mxu0  ;;  %v14233_v3 = vadd.f32 %v14232_v24, %v14231_v21  ;;  %14737 = vmatprep.subr.bf16.mxu1 %v18391_v63  ;;  %v15536_v21 = vld [vmem:[%s21545_s28 + $0x7cc] ss:$16 sps:$4 sm:$0xff]  }
 0x214   :  { %v14172_v62 = vadd.f32 %v14171_v57, %v14170_v38  ;;  %v14235_v60 = vpop.f32.mrb[131].mxu1  ;;  %v18598_v59 = vpop.xlane.xlu0 %735 }
 0x215   :  { %3790 = vmatmul.mubr.bf16.gmra.mrb[236].mxu0 %v15520_v49  ;;  %v2488_v5 = vadd.f32 %v14233_v3, %v14169_v23  ;;  %v14236_v35 = vadd.f32 %v14235_v60, %v14234_v53  ;;  %21547 = vst [vmem:[#allocation7_spill] sm:$0xff] %v18598_v59  ;;  %v18600_v17 = vpop.xlane.xlu1 %741 }
 0x216   :  { %3887 = vmatmul.mubr.bf16.gmra.mrb[236].mxu1 %v15521_v39  ;;  %3797 = vmatprep.mubr.bf16.mxu0 %v15522_v52  ;;  %21548 = vst [vmem:[#allocation8_spill] sm:$0xff] %v18600_v17 }
 0x217   :  { %2550 = vadd.xlane.f32.xlu0 %v2488_v5  ;;  %v2491_v46 = vadd.f32 %v14236_v35, %v14172_v62  ;;  %3894 = vmatprep.mubr.bf16.mxu1 %v15524_v36  ;;  %v15538_v36 = vld [vmem:[%s21545_s28 + $0x7c0] ss:$16 sps:$4 sm:$0xff]   ;;  %v15539_v35 = vld [vmem:[%s21545_s28 + $0x7c8] ss:$16 sps:$4 sm:$0xff]  }
 0x218   :  { %v14173_v13 = vpop.f32.mrb[132].mxu0  ;;  %14674 = vmatpush3.bf16.msra.mxu0 %v18406_v6  ;;  %14738 = vmatpush3.bf16.msra.mxu1 %v18412_v7  ;;  %v15528_v6 = vld [vmem:[%s21545_s28 + $0x7a4] ss:$16 sps:$4 sm:$0xff]  }
 0x219   :  { %v14237_v63 = vpop.f32.mrb[132].mxu1  ;;  %2552 = vadd.xlane.f32.xlu1 %v2491_v46  ;;  %v14174_v55 = vpop.f32.mrb[133].mxu0  ;;  %14675 = vmatprep.subr.bf16.mxu0 %v18418_v11  ;;  %v15530_v11 = vld [vmem:[%s21545_s28 + $0x7ac] ss:$16 sps:$4 sm:$0xff]   ;;  %v15540_v46 = vld [vmem:[%s21545_s28 + $0x7e4] ss:$16 sps:$4 sm:$0xff]  }
 0x21a   :  { %v14175_v12 = vadd.f32 %v14174_v55, %v14173_v13  ;;  %v14238_v29 = vpop.f32.mrb[133].mxu1  ;;  %v14176_v0 = vpop.f32.mrb[134].mxu0  ;;  %14739 = vmatprep.subr.bf16.mxu1 %v18424_v26 }
 0x21b   :  { %v14240_v7 = vpop.f32.mrb[134].mxu1  ;;  %v14177_v40 = vpop.f32.mrb[135].mxu0  ;;  %v14239_v42 = vadd.f32 %v14238_v29, %v14237_v63 }
 0x21c   :  { %v18618_v30 = vpop.xlane.xlu1 %745  ;;  %v14178_v32 = vadd.f32 %v14177_v40, %v14176_v0  ;;  %v14241_v43 = vpop.f32.mrb[135].mxu1  ;;  %14676 = vmatpush3.bf16.msra.mxu0 %v18433_v25  ;;  %14740 = vmatpush3.bf16.msra.mxu1 %v18439_v44 }
 0x21d   :  { %3798 = vmatmul.mubr.bf16.gmra.mrb[240].mxu0 %v15526_v9  ;;  %v2496_v18 = vadd.f32 %v14239_v42, %v14175_v12  ;;  %v14242_v20 = vadd.f32 %v14241_v43, %v14240_v7  ;;  %14677 = vmatprep.subr.bf16.mxu0 %v18445_v22  ;;  %v18623_v26 = vpop.xlane.xlu0 %739  ;;  %v15532_v22 = vld [vmem:[%s21545_s28 + $0x7a0] ss:$16 sps:$4 sm:$0xff]   ;;  %v15542_v9 = vld [vmem:[%s21545_s28 + $0x7ec] ss:$16 sps:$4 sm:$0xff]  }
 0x21e   :  { %3895 = vmatmul.mubr.bf16.gmra.mrb[240].mxu1 %v15527_v33  ;;  %3805 = vmatprep.mubr.bf16.mxu0 %v15528_v6  ;;  %21549 = vst [vmem:[#allocation9_spill] sm:$0xff] %v18623_v26 }
 0x21f   :  { %2554 = vadd.xlane.f32.xlu0 %v2496_v18  ;;  %v2499_v51 = vadd.f32 %v14242_v20, %v14178_v32  ;;  %3902 = vmatprep.mubr.bf16.mxu1 %v15530_v11  ;;  %v15544_v18 = vld [vmem:[%s21545_s28 + $0x7e0] ss:$16 sps:$4 sm:$0xff]  }
 0x220   :  { %v18625_v54 = vpop.xlane.xlu1 %1173  ;;  %v14179_v10 = vpop.f32.mrb[136].mxu0  ;;  %14741 = vmatprep.subr.bf16.mxu1 %v18460_v48  ;;  %14678 = vmatpush3.bf16.msra.mxu0 %v18466_v56  ;;  %v15534_v48 = vld [vmem:[%s21545_s28 + $0x7c4] ss:$16 sps:$4 sm:$0xff]  }
 0x221   :  { %v14243_v25 = vpop.f32.mrb[136].mxu1  ;;  %2556 = vadd.xlane.f32.xlu1 %v2499_v51  ;;  %v14180_v44 = vpop.f32.mrb[137].mxu0  ;;  %14742 = vmatpush3.bf16.msra.mxu1 %v18472_v41 }
 0x222   :  { %v14181_v27 = vadd.f32 %v14180_v44, %v14179_v10  ;;  %v14244_v31 = vpop.f32.mrb[137].mxu1  ;;  %v14182_v58 = vpop.f32.mrb[138].mxu0  ;;  %v15548_v44 = vld [vmem:[%s21545_s28 + $0x804] ss:$16 sps:$4 sm:$0xff]  }
 0x223   :  { %v14245_v56 = vadd.f32 %v14244_v31, %v14243_v25  ;;  %v14246_v2 = vpop.f32.mrb[138].mxu1  ;;  %v14183_v34 = vpop.f32.mrb[139].mxu0  ;;  %v15545_v25 = vld [vmem:[%s21545_s28 + $0x7e8] ss:$16 sps:$4 sm:$0xff]  }
 0x224   :  { %v18642_v14 = vpop.xlane.xlu0 %743  ;;  %v14184_v41 = vadd.f32 %v14183_v34, %v14182_v58  ;;  %v14247_v49 = vpop.f32.mrb[139].mxu1  ;;  %v15551_v58 = vld [vmem:[%s21545_s28 + $0x80c] ss:$16 sps:$4 sm:$0xff]  }
 0x225   :  { %21550 = vst [vmem:[#allocation10_spill] sm:$0xff] %v18642_v14  ;;  %v14248_v23 = vadd.f32 %v14247_v49, %v14246_v2  ;;  %3806 = vmatmul.mubr.bf16.gmra.mrb[244].mxu0 %v15532_v22  ;;  %v2504_v24 = vadd.f32 %v14245_v56, %v14181_v27  ;;  %v18644_v38 = vpop.xlane.xlu1 %1175 }
 0x226   :  { %3903 = vmatmul.mubr.bf16.gmra.mrb[244].mxu1 %v15533_v47  ;;  %3813 = vmatprep.mubr.bf16.mxu0 %v15534_v48 }
 0x227   :  { %2558 = vadd.xlane.f32.xlu0 %v2504_v24  ;;  %v2507_v39 = vadd.f32 %v14248_v23, %v14184_v41  ;;  %3910 = vmatprep.mubr.bf16.mxu1 %v15536_v21 }
 0x228   :  { %v18646_v52 = vpop.xlane.xlu0 %1177  ;;  %v14185_v53 = vpop.f32.mrb[140].mxu0 }
 0x229   :  { %v14249_v57 = vpop.f32.mrb[140].mxu1  ;;  %2560 = vadd.xlane.f32.xlu1 %v2507_v39  ;;  %v14186_v3 = vpop.f32.mrb[141].mxu0 }
 0x22a   :  { %v14187_v62 = vadd.f32 %v14186_v3, %v14185_v53  ;;  %v14250_v60 = vpop.f32.mrb[141].mxu1  ;;  %v14188_v5 = vpop.f32.mrb[142].mxu0  ;;  %v15546_v53 = vld [vmem:[%s21545_s28 + $0x800] ss:$16 sps:$4 sm:$0xff]  }
 0x22b   :  { %v14251_v13 = vadd.f32 %v14250_v60, %v14249_v57  ;;  %v14252_v63 = vpop.f32.mrb[142].mxu1  ;;  %v14189_v55 = vpop.f32.mrb[143].mxu0  ;;  %v15554_v60 = vld [vmem:[%s21545_s28 + $0x824] ss:$16 sps:$4 sm:$0xff]  }
 0x22c   :  { %v18660_v12 = vpop.xlane.xlu1 %1179  ;;  %v14190_v29 = vadd.f32 %v14189_v55, %v14188_v5  ;;  %v14253_v0 = vpop.f32.mrb[143].mxu1 }
 0x22d   :  { %v14254_v33 = vadd.f32 %v14253_v0, %v14252_v63  ;;  %3814 = vmatmul.mubr.bf16.gmra.mrb[248].mxu0 %v15538_v36  ;;  %v2512_v6 = vadd.f32 %v14251_v13, %v14187_v62  ;;  %v18662_v7 = vpop.xlane.xlu0 %1181  ;;  %v15549_v62 = vld [vmem:[%s21545_s28 + $0x808] ss:$16 sps:$4 sm:$0xff]   ;;  %v15557_v13 = vld [vmem:[%s21545_s28 + $0x82c] ss:$16 sps:$4 sm:$0xff]  }
 0x22e   :  { %3911 = vmatmul.mubr.bf16.gmra.mrb[248].mxu1 %v15539_v35  ;;  %3821 = vmatprep.mubr.bf16.mxu0 %v15540_v46 }
 0x22f   :  { %2562 = vadd.xlane.f32.xlu0 %v2512_v6  ;;  %v2515_v40 = vadd.f32 %v14254_v33, %v14190_v29  ;;  %3918 = vmatprep.mubr.bf16.mxu1 %v15542_v9 }
 0x230   :  { %v18664_v42 = vpop.xlane.xlu1 %1183  ;;  %v14191_v11 = vpop.f32.mrb[144].mxu0 }
 0x231   :  { %v14255_v32 = vpop.f32.mrb[144].mxu1  ;;  %2564 = vadd.xlane.f32.xlu1 %v2515_v40  ;;  %v14192_v43 = vpop.f32.mrb[145].mxu0 }
 0x232   :  { %v14193_v20 = vadd.f32 %v14192_v43, %v14191_v11  ;;  %v14256_v51 = vpop.f32.mrb[145].mxu1  ;;  %v14194_v10 = vpop.f32.mrb[146].mxu0 }
 0x233   :  { %v14257_v22 = vadd.f32 %v14256_v51, %v14255_v32  ;;  %v14258_v27 = vpop.f32.mrb[146].mxu1  ;;  %v14195_v31 = vpop.f32.mrb[147].mxu0 }
 0x234   :  { %v18678_v47 = vpop.xlane.xlu0 %1185  ;;  %v14196_v48 = vadd.f32 %v14195_v31, %v14194_v10  ;;  %v14259_v56 = vpop.f32.mrb[147].mxu1 }
 0x235   :  { %v14260_v2 = vadd.f32 %v14259_v56, %v14258_v27  ;;  %3822 = vmatmul.mubr.bf16.gmra.mrb[252].mxu0 %v15544_v18  ;;  %v2520_v34 = vadd.f32 %v14257_v22, %v14193_v20  ;;  %v18680_v21 = vpop.xlane.xlu1 %1187  ;;  %v15552_v18 = vld [vmem:[%s21545_s28 + $0x820] ss:$16 sps:$4 sm:$0xff]  }
 0x236   :  { %3919 = vmatmul.mubr.bf16.gmra.mrb[252].mxu1 %v15545_v25  ;;  %4224 = vmatprep.mubr.bf16.mxu0 %v15548_v44  ;;  %v15555_v25 = vld [vmem:[%s21545_s28 + $0x828] ss:$16 sps:$4 sm:$0xff]   ;;  %v15560_v44 = vld [vmem:[%s21545_s28 + $0x844] ss:$16 sps:$4 sm:$0xff]  }
 0x237   :  { %2566 = vadd.xlane.f32.xlu0 %v2520_v34  ;;  %v2523_v41 = vadd.f32 %v14260_v2, %v14196_v48  ;;  %4321 = vmatprep.mubr.bf16.mxu1 %v15551_v58  ;;  %v15563_v58 = vld [vmem:[%s21545_s28 + $0x84c] ss:$16 sps:$4 sm:$0xff]  }
 0x238   :  { %v18682_v49 = vpop.xlane.xlu0 %1189  ;;  %v14197_v23 = vpop.f32.mrb[148].mxu0 }
 0x239   :  { %v14261_v24 = vpop.f32.mrb[148].mxu1  ;;  %2568 = vadd.xlane.f32.xlu1 %v2523_v41  ;;  %v14198_v39 = vpop.f32.mrb[149].mxu0 }
 0x23a   :  { %v14199_v57 = vadd.f32 %v14198_v39, %v14197_v23  ;;  %v14262_v3 = vpop.f32.mrb[149].mxu1  ;;  %v14200_v36 = vpop.f32.mrb[150].mxu0 }
 0x23b   :  { %v14263_v5 = vadd.f32 %v14262_v3, %v14261_v24  ;;  %v14264_v35 = vpop.f32.mrb[150].mxu1  ;;  %v14201_v46 = vpop.f32.mrb[151].mxu0 }
 0x23c   :  { %v18696_v63 = vpop.xlane.xlu1 %1191  ;;  %v14202_v55 = vadd.f32 %v14201_v46, %v14200_v36  ;;  %v14265_v9 = vpop.f32.mrb[151].mxu1  ;;  %v15558_v36 = vld [vmem:[%s21545_s28 + $0x840] ss:$16 sps:$4 sm:$0xff]   ;;  %v15566_v46 = vld [vmem:[%s21545_s28 + $0x864] ss:$16 sps:$4 sm:$0xff]  }
 0x23d   :  { %v14266_v29 = vadd.f32 %v14265_v9, %v14264_v35  ;;  %4225 = vmatmul.mubr.bf16.vlgmr.msra.gmra.mrb[0].mxu0 %v15546_v53  ;;  %v2528_v0 = vadd.f32 %v14263_v5, %v14199_v57  ;;  %v18698_v33 = vpop.xlane.xlu0 %1193  ;;  %v15561_v35 = vld [vmem:[%s21545_s28 + $0x848] ss:$16 sps:$4 sm:$0xff]  }
 0x23e   :  { %4322 = vmatmul.mubr.bf16.vlgmr.msra.gmra.mrb[0].mxu1 %v15549_v62  ;;  %4232 = vmatprep.mubr.bf16.mxu0 %v15554_v60 }
 0x23f   :  { %2570 = vadd.xlane.f32.xlu0 %v2528_v0  ;;  %v2531_v6 = vadd.f32 %v14266_v29, %v14202_v55  ;;  %4329 = vmatprep.mubr.bf16.mxu1 %v15557_v13  ;;  %v15569_v29 = vld [vmem:[%s21545_s28 + $0x86c] ss:$16 sps:$4 sm:$0xff]  }
 0x240   :  { %v18700_v40 = vpop.xlane.xlu1 %1195  ;;  %v14203_v11 = vpop.f32.mrb[152].mxu0 }
 0x241   :  { %21551 = vst [vmem:[#allocation11_spill] sm:$0xff] %v18700_v40  ;;  %v14267_v32 = vpop.f32.mrb[152].mxu1  ;;  %2572 = vadd.xlane.f32.xlu1 %v2531_v6  ;;  %v14204_v43 = vpop.f32.mrb[153].mxu0 }
 0x242   :  { %v14205_v20 = vadd.f32 %v14204_v43, %v14203_v11  ;;  %v14268_v51 = vpop.f32.mrb[153].mxu1  ;;  %v14206_v10 = vpop.f32.mrb[154].mxu0 }
 0x243   :  { %v14269_v22 = vadd.f32 %v14268_v51, %v14267_v32  ;;  %v14270_v27 = vpop.f32.mrb[154].mxu1  ;;  %v14207_v31 = vpop.f32.mrb[155].mxu0 }
 0x244   :  { %v18714_v48 = vpop.xlane.xlu0 %1197  ;;  %v14208_v56 = vadd.f32 %v14207_v31, %v14206_v10  ;;  %v14271_v2 = vpop.f32.mrb[155].mxu1 }
 0x245   :  { %21552 = vst [vmem:[#allocation12_spill] sm:$0xff] %v18714_v48  ;;  %v14272_v34 = vadd.f32 %v14271_v2, %v14270_v27  ;;  %4233 = vmatmul.mubr.bf16.gmra.mrb[4].mxu0 %v15552_v18  ;;  %v2536_v41 = vadd.f32 %v14269_v22, %v14205_v20  ;;  %v18716_v23 = vpop.xlane.xlu1 %1199  ;;  %v15564_v22 = vld [vmem:[%s21545_s28 + $0x860] ss:$16 sps:$4 sm:$0xff]   ;;  %v15572_v2 = vld [vmem:[%s21545_s28 + $0x884] ss:$16 sps:$4 sm:$0xff]  }
 0x246   :  { %4330 = vmatmul.mubr.bf16.gmra.mrb[4].mxu1 %v15555_v25  ;;  %4240 = vmatprep.mubr.bf16.mxu0 %v15560_v44  ;;  %21553 = vst [vmem:[#allocation13_spill] sm:$0xff] %v18716_v23 }
 0x247   :  { %2574 = vadd.xlane.f32.xlu0 %v2536_v41  ;;  %v2539_v24 = vadd.f32 %v14272_v34, %v14208_v56  ;;  %4337 = vmatprep.mubr.bf16.mxu1 %v15563_v58  ;;  %v15567_v56 = vld [vmem:[%s21545_s28 + $0x868] ss:$16 sps:$4 sm:$0xff]  }
 0x248   :  { %v18718_v39 = vpop.xlane.xlu0 %1201  ;;  %v14209_v53 = vpop.f32.mrb[156].mxu0 }
 0x249   :  { %21554 = vst [vmem:[#allocation14_spill] sm:$0xff] %v18718_v39  ;;  %v14273_v57 = vpop.f32.mrb[156].mxu1  ;;  %2576 = vadd.xlane.f32.xlu1 %v2539_v24  ;;  %v14210_v3 = vpop.f32.mrb[157].mxu0 }
 0x24a   :  { %v14211_v62 = vadd.f32 %v14210_v3, %v14209_v53  ;;  %v14274_v60 = vpop.f32.mrb[157].mxu1  ;;  %v14212_v5 = vpop.f32.mrb[158].mxu0  ;;  %v15575_v53 = vld [vmem:[%s21545_s28 + $0x88c] ss:$16 sps:$4 sm:$0xff]  }
 0x24b   :  { %v14275_v13 = vadd.f32 %v14274_v60, %v14273_v57  ;;  %v14276_v55 = vpop.f32.mrb[158].mxu1  ;;  %v14213_v9 = vpop.f32.mrb[159].mxu0 }
 0x24c   :  { %v18732_v0 = vpop.xlane.xlu1 %1203  ;;  %v14214_v6 = vadd.f32 %v14213_v9, %v14212_v5  ;;  %v14277_v11 = vpop.f32.mrb[159].mxu1 }
 0x24d   :  { %v14278_v32 = vadd.f32 %v14277_v11, %v14276_v55  ;;  %4241 = vmatmul.mubr.bf16.gmra.mrb[8].mxu0 %v15558_v36  ;;  %v2544_v43 = vadd.f32 %v14275_v13, %v14211_v62  ;;  %v18734_v18 = vpop.xlane.xlu0 %1632 }
 0x24e   :  { %4338 = vmatmul.mubr.bf16.gmra.mrb[8].mxu1 %v15561_v35  ;;  %4248 = vmatprep.mubr.bf16.mxu0 %v15566_v46 }
 0x24f   :  { %2578 = vadd.xlane.f32.xlu0 %v2544_v43  ;;  %v2547_v20 = vadd.f32 %v14278_v32, %v14214_v6  ;;  %4345 = vmatprep.mubr.bf16.mxu1 %v15569_v29  ;;  %v15570_v29 = vld [vmem:[%s21545_s28 + $0x880] ss:$16 sps:$4 sm:$0xff]   ;;  %v15573_v43 = vld [vmem:[%s21545_s28 + $0x888] ss:$16 sps:$4 sm:$0xff]  }
 0x250   :  { %v18736_v51 = vpop.xlane.xlu1 %1634  ;;  %v14295_v10 = vpop.f32.mrb[160].mxu0 }
 0x251   :  { %v14359_v25 = vpop.f32.mrb[160].mxu1  ;;  %2580 = vadd.xlane.f32.xlu1 %v2547_v20  ;;  %v14296_v44 = vpop.f32.mrb[161].mxu0  ;;  %v15578_v20 = vld [vmem:[%s21545_s28 + $0x8a4] ss:$16 sps:$4 sm:$0xff]  }
 0x252   :  { %v14297_v27 = vadd.f32 %v14296_v44, %v14295_v10  ;;  %v14360_v31 = vpop.f32.mrb[161].mxu1  ;;  %v14298_v58 = vpop.f32.mrb[162].mxu0 }
 0x253   :  { %v14361_v34 = vadd.f32 %v14360_v31, %v14359_v25  ;;  %v14362_v41 = vpop.f32.mrb[162].mxu1  ;;  %v14299_v24 = vpop.f32.mrb[163].mxu0 }
 0x254   :  { %v18750_v57 = vpop.xlane.xlu0 %1636  ;;  %v14300_v3 = vadd.f32 %v14299_v24, %v14298_v58  ;;  %v14363_v36 = vpop.f32.mrb[163].mxu1 }
 0x255   :  { %v14364_v62 = vadd.f32 %v14363_v36, %v14362_v41  ;;  %4249 = vmatmul.mubr.bf16.gmra.mrb[12].mxu0 %v15564_v22  ;;  %v2947_v60 = vadd.f32 %v14361_v34, %v14297_v27  ;;  %v18752_v5 = vpop.xlane.xlu1 %1638  ;;  %v15581_v22 = vld [vmem:[%s21545_s28 + $0x8ac] ss:$16 sps:$4 sm:$0xff]  }
 0x256   :  { %4346 = vmatmul.mubr.bf16.gmra.mrb[12].mxu1 %v15567_v56  ;;  %4256 = vmatprep.mubr.bf16.mxu0 %v15572_v2 }
 0x257   :  { %3009 = vadd.xlane.f32.xlu0 %v2947_v60  ;;  %v2950_v35 = vadd.f32 %v14364_v62, %v14300_v3  ;;  %4353 = vmatprep.mubr.bf16.mxu1 %v15575_v53  ;;  %v15576_v62 = vld [vmem:[%s21545_s28 + $0x8a0] ss:$16 sps:$4 sm:$0xff]  }
 0x258   :  { %v18754_v46 = vpop.xlane.xlu0 %1640  ;;  %v14301_v13 = vpop.f32.mrb[164].mxu0 }
 0x259   :  { %v14365_v55 = vpop.f32.mrb[164].mxu1  ;;  %3011 = vadd.xlane.f32.xlu1 %v2950_v35  ;;  %v14302_v9 = vpop.f32.mrb[165].mxu0 }
 0x25a   :  { %v14303_v6 = vadd.f32 %v14302_v9, %v14301_v13  ;;  %v14366_v11 = vpop.f32.mrb[165].mxu1  ;;  %v14304_v32 = vpop.f32.mrb[166].mxu0  ;;  %v15584_v9 = vld [vmem:[%s21545_s28 + $0x8c4] ss:$16 sps:$4 sm:$0xff]  }
 0x25b   :  { %v14367_v10 = vadd.f32 %v14366_v11, %v14365_v55  ;;  %v14368_v25 = vpop.f32.mrb[166].mxu1  ;;  %v14305_v44 = vpop.f32.mrb[167].mxu0  ;;  %v15579_v55 = vld [vmem:[%s21545_s28 + $0x8a8] ss:$16 sps:$4 sm:$0xff]  }
 0x25c   :  { %v18768_v27 = vpop.xlane.xlu1 %1642  ;;  %v14306_v31 = vadd.f32 %v14305_v44, %v14304_v32  ;;  %v14369_v58 = vpop.f32.mrb[167].mxu1  ;;  %v15587_v32 = vld [vmem:[%s21545_s28 + $0x8cc] ss:$16 sps:$4 sm:$0xff]  }
 0x25d   :  { %v14370_v56 = vadd.f32 %v14369_v58, %v14368_v25  ;;  %4257 = vmatmul.mubr.bf16.gmra.mrb[16].mxu0 %v15570_v29  ;;  %v2955_v2 = vadd.f32 %v14367_v10, %v14303_v6  ;;  %v18770_v34 = vpop.xlane.xlu0 %1644 }
 0x25e   :  { %4354 = vmatmul.mubr.bf16.gmra.mrb[16].mxu1 %v15573_v43  ;;  %4264 = vmatprep.mubr.bf16.mxu0 %v15578_v20 }
 0x25f   :  { %3013 = vadd.xlane.f32.xlu0 %v2955_v2  ;;  %v2958_v41 = vadd.f32 %v14370_v56, %v14306_v31  ;;  %4361 = vmatprep.mubr.bf16.mxu1 %v15581_v22 }
 0x260   :  { %v18772_v24 = vpop.xlane.xlu1 %1646  ;;  %v14307_v53 = vpop.f32.mrb[168].mxu0 }
 0x261   :  { %v14371_v3 = vpop.f32.mrb[168].mxu1  ;;  %3015 = vadd.xlane.f32.xlu1 %v2958_v41  ;;  %v14308_v36 = vpop.f32.mrb[169].mxu0 }
 0x262   :  { %v14309_v60 = vadd.f32 %v14308_v36, %v14307_v53  ;;  %v14372_v35 = vpop.f32.mrb[169].mxu1  ;;  %v14310_v13 = vpop.f32.mrb[170].mxu0  ;;  %v15582_v53 = vld [vmem:[%s21545_s28 + $0x8c0] ss:$16 sps:$4 sm:$0xff]  }
 0x263   :  { %v14373_v29 = vadd.f32 %v14372_v35, %v14371_v3  ;;  %v14374_v6 = vpop.f32.mrb[170].mxu1  ;;  %v14311_v11 = vpop.f32.mrb[171].mxu0  ;;  %v15590_v35 = vld [vmem:[%s21545_s28 + $0x8e4] ss:$16 sps:$4 sm:$0xff]  }
 0x264   :  { %v18786_v43 = vpop.xlane.xlu0 %1648  ;;  %v14312_v20 = vadd.f32 %v14311_v11, %v14310_v13  ;;  %v14375_v10 = vpop.f32.mrb[171].mxu1 }
 0x265   :  { %v14376_v25 = vadd.f32 %v14375_v10, %v14374_v6  ;;  %4265 = vmatmul.mubr.bf16.gmra.mrb[20].mxu0 %v15576_v62  ;;  %v2963_v44 = vadd.f32 %v14373_v29, %v14309_v60  ;;  %v18788_v22 = vpop.xlane.xlu1 %1650  ;;  %v15585_v60 = vld [vmem:[%s21545_s28 + $0x8c8] ss:$16 sps:$4 sm:$0xff]   ;;  %v15593_v29 = vld [vmem:[%s21545_s28 + $0x8ec] ss:$16 sps:$4 sm:$0xff]  }
 0x266   :  { %4362 = vmatmul.mubr.bf16.gmra.mrb[20].mxu1 %v15579_v55  ;;  %4272 = vmatprep.mubr.bf16.mxu0 %v15584_v9 }
 0x267   :  { %3017 = vadd.xlane.f32.xlu0 %v2963_v44  ;;  %v2966_v31 = vadd.f32 %v14376_v25, %v14312_v20  ;;  %4369 = vmatprep.mubr.bf16.mxu1 %v15587_v32 }
 0x268   :  { %v18790_v58 = vpop.xlane.xlu0 %1652  ;;  %v14313_v56 = vpop.f32.mrb[172].mxu0 }
 0x269   :  { %21555 = vst [vmem:[#allocation15_spill] sm:$0xff] %v18790_v58  ;;  %v14377_v2 = vpop.f32.mrb[172].mxu1  ;;  %3019 = vadd.xlane.f32.xlu1 %v2966_v31  ;;  %v14314_v41 = vpop.f32.mrb[173].mxu0 }
 0x26a   :  { %v14315_v3 = vadd.f32 %v14314_v41, %v14313_v56  ;;  %v14378_v36 = vpop.f32.mrb[173].mxu1  ;;  %v14316_v62 = vpop.f32.mrb[174].mxu0 }
 0x26b   :  { %v14379_v13 = vadd.f32 %v14378_v36, %v14377_v2  ;;  %v14380_v55 = vpop.f32.mrb[174].mxu1  ;;  %v14317_v9 = vpop.f32.mrb[175].mxu0  ;;  %v15588_v36 = vld [vmem:[%s21545_s28 + $0x8e0] ss:$16 sps:$4 sm:$0xff]  }
 0x26c   :  { %v18804_v6 = vpop.xlane.xlu1 %1654  ;;  %v14318_v11 = vadd.f32 %v14317_v9, %v14316_v62  ;;  %v14381_v32 = vpop.f32.mrb[175].mxu1 }
 0x26d   :  { %21556 = vst [vmem:[#allocation16_spill] sm:$0xff] %v18804_v6  ;;  %v14382_v20 = vadd.f32 %v14381_v32, %v14380_v55  ;;  %4273 = vmatmul.mubr.bf16.gmra.mrb[24].mxu0 %v15582_v53  ;;  %v2971_v10 = vadd.f32 %v14379_v13, %v14315_v3  ;;  %v18806_v25 = vpop.xlane.xlu0 %1656 }
 0x26e   :  { %4370 = vmatmul.mubr.bf16.gmra.mrb[24].mxu1 %v15585_v60  ;;  %4280 = vmatprep.mubr.bf16.mxu0 %v15590_v35  ;;  %21557 = vst [vmem:[#allocation17_spill] sm:$0xff] %v18806_v25  ;;  %v15591_v60 = vld [vmem:[%s21545_s28 + $0x8e8] ss:$16 sps:$4 sm:$0xff]  }
 0x26f   :  { %3021 = vadd.xlane.f32.xlu0 %v2971_v10  ;;  %v2974_v44 = vadd.f32 %v14382_v20, %v14318_v11  ;;  %4377 = vmatprep.mubr.bf16.mxu1 %v15593_v29 }
 0x270   :  { %v18808_v31 = vpop.xlane.xlu1 %1658  ;;  %v14319_v56 = vpop.f32.mrb[176].mxu0 }
 0x271   :  { %21558 = vst [vmem:[#allocation18_spill] sm:$0xff] %v18808_v31  ;;  %v14383_v2 = vpop.f32.mrb[176].mxu1  ;;  %3023 = vadd.xlane.f32.xlu1 %v2974_v44  ;;  %v14320_v41 = vpop.f32.mrb[177].mxu0 }
 0x272   :  { %v14321_v62 = vadd.f32 %v14320_v41, %v14319_v56  ;;  %v14384_v53 = vpop.f32.mrb[177].mxu1  ;;  %v14322_v3 = vpop.f32.mrb[178].mxu0 }
 0x273   :  { %v14385_v35 = vadd.f32 %v14384_v53, %v14383_v2  ;;  %v14386_v13 = vpop.f32.mrb[178].mxu1  ;;  %v14323_v55 = vpop.f32.mrb[179].mxu0 }
 0x274   :  { %v18816_v9 = vpop.xlane.xlu0 %1660  ;;  %v14324_v29 = vadd.f32 %v14323_v55, %v14322_v3  ;;  %v14387_v11 = vpop.f32.mrb[179].mxu1 }
 0x275   :  { %21559 = vst [vmem:[#allocation19_spill] sm:$0xff] %v18816_v9  ;;  %v14388_v32 = vadd.f32 %v14387_v11, %v14386_v13  ;;  %4281 = vmatmul.mubr.bf16.gmra.mrb[28].mxu0 %v15588_v36  ;;  %v2979_v20 = vadd.f32 %v14385_v35, %v14321_v62  ;;  %v18818_v10 = vpop.xlane.xlu1 %1662 }
 0x276   :  { %4378 = vmatmul.mubr.bf16.gmra.mrb[28].mxu1 %v15591_v60 }
 0x277   :  { %3025 = vadd.xlane.f32.xlu0 %v2979_v20  ;;  %v2982_v44 = vadd.f32 %v14388_v32, %v14324_v29 }
 0x278   :  { %v18820_v56 = vpop.xlane.xlu0 %2091  ;;  %v14325_v41 = vpop.f32.mrb[180].mxu0 }
 0x279   :  { %v14389_v14 = vpop.f32.mrb[180].mxu1  ;;  %3027 = vadd.xlane.f32.xlu1 %v2982_v44  ;;  %v14326_v2 = vpop.f32.mrb[181].mxu0 }
 0x27a   :  { %v14327_v53 = vadd.f32 %v14326_v2, %v14325_v41  ;;  %v14390_v39 = vpop.f32.mrb[181].mxu1  ;;  %v14328_v31 = vpop.f32.mrb[182].mxu0 }
 0x27b   :  { %v14391_v9 = vadd.f32 %v14390_v39, %v14389_v14  ;;  %v14392_v3 = vpop.f32.mrb[182].mxu1  ;;  %v14329_v55 = vpop.f32.mrb[183].mxu0 }
 0x27c   :  { %v18822_v13 = vpop.xlane.xlu1 %2093  ;;  %v14330_v36 = vadd.f32 %v14329_v55, %v14328_v31  ;;  %v14393_v62 = vpop.f32.mrb[183].mxu1 }
 0x27d   :  { %v14394_v60 = vadd.f32 %v14393_v62, %v14392_v3  ;;  %v2987_v35 = vadd.f32 %v14391_v9, %v14327_v53  ;;  %v18824_v11 = vpop.xlane.xlu0 %2095 }
 0x27f   :  { %3029 = vadd.xlane.f32.xlu0 %v2987_v35  ;;  %v2990_v29 = vadd.f32 %v14394_v60, %v14330_v36 }
 0x280   :  { %v18826_v32 = vpop.xlane.xlu1 %2097  ;;  %v14331_v20 = vpop.f32.mrb[184].mxu0 }
 0x281   :  { %v14395_v44 = vpop.f32.mrb[184].mxu1  ;;  %3031 = vadd.xlane.f32.xlu1 %v2990_v29  ;;  %v14332_v41 = vpop.f32.mrb[185].mxu0 }
 0x282   :  { %v14333_v2 = vadd.f32 %v14332_v41, %v14331_v20  ;;  %v14396_v14 = vpop.f32.mrb[185].mxu1  ;;  %v14334_v39 = vpop.f32.mrb[186].mxu0 }
 0x283   :  { %v14397_v17 = vadd.f32 %v14396_v14, %v14395_v44  ;;  %v14398_v25 = vpop.f32.mrb[186].mxu1  ;;  %v14335_v23 = vpop.f32.mrb[187].mxu0 }
 0x284   :  { %v18828_v31 = vpop.xlane.xlu0 %2099  ;;  %v14336_v3 = vadd.f32 %v14335_v23, %v14334_v39  ;;  %v14399_v9 = vpop.f32.mrb[187].mxu1 }
 0x285   :  { %v14400_v53 = vadd.f32 %v14399_v9, %v14398_v25  ;;  %v2995_v55 = vadd.f32 %v14397_v17, %v14333_v2  ;;  %v18830_v62 = vpop.xlane.xlu1 %2101 }
 0x287   :  { %3033 = vadd.xlane.f32.xlu0 %v2995_v55  ;;  %v2998_v36 = vadd.f32 %v14400_v53, %v14336_v3 }
 0x288   :  { %v18832_v60 = vpop.xlane.xlu0 %2103  ;;  %v14337_v35 = vpop.f32.mrb[188].mxu0 }
 0x289   :  { %v14401_v29 = vpop.f32.mrb[188].mxu1  ;;  %3035 = vadd.xlane.f32.xlu1 %v2998_v36  ;;  %v14338_v20 = vpop.f32.mrb[189].mxu0 }
 0x28a   :  { %v14339_v41 = vadd.f32 %v14338_v20, %v14337_v35  ;;  %v14402_v44 = vpop.f32.mrb[189].mxu1  ;;  %v14340_v14 = vpop.f32.mrb[190].mxu0 }
 0x28b   :  { %v14403_v26 = vadd.f32 %v14402_v44, %v14401_v29  ;;  %v14404_v48 = vpop.f32.mrb[190].mxu1  ;;  %v14341_v6 = vpop.f32.mrb[191].mxu0 }
 0x28c   :  { %v18834_v23 = vpop.xlane.xlu1 %2105  ;;  %v14342_v25 = vadd.f32 %v14341_v6, %v14340_v14  ;;  %v14405_v17 = vpop.f32.mrb[191].mxu1 }
 0x28d   :  { %v14406_v2 = vadd.f32 %v14405_v17, %v14404_v48  ;;  %v3003_v39 = vadd.f32 %v14403_v26, %v14339_v41  ;;  %v18836_v9 = vpop.xlane.xlu0 %2107 }
 0x28f   :  { %3037 = vadd.xlane.f32.xlu0 %v3003_v39  ;;  %v3006_v3 = vadd.f32 %v14406_v2, %v14342_v25  ;;  %v18847_v2 = vld [vmem:[%s21524_s2 + $0x1] ss:$0 sm:$0xff] }
 0x290   :  { %v18838_v53 = vpop.xlane.xlu1 %2109  ;;  %v14423_v55 = vpop.f32.mrb[192].mxu0 }
 0x291   :  { %v14487_v36 = vpop.f32.mrb[192].mxu1  ;;  %3039 = vadd.xlane.f32.xlu1 %v3006_v3  ;;  %v14424_v35 = vpop.f32.mrb[193].mxu0 }
 0x292   :  { %v14425_v20 = vadd.f32 %v14424_v35, %v14423_v55  ;;  %v14488_v29 = vpop.f32.mrb[193].mxu1  ;;  %v14426_v44 = vpop.f32.mrb[194].mxu0  ;;  %v1228_v55 = vmul.f32 %v18847_v2, %v18732_v0 }
 0x293   :  { %v14489_v61 = vadd.f32 %v14488_v29, %v14487_v36  ;;  %v14490_v58 = vpop.f32.mrb[194].mxu1  ;;  %v14427_v40 = vpop.f32.mrb[195].mxu0 }
 0x294   :  { %v18840_v6 = vpop.xlane.xlu1 %2113  ;;  %v14428_v48 = vadd.f32 %v14427_v40, %v14426_v44  ;;  %v14491_v26 = vpop.f32.mrb[195].mxu1 }
 0x295   :  { %21560 = vst [vmem:[#allocation20_spill] sm:$0xff] %v18840_v6  ;;  %v14492_v41 = vadd.f32 %v14491_v26, %v14490_v58  ;;  %v3406_v14 = vadd.f32 %v14489_v61, %v14425_v20  ;;  %v18842_v17 = vpop.xlane.xlu0 %2111  ;;  %v18856_v61 = vld [vmem:[%s21524_s2] ss:$0 sm:$0xff]  ;;  %v18861_v58 = vld [vmem:[%s21524_s2 + $0x2] ss:$0 sm:$0xff]  ;;  %v1213_v6 = vmul.f32 %v18847_v2, %v18625_v54 }
 0x296   :  { %21561 = vst [vmem:[#allocation21_spill] sm:$0xff] %v18842_v17  ;;  %v769_v44 = vmul.f32 %v18856_v61, %v18618_v30  ;;  %v1687_v0 = vmul.f32 %v18861_v58, %v18818_v10  ;;  %v754_v59 = vmul.f32 %v18856_v61, %v18499_v37  ;;  %v1214_v30 = vmul.f32 %v18847_v2, %v18644_v38  ;;  %v18878_v10 = vld [vmem:[%s21524_s2 + $0x3] ss:$0 sm:$0xff] }
 0x297   :  { %3468 = vadd.xlane.f32.xlu0 %v3406_v14  ;;  %v3409_v25 = vadd.f32 %v14492_v41, %v14428_v48  ;;  %v755_v37 = vmul.f32 %v18856_v61, %v18513_v19  ;;  %v1673_v38 = vmul.f32 %v18861_v58, %v18736_v51  ;;  %v18896_v19 = vld [vmem:[%s21524_s2 + $0x4] ss:$0 sm:$0xff] }
 0x298   :  { %v18849_v39 = vpop.xlane.xlu1 %2117  ;;  %v14429_v3 = vpop.f32.mrb[196].mxu0  ;;  %v1244_v17 = vadd.f32 %v1228_v55, %v769_v44  ;;  %v1229_v44 = vadd.f32 %v1213_v6, %v754_v59  ;;  %v2132_v59 = vmul.f32 %v18878_v10, %v18822_v13  ;;  %v1216_v13 = vmul.f32 %v18847_v2, %v18660_v12 }
 0x299   :  { %21562 = vst [vmem:[#allocation22_spill] sm:$0xff] %v18849_v39  ;;  %v14493_v36 = vpop.f32.mrb[196].mxu1  ;;  %3470 = vadd.xlane.f32.xlu1 %v3409_v25  ;;  %v14430_v40 = vpop.f32.mrb[197].mxu0  ;;  %v2133_v12 = vmul.f32 %v18878_v10, %v18824_v11 }
 0x29a   :  { %v14431_v35 = vadd.f32 %v14430_v40, %v14429_v3  ;;  %v14494_v20 = vpop.f32.mrb[197].mxu1  ;;  %v14432_v29 = vpop.f32.mrb[198].mxu0 }
 0x29b   :  { %v14495_v48 = vadd.f32 %v14494_v20, %v14493_v36  ;;  %v14496_v26 = vpop.f32.mrb[198].mxu1  ;;  %v14433_v41 = vpop.f32.mrb[199].mxu0  ;;  %v1672_v20 = vmul.f32 %v18861_v58, %v18734_v18 }
 0x29c   :  { %v18867_v14 = vpop.xlane.xlu0 %2115  ;;  %v14434_v25 = vadd.f32 %v14433_v41, %v14432_v29  ;;  %v14497_v39 = vpop.f32.mrb[199].mxu1  ;;  %v1703_v29 = vadd.f32 %v1687_v0, %v1244_v17  ;;  %v1230_v0 = vadd.f32 %v1214_v30, %v755_v37 }
 0x29d   :  { %v3414_v3 = vadd.f32 %v14495_v48, %v14431_v35  ;;  %v14498_v40 = vadd.f32 %v14497_v39, %v14496_v26  ;;  %v2131_v48 = vmul.f32 %v18878_v10, %v18820_v56  ;;  %v1688_v51 = vadd.f32 %v1672_v20, %v1229_v44 }
 0x29e   :  { %v2122_v36 = vpop.xlane.xlu1 %2121  ;;  %v756_v20 = vmul.f32 %v18856_v61, %v18524_v50  ;;  %v1674_v44 = vmul.f32 %v18861_v58, %v18750_v57  ;;  %v1675_v50 = vmul.f32 %v18861_v58, %v18752_v5 }
 0x29f   :  { %v3417_v54 = vadd.f32 %v14498_v40, %v14434_v25  ;;  %v2146_v55 = vmul.f32 %v18878_v10, %v2122_v36  ;;  %3472 = vadd.xlane.f32.xlu0 %v3414_v3  ;;  %v1215_v36 = vmul.f32 %v18847_v2, %v18646_v52  ;;  %v2147_v37 = vadd.f32 %v2131_v48, %v1688_v51 }
 0x2a0   :  { %v18887_v39 = vpop.xlane.xlu0 %2119  ;;  %v14435_v35 = vpop.f32.mrb[200].mxu0 }
 0x2a1   :  { %v18891_v26 = vadd.f32 %v2146_v55, %v1703_v29  ;;  %v14499_v18 = vpop.f32.mrb[200].mxu1  ;;  %3474 = vadd.xlane.f32.xlu1 %v3417_v54  ;;  %v14436_v17 = vpop.f32.mrb[201].mxu0  ;;  %v1689_v29 = vadd.f32 %v1673_v38, %v1230_v0 }
 0x2a2   :  { %v14437_v41 = vadd.f32 %v14436_v17, %v14435_v35  ;;  %v14500_v25 = vpop.f32.mrb[201].mxu1  ;;  %v14438_v3 = vpop.f32.mrb[202].mxu0 }
 0x2a3   :  { %21563 = vst [vmem:[#allocation23_spill] sm:$0xff] %v18891_v26  ;;  %v14501_v6 = vadd.f32 %v14500_v25, %v14499_v18  ;;  %v14502_v56 = vpop.f32.mrb[202].mxu1  ;;  %v14439_v40 = vpop.f32.mrb[203].mxu0  ;;  %v2148_v52 = vadd.f32 %v2132_v59, %v1689_v29 }
 0x2a4   :  { %v14440_v30 = vadd.f32 %v14439_v40, %v14438_v3  ;;  %v14503_v54 = vpop.f32.mrb[203].mxu1  ;;  %v2551_v55 = vpop.xlane.xlu0 %2550  ;;  %v1231_v3 = vadd.f32 %v1215_v36, %v756_v20  ;;  %v1217_v36 = vmul.f32 %v18847_v2, %v18662_v7 }
 0x2a5   :  { %v3422_v35 = vadd.f32 %v14501_v6, %v14437_v41  ;;  %v14504_v17 = vadd.f32 %v14503_v54, %v14502_v56  ;;  %v2590_v26 = vmul.f32 %v18896_v19, %v2551_v55  ;;  %v757_v41 = vmul.f32 %v18856_v61, %v18526_v16 }
 0x2a6   :  { %v2553_v18 = vpop.xlane.xlu1 %2552  ;;  %v1690_v29 = vadd.f32 %v1674_v44, %v1231_v3  ;;  %v2134_v16 = vmul.f32 %v18878_v10, %v18826_v32  ;;  %v758_v44 = vmul.f32 %v18856_v61, %v18544_v4  ;;  %v1218_v32 = vmul.f32 %v18847_v2, %v18664_v42 }
 0x2a7   :  { %v3425_v38 = vadd.f32 %v14504_v17, %v14440_v30  ;;  %v18909_v0 = vadd.f32 %v2590_v26, %v2147_v37  ;;  %v2591_v48 = vmul.f32 %v18896_v19, %v2553_v18  ;;  %3476 = vadd.xlane.f32.xlu0 %v3422_v35  ;;  %v1232_v59 = vadd.f32 %v1216_v13, %v757_v41 }
 0x2a8   :  { %v14441_v25 = vpop.f32.mrb[204].mxu0  ;;  %v2149_v17 = vadd.f32 %v2133_v12, %v1690_v29  ;;  %v1677_v4 = vmul.f32 %v18861_v58, %v18768_v27  ;;  %v1233_v12 = vadd.f32 %v1217_v36, %v758_v44  ;;  %v2135_v42 = vmul.f32 %v18878_v10, %v18828_v31 }
 0x2a9   :  { %v18918_v57 = vadd.f32 %v2591_v48, %v2148_v52  ;;  %v14505_v51 = vpop.f32.mrb[204].mxu1  ;;  %3478 = vadd.xlane.f32.xlu1 %v3425_v38  ;;  %v14442_v26 = vpop.f32.mrb[205].mxu0  ;;  %v1691_v11 = vadd.f32 %v1675_v50, %v1232_v59  ;;  %v1676_v52 = vmul.f32 %v18861_v58, %v18754_v46 }
 0x2aa   :  { %v14443_v6 = vadd.f32 %v14442_v26, %v14441_v25  ;;  %v14506_v56 = vpop.f32.mrb[205].mxu1  ;;  %v14444_v40 = vpop.f32.mrb[206].mxu0  ;;  %v759_v25 = vmul.f32 %v18856_v61, %v18549_v15  ;;  %v2136_v15 = vmul.f32 %v18878_v10, %v18830_v62  ;;  %v1220_v62 = vmul.f32 %v18847_v2, %v18680_v21 }
 0x2ab   :  { %v14507_v30 = vadd.f32 %v14506_v56, %v14505_v51  ;;  %v14508_v5 = vpop.f32.mrb[206].mxu1  ;;  %v14445_v54 = vpop.f32.mrb[207].mxu0  ;;  %v2150_v7 = vadd.f32 %v2134_v16, %v1691_v11  ;;  %v1692_v29 = vadd.f32 %v1676_v52, %v1233_v12  ;;  %v2137_v21 = vmul.f32 %v18878_v10, %v18832_v60 }
 0x2ac   :  { %v14446_v55 = vadd.f32 %v14445_v54, %v14444_v40  ;;  %v14509_v37 = vpop.f32.mrb[207].mxu1  ;;  %v2555_v35 = vpop.xlane.xlu0 %2554  ;;  %v1234_v59 = vadd.f32 %v1218_v32, %v759_v25 }
 0x2ad   :  { %v3430_v20 = vadd.f32 %v14507_v30, %v14443_v6  ;;  %v14510_v13 = vadd.f32 %v14509_v37, %v14508_v5  ;;  %v2592_v18 = vmul.f32 %v18896_v19, %v2555_v35  ;;  %v1219_v5 = vmul.f32 %v18847_v2, %v18678_v47 }
 0x2ae   :  { %v2557_v38 = vpop.xlane.xlu1 %2556  ;;  %v1693_v31 = vadd.f32 %v1677_v4, %v1234_v59 }
 0x2af   :  { %v3433_v48 = vadd.f32 %v14510_v13, %v14446_v55  ;;  %v18931_v41 = vadd.f32 %v2592_v18, %v2149_v17  ;;  %v2593_v50 = vmul.f32 %v18896_v19, %v2557_v38  ;;  %3480 = vadd.xlane.f32.xlu0 %v3430_v20  ;;  %v2151_v55 = vadd.f32 %v2135_v42, %v1692_v29 }
 0x2b0   :  { %v14447_v3 = vpop.f32.mrb[208].mxu0  ;;  %v760_v20 = vmul.f32 %v18856_v61, %v18551_v28  ;;  %v1678_v13 = vmul.f32 %v18861_v58, %v18770_v34  ;;  %v2152_v47 = vadd.f32 %v2136_v15, %v1693_v31  ;;  %v761_v38 = vmul.f32 %v18856_v61, %v18570_v45 }
 0x2b1   :  { %v18940_v46 = vadd.f32 %v2593_v50, %v2150_v7  ;;  %v14511_v51 = vpop.f32.mrb[208].mxu1  ;;  %3482 = vadd.xlane.f32.xlu1 %v3433_v48  ;;  %v14448_v26 = vpop.f32.mrb[209].mxu0  ;;  %v1679_v28 = vmul.f32 %v18861_v58, %v18772_v24  ;;  %v2138_v45 = vmul.f32 %v18878_v10, %v18834_v23  ;;  %v1222_v23 = vmul.f32 %v18847_v2, %v18696_v63 }
 0x2b2   :  { %v14449_v6 = vadd.f32 %v14448_v26, %v14447_v3  ;;  %v14512_v56 = vpop.f32.mrb[209].mxu1  ;;  %v14450_v40 = vpop.f32.mrb[210].mxu0  ;;  %v1235_v48 = vadd.f32 %v1219_v5, %v760_v20  ;;  %v1236_v4 = vadd.f32 %v1220_v62, %v761_v38  ;;  %v762_v5 = vmul.f32 %v18856_v61, %v18574_v1 }
 0x2b3   :  { %v14513_v16 = vadd.f32 %v14512_v56, %v14511_v51  ;;  %v14514_v27 = vpop.f32.mrb[210].mxu1  ;;  %v14451_v30 = vpop.f32.mrb[211].mxu0  ;;  %v1680_v31 = vmul.f32 %v18861_v58, %v18786_v43  ;;  %v1681_v1 = vmul.f32 %v18861_v58, %v18788_v22  ;;  %v2139_v63 = vmul.f32 %v18878_v10, %v18836_v9 }
 0x2b4   :  { %v14452_v54 = vadd.f32 %v14451_v30, %v14450_v40  ;;  %v14515_v36 = vpop.f32.mrb[211].mxu1  ;;  %v2559_v11 = vpop.xlane.xlu0 %2558  ;;  %v1694_v51 = vadd.f32 %v1678_v13, %v1235_v48  ;;  %v1695_v60 = vadd.f32 %v1679_v28, %v1236_v4 }
 0x2b5   :  { %v3438_v37 = vadd.f32 %v14513_v16, %v14449_v6  ;;  %v14516_v35 = vadd.f32 %v14515_v36, %v14514_v27  ;;  %v2594_v17 = vmul.f32 %v18896_v19, %v2559_v11  ;;  %v1221_v6 = vmul.f32 %v18847_v2, %v18682_v49 }
 0x2b6   :  { %v2561_v18 = vpop.xlane.xlu1 %2560  ;;  %v2153_v15 = vadd.f32 %v2137_v21, %v1694_v51  ;;  %v2154_v49 = vadd.f32 %v2138_v45, %v1695_v60  ;;  %v21565_v45 = vld [vmem:[#allocation11_spill] sm:$0xff] }
 0x2b7   :  { %v3441_v44 = vadd.f32 %v14516_v35, %v14452_v54  ;;  %v18953_v32 = vadd.f32 %v2594_v17, %v2151_v55  ;;  %v2595_v52 = vmul.f32 %v18896_v19, %v2561_v18  ;;  %3484 = vadd.xlane.f32.xlu0 %v3438_v37  ;;  %v763_v37 = vmul.f32 %v18856_v61, %v18576_v8 }
 0x2b8   :  { %v14453_v7 = vpop.f32.mrb[212].mxu0  ;;  %v1237_v17 = vadd.f32 %v1221_v6, %v762_v5  ;;  %v2140_v8 = vmul.f32 %v18878_v10, %v18838_v53  ;;  %v1224_v53 = vmul.f32 %v18847_v2, %v21565_v45  ;;  %v21569_v5 = vld [vmem:[#allocation21_spill] sm:$0xff] }
 0x2b9   :  { %v18962_v34 = vadd.f32 %v2595_v52, %v2152_v47  ;;  %v14517_v50 = vpop.f32.mrb[212].mxu1  ;;  %3486 = vadd.xlane.f32.xlu1 %v3441_v44  ;;  %v14454_v25 = vpop.f32.mrb[213].mxu0  ;;  %v1238_v13 = vadd.f32 %v1222_v23, %v763_v37  ;;  %v2141_v23 = vmul.f32 %v18878_v10, %v21569_v5 }
 0x2ba   :  { %v14455_v3 = vadd.f32 %v14454_v25, %v14453_v7  ;;  %v14518_v12 = vpop.f32.mrb[213].mxu1  ;;  %v14456_v42 = vpop.f32.mrb[214].mxu0  ;;  %v1696_v52 = vadd.f32 %v1680_v31, %v1237_v17  ;;  %v1223_v7 = vmul.f32 %v18847_v2, %v18698_v33  ;;  %v21570_v17 = vld [vmem:[#allocation20_spill] sm:$0xff] }
 0x2bb   :  { %v14519_v26 = vadd.f32 %v14518_v12, %v14517_v50  ;;  %v14520_v24 = vpop.f32.mrb[214].mxu1  ;;  %v14457_v59 = vpop.f32.mrb[215].mxu0  ;;  %v1697_v9 = vadd.f32 %v1681_v1, %v1238_v13 }
 0x2bc   :  { %v14458_v56 = vadd.f32 %v14457_v59, %v14456_v42  ;;  %v14521_v40 = vpop.f32.mrb[215].mxu1  ;;  %v2563_v29 = vpop.xlane.xlu0 %2562  ;;  %v2155_v25 = vadd.f32 %v2139_v63, %v1696_v52  ;;  %v21564_v42 = vld [vmem:[#allocation7_spill] sm:$0xff]  ;;  %v2142_v63 = vmul.f32 %v18878_v10, %v21570_v17 }
 0x2bd   :  { %v3446_v16 = vadd.f32 %v14519_v26, %v14455_v3  ;;  %v14522_v27 = vadd.f32 %v14521_v40, %v14520_v24  ;;  %v2596_v30 = vmul.f32 %v18896_v19, %v2563_v29  ;;  %v764_v51 = vmul.f32 %v18856_v61, %v21564_v42  ;;  %v21566_v26 = vld [vmem:[#allocation15_spill] sm:$0xff]  ;;  %v21567_v40 = vld [vmem:[#allocation6_spill] sm:$0xff] }
 0x2be   :  { %v2565_v54 = vpop.xlane.xlu1 %2564  ;;  %v1682_v24 = vmul.f32 %v18861_v58, %v21566_v26  ;;  %v2156_v33 = vadd.f32 %v2140_v8, %v1697_v9  ;;  %v765_v29 = vmul.f32 %v18856_v61, %v21567_v40  ;;  %v21575_v26 = vld [vmem:[#allocation8_spill] sm:$0xff]  ;;  %v2143_v40 = vmul.f32 %v18878_v10, %v18867_v14 }
 0x2bf   :  { %v3449_v36 = vadd.f32 %v14522_v27, %v14458_v56  ;;  %v18975_v11 = vadd.f32 %v2596_v30, %v2153_v15  ;;  %v2597_v55 = vmul.f32 %v18896_v19, %v2565_v54  ;;  %3488 = vadd.xlane.f32.xlu0 %v3446_v16  ;;  %v21568_v15 = vld [vmem:[#allocation16_spill] sm:$0xff]  ;;  %v1239_v30 = vadd.f32 %v1223_v7, %v764_v51 }
 0x2c0   :  { %v14459_v35 = vpop.f32.mrb[216].mxu0  ;;  %v1683_v16 = vmul.f32 %v18861_v58, %v21568_v15 }
 0x2c1   :  { %v18984_v43 = vadd.f32 %v2597_v55, %v2154_v49  ;;  %v14523_v20 = vpop.f32.mrb[216].mxu1  ;;  %3490 = vadd.xlane.f32.xlu1 %v3449_v36  ;;  %v14460_v62 = vpop.f32.mrb[217].mxu0  ;;  %v1240_v36 = vadd.f32 %v1224_v53, %v765_v29 }
 0x2c2   :  { %v14461_v18 = vadd.f32 %v14460_v62, %v14459_v35  ;;  %v14524_v47 = vpop.f32.mrb[217].mxu1  ;;  %v14462_v44 = vpop.f32.mrb[218].mxu0  ;;  %v1698_v35 = vadd.f32 %v1682_v24, %v1239_v30  ;;  %v767_v24 = vmul.f32 %v18856_v61, %v21575_v26 }
 0x2c3   :  { %v14525_v38 = vadd.f32 %v14524_v47, %v14523_v20  ;;  %v14526_v22 = vpop.f32.mrb[218].mxu1  ;;  %v14463_v28 = vpop.f32.mrb[219].mxu0 }
 0x2c4   :  { %v14464_v48 = vadd.f32 %v14463_v28, %v14462_v44  ;;  %v14527_v21 = vpop.f32.mrb[219].mxu1  ;;  %v2567_v50 = vpop.xlane.xlu0 %2566  ;;  %v1699_v44 = vadd.f32 %v1683_v16, %v1240_v36 }
 0x2c5   :  { %v3454_v4 = vadd.f32 %v14525_v38, %v14461_v18  ;;  %v14528_v3 = vadd.f32 %v14527_v21, %v14526_v22  ;;  %v2598_v12 = vmul.f32 %v18896_v19, %v2567_v50  ;;  %v21571_v18 = vld [vmem:[#allocation12_spill] sm:$0xff]  ;;  %v2157_v22 = vadd.f32 %v2141_v23, %v1698_v35  ;;  %v21573_v50 = vld [vmem:[#allocation13_spill] sm:$0xff]  ;;  %v21578_v35 = vld [vmem:[#allocation14_spill] sm:$0xff] }
 0x2c6   :  { %v2569_v59 = vpop.xlane.xlu1 %2568  ;;  %v1225_v47 = vmul.f32 %v18847_v2, %v21571_v18  ;;  %v2158_v42 = vadd.f32 %v2142_v63, %v1699_v44  ;;  %v1227_v17 = vmul.f32 %v18847_v2, %v21578_v35  ;;  %v19056_v35 = vld [vmem:[%s21524_s2 + $0x5] ss:$0 sm:$0xff] }
 0x2c7   :  { %v3457_v6 = vadd.f32 %v14528_v3, %v14464_v48  ;;  %v18997_v60 = vadd.f32 %v2598_v12, %v2155_v25  ;;  %v2599_v56 = vmul.f32 %v18896_v19, %v2569_v59  ;;  %3492 = vadd.xlane.f32.xlu0 %v3454_v4  ;;  %v21572_v48 = vld [vmem:[#allocation9_spill] sm:$0xff]  ;;  %v1226_v25 = vmul.f32 %v18847_v2, %v21573_v50  ;;  %v21576_v59 = vld [vmem:[#allocation18_spill] sm:$0xff] }
 0x2c8   :  { %v14465_v27 = vpop.f32.mrb[220].mxu0  ;;  %v766_v21 = vmul.f32 %v18856_v61, %v21572_v48  ;;  %v21574_v4 = vld [vmem:[#allocation17_spill] sm:$0xff] }
 0x2c9   :  { %v19006_v31 = vadd.f32 %v2599_v56, %v2156_v33  ;;  %v14529_v54 = vpop.f32.mrb[220].mxu1  ;;  %3494 = vadd.xlane.f32.xlu1 %v3457_v6  ;;  %v14466_v49 = vpop.f32.mrb[221].mxu0  ;;  %v1684_v3 = vmul.f32 %v18861_v58, %v21574_v4  ;;  %v1685_v33 = vmul.f32 %v18861_v58, %v21576_v59 }
 0x2ca   :  { %v14467_v55 = vadd.f32 %v14466_v49, %v14465_v27  ;;  %v14530_v37 = vpop.f32.mrb[221].mxu1  ;;  %v14468_v1 = vpop.f32.mrb[222].mxu0  ;;  %v1241_v56 = vadd.f32 %v1225_v47, %v766_v21  ;;  %v1242_v27 = vadd.f32 %v1226_v25, %v767_v24  ;;  %v21577_v49 = vld [vmem:[#allocation22_spill] sm:$0xff]  ;;  %v2145_v25 = vmul.f32 %v18878_v10, %v18887_v39 }
 0x2cb   :  { %v14531_v20 = vadd.f32 %v14530_v37, %v14529_v54  ;;  %v14532_v62 = vpop.f32.mrb[222].mxu1  ;;  %v14469_v13 = vpop.f32.mrb[223].mxu0  ;;  %v2144_v36 = vmul.f32 %v18878_v10, %v21577_v49 }
 0x2cc   :  { %v14470_v52 = vadd.f32 %v14469_v13, %v14468_v1  ;;  %v14533_v8 = vpop.f32.mrb[223].mxu1  ;;  %v2571_v38 = vpop.xlane.xlu0 %2570  ;;  %v1700_v54 = vadd.f32 %v1684_v3, %v1241_v56  ;;  %v1701_v14 = vadd.f32 %v1685_v33, %v1242_v27 }
 0x2cd   :  { %v3462_v28 = vadd.f32 %v14531_v20, %v14467_v55  ;;  %v14534_v7 = vadd.f32 %v14533_v8, %v14532_v62  ;;  %v2600_v9 = vmul.f32 %v18896_v19, %v2571_v38  ;;  %v21580_v38 = vld [vmem:[#allocation19_spill] sm:$0xff] }
 0x2ce   :  { %v2573_v12 = vpop.xlane.xlu1 %2572  ;;  %v2159_v13 = vadd.f32 %v2143_v40, %v1700_v54 }
 0x2cf   :  { %v3465_v51 = vadd.f32 %v14534_v7, %v14470_v52  ;;  %v19019_v45 = vadd.f32 %v2600_v9, %v2157_v22  ;;  %v2601_v53 = vmul.f32 %v18896_v19, %v2573_v12  ;;  %3496 = vadd.xlane.f32.xlu0 %v3462_v28  ;;  %v21579_v52 = vld [vmem:[#allocation10_spill] sm:$0xff]  ;;  %v1686_v22 = vmul.f32 %v18861_v58, %v21580_v38 }
 0x2d0   :  { %v14551_v6 = vpop.f32.mrb[224].mxu0  ;;  %v768_v8 = vmul.f32 %v18856_v61, %v21579_v52  ;;  %v2160_v7 = vadd.f32 %v2144_v36, %v1701_v14 }
 0x2d1   :  { %v19028_v29 = vadd.f32 %v2601_v53, %v2158_v42  ;;  %v14615_v15 = vpop.f32.mrb[224].mxu1  ;;  %3498 = vadd.xlane.f32.xlu1 %v3465_v51  ;;  %v14552_v16 = vpop.f32.mrb[225].mxu0 }
 0x2d2   :  { %v14553_v30 = vadd.f32 %v14552_v16, %v14551_v6  ;;  %v14616_v5 = vpop.f32.mrb[225].mxu1  ;;  %v14554_v23 = vpop.f32.mrb[226].mxu0  ;;  %v1243_v50 = vadd.f32 %v1227_v17, %v768_v8 }
 0x2d3   :  { %v14617_v55 = vadd.f32 %v14616_v5, %v14615_v15  ;;  %v14618_v37 = vpop.f32.mrb[226].mxu1  ;;  %v14555_v1 = vpop.f32.mrb[227].mxu0 }
 0x2d4   :  { %v14556_v63 = vadd.f32 %v14555_v1, %v14554_v23  ;;  %v14619_v20 = vpop.f32.mrb[227].mxu1  ;;  %v2575_v62 = vpop.xlane.xlu0 %2574  ;;  %v1702_v51 = vadd.f32 %v1686_v22, %v1243_v50  ;;  %v21581_v23 = vld [vmem:[#allocation23_spill] sm:$0xff] }
 0x2d5   :  { %v3865_v18 = vadd.f32 %v14617_v55, %v14553_v30  ;;  %v14620_v47 = vadd.f32 %v14619_v20, %v14618_v37  ;;  %v2602_v44 = vmul.f32 %v18896_v19, %v2575_v62 }
 0x2d6   :  { %v2577_v28 = vpop.xlane.xlu1 %2576  ;;  %v2161_v56 = vadd.f32 %v2145_v25, %v1702_v51 }
 0x2d7   :  { %v3868_v9 = vadd.f32 %v14620_v47, %v14556_v63  ;;  %v19039_v48 = vadd.f32 %v2602_v44, %v2159_v13  ;;  %v2603_v2 = vmul.f32 %v18896_v19, %v2577_v28  ;;  %3927 = vadd.xlane.f32.xlu0 %v3865_v18 }
 0x2d8   :  { %v14557_v21 = vpop.f32.mrb[228].mxu0 }
 0x2d9   :  { %v19044_v4 = vadd.f32 %v2603_v2, %v2160_v7  ;;  %v14621_v3 = vpop.f32.mrb[228].mxu1  ;;  %3929 = vadd.xlane.f32.xlu1 %v3868_v9  ;;  %v14558_v61 = vpop.f32.mrb[229].mxu0 }
 0x2da   :  { %v14559_v12 = vadd.f32 %v14558_v61, %v14557_v21  ;;  %v14622_v58 = vpop.f32.mrb[229].mxu1  ;;  %v14560_v42 = vpop.f32.mrb[230].mxu0 }
 0x2db   :  { %v14623_v53 = vadd.f32 %v14622_v58, %v14621_v3  ;;  %v14624_v26 = vpop.f32.mrb[230].mxu1  ;;  %v14561_v24 = vpop.f32.mrb[231].mxu0 }
 0x2dc   :  { %v14562_v59 = vadd.f32 %v14561_v24, %v14560_v42  ;;  %v14625_v33 = vpop.f32.mrb[231].mxu1  ;;  %v2579_v6 = vpop.xlane.xlu0 %2578 }
 0x2dd   :  { %v3873_v40 = vadd.f32 %v14623_v53, %v14559_v12  ;;  %v14626_v15 = vadd.f32 %v14625_v33, %v14624_v26  ;;  %v2604_v10 = vmul.f32 %v18896_v19, %v2579_v6 }
 0x2de   :  { %v2581_v39 = vpop.xlane.xlu1 %2580 }
 0x2df   :  { %v3876_v16 = vadd.f32 %v14626_v15, %v14562_v59  ;;  %v19047_v27 = vadd.f32 %v2604_v10, %v2161_v56  ;;  %v2605_v30 = vmul.f32 %v18896_v19, %v2581_v39  ;;  %3931 = vadd.xlane.f32.xlu0 %v3873_v40 }
 0x2e0   :  { %v14563_v5 = vpop.f32.mrb[232].mxu0 }
 0x2e1   :  { %v19051_v54 = vadd.f32 %v2605_v30, %v21581_v23  ;;  %v14627_v49 = vpop.f32.mrb[232].mxu1  ;;  %3933 = vadd.xlane.f32.xlu1 %v3876_v16  ;;  %v14564_v36 = vpop.f32.mrb[233].mxu0 }
 0x2e2   :  { %v14565_v55 = vadd.f32 %v14564_v36, %v14563_v5  ;;  %v14628_v37 = vpop.f32.mrb[233].mxu1  ;;  %v14566_v1 = vpop.f32.mrb[234].mxu0 }
 0x2e3   :  { %v14629_v17 = vadd.f32 %v14628_v37, %v14627_v49  ;;  %v14630_v14 = vpop.f32.mrb[234].mxu1  ;;  %v14567_v63 = vpop.f32.mrb[235].mxu0 }
 0x2e4   :  { %v14568_v19 = vadd.f32 %v14567_v63, %v14566_v1  ;;  %v14631_v20 = vpop.f32.mrb[235].mxu1  ;;  %v3010_v62 = vpop.xlane.xlu0 %3009 }
 0x2e5   :  { %v3881_v13 = vadd.f32 %v14629_v17, %v14565_v55  ;;  %v14632_v18 = vadd.f32 %v14631_v20, %v14630_v14  ;;  %v3049_v47 = vmul.f32 %v19056_v35, %v3010_v62 }
 0x2e6   :  { %v3012_v44 = vpop.xlane.xlu1 %3011 }
 0x2e7   :  { %v3884_v52 = vadd.f32 %v14632_v18, %v14568_v19  ;;  %v19060_v8 = vadd.f32 %v3049_v47, %v18909_v0  ;;  %v3050_v38 = vmul.f32 %v19056_v35, %v3012_v44  ;;  %3935 = vadd.xlane.f32.xlu0 %v3881_v13 }
 0x2e8   :  { %v14569_v22 = vpop.f32.mrb[236].mxu0 }
 0x2e9   :  { %v19064_v28 = vadd.f32 %v3050_v38, %v18918_v57  ;;  %v14633_v7 = vpop.f32.mrb[236].mxu1  ;;  %3937 = vadd.xlane.f32.xlu1 %v3884_v52  ;;  %v14570_v9 = vpop.f32.mrb[237].mxu0 }
 0x2ea   :  { %v14571_v2 = vadd.f32 %v14570_v9, %v14569_v22  ;;  %v14634_v21 = vpop.f32.mrb[237].mxu1  ;;  %v14572_v50 = vpop.f32.mrb[238].mxu0 }
 0x2eb   :  { %v14635_v25 = vadd.f32 %v14634_v21, %v14633_v7  ;;  %v14636_v3 = vpop.f32.mrb[238].mxu1  ;;  %v14573_v61 = vpop.f32.mrb[239].mxu0 }
 0x2ec   :  { %v14574_v12 = vadd.f32 %v14573_v61, %v14572_v50  ;;  %v14637_v58 = vpop.f32.mrb[239].mxu1  ;;  %v3014_v0 = vpop.xlane.xlu0 %3013 }
 0x2ed   :  { %v3889_v42 = vadd.f32 %v14635_v25, %v14571_v2  ;;  %v14638_v51 = vadd.f32 %v14637_v58, %v14636_v3  ;;  %v3051_v53 = vmul.f32 %v19056_v35, %v3014_v0 }
 0x2ee   :  { %v3016_v26 = vpop.xlane.xlu1 %3015 }
 0x2ef   :  { %v3892_v24 = vadd.f32 %v14638_v51, %v14574_v12  ;;  %v19068_v57 = vadd.f32 %v3051_v53, %v18931_v41  ;;  %v3052_v59 = vmul.f32 %v19056_v35, %v3016_v26  ;;  %3939 = vadd.xlane.f32.xlu0 %v3889_v42 }
 0x2f0   :  { %v14575_v33 = vpop.f32.mrb[240].mxu0 }
 0x2f1   :  { %v19072_v6 = vadd.f32 %v3052_v59, %v18940_v46  ;;  %v14639_v56 = vpop.f32.mrb[240].mxu1  ;;  %3941 = vadd.xlane.f32.xlu1 %v3892_v24  ;;  %v14576_v40 = vpop.f32.mrb[241].mxu0 }
 0x2f2   :  { %v14577_v15 = vadd.f32 %v14576_v40, %v14575_v33  ;;  %v14640_v10 = vpop.f32.mrb[241].mxu1  ;;  %v14578_v39 = vpop.f32.mrb[242].mxu0 }
 0x2f3   :  { %v14641_v16 = vadd.f32 %v14640_v10, %v14639_v56  ;;  %v14642_v30 = vpop.f32.mrb[242].mxu1  ;;  %v14579_v5 = vpop.f32.mrb[243].mxu0 }
 0x2f4   :  { %v14580_v23 = vadd.f32 %v14579_v5, %v14578_v39  ;;  %v14643_v49 = vpop.f32.mrb[243].mxu1  ;;  %v3018_v41 = vpop.xlane.xlu0 %3017 }
 0x2f5   :  { %v3897_v36 = vadd.f32 %v14641_v16, %v14577_v15  ;;  %v14644_v55 = vadd.f32 %v14643_v49, %v14642_v30  ;;  %v3053_v37 = vmul.f32 %v19056_v35, %v3018_v41 }
 0x2f6   :  { %v3020_v1 = vpop.xlane.xlu1 %3019 }
 0x2f7   :  { %v3900_v17 = vadd.f32 %v14644_v55, %v14580_v23  ;;  %v19076_v46 = vadd.f32 %v3053_v37, %v18953_v32  ;;  %v3054_v14 = vmul.f32 %v19056_v35, %v3020_v1  ;;  %3943 = vadd.xlane.f32.xlu0 %v3897_v36 }
 0x2f8   :  { %v14581_v63 = vpop.f32.mrb[244].mxu0 }
 0x2f9   :  { %v19080_v19 = vadd.f32 %v3054_v14, %v18962_v34  ;;  %v14645_v20 = vpop.f32.mrb[244].mxu1  ;;  %3945 = vadd.xlane.f32.xlu1 %v3900_v17  ;;  %v14582_v62 = vpop.f32.mrb[245].mxu0 }
 0x2fa   :  { %v14583_v13 = vadd.f32 %v14582_v62, %v14581_v63  ;;  %v14646_v18 = vpop.f32.mrb[245].mxu1  ;;  %v14584_v47 = vpop.f32.mrb[246].mxu0 }
 0x2fb   :  { %v14647_v44 = vadd.f32 %v14646_v18, %v14645_v20  ;;  %v14648_v52 = vpop.f32.mrb[246].mxu1  ;;  %v14585_v38 = vpop.f32.mrb[247].mxu0 }
 0x2fc   :  { %v14586_v22 = vadd.f32 %v14585_v38, %v14584_v47  ;;  %v14649_v7 = vpop.f32.mrb[247].mxu1  ;;  %v3022_v32 = vpop.xlane.xlu0 %3021 }
 0x2fd   :  { %v3905_v9 = vadd.f32 %v14647_v44, %v14583_v13  ;;  %v14650_v2 = vadd.f32 %v14649_v7, %v14648_v52  ;;  %v3055_v21 = vmul.f32 %v19056_v35, %v3022_v32 }
 0x2fe   :  { %v3024_v50 = vpop.xlane.xlu1 %3023 }
 0x2ff   :  { %v3908_v25 = vadd.f32 %v14650_v2, %v14586_v22  ;;  %v19084_v34 = vadd.f32 %v3055_v21, %v18975_v11  ;;  %v3056_v3 = vmul.f32 %v19056_v35, %v3024_v50  ;;  %3947 = vadd.xlane.f32.xlu0 %v3905_v9 }
 0x300   :  { %v14587_v61 = vpop.f32.mrb[248].mxu0 }
 0x301   :  { %v19088_v12 = vadd.f32 %v3056_v3, %v18984_v43  ;;  %v14651_v58 = vpop.f32.mrb[248].mxu1  ;;  %3949 = vadd.xlane.f32.xlu1 %v3908_v25  ;;  %v14588_v0 = vpop.f32.mrb[249].mxu0 }
 0x302   :  { %v14589_v42 = vadd.f32 %v14588_v0, %v14587_v61  ;;  %v14652_v51 = vpop.f32.mrb[249].mxu1  ;;  %v14590_v53 = vpop.f32.mrb[250].mxu0 }
 0x303   :  { %v14653_v26 = vadd.f32 %v14652_v51, %v14651_v58  ;;  %v14654_v24 = vpop.f32.mrb[250].mxu1  ;;  %v14591_v59 = vpop.f32.mrb[251].mxu0 }
 0x304   :  { %v14592_v33 = vadd.f32 %v14591_v59, %v14590_v53  ;;  %v14655_v56 = vpop.f32.mrb[251].mxu1  ;;  %v3026_v11 = vpop.xlane.xlu0 %3025 }
 0x305   :  { %v3913_v40 = vadd.f32 %v14653_v26, %v14589_v42  ;;  %v14656_v15 = vadd.f32 %v14655_v56, %v14654_v24  ;;  %v3057_v10 = vmul.f32 %v19056_v35, %v3026_v11 }
 0x306   :  { %v3028_v39 = vpop.xlane.xlu1 %3027 }
 0x307   :  { %v3916_v16 = vadd.f32 %v14656_v15, %v14592_v33  ;;  %v19092_v43 = vadd.f32 %v3057_v10, %v18997_v60  ;;  %v3058_v30 = vmul.f32 %v19056_v35, %v3028_v39  ;;  %3951 = vadd.xlane.f32.xlu0 %v3913_v40 }
 0x308   :  { %v14593_v5 = vpop.f32.mrb[252].mxu0 }
 0x309   :  { %v19096_v23 = vadd.f32 %v3058_v30, %v19006_v31  ;;  %v14657_v49 = vpop.f32.mrb[252].mxu1  ;;  %3953 = vadd.xlane.f32.xlu1 %v3916_v16  ;;  %v14594_v41 = vpop.f32.mrb[253].mxu0 }
 0x30a   :  { %v14595_v36 = vadd.f32 %v14594_v41, %v14593_v5  ;;  %v14658_v55 = vpop.f32.mrb[253].mxu1  ;;  %v14596_v37 = vpop.f32.mrb[254].mxu0 }
 0x30b   :  { %v14659_v1 = vadd.f32 %v14658_v55, %v14657_v49  ;;  %v14660_v17 = vpop.f32.mrb[254].mxu1  ;;  %v14597_v14 = vpop.f32.mrb[255].mxu0 }
 0x30c   :  { %v14598_v63 = vadd.f32 %v14597_v14, %v14596_v37  ;;  %v14661_v20 = vpop.f32.mrb[255].mxu1  ;;  %v3030_v60 = vpop.xlane.xlu0 %3029 }
 0x30d   :  { %v3921_v62 = vadd.f32 %v14659_v1, %v14595_v36  ;;  %v14662_v13 = vadd.f32 %v14661_v20, %v14660_v17  ;;  %v3059_v18 = vmul.f32 %v19056_v35, %v3030_v60 }
 0x30e   :  { %v3032_v47 = vpop.xlane.xlu1 %3031 }
 0x30f   :  { %v3924_v44 = vadd.f32 %v14662_v13, %v14598_v63  ;;  %v19100_v31 = vadd.f32 %v3059_v18, %v19019_v45  ;;  %v3060_v52 = vmul.f32 %v19056_v35, %v3032_v47  ;;  %3955 = vadd.xlane.f32.xlu0 %v3921_v62 }
 0x310   :  { %v14679_v38 = vpop.f32.mrb[0].mxu0 }
 0x311   :  { %v19104_v22 = vadd.f32 %v3060_v52, %v19028_v29  ;;  %v14743_v7 = vpop.f32.mrb[0].mxu1  ;;  %3957 = vadd.xlane.f32.xlu1 %v3924_v44  ;;  %v14680_v32 = vpop.f32.mrb[1].mxu0 }
 0x312   :  { %v14681_v9 = vadd.f32 %v14680_v32, %v14679_v38  ;;  %v14744_v2 = vpop.f32.mrb[1].mxu1  ;;  %v14682_v21 = vpop.f32.mrb[2].mxu0 }
 0x313   :  { %v14745_v50 = vadd.f32 %v14744_v2, %v14743_v7  ;;  %v14746_v25 = vpop.f32.mrb[2].mxu1  ;;  %v14683_v3 = vpop.f32.mrb[3].mxu0 }
 0x314   :  { %v14684_v61 = vadd.f32 %v14683_v3, %v14682_v21  ;;  %v14747_v58 = vpop.f32.mrb[3].mxu1  ;;  %v3034_v45 = vpop.xlane.xlu0 %3033 }
 0x315   :  { %v4324_v0 = vadd.f32 %v14745_v50, %v14681_v9  ;;  %v14748_v42 = vadd.f32 %v14747_v58, %v14746_v25  ;;  %v3061_v51 = vmul.f32 %v19056_v35, %v3034_v45 }
 0x316   :  { %v3036_v53 = vpop.xlane.xlu1 %3035 }
 0x317   :  { %v4327_v26 = vadd.f32 %v14748_v42, %v14684_v61  ;;  %v19108_v29 = vadd.f32 %v3061_v51, %v19039_v48  ;;  %v3062_v24 = vmul.f32 %v19056_v35, %v3036_v53  ;;  %4386 = vadd.xlane.f32.xlu0 %v4324_v0  ;;  %v19129_v42 = vld [vmem:[%s21524_s2 + $0x6] ss:$0 sm:$0xff] }
 0x318   :  { %v14685_v59 = vpop.f32.mrb[4].mxu0 }
 0x319   :  { %v19112_v33 = vadd.f32 %v3062_v24, %v19044_v4  ;;  %v14749_v56 = vpop.f32.mrb[4].mxu1  ;;  %4388 = vadd.xlane.f32.xlu1 %v4327_v26  ;;  %v14686_v11 = vpop.f32.mrb[5].mxu0 }
 0x31a   :  { %v14687_v40 = vadd.f32 %v14686_v11, %v14685_v59  ;;  %v14750_v15 = vpop.f32.mrb[5].mxu1  ;;  %v14688_v10 = vpop.f32.mrb[6].mxu0 }
 0x31b   :  { %v14751_v39 = vadd.f32 %v14750_v15, %v14749_v56  ;;  %v14752_v16 = vpop.f32.mrb[6].mxu1  ;;  %v14689_v30 = vpop.f32.mrb[7].mxu0 }
 0x31c   :  { %v14690_v5 = vadd.f32 %v14689_v30, %v14688_v10  ;;  %v14753_v49 = vpop.f32.mrb[7].mxu1  ;;  %v3038_v48 = vpop.xlane.xlu0 %3037 }
 0x31d   :  { %v4332_v41 = vadd.f32 %v14751_v39, %v14687_v40  ;;  %v14754_v36 = vadd.f32 %v14753_v49, %v14752_v16  ;;  %v3063_v55 = vmul.f32 %v19056_v35, %v3038_v48 }
 0x31e   :  { %v3040_v37 = vpop.xlane.xlu1 %3039 }
 0x31f   :  { %v4335_v1 = vadd.f32 %v14754_v36, %v14690_v5  ;;  %v19116_v4 = vadd.f32 %v3063_v55, %v19047_v27  ;;  %v3064_v17 = vmul.f32 %v19056_v35, %v3040_v37  ;;  %4390 = vadd.xlane.f32.xlu0 %v4332_v41 }
 0x320   :  { %v14691_v14 = vpop.f32.mrb[8].mxu0 }
 0x321   :  { %v19120_v63 = vadd.f32 %v3064_v17, %v19051_v54  ;;  %v14755_v20 = vpop.f32.mrb[8].mxu1  ;;  %4392 = vadd.xlane.f32.xlu1 %v4335_v1  ;;  %v14692_v60 = vpop.f32.mrb[9].mxu0 }
 0x322   :  { %v14693_v62 = vadd.f32 %v14692_v60, %v14691_v14  ;;  %v14756_v13 = vpop.f32.mrb[9].mxu1  ;;  %v14694_v18 = vpop.f32.mrb[10].mxu0 }
 0x323   :  { %v14757_v47 = vadd.f32 %v14756_v13, %v14755_v20  ;;  %v14758_v44 = vpop.f32.mrb[10].mxu1  ;;  %v14695_v52 = vpop.f32.mrb[11].mxu0 }
 0x324   :  { %v14696_v38 = vadd.f32 %v14695_v52, %v14694_v18  ;;  %v14759_v7 = vpop.f32.mrb[11].mxu1  ;;  %v19122_v35 = vpop.xlane.xlu0 %3468 }
 0x325   :  { %v4340_v27 = vadd.f32 %v14757_v47, %v14693_v62  ;;  %v14760_v32 = vadd.f32 %v14759_v7, %v14758_v44 }
 0x326   :  { %v19124_v2 = vpop.xlane.xlu1 %3470 }
 0x327   :  { %v4343_v9 = vadd.f32 %v14760_v32, %v14696_v38  ;;  %4394 = vadd.xlane.f32.xlu0 %v4340_v27 }
 0x328   :  { %v14697_v54 = vpop.f32.mrb[12].mxu0 }
 0x329   :  { %v14761_v21 = vpop.f32.mrb[12].mxu1  ;;  %4396 = vadd.xlane.f32.xlu1 %v4343_v9  ;;  %v14698_v50 = vpop.f32.mrb[13].mxu0 }
 0x32a   :  { %v14699_v25 = vadd.f32 %v14698_v50, %v14697_v54  ;;  %v14762_v3 = vpop.f32.mrb[13].mxu1  ;;  %v14700_v61 = vpop.f32.mrb[14].mxu0 }
 0x32b   :  { %v14763_v58 = vadd.f32 %v14762_v3, %v14761_v21  ;;  %v14764_v45 = vpop.f32.mrb[14].mxu1  ;;  %v14701_v0 = vpop.f32.mrb[15].mxu0 }
 0x32c   :  { %v14702_v51 = vadd.f32 %v14701_v0, %v14700_v61  ;;  %v14765_v53 = vpop.f32.mrb[15].mxu1  ;;  %v3473_v26 = vpop.xlane.xlu0 %3472 }
 0x32d   :  { %v4348_v24 = vadd.f32 %v14763_v58, %v14699_v25  ;;  %v14766_v59 = vadd.f32 %v14765_v53, %v14764_v45  ;;  %v3510_v56 = vmul.f32 %v19129_v42, %v3473_v26 }
 0x32e   :  { %v3475_v11 = vpop.xlane.xlu1 %3474 }
 0x32f   :  { %v4351_v40 = vadd.f32 %v14766_v59, %v14702_v51  ;;  %v19133_v15 = vadd.f32 %v3510_v56, %v19068_v57  ;;  %v3511_v10 = vmul.f32 %v19129_v42, %v3475_v11  ;;  %4398 = vadd.xlane.f32.xlu0 %v4348_v24 }
 0x330   :  { %v14703_v39 = vpop.f32.mrb[16].mxu0 }
 0x331   :  { %v19137_v16 = vadd.f32 %v3511_v10, %v19072_v6  ;;  %v14767_v30 = vpop.f32.mrb[16].mxu1  ;;  %4400 = vadd.xlane.f32.xlu1 %v4351_v40  ;;  %v14704_v5 = vpop.f32.mrb[17].mxu0 }
 0x332   :  { %v14705_v49 = vadd.f32 %v14704_v5, %v14703_v39  ;;  %v14768_v48 = vpop.f32.mrb[17].mxu1  ;;  %v14706_v41 = vpop.f32.mrb[18].mxu0 }
 0x333   :  { %v14769_v36 = vadd.f32 %v14768_v48, %v14767_v30  ;;  %v14770_v55 = vpop.f32.mrb[18].mxu1  ;;  %v14707_v37 = vpop.f32.mrb[19].mxu0 }
 0x334   :  { %v14708_v1 = vadd.f32 %v14707_v37, %v14706_v41  ;;  %v14771_v17 = vpop.f32.mrb[19].mxu1  ;;  %v3477_v57 = vpop.xlane.xlu0 %3476 }
 0x335   :  { %v4356_v14 = vadd.f32 %v14769_v36, %v14705_v49  ;;  %v14772_v20 = vadd.f32 %v14771_v17, %v14770_v55  ;;  %v3512_v60 = vmul.f32 %v19129_v42, %v3477_v57 }
 0x336   :  { %v3479_v62 = vpop.xlane.xlu1 %3478 }
 0x337   :  { %v4359_v13 = vadd.f32 %v14772_v20, %v14708_v1  ;;  %v19141_v6 = vadd.f32 %v3512_v60, %v19076_v46  ;;  %v3513_v18 = vmul.f32 %v19129_v42, %v3479_v62  ;;  %4402 = vadd.xlane.f32.xlu0 %v4356_v14 }
 0x338   :  { %v14709_v47 = vpop.f32.mrb[20].mxu0 }
 0x339   :  { %v19145_v44 = vadd.f32 %v3513_v18, %v19080_v19  ;;  %v14773_v52 = vpop.f32.mrb[20].mxu1  ;;  %4404 = vadd.xlane.f32.xlu1 %v4359_v13  ;;  %v14710_v38 = vpop.f32.mrb[21].mxu0 }
 0x33a   :  { %v14711_v7 = vadd.f32 %v14710_v38, %v14709_v47  ;;  %v14774_v27 = vpop.f32.mrb[21].mxu1  ;;  %v14712_v32 = vpop.f32.mrb[22].mxu0 }
 0x33b   :  { %v14775_v9 = vadd.f32 %v14774_v27, %v14773_v52  ;;  %v14776_v54 = vpop.f32.mrb[22].mxu1  ;;  %v14713_v21 = vpop.f32.mrb[23].mxu0 }
 0x33c   :  { %v14714_v50 = vadd.f32 %v14713_v21, %v14712_v32  ;;  %v14777_v25 = vpop.f32.mrb[23].mxu1  ;;  %v3481_v46 = vpop.xlane.xlu0 %3480 }
 0x33d   :  { %v4364_v3 = vadd.f32 %v14775_v9, %v14711_v7  ;;  %v14778_v61 = vadd.f32 %v14777_v25, %v14776_v54  ;;  %v3514_v58 = vmul.f32 %v19129_v42, %v3481_v46 }
 0x33e   :  { %v3483_v45 = vpop.xlane.xlu1 %3482 }
 0x33f   :  { %v4367_v0 = vadd.f32 %v14778_v61, %v14714_v50  ;;  %v19149_v19 = vadd.f32 %v3514_v58, %v19084_v34  ;;  %v3515_v51 = vmul.f32 %v19129_v42, %v3483_v45  ;;  %4406 = vadd.xlane.f32.xlu0 %v4364_v3 }
 0x340   :  { %v14715_v53 = vpop.f32.mrb[24].mxu0 }
 0x341   :  { %v19153_v26 = vadd.f32 %v3515_v51, %v19088_v12  ;;  %v14779_v24 = vpop.f32.mrb[24].mxu1  ;;  %4408 = vadd.xlane.f32.xlu1 %v4367_v0  ;;  %v14716_v59 = vpop.f32.mrb[25].mxu0 }
 0x342   :  { %v14717_v56 = vadd.f32 %v14716_v59, %v14715_v53  ;;  %v14780_v11 = vpop.f32.mrb[25].mxu1  ;;  %v14718_v40 = vpop.f32.mrb[26].mxu0 }
 0x343   :  { %v14781_v10 = vadd.f32 %v14780_v11, %v14779_v24  ;;  %v14782_v39 = vpop.f32.mrb[26].mxu1  ;;  %v14719_v30 = vpop.f32.mrb[27].mxu0 }
 0x344   :  { %v14720_v5 = vadd.f32 %v14719_v30, %v14718_v40  ;;  %v14783_v49 = vpop.f32.mrb[27].mxu1  ;;  %v3485_v34 = vpop.xlane.xlu0 %3484  ;;  %v15596_v40 = vld [vmem:[%s21526_s4] sm:$0xff]  }
 0x345   :  { %v4372_v48 = vadd.f32 %v14781_v10, %v14717_v56  ;;  %v14784_v41 = vadd.f32 %v14783_v49, %v14782_v39  ;;  %v3516_v36 = vmul.f32 %v19129_v42, %v3485_v34  ;;  %14897 = vmatprep.mubr.bf16.mxu0 %v15596_v40 }
 0x346   :  { %v3487_v55 = vpop.xlane.xlu1 %3486 }
 0x347   :  { %v4375_v37 = vadd.f32 %v14784_v41, %v14720_v5  ;;  %v19157_v12 = vadd.f32 %v3516_v36, %v19092_v43  ;;  %v3517_v1 = vmul.f32 %v19129_v42, %v3487_v55  ;;  %4410 = vadd.xlane.f32.xlu0 %v4372_v48  ;;  %v19210_v36 = vld [vmem:[%s21524_s2 + $0x7] ss:$0 sm:$0xff] }
 0x348   :  { %v14721_v17 = vpop.f32.mrb[28].mxu0 }
 0x349   :  { %v19161_v57 = vadd.f32 %v3517_v1, %v19096_v23  ;;  %v14785_v14 = vpop.f32.mrb[28].mxu1  ;;  %4412 = vadd.xlane.f32.xlu1 %v4375_v37  ;;  %v14722_v20 = vpop.f32.mrb[29].mxu0  ;;  %v3508_v37 = vmul.f32 %v19129_v42, %v19122_v35 }
 0x34a   :  { %v14723_v60 = vadd.f32 %v14722_v20, %v14721_v17  ;;  %v14786_v62 = vpop.f32.mrb[29].mxu1  ;;  %v14724_v13 = vpop.f32.mrb[30].mxu0  ;;  %v3509_v17 = vmul.f32 %v19129_v42, %v19124_v2  ;;  %v19235_v2 = vld [vmem:[%s21525_s3] ss:$0 sm:$0xff] }
 0x34b   :  { %v14787_v18 = vadd.f32 %v14786_v62, %v14785_v14  ;;  %v14788_v47 = vpop.f32.mrb[30].mxu1  ;;  %v14725_v52 = vpop.f32.mrb[31].mxu0  ;;  %v3524_v62 = vadd.f32 %v3508_v37, %v19060_v8 }
 0x34c   :  { %v14726_v38 = vadd.f32 %v14725_v52, %v14724_v13  ;;  %v14789_v7 = vpop.f32.mrb[31].mxu1  ;;  %v3489_v43 = vpop.xlane.xlu0 %3488  ;;  %v3525_v35 = vadd.f32 %v3509_v17, %v19064_v28 }
 0x34d   :  { %v4380_v27 = vadd.f32 %v14787_v18, %v14723_v60  ;;  %v14790_v32 = vadd.f32 %v14789_v7, %v14788_v47  ;;  %v3518_v9 = vmul.f32 %v19129_v42, %v3489_v43  ;;  %v19226_v60 = vld [vmem:[%s21524_s2 + $0x8] ss:$0 sm:$0xff] }
 0x34e   :  { %v3491_v54 = vpop.xlane.xlu1 %3490 }
 0x34f   :  { %v4383_v21 = vadd.f32 %v14790_v32, %v14726_v38  ;;  %v19165_v23 = vadd.f32 %v3518_v9, %v19100_v31  ;;  %v3519_v50 = vmul.f32 %v19129_v42, %v3491_v54  ;;  %4414 = vadd.xlane.f32.xlu0 %v4380_v27 }
 0x351   :  { %v19169_v25 = vadd.f32 %v3519_v50, %v19104_v22  ;;  %4416 = vadd.xlane.f32.xlu1 %v4383_v21 }
 0x354   :  { %v3493_v46 = vpop.xlane.xlu0 %3492 }
 0x355   :  { %v3520_v3 = vmul.f32 %v19129_v42, %v3493_v46 }
 0x356   :  { %v3495_v61 = vpop.xlane.xlu1 %3494 }
 0x357   :  { %v19173_v58 = vadd.f32 %v3520_v3, %v19108_v29  ;;  %v3521_v45 = vmul.f32 %v19129_v42, %v3495_v61  ;;  %v15594_v29 = vld [vmem:[%s21526_s4 + $0x10] sm:$0xff]  }
 0x358   :  { %14917 = vmatprep.mubr.bf16.mxu1 %v15594_v29 }
 0x359   :  { %v19177_v0 = vadd.f32 %v3521_v45, %v19112_v33 }
 0x35c   :  { %v3497_v31 = vpop.xlane.xlu0 %3496 }
 0x35d   :  { %v3522_v51 = vmul.f32 %v19129_v42, %v3497_v31 }
 0x35e   :  { %v3499_v53 = vpop.xlane.xlu1 %3498 }
 0x35f   :  { %v19181_v22 = vadd.f32 %v3522_v51, %v19116_v4  ;;  %v3523_v24 = vmul.f32 %v19129_v42, %v3499_v53 }
 0x361   :  { %v19185_v59 = vadd.f32 %v3523_v24, %v19120_v63 }
 0x364   :  { %v3928_v56 = vpop.xlane.xlu0 %3927 }
 0x365   :  { %v3967_v14 = vmul.f32 %v19210_v36, %v3928_v56 }
 0x366   :  { %v3930_v33 = vpop.xlane.xlu1 %3929 }
 0x367   :  { %v3968_v13 = vmul.f32 %v19210_v36, %v3930_v33  ;;  %v3983_v47 = vadd.f32 %v3967_v14, %v3524_v62 }
 0x369   :  { %v3984_v38 = vadd.f32 %v3968_v13, %v3525_v35 }
 0x36c   :  { %v3932_v11 = vpop.xlane.xlu0 %3931 }
 0x36d   :  { %v3969_v8 = vmul.f32 %v19210_v36, %v3932_v11 }
 0x36e   :  { %v3934_v10 = vpop.xlane.xlu1 %3933 }
 0x36f   :  { %v3970_v28 = vmul.f32 %v19210_v36, %v3934_v10  ;;  %v3985_v50 = vadd.f32 %v3969_v8, %v19133_v15 }
 0x371   :  { %v3986_v61 = vadd.f32 %v3970_v28, %v19137_v16 }
 0x374   :  { %v3936_v4 = vpop.xlane.xlu0 %3935 }
 0x375   :  { %v3971_v56 = vmul.f32 %v19210_v36, %v3936_v4 }
 0x376   :  { %v3938_v39 = vpop.xlane.xlu1 %3937 }
 0x377   :  { %v3972_v15 = vmul.f32 %v19210_v36, %v3938_v39  ;;  %v3987_v4 = vadd.f32 %v3971_v56, %v19141_v6 }
 0x379   :  { %v3988_v39 = vadd.f32 %v3972_v15, %v19145_v44 }
 0x37c   :  { %v19193_v30 = vpop.xlane.xlu0 %3939 }
 0x37e   :  { %v19195_v63 = vpop.xlane.xlu1 %3941 }
 0x384   :  { %v19197_v5 = vpop.xlane.xlu0 %3943 }
 0x386   :  { %v19199_v49 = vpop.xlane.xlu1 %3945 }
 0x38c   :  { %v19201_v34 = vpop.xlane.xlu0 %3947 }
 0x38e   :  { %v19203_v48 = vpop.xlane.xlu1 %3949 }
 0x394   :  { %v19205_v41 = vpop.xlane.xlu0 %3951 }
 0x396   :  { %v19212_v55 = vpop.xlane.xlu1 %3953 }
 0x39c   :  { %v19216_v1 = vpop.xlane.xlu0 %3955 }
 0x39e   :  { %v19221_v20 = vpop.xlane.xlu1 %3957 }
 0x3a4   :  { %v4387_v18 = vpop.xlane.xlu0 %4386 }
 0x3a5   :  { %v4426_v52 = vmul.f32 %v19226_v60, %v4387_v18 }
 0x3a6   :  { %v4389_v42 = vpop.xlane.xlu1 %4388 }
 0x3a7   :  { %v4442_v7 = vadd.f32 %v4426_v52, %v3983_v47  ;;  %v4427_v43 = vmul.f32 %v19226_v60, %v4389_v42  ;;  %v3973_v52 = vmul.f32 %v19210_v36, %v19193_v30 }
 0x3a9   :  { %v4465_v27 = vadd.f32 %v19235_v2, %v4442_v7  ;;  %v4443_v32 = vadd.f32 %v4427_v43, %v3984_v38  ;;  %v3974_v38 = vmul.f32 %v19210_v36, %v19195_v63  ;;  %v3989_v30 = vadd.f32 %v3973_v52, %v19149_v19 }
 0x3ab   :  { %v4497_v9 = vmul.f32 0.2, %v4465_v27  ;;  %v4466_v54 = vadd.f32 %v19235_v2, %v4443_v32  ;;  %vm4481_vm0 = vcmp.ge.f32.partialorder %v4465_v27, 0.0  ;;  %v3990_v63 = vadd.f32 %v3974_v38, %v19153_v26 }
 0x3ac   :  { %v4391_v21 = vpop.xlane.xlu0 %4390 }
 0x3ad   :  { %vm4482_vm1 = vcmp.ge.f32.partialorder %v4466_v54, 0.0  ;;  %v4498_v46 = vmul.f32 0.2, %v4466_v54  ;;  %v4428_v3 = vmul.f32 %v19226_v60, %v4391_v21  ;;  %v4513_v31 = vsel %vm4481_vm0, %v4465_v27, %v4497_v9 }
 0x3ae   :  { %v4393_v45 = vpop.xlane.xlu1 %4392 }
 0x3af   :  { %v4514_v51 = vsel %vm4482_vm1, %v4466_v54, %v4498_v46  ;;  %v4444_v53 = vadd.f32 %v4428_v3, %v3985_v50  ;;  %v4429_v24 = vmul.f32 %v19226_v60, %v4393_v45  ;;  %v3975_v46 = vmul.f32 %v19210_v36, %v19197_v5 }
 0x3b0   :  { %v19246_v29 = vpack.c.bf16 %v4514_v51, %v4513_v31 }
 0x3b1   :  { %v4467_v33 = vadd.f32 %v19235_v2, %v4444_v53  ;;  %v4445_v11 = vadd.f32 %v4429_v24, %v3986_v61  ;;  %v3976_v61 = vmul.f32 %v19210_v36, %v19199_v49  ;;  %v3991_v5 = vadd.f32 %v3975_v46, %v19157_v12 }
 0x3b2   :  { %14881 = vmatprep.subr.bf16.mxu0 %v19246_v29  ;;  %14901 = vmatprep.subr.bf16.mxu1 %v19246_v29 }
 0x3b3   :  { %v4499_v16 = vmul.f32 0.2, %v4467_v33  ;;  %v4468_v40 = vadd.f32 %v19235_v2, %v4445_v11  ;;  %14882 = vmatpush3.bf16.msra.mxu0 %v19246_v29  ;;  %14902 = vmatpush3.bf16.msra.mxu1 %v19246_v29  ;;  %vm4483_vm2 = vcmp.ge.f32.partialorder %v4467_v33, 0.0  ;;  %v3992_v49 = vadd.f32 %v3976_v61, %v19161_v57 }
 0x3b4   :  { %v4395_v10 = vpop.xlane.xlu0 %4394 }
 0x3b5   :  { %vm4484_vm3 = vcmp.ge.f32.partialorder %v4468_v40, 0.0  ;;  %v4500_v37 = vmul.f32 0.2, %v4468_v40  ;;  %v4430_v17 = vmul.f32 %v19226_v60, %v4395_v10  ;;  %v4515_v62 = vsel %vm4483_vm2, %v4467_v33, %v4499_v16 }
 0x3b6   :  { %v4397_v14 = vpop.xlane.xlu1 %4396 }
 0x3b7   :  { %v4516_v13 = vsel %vm4484_vm3, %v4468_v40, %v4500_v37  ;;  %v4446_v18 = vadd.f32 %v4430_v17, %v3987_v4  ;;  %v4431_v35 = vmul.f32 %v19226_v60, %v4397_v14  ;;  %v3977_v40 = vmul.f32 %v19210_v36, %v19201_v34 }
 0x3b8   :  { %v19260_v47 = vpack.c.bf16 %v4516_v13, %v4515_v62  ;;  %v3978_v4 = vmul.f32 %v19210_v36, %v19203_v48 }
 0x3b9   :  { %v4469_v42 = vadd.f32 %v19235_v2, %v4446_v18  ;;  %v4447_v6 = vadd.f32 %v4431_v35, %v3988_v39  ;;  %v3993_v34 = vadd.f32 %v3977_v40, %v19165_v23  ;;  %v15595_v40 = vld [vmem:[%s21526_s4 + $0x18] sm:$0xff]  }
 0x3ba   :  { %14883 = vmatprep.subr.bf16.mxu0 %v19260_v47  ;;  %14903 = vmatprep.subr.bf16.mxu1 %v19260_v47  ;;  %v3994_v48 = vadd.f32 %v3978_v4, %v19169_v25  ;;  %v15600_v4 = vld [vmem:[%s21526_s4 + $0x30] sm:$0xff]  }
 0x3bb   :  { %v4501_v44 = vmul.f32 0.2, %v4469_v42  ;;  %v4470_v7 = vadd.f32 %v19235_v2, %v4447_v6  ;;  %14884 = vmatpush3.bf16.msra.mxu0 %v19260_v47  ;;  %14904 = vmatpush3.bf16.msra.mxu1 %v19260_v47  ;;  %vm4485_vm4 = vcmp.ge.f32.partialorder %v4469_v42, 0.0  ;;  %v3979_v6 = vmul.f32 %v19210_v36, %v19205_v41 }
 0x3bc   :  { %v4399_v43 = vpop.xlane.xlu0 %4398 }
 0x3bd   :  { %vm4486_vm5 = vcmp.ge.f32.partialorder %v4470_v7, 0.0  ;;  %v4502_v8 = vmul.f32 0.2, %v4470_v7  ;;  %v4432_v27 = vmul.f32 %v19226_v60, %v4399_v43  ;;  %v4517_v28 = vsel %vm4485_vm4, %v4469_v42, %v4501_v44 }
 0x3be   :  { %v4401_v32 = vpop.xlane.xlu1 %4400  ;;  %v3980_v44 = vmul.f32 %v19210_v36, %v19212_v55  ;;  %v3995_v41 = vadd.f32 %v3979_v6, %v19173_v58  ;;  %v15625_v6 = vld [vmem:[#allocation3 + $0xd0] ss:$8 sps:$4 sm:$0xff]  }
 0x3bf   :  { %v4518_v9 = vsel %vm4486_vm5, %v4470_v7, %v4502_v8  ;;  %v4448_v54 = vadd.f32 %v4432_v27, %v3989_v30  ;;  %v4433_v21 = vmul.f32 %v19226_v60, %v4401_v32 }
 0x3c0   :  { %v19276_v50 = vpack.c.bf16 %v4518_v9, %v4517_v28  ;;  %v3996_v55 = vadd.f32 %v3980_v44, %v19177_v0  ;;  %v15630_v44 = vld [vmem:[#allocation3 + $0xe4] ss:$8 sps:$4 sm:$0xff]  }
 0x3c1   :  { %v4471_v3 = vadd.f32 %v19235_v2, %v4448_v54  ;;  %v4449_v19 = vadd.f32 %v4433_v21, %v3990_v63  ;;  %v3981_v21 = vmul.f32 %v19210_v36, %v19216_v1 }
 0x3c2   :  { %14885 = vmatprep.subr.bf16.mxu0 %v19276_v50  ;;  %14905 = vmatprep.subr.bf16.mxu1 %v19276_v50 }
 0x3c3   :  { %v4503_v26 = vmul.f32 0.2, %v4471_v3  ;;  %v4472_v45 = vadd.f32 %v19235_v2, %v4449_v19  ;;  %14886 = vmatpush3.bf16.msra.mxu0 %v19276_v50  ;;  %14906 = vmatpush3.bf16.msra.mxu1 %v19276_v50  ;;  %vm4487_vm6 = vcmp.ge.f32.partialorder %v4471_v3, 0.0  ;;  %v3997_v1 = vadd.f32 %v3981_v21, %v19181_v22 }
 0x3c4   :  { %v4403_v31 = vpop.xlane.xlu0 %4402 }
 0x3c5   :  { %vm4488_vm7 = vcmp.ge.f32.partialorder %v4472_v45, 0.0  ;;  %v4504_v51 = vmul.f32 0.2, %v4472_v45  ;;  %v4434_v53 = vmul.f32 %v19226_v60, %v4403_v31  ;;  %v4519_v56 = vsel %vm4487_vm6, %v4471_v3, %v4503_v26 }
 0x3c6   :  { %v4405_v24 = vpop.xlane.xlu1 %4404  ;;  %v3982_v3 = vmul.f32 %v19210_v36, %v19221_v20 }
 0x3c7   :  { %v4520_v33 = vsel %vm4488_vm7, %v4472_v45, %v4504_v51  ;;  %v4450_v11 = vadd.f32 %v4434_v53, %v3991_v5  ;;  %v4435_v15 = vmul.f32 %v19226_v60, %v4405_v24 }
 0x3c8   :  { %v19292_v16 = vpack.c.bf16 %v4520_v33, %v4519_v56  ;;  %v3998_v36 = vadd.f32 %v3982_v3, %v19185_v59 }
 0x3c9   :  { %v4473_v10 = vadd.f32 %v19235_v2, %v4450_v11  ;;  %v4451_v12 = vadd.f32 %v4435_v15, %v3992_v49 }
 0x3ca   :  { %14887 = vmatprep.subr.bf16.mxu0 %v19292_v16  ;;  %14907 = vmatprep.subr.bf16.mxu1 %v19292_v16 }
 0x3cb   :  { %v4505_v57 = vmul.f32 0.2, %v4473_v10  ;;  %v4474_v37 = vadd.f32 %v19235_v2, %v4451_v12  ;;  %14888 = vmatpush3.bf16.msra.mxu0 %v19292_v16  ;;  %14908 = vmatpush3.bf16.msra.mxu1 %v19292_v16  ;;  %vm4489_vm8 = vcmp.ge.f32.partialorder %v4473_v10, 0.0  ;;  %v15599_v12 = vld [vmem:[%s21526_s4 + $0x28] sm:$0xff]  }
 0x3cc   :  { %v4407_v17 = vpop.xlane.xlu0 %4406 }
 0x3cd   :  { %vm4490_vm9 = vcmp.ge.f32.partialorder %v4474_v37, 0.0  ;;  %v4506_v39 = vmul.f32 0.2, %v4474_v37  ;;  %v4436_v14 = vmul.f32 %v19226_v60, %v4407_v17  ;;  %v4521_v13 = vsel %vm4489_vm8, %v4473_v10, %v4505_v57  ;;  %v15598_v10 = vld [vmem:[%s21526_s4 + $0x20] sm:$0xff]   ;;  %v15611_v17 = vld [vmem:[#allocation3 + $0x90] ss:$8 sps:$4 sm:$0xff]  }
 0x3ce   :  { %v4409_v62 = vpop.xlane.xlu1 %4408  ;;  %v15608_v57 = vld [vmem:[#allocation3 + $0x80] ss:$8 sps:$4 sm:$0xff]   ;;  %vm6713_vm8 = vcmask 261120  }
 0x3cf   :  { %v4522_v18 = vsel %vm4490_vm9, %v4474_v37, %v4506_v39  ;;  %v4452_v35 = vadd.f32 %v4436_v14, %v3993_v34  ;;  %v4437_v52 = vmul.f32 %v19226_v60, %v4409_v62  ;;  %v15610_v37 = vld [vmem:[#allocation3 + $0x84] ss:$8 sps:$4 sm:$0xff]   ;;  %v15613_v34 = vld [vmem:[#allocation3 + $0x94] ss:$8 sps:$4 sm:$0xff]  }
 0x3d0   :  { %v19308_v42 = vpack.c.bf16 %v4522_v18, %v4521_v13  ;;  %v15601_v39 = vld [vmem:[%s21526_s4 + $0x38] sm:$0xff]   ;;  %v15602_v14 = vld [vmem:[%s21526_s4 + $0x40] sm:$0xff]  }
 0x3d1   :  { %v4475_v38 = vadd.f32 %v19235_v2, %v4452_v35  ;;  %v4453_v23 = vadd.f32 %v4437_v52, %v3994_v48  ;;  %v15614_v48 = vld [vmem:[#allocation3 + $0xa0] ss:$8 sps:$4 sm:$0xff]   ;;  %v15616_v62 = vld [vmem:[#allocation3 + $0xa4] ss:$8 sps:$4 sm:$0xff]   ;;  %v15619_v13 = vld [vmem:[#allocation3 + $0xb0] ss:$8 sps:$4 sm:$0xff]  }
 0x3d2   :  { %14889 = vmatprep.subr.bf16.mxu0 %v19308_v42  ;;  %14909 = vmatprep.subr.bf16.mxu1 %v19308_v42  ;;  %v15621_v18 = vld [vmem:[#allocation3 + $0xb4] ss:$8 sps:$4 sm:$0xff]   ;;  %v15622_v35 = vld [vmem:[#allocation3 + $0xc0] ss:$8 sps:$4 sm:$0xff]   ;;  %v15624_v52 = vld [vmem:[#allocation3 + $0xc4] ss:$8 sps:$4 sm:$0xff]  }
 0x3d3   :  { %v4507_v25 = vmul.f32 0.2, %v4475_v38  ;;  %v4476_v7 = vadd.f32 %v19235_v2, %v4453_v23  ;;  %14890 = vmatpush3.bf16.msra.mxu0 %v19308_v42  ;;  %14910 = vmatpush3.bf16.msra.mxu1 %v19308_v42  ;;  %vm4491_vm10 = vcmp.ge.f32.partialorder %v4475_v38, 0.0  ;;  %v15628_v23 = vld [vmem:[#allocation3 + $0xe0] ss:$8 sps:$4 sm:$0xff]  }
 0x3d4   :  { %v4411_v43 = vpop.xlane.xlu0 %4410 }
 0x3d5   :  { %vm4492_vm11 = vcmp.ge.f32.partialorder %v4476_v7, 0.0  ;;  %v4508_v30 = vmul.f32 0.2, %v4476_v7  ;;  %v4438_v8 = vmul.f32 %v19226_v60, %v4411_v43  ;;  %v4523_v63 = vsel %vm4491_vm10, %v4475_v38, %v4507_v25  ;;  %v15627_v38 = vld [vmem:[#allocation3 + $0xd4] ss:$8 sps:$4 sm:$0xff]  }
 0x3d6   :  { %v4413_v27 = vpop.xlane.xlu1 %4412  ;;  %v15633_v25 = vld [vmem:[#allocation3 + $0xf4] ss:$8 sps:$4 sm:$0xff]   ;;  %v15636_v43 = vld [vmem:[#allocation3 + $0x4] ss:$8 sps:$4 sm:$0xff]  }
 0x3d7   :  { %v4524_v32 = vsel %vm4492_vm11, %v4476_v7, %v4508_v30  ;;  %v4454_v28 = vadd.f32 %v4438_v8, %v3995_v41  ;;  %v4439_v9 = vmul.f32 %v19226_v60, %v4413_v27  ;;  %v15631_v7 = vld [vmem:[#allocation3 + $0xf0] ss:$8 sps:$4 sm:$0xff]   ;;  %v16831_v41 = vmov 0   ;;  %v15603_v30 = vld [vmem:[%s21526_s4 + $0x48] sm:$0xff]   ;;  %v15606_v27 = vld [vmem:[%s21526_s4 + $0x60] sm:$0xff]  }
 0x3d8   :  { %v19324_v54 = vpack.c.bf16 %v4524_v32, %v4523_v63  ;;  %v15604_v8 = vld [vmem:[%s21526_s4 + $0x50] sm:$0xff]   ;;  %v15607_v63 = vld [vmem:[%s21526_s4 + $0x68] sm:$0xff]  }
 0x3d9   :  { %v4477_v46 = vadd.f32 %v19235_v2, %v4454_v28  ;;  %v4455_v58 = vadd.f32 %v4439_v9, %v3996_v55  ;;  %v15605_v55 = vld [vmem:[%s21526_s4 + $0x58] sm:$0xff]   ;;  %v15617_v32 = vld [vmem:[%s21526_s4 + $0x70] sm:$0xff]   ;;  %v15661_v9 = vld [vmem:[%s21526_s4 + $0x80] sm:$0xff]  }
 0x3da   :  { %14891 = vmatprep.subr.bf16.mxu0 %v19324_v54  ;;  %14911 = vmatprep.subr.bf16.mxu1 %v19324_v54  ;;  %v15618_v28 = vld [vmem:[%s21526_s4 + $0x78] sm:$0xff]  }
 0x3db   :  { %v4509_v0 = vmul.f32 0.2, %v4477_v46  ;;  %v4478_v19 = vadd.f32 %v19235_v2, %v4455_v58  ;;  %14892 = vmatpush3.bf16.msra.mxu0 %v19324_v54  ;;  %14912 = vmatpush3.bf16.msra.mxu1 %v19324_v54  ;;  %vm4493_vm12 = vcmp.ge.f32.partialorder %v4477_v46, 0.0 }
 0x3dc   :  { %v4415_v61 = vpop.xlane.xlu0 %4414 }
 0x3dd   :  { %vm4494_vm13 = vcmp.ge.f32.partialorder %v4478_v19, 0.0  ;;  %v4510_v26 = vmul.f32 0.2, %v4478_v19  ;;  %v4440_v45 = vmul.f32 %v19226_v60, %v4415_v61  ;;  %v4525_v31 = vsel %vm4493_vm12, %v4477_v46, %v4509_v0 }
 0x3de   :  { %v4417_v20 = vpop.xlane.xlu1 %4416 }
 0x3df   :  { %v4526_v5 = vsel %vm4494_vm13, %v4478_v19, %v4510_v26  ;;  %v4456_v51 = vadd.f32 %v4440_v45, %v3997_v1  ;;  %v4441_v53 = vmul.f32 %v19226_v60, %v4417_v20  ;;  %v15639_v1 = vld [vmem:[#allocation3 + $0x14] ss:$8 sps:$4 sm:$0xff]   ;;  %v15642_v45 = vld [vmem:[#allocation3 + $0x24] ss:$8 sps:$4 sm:$0xff]   ;;  %v15640_v20 = vld [vmem:[#allocation3 + $0x20] ss:$8 sps:$4 sm:$0xff]  }
 0x3e0   :  { %v19340_v49 = vpack.c.bf16 %v4526_v5, %v4525_v31  ;;  %v15645_v31 = vld [vmem:[#allocation3 + $0x34] ss:$8 sps:$4 sm:$0xff]   ;;  %v15643_v5 = vld [vmem:[#allocation3 + $0x30] ss:$8 sps:$4 sm:$0xff]   ;;  %vm11566_vm13 = vcmask 64512  }
 0x3e1   :  { %v4479_v24 = vadd.f32 %v19235_v2, %v4456_v51  ;;  %v4457_v56 = vadd.f32 %v4441_v53, %v3998_v36  ;;  %v15665_v36 = vld [vmem:[%s21526_s4 + $0x88] sm:$0xff]  }
 0x3e2   :  { %14893 = vmatprep.subr.bf16.mxu0 %v19340_v49  ;;  %14913 = vmatprep.subr.bf16.mxu1 %v19340_v49  ;;  %v15648_v51 = vld [vmem:[#allocation3 + $0x44] ss:$8 sps:$4 sm:$0xff]   ;;  %v15646_v53 = vld [vmem:[#allocation3 + $0x40] ss:$8 sps:$4 sm:$0xff]  }
 0x3e3   :  { %v4511_v22 = vmul.f32 0.2, %v4479_v24  ;;  %v4480_v33 = vadd.f32 %v19235_v2, %v4457_v56  ;;  %14894 = vmatpush3.bf16.msra.mxu0 %v19340_v49  ;;  %14914 = vmatpush3.bf16.msra.mxu1 %v19340_v49  ;;  %vm4495_vm14 = vcmp.ge.f32.partialorder %v4479_v24, 0.0  ;;  %v15597_v2 = vld [vmem:[%s21526_s4 + $0x8] sm:$0xff]  }
 0x3e4   :  { %v15654_v56 = vld [vmem:[#allocation3 + $0x64] ss:$8 sps:$4 sm:$0xff]  }
 0x3e5   :  { %vm4496_vm15 = vcmp.ge.f32.partialorder %v4480_v33, 0.0  ;;  %v4512_v59 = vmul.f32 0.2, %v4480_v33  ;;  %v4527_v60 = vsel %vm4495_vm14, %v4479_v24, %v4511_v22  ;;  %v15649_v24 = vld [vmem:[#allocation3 + $0x50] ss:$8 sps:$4 sm:$0xff]   ;;  %vm11712_vm14 = vcmask 1041408  }
 0x3e6   :  { %v15652_v22 = vld [vmem:[#allocation3 + $0x60] ss:$8 sps:$4 sm:$0xff]  }
 0x3e7   :  { %v4528_v11 = vsel %vm4496_vm15, %v4480_v33, %v4512_v59  ;;  %v15657_v33 = vld [vmem:[#allocation3 + $0x74] ss:$8 sps:$4 sm:$0xff]   ;;  %v15655_v59 = vld [vmem:[#allocation3 + $0x70] ss:$8 sps:$4 sm:$0xff]   ;;  %vm11736_vm15 = vcmask 1024  }
 0x3e8   :  { %v19348_v15 = vpack.c.bf16 %v4528_v11, %v4527_v60  ;;  %v15660_v60 = vld [vmem:[#allocation3 + $0x104] ss:$8 sps:$4 sm:$0xff]  }
 0x3ea   :  { %14895 = vmatprep.subr.bf16.mxu0 %v19348_v15  ;;  %14915 = vmatprep.subr.bf16.mxu1 %v19348_v15 }
 0x3eb   :  { %14896 = vmatpush3.bf16.msra.mxu0 %v19348_v15  ;;  %14916 = vmatpush3.bf16.msra.mxu1 %v19348_v15 }
 0x3ec   :  { %14921 = vmatprep.subr.bf16.mxu1 %v19246_v29  ;;  %4785 = vmatprep.subr.bf16.mxu0 %v15610_v37  ;;  %v15662_v37 = vld [vmem:[#allocation3 + $0x110] ss:$8 sps:$4 sm:$0xff]  }
 0x3ee   :  { %14918 = vmatmul.mubr.bf16.vlgmr.msra.gmra.mrb[32].mxu1 %v15595_v40  ;;  %14898 = vmatmul.mubr.bf16.vlgmr.msra.gmra.mrb[32].mxu0 %v15597_v2  ;;  %v15658_v2 = vld [vmem:[#allocation3 + $0x100] ss:$8 sps:$4 sm:$0xff]  }
 0x3ef   :  { %14922 = vmatpush3.bf16.msra.mxu1 %v19246_v29  ;;  %14937 = vmatprep.mubr.bf16.mxu1 %v15598_v10 }
 0x3f0   :  { %14923 = vmatprep.subr.bf16.mxu1 %v19260_v47  ;;  %4786 = vmatpush1.bf16.msra.mxu0 %v15608_v57 }
 0x3f1   :  { %4787 = vmatprep.subr.bf16.mxu0 %v15613_v34  ;;  %4817 = vmatprep.mubr.bf16.mxu0 %v16831_v41  ;;  %v15666_v34 = vld [vmem:[#allocation3 + $0x120] ss:$8 sps:$4 sm:$0xff]  }
 0x3f3   :  { %14924 = vmatpush3.bf16.msra.mxu1 %v19260_v47 }
 0x3f4   :  { %14925 = vmatprep.subr.bf16.mxu1 %v19276_v50  ;;  %4788 = vmatpush1.bf16.msra.mxu0 %v15611_v17  ;;  %v15668_v17 = vld [vmem:[#allocation3 + $0x124] ss:$8 sps:$4 sm:$0xff]  }
 0x3f5   :  { %4789 = vmatprep.subr.bf16.mxu0 %v15616_v62  ;;  %v15672_v62 = vld [vmem:[#allocation3 + $0x140] ss:$8 sps:$4 sm:$0xff]  }
 0x3f7   :  { %14926 = vmatpush3.bf16.msra.mxu1 %v19276_v50 }
 0x3f8   :  { %14927 = vmatprep.subr.bf16.mxu1 %v19292_v16  ;;  %4790 = vmatpush1.bf16.msra.mxu0 %v15614_v48  ;;  %v15674_v48 = vld [vmem:[#allocation3 + $0x144] ss:$8 sps:$4 sm:$0xff]  }
 0x3f9   :  { %4791 = vmatprep.subr.bf16.mxu0 %v15621_v18  ;;  %v15675_v18 = vld [vmem:[#allocation3 + $0x150] ss:$8 sps:$4 sm:$0xff]  }
 0x3fb   :  { %14928 = vmatpush3.bf16.msra.mxu1 %v19292_v16 }
 0x3fc   :  { %14929 = vmatprep.subr.bf16.mxu1 %v19308_v42  ;;  %4792 = vmatpush1.bf16.msra.mxu0 %v15619_v13  ;;  %v15677_v13 = vld [vmem:[#allocation3 + $0x154] ss:$8 sps:$4 sm:$0xff]  }
 0x3fd   :  { %4793 = vmatprep.subr.bf16.mxu0 %v15624_v52  ;;  %v15678_v52 = vld [vmem:[#allocation3 + $0x160] ss:$8 sps:$4 sm:$0xff]  }
 0x3ff   :  { %14930 = vmatpush3.bf16.msra.mxu1 %v19308_v42 }
 0x400   :  { %14931 = vmatprep.subr.bf16.mxu1 %v19324_v54  ;;  %4794 = vmatpush1.bf16.msra.mxu0 %v15622_v35  ;;  %v15680_v35 = vld [vmem:[#allocation3 + $0x164] ss:$8 sps:$4 sm:$0xff]  }
 0x401   :  { %4795 = vmatprep.subr.bf16.mxu0 %v15627_v38  ;;  %v15681_v38 = vld [vmem:[#allocation3 + $0x170] ss:$8 sps:$4 sm:$0xff]  }
 0x403   :  { %14932 = vmatpush3.bf16.msra.mxu1 %v19324_v54 }
 0x404   :  { %14933 = vmatprep.subr.bf16.mxu1 %v19340_v49  ;;  %4796 = vmatpush1.bf16.msra.mxu0 %v15625_v6  ;;  %v15683_v6 = vld [vmem:[#allocation3 + $0x174] ss:$8 sps:$4 sm:$0xff]  }
 0x405   :  { %4797 = vmatprep.subr.bf16.mxu0 %v15630_v44 }
 0x407   :  { %14934 = vmatpush3.bf16.msra.mxu1 %v19340_v49 }
 0x408   :  { %14935 = vmatprep.subr.bf16.mxu1 %v19348_v15  ;;  %4798 = vmatpush1.bf16.msra.mxu0 %v15628_v23  ;;  %v15686_v23 = vld [vmem:[#allocation3 + $0x184] ss:$8 sps:$4 sm:$0xff]  }
 0x409   :  { %4799 = vmatprep.subr.bf16.mxu0 %v15633_v25 }
 0x40b   :  { %14936 = vmatpush3.bf16.msra.mxu1 %v19348_v15 }
 0x40c   :  { %14941 = vmatprep.subr.bf16.mxu1 %v19246_v29  ;;  %4800 = vmatpush1.bf16.msra.mxu0 %v15631_v7 }
 0x40d   :  { %4918 = vmatprep.subr.bf16.mxu0 %v15636_v43  ;;  %v15684_v43 = vld [vmem:[#allocation3 + $0x180] ss:$8 sps:$4 sm:$0xff]  }
 0x40e   :  { %14938 = vmatmul.mubr.bf16.vlgmr.msra.gmra.mrb[36].mxu1 %v15599_v12 }
 0x40f   :  { %14942 = vmatpush3.bf16.msra.mxu1 %v19246_v29  ;;  %14957 = vmatprep.mubr.bf16.mxu1 %v15600_v4  ;;  %v15664_v4 = vld [vmem:[#allocation3 + $0x114] ss:$8 sps:$4 sm:$0xff]  }
 0x410   :  { %14943 = vmatprep.subr.bf16.mxu1 %v19260_v47 }
 0x413   :  { %14944 = vmatpush3.bf16.msra.mxu1 %v19260_v47 }
 0x414   :  { %14945 = vmatprep.subr.bf16.mxu1 %v19276_v50 }
 0x417   :  { %14946 = vmatpush3.bf16.msra.mxu1 %v19276_v50 }
 0x418   :  { %14947 = vmatprep.subr.bf16.mxu1 %v19292_v16 }
 0x41b   :  { %14948 = vmatpush3.bf16.msra.mxu1 %v19292_v16 }
 0x41c   :  { %14949 = vmatprep.subr.bf16.mxu1 %v19308_v42 }
 0x41f   :  { %14950 = vmatpush3.bf16.msra.mxu1 %v19308_v42 }
 0x420   :  { %14951 = vmatprep.subr.bf16.mxu1 %v19324_v54 }
 0x423   :  { %14952 = vmatpush3.bf16.msra.mxu1 %v19324_v54 }
 0x424   :  { %14953 = vmatprep.subr.bf16.mxu1 %v19340_v49 }
 0x427   :  { %14954 = vmatpush3.bf16.msra.mxu1 %v19340_v49 }
 0x428   :  { %14955 = vmatprep.subr.bf16.mxu1 %v19348_v15 }
 0x42b   :  { %14956 = vmatpush3.bf16.msra.mxu1 %v19348_v15 }
 0x42c   :  { %14961 = vmatprep.subr.bf16.mxu1 %v19246_v29 }
 0x42e   :  { %14958 = vmatmul.mubr.bf16.vlgmr.msra.gmra.mrb[40].mxu1 %v15601_v39  ;;  %v15671_v39 = vld [vmem:[#allocation3 + $0x134] ss:$8 sps:$4 sm:$0xff]  }
 0x42f   :  { %14962 = vmatpush3.bf16.msra.mxu1 %v19246_v29  ;;  %14977 = vmatprep.mubr.bf16.mxu1 %v15602_v14  ;;  %v15669_v14 = vld [vmem:[#allocation3 + $0x130] ss:$8 sps:$4 sm:$0xff]  }
 0x430   :  { %14963 = vmatprep.subr.bf16.mxu1 %v19260_v47 }
 0x433   :  { %14964 = vmatpush3.bf16.msra.mxu1 %v19260_v47 }
 0x434   :  { %14965 = vmatprep.subr.bf16.mxu1 %v19276_v50 }
 0x437   :  { %14966 = vmatpush3.bf16.msra.mxu1 %v19276_v50 }
 0x438   :  { %14967 = vmatprep.subr.bf16.mxu1 %v19292_v16 }
 0x43b   :  { %14968 = vmatpush3.bf16.msra.mxu1 %v19292_v16 }
 0x43c   :  { %14969 = vmatprep.subr.bf16.mxu1 %v19308_v42 }
 0x43f   :  { %14970 = vmatpush3.bf16.msra.mxu1 %v19308_v42 }
 0x440   :  { %14971 = vmatprep.subr.bf16.mxu1 %v19324_v54 }
 0x443   :  { %14972 = vmatpush3.bf16.msra.mxu1 %v19324_v54 }
 0x444   :  { %14973 = vmatprep.subr.bf16.mxu1 %v19340_v49 }
 0x447   :  { %14974 = vmatpush3.bf16.msra.mxu1 %v19340_v49 }
 0x448   :  { %14975 = vmatprep.subr.bf16.mxu1 %v19348_v15 }
 0x44b   :  { %14976 = vmatpush3.bf16.msra.mxu1 %v19348_v15 }
 0x44c   :  { %14981 = vmatprep.subr.bf16.mxu1 %v19246_v29 }
 0x44e   :  { %14978 = vmatmul.mubr.bf16.vlgmr.msra.gmra.mrb[44].mxu1 %v15603_v30 }
 0x44f   :  { %14982 = vmatpush3.bf16.msra.mxu1 %v19246_v29  ;;  %14997 = vmatprep.mubr.bf16.mxu1 %v15604_v8 }
 0x450   :  { %14983 = vmatprep.subr.bf16.mxu1 %v19260_v47 }
 0x453   :  { %14984 = vmatpush3.bf16.msra.mxu1 %v19260_v47 }
 0x454   :  { %14985 = vmatprep.subr.bf16.mxu1 %v19276_v50 }
 0x457   :  { %14986 = vmatpush3.bf16.msra.mxu1 %v19276_v50 }
 0x458   :  { %14987 = vmatprep.subr.bf16.mxu1 %v19292_v16 }
 0x45b   :  { %14988 = vmatpush3.bf16.msra.mxu1 %v19292_v16 }
 0x45c   :  { %14989 = vmatprep.subr.bf16.mxu1 %v19308_v42 }
 0x45f   :  { %14990 = vmatpush3.bf16.msra.mxu1 %v19308_v42 }
 0x460   :  { %14991 = vmatprep.subr.bf16.mxu1 %v19324_v54 }
 0x463   :  { %14992 = vmatpush3.bf16.msra.mxu1 %v19324_v54 }
 0x464   :  { %14993 = vmatprep.subr.bf16.mxu1 %v19340_v49 }
 0x467   :  { %14994 = vmatpush3.bf16.msra.mxu1 %v19340_v49 }
 0x468   :  { %14995 = vmatprep.subr.bf16.mxu1 %v19348_v15 }
 0x46b   :  { %14996 = vmatpush3.bf16.msra.mxu1 %v19348_v15 }
 0x46c   :  { %15001 = vmatprep.subr.bf16.mxu1 %v19246_v29 }
 0x46e   :  { %14998 = vmatmul.mubr.bf16.vlgmr.msra.gmra.mrb[48].mxu1 %v15605_v55  ;;  %v15689_v55 = vld [vmem:[#allocation3 + $0x194] ss:$8 sps:$4 sm:$0xff]  }
 0x46f   :  { %15002 = vmatpush3.bf16.msra.mxu1 %v19246_v29  ;;  %15017 = vmatprep.mubr.bf16.mxu1 %v15606_v27 }
 0x470   :  { %15003 = vmatprep.subr.bf16.mxu1 %v19260_v47 }
 0x473   :  { %15004 = vmatpush3.bf16.msra.mxu1 %v19260_v47 }
 0x474   :  { %15005 = vmatprep.subr.bf16.mxu1 %v19276_v50 }
 0x477   :  { %15006 = vmatpush3.bf16.msra.mxu1 %v19276_v50 }
 0x478   :  { %15007 = vmatprep.subr.bf16.mxu1 %v19292_v16 }
 0x47b   :  { %15008 = vmatpush3.bf16.msra.mxu1 %v19292_v16 }
 0x47c   :  { %15009 = vmatprep.subr.bf16.mxu1 %v19308_v42 }
 0x47f   :  { %15010 = vmatpush3.bf16.msra.mxu1 %v19308_v42 }
 0x480   :  { %15011 = vmatprep.subr.bf16.mxu1 %v19324_v54 }
 0x483   :  { %15012 = vmatpush3.bf16.msra.mxu1 %v19324_v54 }
 0x484   :  { %15013 = vmatprep.subr.bf16.mxu1 %v19340_v49 }
 0x487   :  { %15014 = vmatpush3.bf16.msra.mxu1 %v19340_v49 }
 0x488   :  { %15015 = vmatprep.subr.bf16.mxu1 %v19348_v15 }
 0x48b   :  { %15016 = vmatpush3.bf16.msra.mxu1 %v19348_v15 }
 0x48c   :  { %15021 = vmatprep.subr.bf16.mxu1 %v19246_v29 }
 0x48e   :  { %15018 = vmatmul.mubr.bf16.vlgmr.msra.gmra.mrb[52].mxu1 %v15607_v63  ;;  %v15687_v63 = vld [vmem:[#allocation3 + $0x190] ss:$8 sps:$4 sm:$0xff]  }
 0x48f   :  { %15022 = vmatpush3.bf16.msra.mxu1 %v19246_v29  ;;  %15037 = vmatprep.mubr.bf16.mxu1 %v15617_v32  ;;  %v15692_v32 = vld [vmem:[#allocation3 + $0x1a4] ss:$8 sps:$4 sm:$0xff]  }
 0x490   :  { %15023 = vmatprep.subr.bf16.mxu1 %v19260_v47 }
 0x493   :  { %15024 = vmatpush3.bf16.msra.mxu1 %v19260_v47 }
 0x494   :  { %15025 = vmatprep.subr.bf16.mxu1 %v19276_v50 }
 0x497   :  { %15026 = vmatpush3.bf16.msra.mxu1 %v19276_v50 }
 0x498   :  { %15027 = vmatprep.subr.bf16.mxu1 %v19292_v16 }
 0x49b   :  { %15028 = vmatpush3.bf16.msra.mxu1 %v19292_v16 }
 0x49c   :  { %15029 = vmatprep.subr.bf16.mxu1 %v19308_v42 }
 0x49f   :  { %15030 = vmatpush3.bf16.msra.mxu1 %v19308_v42 }
 0x4a0   :  { %15031 = vmatprep.subr.bf16.mxu1 %v19324_v54 }
 0x4a3   :  { %15032 = vmatpush3.bf16.msra.mxu1 %v19324_v54 }
 0x4a4   :  { %15033 = vmatprep.subr.bf16.mxu1 %v19340_v49 }
 0x4a7   :  { %15034 = vmatpush3.bf16.msra.mxu1 %v19340_v49 }
 0x4a8   :  { %15035 = vmatprep.subr.bf16.mxu1 %v19348_v15 }
 0x4ab   :  { %15036 = vmatpush3.bf16.msra.mxu1 %v19348_v15 }
 0x4ac   :  { %15041 = vmatprep.subr.bf16.mxu1 %v19246_v29 }
 0x4ae   :  { %15038 = vmatmul.mubr.bf16.vlgmr.msra.gmra.mrb[56].mxu1 %v15618_v28  ;;  %v15690_v28 = vld [vmem:[#allocation3 + $0x1a0] ss:$8 sps:$4 sm:$0xff]  }
 0x4af   :  { %15042 = vmatpush3.bf16.msra.mxu1 %v19246_v29  ;;  %15057 = vmatprep.mubr.bf16.mxu1 %v15661_v9  ;;  %v15695_v9 = vld [vmem:[#allocation3 + $0x1b4] ss:$8 sps:$4 sm:$0xff]  }
 0x4b0   :  { %15043 = vmatprep.subr.bf16.mxu1 %v19260_v47 }
 0x4b3   :  { %15044 = vmatpush3.bf16.msra.mxu1 %v19260_v47 }
 0x4b4   :  { %15045 = vmatprep.subr.bf16.mxu1 %v19276_v50 }
 0x4b7   :  { %15046 = vmatpush3.bf16.msra.mxu1 %v19276_v50 }
 0x4b8   :  { %15047 = vmatprep.subr.bf16.mxu1 %v19292_v16 }
 0x4bb   :  { %15048 = vmatpush3.bf16.msra.mxu1 %v19292_v16  ;;  %v15634_v16 = vld [vmem:[#allocation3] ss:$8 sps:$4 sm:$0xff]  }
 0x4bc   :  { %15049 = vmatprep.subr.bf16.mxu1 %v19308_v42 }
 0x4bf   :  { %15050 = vmatpush3.bf16.msra.mxu1 %v19308_v42 }
 0x4c0   :  { %15051 = vmatprep.subr.bf16.mxu1 %v19324_v54 }
 0x4c1   :  { %v14919_v29 = vpop.f32.mrb[32].mxu1  ;;  %v19507_v21 = vpop.f32.mrb[32].mxu0 }
 0x4c2   :  { %v4671_v46 = vpop.f32.mrb[33].mxu1  ;;  %v4587_v58 = vpop.f32.mrb[33].mxu0 }
 0x4c3   :  { %v14920_v47 = vpop.f32.mrb[34].mxu1  ;;  %15052 = vmatpush3.bf16.msra.mxu1 %v19324_v54  ;;  %v19510_v3 = vpop.f32.mrb[34].mxu0  ;;  %v15637_v54 = vld [vmem:[#allocation3 + $0x10] ss:$8 sps:$4 sm:$0xff]  }
 0x4c4   :  { %v4687_v50 = vpack.c.bf16 %v14920_v47, %v14919_v29  ;;  %v4674_v0 = vpop.f32.mrb[35].mxu1  ;;  %15053 = vmatprep.subr.bf16.mxu1 %v19340_v49  ;;  %v4603_v42 = vpack.c.bf16 %v19510_v3, %v19507_v21  ;;  %v4590_v19 = vpop.f32.mrb[35].mxu0  ;;  %v15693_v29 = vld [vmem:[#allocation3 + $0x1b0] ss:$8 sps:$4 sm:$0xff]   ;;  %v15698_v21 = vld [vmem:[#allocation3 + $0x1c4] ss:$8 sps:$4 sm:$0xff]  }
 0x4c5   :  { %v4686_v61 = vpack.c.bf16 %v4674_v0, %v4671_v46  ;;  %v4602_v26 = vpack.c.bf16 %v4590_v19, %v4587_v58  ;;  %v15696_v46 = vld [vmem:[#allocation3 + $0x1c0] ss:$8 sps:$4 sm:$0xff]   ;;  %v15701_v58 = vld [vmem:[#allocation3 + $0x1d4] ss:$8 sps:$4 sm:$0xff]   ;;  %v15699_v47 = vld [vmem:[#allocation3 + $0x1d0] ss:$8 sps:$4 sm:$0xff]  }
 0x4c6   :  { %v15704_v3 = vld [vmem:[#allocation3 + $0x1e4] ss:$8 sps:$4 sm:$0xff]   ;;  %v15707_v0 = vld [vmem:[#allocation3 + $0x1f4] ss:$8 sps:$4 sm:$0xff]  }
 0x4c7   :  { %4818 = vmatmul.mubr.bf16.vlgmr.msra.gmra.mrb[36].mxu0 %v4686_v61  ;;  %15054 = vmatpush3.bf16.msra.mxu1 %v19340_v49  ;;  %v15651_v49 = vld [vmem:[#allocation3 + $0x54] ss:$8 sps:$4 sm:$0xff]  }
 0x4c8   :  { %4919 = vmatpush1.bf16.msra.mxu0 %v15634_v16  ;;  %15055 = vmatprep.subr.bf16.mxu1 %v19348_v15  ;;  %v15705_v16 = vld [vmem:[#allocation3 + $0x1f0] ss:$8 sps:$4 sm:$0xff]  }
 0x4c9   :  { %4920 = vmatprep.subr.bf16.mxu0 %v15639_v1  ;;  %4827 = vmatprep.mubr.bf16.mxu0 %v16831_v41 }
 0x4cb   :  { %15056 = vmatpush3.bf16.msra.mxu1 %v19348_v15 }
 0x4cc   :  { %4921 = vmatpush1.bf16.msra.mxu0 %v15637_v54 }
 0x4cd   :  { %4922 = vmatprep.subr.bf16.mxu0 %v15642_v45 }
 0x4ce   :  { %15058 = vmatmul.mubr.bf16.vlgmr.msra.gmra.mrb[60].mxu1 %v15665_v36  ;;  %v15713_v36 = vld [vmem:[#allocation3 + $0x214] ss:$8 sps:$4 sm:$0xff]  }
 0x4cf   :  { %4828 = vmatmul.mubr.bf16.gmra.mrb[40].mxu0 %v4687_v50  ;;  %6749 = vmatprep.mubr.bf16.mxu1 %v16831_v41  ;;  %v15702_v50 = vld [vmem:[#allocation3 + $0x1e0] ss:$8 sps:$4 sm:$0xff]  }
 0x4d0   :  { %4923 = vmatpush1.bf16.msra.mxu0 %v15640_v20  ;;  %4950 = vmatprep.mubr.bf16.mxu0 %v16831_v41 }
 0x4d1   :  { %4924 = vmatprep.subr.bf16.mxu0 %v15645_v31  ;;  %v15711_v31 = vld [vmem:[#allocation3 + $0x210] ss:$8 sps:$4 sm:$0xff]  }
 0x4d4   :  { %4925 = vmatpush1.bf16.msra.mxu0 %v15643_v5  ;;  %v15716_v5 = vld [vmem:[#allocation3 + $0x224] ss:$8 sps:$4 sm:$0xff]  }
 0x4d5   :  { %4926 = vmatprep.subr.bf16.mxu0 %v15648_v51  ;;  %v15714_v51 = vld [vmem:[#allocation3 + $0x220] ss:$8 sps:$4 sm:$0xff]  }
 0x4d8   :  { %4927 = vmatpush1.bf16.msra.mxu0 %v15646_v53  ;;  %v15719_v53 = vld [vmem:[#allocation3 + $0x234] ss:$8 sps:$4 sm:$0xff]  }
 0x4d9   :  { %4928 = vmatprep.subr.bf16.mxu0 %v15651_v49  ;;  %v15717_v49 = vld [vmem:[#allocation3 + $0x230] ss:$8 sps:$4 sm:$0xff]  }
 0x4dc   :  { %4929 = vmatpush1.bf16.msra.mxu0 %v15649_v24  ;;  %v15722_v24 = vld [vmem:[#allocation3 + $0x244] ss:$8 sps:$4 sm:$0xff]  }
 0x4dd   :  { %4930 = vmatprep.subr.bf16.mxu0 %v15654_v56  ;;  %v15720_v56 = vld [vmem:[#allocation3 + $0x240] ss:$8 sps:$4 sm:$0xff]  }
 0x4e0   :  { %4931 = vmatpush1.bf16.msra.mxu0 %v15652_v22  ;;  %v15725_v22 = vld [vmem:[#allocation3 + $0x254] ss:$8 sps:$4 sm:$0xff]  }
 0x4e1   :  { %4932 = vmatprep.subr.bf16.mxu0 %v15657_v33  ;;  %v14939_v11 = vpop.f32.mrb[36].mxu1  ;;  %v15723_v33 = vld [vmem:[#allocation3 + $0x250] ss:$8 sps:$4 sm:$0xff]  }
 0x4e2   :  { %v5022_v15 = vpop.f32.mrb[37].mxu1 }
 0x4e3   :  { %v14940_v40 = vpop.f32.mrb[38].mxu1 }
 0x4e4   :  { %4933 = vmatpush1.bf16.msra.mxu0 %v15655_v59  ;;  %v5038_v10 = vpack.c.bf16 %v14940_v40, %v14939_v11  ;;  %v5025_v12 = vpop.f32.mrb[39].mxu1  ;;  %v15728_v59 = vld [vmem:[#allocation3 + $0x264] ss:$8 sps:$4 sm:$0xff]   ;;  %v15731_v11 = vld [vmem:[#allocation3 + $0x274] ss:$8 sps:$4 sm:$0xff]  }
 0x4e5   :  { %5136 = vmatprep.subr.bf16.mxu0 %v15660_v60  ;;  %v5037_v57 = vpack.c.bf16 %v5025_v12, %v5022_v15  ;;  %v15726_v60 = vld [vmem:[#allocation3 + $0x260] ss:$8 sps:$4 sm:$0xff]   ;;  %v15729_v15 = vld [vmem:[#allocation3 + $0x270] ss:$8 sps:$4 sm:$0xff]   ;;  %v15734_v40 = vld [vmem:[#allocation3 + $0x284] ss:$8 sps:$4 sm:$0xff]  }
 0x4e7   :  { %4951 = vmatmul.mubr.bf16.vlgmr.msra.gmra.mrb[36].mxu0 %v4602_v26  ;;  %v15708_v26 = vld [vmem:[#allocation3 + $0x200] ss:$8 sps:$4 sm:$0xff]  }
 0x4e8   :  { %5137 = vmatpush1.bf16.msra.mxu0 %v15658_v2  ;;  %4960 = vmatprep.mubr.bf16.mxu0 %v16831_v41 }
 0x4e9   :  { %5138 = vmatprep.subr.bf16.mxu0 %v15664_v4  ;;  %v15732_v4 = vld [vmem:[#allocation3 + $0x280] ss:$8 sps:$4 sm:$0xff]  }
 0x4ec   :  { %5139 = vmatpush1.bf16.msra.mxu0 %v15662_v37 }
 0x4ed   :  { %5140 = vmatprep.subr.bf16.mxu0 %v15668_v17  ;;  %v15737_v17 = vld [vmem:[#allocation3 + $0x294] ss:$8 sps:$4 sm:$0xff]  }
 0x4ef   :  { %4961 = vmatmul.mubr.bf16.gmra.mrb[40].mxu0 %v4603_v42  ;;  %v15710_v42 = vld [vmem:[#allocation3 + $0x204] ss:$8 sps:$4 sm:$0xff]  }
 0x4f0   :  { %5141 = vmatpush1.bf16.msra.mxu0 %v15666_v34  ;;  %5168 = vmatprep.mubr.bf16.mxu0 %v16831_v41 }
 0x4f1   :  { %5142 = vmatprep.subr.bf16.mxu0 %v15671_v39  ;;  %v15735_v39 = vld [vmem:[#allocation3 + $0x290] ss:$8 sps:$4 sm:$0xff]  }
 0x4f4   :  { %5143 = vmatpush1.bf16.msra.mxu0 %v15669_v14  ;;  %v15740_v14 = vld [vmem:[#allocation3 + $0x2a4] ss:$8 sps:$4 sm:$0xff]  }
 0x4f5   :  { %5144 = vmatprep.subr.bf16.mxu0 %v15674_v48  ;;  %v15738_v48 = vld [vmem:[#allocation3 + $0x2a0] ss:$8 sps:$4 sm:$0xff]  }
 0x4f8   :  { %5145 = vmatpush1.bf16.msra.mxu0 %v15672_v62  ;;  %v15743_v62 = vld [vmem:[#allocation3 + $0x2b4] ss:$8 sps:$4 sm:$0xff]  }
 0x4f9   :  { %5146 = vmatprep.subr.bf16.mxu0 %v15677_v13  ;;  %v15741_v13 = vld [vmem:[#allocation3 + $0x2b0] ss:$8 sps:$4 sm:$0xff]  }
 0x4fc   :  { %5147 = vmatpush1.bf16.msra.mxu0 %v15675_v18  ;;  %v15746_v18 = vld [vmem:[#allocation3 + $0x2c4] ss:$8 sps:$4 sm:$0xff]  }
 0x4fd   :  { %5148 = vmatprep.subr.bf16.mxu0 %v15680_v35  ;;  %v15744_v35 = vld [vmem:[#allocation3 + $0x2c0] ss:$8 sps:$4 sm:$0xff]  }
 0x500   :  { %5149 = vmatpush1.bf16.msra.mxu0 %v15678_v52  ;;  %v15749_v52 = vld [vmem:[#allocation3 + $0x2d4] ss:$8 sps:$4 sm:$0xff]  }
 0x501   :  { %5150 = vmatprep.subr.bf16.mxu0 %v15683_v6  ;;  %v14959_v44 = vpop.f32.mrb[40].mxu1  ;;  %v15747_v6 = vld [vmem:[#allocation3 + $0x2d0] ss:$8 sps:$4 sm:$0xff]  }
 0x502   :  { %v5248_v25 = vpop.f32.mrb[41].mxu1 }
 0x503   :  { %v14960_v7 = vpop.f32.mrb[42].mxu1 }
 0x504   :  { %5151 = vmatpush1.bf16.msra.mxu0 %v15681_v38  ;;  %v5264_v30 = vpack.c.bf16 %v14960_v7, %v14959_v44  ;;  %v5251_v8 = vpop.f32.mrb[43].mxu1  ;;  %v15752_v38 = vld [vmem:[#allocation3 + $0x2e4] ss:$8 sps:$4 sm:$0xff]   ;;  %v15755_v44 = vld [vmem:[#allocation3 + $0x2f4] ss:$8 sps:$4 sm:$0xff]  }
 0x505   :  { %5362 = vmatprep.subr.bf16.mxu0 %v15686_v23  ;;  %v5263_v27 = vpack.c.bf16 %v5251_v8, %v5248_v25  ;;  %v15750_v23 = vld [vmem:[#allocation3 + $0x2e0] ss:$8 sps:$4 sm:$0xff]   ;;  %v15753_v25 = vld [vmem:[#allocation3 + $0x2f0] ss:$8 sps:$4 sm:$0xff]   ;;  %v15758_v7 = vld [vmem:[#allocation3 + $0x304] ss:$8 sps:$4 sm:$0xff]  }
 0x507   :  { %5169 = vmatmul.mubr.bf16.vlgmr.msra.gmra.mrb[36].mxu0 %v5037_v57 }
 0x508   :  { %5363 = vmatpush1.bf16.msra.mxu0 %v15684_v43  ;;  %5178 = vmatprep.mubr.bf16.mxu0 %v16831_v41 }
 0x509   :  { %5364 = vmatprep.subr.bf16.mxu0 %v15689_v55  ;;  %v15756_v55 = vld [vmem:[#allocation3 + $0x300] ss:$8 sps:$4 sm:$0xff]  }
 0x50c   :  { %5365 = vmatpush1.bf16.msra.mxu0 %v15687_v63 }
 0x50d   :  { %5366 = vmatprep.subr.bf16.mxu0 %v15692_v32  ;;  %v15761_v32 = vld [vmem:[#allocation3 + $0x314] ss:$8 sps:$4 sm:$0xff]  }
 0x50f   :  { %5179 = vmatmul.mubr.bf16.gmra.mrb[40].mxu0 %v5038_v10 }
 0x510   :  { %5367 = vmatpush1.bf16.msra.mxu0 %v15690_v28  ;;  %5394 = vmatprep.mubr.bf16.mxu0 %v16831_v41 }
 0x511   :  { %5368 = vmatprep.subr.bf16.mxu0 %v15695_v9  ;;  %v15759_v9 = vld [vmem:[#allocation3 + $0x310] ss:$8 sps:$4 sm:$0xff]  }
 0x514   :  { %5369 = vmatpush1.bf16.msra.mxu0 %v15693_v29  ;;  %v15764_v29 = vld [vmem:[#allocation3 + $0x324] ss:$8 sps:$4 sm:$0xff]  }
 0x515   :  { %5370 = vmatprep.subr.bf16.mxu0 %v15698_v21  ;;  %v15762_v21 = vld [vmem:[#allocation3 + $0x320] ss:$8 sps:$4 sm:$0xff]  }
 0x518   :  { %5371 = vmatpush1.bf16.msra.mxu0 %v15696_v46  ;;  %v15767_v46 = vld [vmem:[#allocation3 + $0x334] ss:$8 sps:$4 sm:$0xff]  }
 0x519   :  { %5372 = vmatprep.subr.bf16.mxu0 %v15701_v58  ;;  %v15765_v58 = vld [vmem:[#allocation3 + $0x330] ss:$8 sps:$4 sm:$0xff]  }
 0x51c   :  { %5373 = vmatpush1.bf16.msra.mxu0 %v15699_v47  ;;  %v15770_v47 = vld [vmem:[#allocation3 + $0x344] ss:$8 sps:$4 sm:$0xff]  }
 0x51d   :  { %5374 = vmatprep.subr.bf16.mxu0 %v15704_v3  ;;  %v15768_v3 = vld [vmem:[#allocation3 + $0x340] ss:$8 sps:$4 sm:$0xff]  }
 0x520   :  { %5375 = vmatpush1.bf16.msra.mxu0 %v15702_v50  ;;  %v15773_v50 = vld [vmem:[#allocation3 + $0x354] ss:$8 sps:$4 sm:$0xff]  }
 0x521   :  { %5376 = vmatprep.subr.bf16.mxu0 %v15707_v0  ;;  %v14979_v19 = vpop.f32.mrb[44].mxu1  ;;  %v15771_v0 = vld [vmem:[#allocation3 + $0x350] ss:$8 sps:$4 sm:$0xff]  }
 0x522   :  { %v5474_v61 = vpop.f32.mrb[45].mxu1 }
 0x523   :  { %v14980_v1 = vpop.f32.mrb[46].mxu1 }
 0x524   :  { %5377 = vmatpush1.bf16.msra.mxu0 %v15705_v16  ;;  %v5490_v54 = vpack.c.bf16 %v14980_v1, %v14979_v19  ;;  %v5477_v45 = vpop.f32.mrb[47].mxu1  ;;  %v15776_v16 = vld [vmem:[#allocation3 + $0x364] ss:$8 sps:$4 sm:$0xff]   ;;  %v15779_v19 = vld [vmem:[#allocation3 + $0x374] ss:$8 sps:$4 sm:$0xff]  }
 0x525   :  { %5588 = vmatprep.subr.bf16.mxu0 %v15710_v42  ;;  %v5489_v20 = vpack.c.bf16 %v5477_v45, %v5474_v61  ;;  %v15774_v42 = vld [vmem:[#allocation3 + $0x360] ss:$8 sps:$4 sm:$0xff]   ;;  %v15777_v61 = vld [vmem:[#allocation3 + $0x370] ss:$8 sps:$4 sm:$0xff]   ;;  %v15782_v1 = vld [vmem:[#allocation3 + $0x384] ss:$8 sps:$4 sm:$0xff]  }
 0x527   :  { %5395 = vmatmul.mubr.bf16.vlgmr.msra.gmra.mrb[36].mxu0 %v5263_v27 }
 0x528   :  { %5589 = vmatpush1.bf16.msra.mxu0 %v15708_v26  ;;  %5404 = vmatprep.mubr.bf16.mxu0 %v16831_v41 }
 0x529   :  { %5590 = vmatprep.subr.bf16.mxu0 %v15713_v36  ;;  %v15780_v36 = vld [vmem:[#allocation3 + $0x380] ss:$8 sps:$4 sm:$0xff]  }
 0x52c   :  { %5591 = vmatpush1.bf16.msra.mxu0 %v15711_v31 }
 0x52d   :  { %5592 = vmatprep.subr.bf16.mxu0 %v15716_v5  ;;  %v15785_v5 = vld [vmem:[#allocation3 + $0x394] ss:$8 sps:$4 sm:$0xff]  }
 0x52f   :  { %5405 = vmatmul.mubr.bf16.gmra.mrb[40].mxu0 %v5264_v30 }
 0x530   :  { %5593 = vmatpush1.bf16.msra.mxu0 %v15714_v51  ;;  %5620 = vmatprep.mubr.bf16.mxu0 %v16831_v41 }
 0x531   :  { %5594 = vmatprep.subr.bf16.mxu0 %v15719_v53  ;;  %v15783_v53 = vld [vmem:[#allocation3 + $0x390] ss:$8 sps:$4 sm:$0xff]  }
 0x534   :  { %5595 = vmatpush1.bf16.msra.mxu0 %v15717_v49  ;;  %v15788_v49 = vld [vmem:[#allocation3 + $0x3a4] ss:$8 sps:$4 sm:$0xff]  }
 0x535   :  { %5596 = vmatprep.subr.bf16.mxu0 %v15722_v24  ;;  %v15786_v24 = vld [vmem:[#allocation3 + $0x3a0] ss:$8 sps:$4 sm:$0xff]  }
 0x538   :  { %5597 = vmatpush1.bf16.msra.mxu0 %v15720_v56  ;;  %v15791_v56 = vld [vmem:[#allocation3 + $0x3b4] ss:$8 sps:$4 sm:$0xff]  }
 0x539   :  { %5598 = vmatprep.subr.bf16.mxu0 %v15725_v22  ;;  %v15789_v22 = vld [vmem:[#allocation3 + $0x3b0] ss:$8 sps:$4 sm:$0xff]  }
 0x53c   :  { %5599 = vmatpush1.bf16.msra.mxu0 %v15723_v33  ;;  %v15794_v33 = vld [vmem:[#allocation3 + $0x3c4] ss:$8 sps:$4 sm:$0xff]  }
 0x53d   :  { %5600 = vmatprep.subr.bf16.mxu0 %v15728_v59  ;;  %v15792_v59 = vld [vmem:[#allocation3 + $0x3c0] ss:$8 sps:$4 sm:$0xff]  }
 0x540   :  { %5601 = vmatpush1.bf16.msra.mxu0 %v15726_v60  ;;  %v15797_v60 = vld [vmem:[#allocation3 + $0x3d4] ss:$8 sps:$4 sm:$0xff]  }
 0x541   :  { %5602 = vmatprep.subr.bf16.mxu0 %v15731_v11  ;;  %v14999_v2 = vpop.f32.mrb[48].mxu1  ;;  %v15795_v11 = vld [vmem:[#allocation3 + $0x3d0] ss:$8 sps:$4 sm:$0xff]  }
 0x542   :  { %v5700_v10 = vpop.f32.mrb[49].mxu1 }
 0x543   :  { %v15000_v12 = vpop.f32.mrb[50].mxu1 }
 0x544   :  { %5603 = vmatpush1.bf16.msra.mxu0 %v15729_v15  ;;  %v5716_v57 = vpack.c.bf16 %v15000_v12, %v14999_v2  ;;  %v5703_v37 = vpop.f32.mrb[51].mxu1  ;;  %v15800_v15 = vld [vmem:[#allocation3 + $0x3e4] ss:$8 sps:$4 sm:$0xff]   ;;  %v15803_v2 = vld [vmem:[#allocation3 + $0x3f4] ss:$8 sps:$4 sm:$0xff]  }
 0x545   :  { %5814 = vmatprep.subr.bf16.mxu0 %v15734_v40  ;;  %v5715_v34 = vpack.c.bf16 %v5703_v37, %v5700_v10  ;;  %v15798_v40 = vld [vmem:[#allocation3 + $0x3e0] ss:$8 sps:$4 sm:$0xff]   ;;  %v15801_v10 = vld [vmem:[#allocation3 + $0x3f0] ss:$8 sps:$4 sm:$0xff]   ;;  %v15806_v12 = vld [vmem:[#allocation3 + $0x404] ss:$8 sps:$4 sm:$0xff]  }
 0x547   :  { %5621 = vmatmul.mubr.bf16.vlgmr.msra.gmra.mrb[36].mxu0 %v5489_v20 }
 0x548   :  { %5815 = vmatpush1.bf16.msra.mxu0 %v15732_v4  ;;  %5630 = vmatprep.mubr.bf16.mxu0 %v16831_v41 }
 0x549   :  { %5816 = vmatprep.subr.bf16.mxu0 %v15737_v17  ;;  %v15804_v17 = vld [vmem:[#allocation3 + $0x400] ss:$8 sps:$4 sm:$0xff]  }
 0x54c   :  { %5817 = vmatpush1.bf16.msra.mxu0 %v15735_v39 }
 0x54d   :  { %5818 = vmatprep.subr.bf16.mxu0 %v15740_v14  ;;  %v15809_v14 = vld [vmem:[#allocation3 + $0x414] ss:$8 sps:$4 sm:$0xff]  }
 0x54f   :  { %5631 = vmatmul.mubr.bf16.gmra.mrb[40].mxu0 %v5490_v54 }
 0x550   :  { %5819 = vmatpush1.bf16.msra.mxu0 %v15738_v48  ;;  %5846 = vmatprep.mubr.bf16.mxu0 %v16831_v41 }
 0x551   :  { %5820 = vmatprep.subr.bf16.mxu0 %v15743_v62  ;;  %v15807_v62 = vld [vmem:[#allocation3 + $0x410] ss:$8 sps:$4 sm:$0xff]  }
 0x554   :  { %5821 = vmatpush1.bf16.msra.mxu0 %v15741_v13  ;;  %v15812_v13 = vld [vmem:[#allocation3 + $0x424] ss:$8 sps:$4 sm:$0xff]  }
 0x555   :  { %5822 = vmatprep.subr.bf16.mxu0 %v15746_v18  ;;  %v15810_v18 = vld [vmem:[#allocation3 + $0x420] ss:$8 sps:$4 sm:$0xff]  }
 0x558   :  { %5823 = vmatpush1.bf16.msra.mxu0 %v15744_v35  ;;  %v15815_v35 = vld [vmem:[#allocation3 + $0x434] ss:$8 sps:$4 sm:$0xff]  }
 0x559   :  { %5824 = vmatprep.subr.bf16.mxu0 %v15749_v52  ;;  %v15813_v52 = vld [vmem:[#allocation3 + $0x430] ss:$8 sps:$4 sm:$0xff]  }
 0x55c   :  { %5825 = vmatpush1.bf16.msra.mxu0 %v15747_v6  ;;  %v15818_v6 = vld [vmem:[#allocation3 + $0x444] ss:$8 sps:$4 sm:$0xff]  }
 0x55d   :  { %5826 = vmatprep.subr.bf16.mxu0 %v15752_v38  ;;  %v15816_v38 = vld [vmem:[#allocation3 + $0x440] ss:$8 sps:$4 sm:$0xff]  }
 0x560   :  { %5827 = vmatpush1.bf16.msra.mxu0 %v15750_v23  ;;  %v15821_v23 = vld [vmem:[#allocation3 + $0x454] ss:$8 sps:$4 sm:$0xff]  }
 0x561   :  { %5828 = vmatprep.subr.bf16.mxu0 %v15755_v44  ;;  %v15019_v43 = vpop.f32.mrb[52].mxu1  ;;  %v15819_v44 = vld [vmem:[#allocation3 + $0x450] ss:$8 sps:$4 sm:$0xff]  }
 0x562   :  { %v5926_v30 = vpop.f32.mrb[53].mxu1 }
 0x563   :  { %v15020_v8 = vpop.f32.mrb[54].mxu1 }
 0x564   :  { %5829 = vmatpush1.bf16.msra.mxu0 %v15753_v25  ;;  %v5942_v27 = vpack.c.bf16 %v15020_v8, %v15019_v43  ;;  %v5929_v63 = vpop.f32.mrb[55].mxu1  ;;  %v15824_v25 = vld [vmem:[#allocation3 + $0x464] ss:$8 sps:$4 sm:$0xff]   ;;  %v15827_v43 = vld [vmem:[#allocation3 + $0x474] ss:$8 sps:$4 sm:$0xff]  }
 0x565   :  { %6040 = vmatprep.subr.bf16.mxu0 %v15758_v7  ;;  %v5941_v28 = vpack.c.bf16 %v5929_v63, %v5926_v30  ;;  %v15822_v7 = vld [vmem:[#allocation3 + $0x460] ss:$8 sps:$4 sm:$0xff]   ;;  %v15825_v30 = vld [vmem:[#allocation3 + $0x470] ss:$8 sps:$4 sm:$0xff]  }
 0x566   :  { %v15831_v8 = vld [vmem:[%s21532_s10 + $0x208] ss:$16 sps:$4 sm:$0xff]  }
 0x567   :  { %5847 = vmatmul.mubr.bf16.vlgmr.msra.gmra.mrb[36].mxu0 %v5715_v34  ;;  %v15837_v63 = vld [vmem:[%s21532_s10 + $0x228] ss:$16 sps:$4 sm:$0xff]  }
 0x568   :  { %6041 = vmatpush1.bf16.msra.mxu0 %v15756_v55  ;;  %5856 = vmatprep.mubr.bf16.mxu0 %v16831_v41  ;;  %v15833_v55 = vld [vmem:[%s21532_s10 + $0x20c] ss:$16 sps:$4 sm:$0xff]  }
 0x569   :  { %6042 = vmatprep.subr.bf16.mxu0 %v15761_v32  ;;  %v15845_v32 = vld [vmem:[%s21532_s10 + $0x24c] ss:$16 sps:$4 sm:$0xff]  }
 0x56c   :  { %6043 = vmatpush1.bf16.msra.mxu0 %v15759_v9  ;;  %v15851_v9 = vld [vmem:[%s21532_s10 + $0x26c] ss:$16 sps:$4 sm:$0xff]  }
 0x56d   :  { %6044 = vmatprep.subr.bf16.mxu0 %v15764_v29  ;;  %v15849_v29 = vld [vmem:[%s21532_s10 + $0x268] ss:$16 sps:$4 sm:$0xff]  }
 0x56f   :  { %5857 = vmatmul.mubr.bf16.gmra.mrb[40].mxu0 %v5716_v57 }
 0x570   :  { %6045 = vmatpush1.bf16.msra.mxu0 %v15762_v21  ;;  %6072 = vmatprep.mubr.bf16.mxu0 %v16831_v41  ;;  %v15857_v21 = vld [vmem:[%s21532_s10 + $0x28c] ss:$16 sps:$4 sm:$0xff]  }
 0x571   :  { %6046 = vmatprep.subr.bf16.mxu0 %v15767_v46  ;;  %v6555_v46 = vlaneseq }
 0x574   :  { %6047 = vmatpush1.bf16.msra.mxu0 %v15765_v58  ;;  %v15855_v58 = vld [vmem:[%s21532_s10 + $0x288] ss:$16 sps:$4 sm:$0xff]  }
 0x575   :  { %6048 = vmatprep.subr.bf16.mxu0 %v15770_v47  ;;  %v15863_v47 = vld [vmem:[%s21532_s10 + $0x2ac] ss:$16 sps:$4 sm:$0xff]  }
 0x578   :  { %6049 = vmatpush1.bf16.msra.mxu0 %v15768_v3  ;;  %v19572_v3 = vshrl.u32 %v6555_v46, 7 }
 0x579   :  { %6050 = vmatprep.subr.bf16.mxu0 %v15773_v50  ;;  %v15861_v50 = vld [vmem:[%s21532_s10 + $0x2a8] ss:$16 sps:$4 sm:$0xff]  }
 0x57c   :  { %6051 = vmatpush1.bf16.msra.mxu0 %v15771_v0  ;;  %v15869_v0 = vld [vmem:[%s21532_s10 + $0x2cc] ss:$16 sps:$4 sm:$0xff]  }
 0x57d   :  { %6052 = vmatprep.subr.bf16.mxu0 %v15776_v16  ;;  %v19581_v16 = vsub.s32 0, %v19572_v3 }
 0x580   :  { %6053 = vmatpush1.bf16.msra.mxu0 %v15774_v42  ;;  %v15867_v42 = vld [vmem:[%s21532_s10 + $0x2c8] ss:$16 sps:$4 sm:$0xff]  }
 0x581   :  { %6054 = vmatprep.subr.bf16.mxu0 %v15779_v19  ;;  %v15039_v26 = vpop.f32.mrb[56].mxu1  ;;  %v6553_v19 = vld [vmem:[%s21528_s6] sm:$0x3] }
 0x582   :  { %v6152_v54 = vpop.f32.mrb[57].mxu1 }
 0x583   :  { %v15040_v45 = vpop.f32.mrb[58].mxu1 }
 0x584   :  { %6055 = vmatpush1.bf16.msra.mxu0 %v15777_v61  ;;  %v6168_v20 = vpack.c.bf16 %v15040_v45, %v15039_v26  ;;  %v6155_v31 = vpop.f32.mrb[59].mxu1  ;;  %v19590_v61 = vsub.s32 1, %v19572_v3  ;;  %v6558_v26 = vrot.slane %v6553_v19, %v19581_v16 }
 0x585   :  { %6266 = vmatprep.subr.bf16.mxu0 %v15782_v1  ;;  %v6167_v51 = vpack.c.bf16 %v6155_v31, %v6152_v54  ;;  %v15875_v1 = vld [vmem:[%s21532_s10 + $0x2ec] ss:$16 sps:$4 sm:$0xff]   ;;  %v15873_v54 = vld [vmem:[%s21532_s10 + $0x2e8] ss:$16 sps:$4 sm:$0xff]  }
 0x586   :  { %v15881_v31 = vld [vmem:[%s21532_s10 + $0x30c] ss:$16 sps:$4 sm:$0xff]  }
 0x587   :  { %6073 = vmatmul.mubr.bf16.vlgmr.msra.gmra.mrb[36].mxu0 %v5941_v28  ;;  %v15843_v28 = vld [vmem:[%s21532_s10 + $0x248] ss:$16 sps:$4 sm:$0xff]  }
 0x588   :  { %6267 = vmatpush1.bf16.msra.mxu0 %v15780_v36  ;;  %6082 = vmatprep.mubr.bf16.mxu0 %v16831_v41  ;;  %v6562_v36 = vrot.slane %v6553_v19, %v19590_v61 }
 0x589   :  { %6268 = vmatprep.subr.bf16.mxu0 %v15785_v5 }
 0x58c   :  { %6269 = vmatpush1.bf16.msra.mxu0 %v15783_v53 }
 0x58d   :  { %6270 = vmatprep.subr.bf16.mxu0 %v15788_v49 }
 0x58f   :  { %6083 = vmatmul.mubr.bf16.gmra.mrb[40].mxu0 %v5942_v27  ;;  %v15839_v27 = vld [vmem:[%s21532_s10 + $0x22c] ss:$16 sps:$4 sm:$0xff]  }
 0x590   :  { %6271 = vmatpush1.bf16.msra.mxu0 %v15786_v24  ;;  %6298 = vmatprep.mubr.bf16.mxu0 %v16831_v41  ;;  %v15879_v24 = vld [vmem:[%s21532_s10 + $0x308] ss:$16 sps:$4 sm:$0xff]  }
 0x591   :  { %6272 = vmatprep.subr.bf16.mxu0 %v15791_v56 }
 0x594   :  { %6273 = vmatpush1.bf16.msra.mxu0 %v15789_v22 }
 0x595   :  { %6274 = vmatprep.subr.bf16.mxu0 %v15794_v33 }
 0x598   :  { %6275 = vmatpush1.bf16.msra.mxu0 %v15792_v59  ;;  %v15887_v59 = vld [vmem:[%s21532_s10 + $0x32c] ss:$16 sps:$4 sm:$0xff]  }
 0x599   :  { %6276 = vmatprep.subr.bf16.mxu0 %v15797_v60 }
 0x59c   :  { %6277 = vmatpush1.bf16.msra.mxu0 %v15795_v11  ;;  %v15885_v11 = vld [vmem:[%s21532_s10 + $0x328] ss:$16 sps:$4 sm:$0xff]  }
 0x59d   :  { %6278 = vmatprep.subr.bf16.mxu0 %v15800_v15 }
 0x5a0   :  { %6279 = vmatpush1.bf16.msra.mxu0 %v15798_v40 }
 0x5a1   :  { %6280 = vmatprep.subr.bf16.mxu0 %v15803_v2  ;;  %v15059_v4 = vpop.f32.mrb[60].mxu1 }
 0x5a2   :  { %v6378_v57 = vpop.f32.mrb[61].mxu1 }
 0x5a3   :  { %v15060_v37 = vpop.f32.mrb[62].mxu1 }
 0x5a4   :  { %6281 = vmatpush1.bf16.msra.mxu0 %v15801_v10  ;;  %v6394_v34 = vpack.c.bf16 %v15060_v37, %v15059_v4  ;;  %v6381_v39 = vpop.f32.mrb[63].mxu1  ;;  %v15893_v10 = vld [vmem:[%s21532_s10 + $0x34c] ss:$16 sps:$4 sm:$0xff]  }
 0x5a5   :  { %6492 = vmatprep.subr.bf16.mxu0 %v15806_v12  ;;  %v6393_v48 = vpack.c.bf16 %v6381_v39, %v6378_v57 }
 0x5a7   :  { %6299 = vmatmul.mubr.bf16.vlgmr.msra.gmra.mrb[36].mxu0 %v6167_v51 }
 0x5a8   :  { %6493 = vmatpush1.bf16.msra.mxu0 %v15804_v17  ;;  %6308 = vmatprep.mubr.bf16.mxu0 %v16831_v41 }
 0x5a9   :  { %6494 = vmatprep.subr.bf16.mxu0 %v15809_v14 }
 0x5ac   :  { %6495 = vmatpush1.bf16.msra.mxu0 %v15807_v62  ;;  %v15899_v62 = vld [vmem:[%s21532_s10 + $0x36c] ss:$16 sps:$4 sm:$0xff]  }
 0x5ad   :  { %6496 = vmatprep.subr.bf16.mxu0 %v15812_v13 }
 0x5af   :  { %6309 = vmatmul.mubr.bf16.gmra.mrb[40].mxu0 %v6168_v20 }
 0x5b0   :  { %6497 = vmatpush1.bf16.msra.mxu0 %v15810_v18  ;;  %6524 = vmatprep.mubr.bf16.mxu0 %v16831_v41 }
 0x5b1   :  { %6498 = vmatprep.subr.bf16.mxu0 %v15815_v35  ;;  %v15897_v35 = vld [vmem:[%s21532_s10 + $0x368] ss:$16 sps:$4 sm:$0xff]  }
 0x5b4   :  { %6499 = vmatpush1.bf16.msra.mxu0 %v15813_v52 }
 0x5b5   :  { %6500 = vmatprep.subr.bf16.mxu0 %v15818_v6 }
 0x5b8   :  { %6501 = vmatpush1.bf16.msra.mxu0 %v15816_v38  ;;  %v15905_v38 = vld [vmem:[%s21532_s10 + $0x38c] ss:$16 sps:$4 sm:$0xff]  }
 0x5b9   :  { %6502 = vmatprep.subr.bf16.mxu0 %v15821_v23 }
 0x5bc   :  { %6503 = vmatpush1.bf16.msra.mxu0 %v15819_v44 }
 0x5bd   :  { %6504 = vmatprep.subr.bf16.mxu0 %v15824_v25  ;;  %v15903_v25 = vld [vmem:[%s21532_s10 + $0x388] ss:$16 sps:$4 sm:$0xff]  }
 0x5c0   :  { %6505 = vmatpush1.bf16.msra.mxu0 %v15822_v7 }
 0x5c1   :  { %6506 = vmatprep.subr.bf16.mxu0 %v15827_v43 }
 0x5c4   :  { %6507 = vmatpush1.bf16.msra.mxu0 %v15825_v30 }
 0x5c5   :  { %7298 = vmatprep.subr.bf16.mxu0 %v15833_v55 }
 0x5c7   :  { %6525 = vmatmul.mubr.bf16.vlgmr.msra.gmra.mrb[36].mxu0 %v6393_v48 }
 0x5c8   :  { %6534 = vmatprep.mubr.bf16.mxu0 %v16831_v41  ;;  %7299 = vmatpush1.bf16.msra.mxu0 %v15831_v8 }
 0x5c9   :  { %7300 = vmatprep.subr.bf16.mxu0 %v15839_v27 }
 0x5cc   :  { %7301 = vmatpush1.bf16.msra.mxu0 %v15837_v63 }
 0x5cd   :  { %7302 = vmatprep.subr.bf16.mxu0 %v15845_v32 }
 0x5cf   :  { %6535 = vmatmul.mubr.bf16.gmra.mrb[40].mxu0 %v6394_v34  ;;  %v15891_v34 = vld [vmem:[%s21532_s10 + $0x348] ss:$16 sps:$4 sm:$0xff]  }
 0x5d0   :  { %7303 = vmatpush1.bf16.msra.mxu0 %v15843_v28 }
 0x5d1   :  { %7304 = vmatprep.subr.bf16.mxu0 %v15851_v9 }
 0x5d4   :  { %7305 = vmatpush1.bf16.msra.mxu0 %v15849_v29 }
 0x5d5   :  { %7306 = vmatprep.subr.bf16.mxu0 %v15857_v21 }
 0x5d8   :  { %7307 = vmatpush1.bf16.msra.mxu0 %v15855_v58 }
 0x5d9   :  { %7308 = vmatprep.subr.bf16.mxu0 %v15863_v47 }
 0x5dc   :  { %7309 = vmatpush1.bf16.msra.mxu0 %v15861_v50 }
 0x5dd   :  { %7310 = vmatprep.subr.bf16.mxu0 %v15869_v0 }
 0x5e0   :  { %7311 = vmatpush1.bf16.msra.mxu0 %v15867_v42 }
 0x5e1   :  { %7312 = vmatprep.subr.bf16.mxu0 %v15875_v1 }
 0x5e4   :  { %7313 = vmatpush1.bf16.msra.mxu0 %v15873_v54 }
 0x5e5   :  { %7314 = vmatprep.subr.bf16.mxu0 %v15881_v31 }
 0x5e8   :  { %7315 = vmatpush1.bf16.msra.mxu0 %v15879_v24 }
 0x5e9   :  { %7316 = vmatprep.subr.bf16.mxu0 %v15887_v59 }
 0x5ec   :  { %7317 = vmatpush1.bf16.msra.mxu0 %v15885_v11 }
 0x5ed   :  { %7318 = vmatprep.subr.bf16.mxu0 %v15893_v10 }
 0x5f0   :  { %7319 = vmatpush1.bf16.msra.mxu0 %v15891_v34 }
 0x5f1   :  { %7320 = vmatprep.subr.bf16.mxu0 %v15899_v62 }
 0x5f4   :  { %7321 = vmatpush1.bf16.msra.mxu0 %v15897_v35 }
 0x5f5   :  { %7322 = vmatprep.subr.bf16.mxu0 %v15905_v38 }
 0x5f8   :  { %7323 = vmatpush1.bf16.msra.mxu0 %v15903_v25 }
 0x69a   :  { %v6526_v45 = vpop.f32.mrb[36].mxu0 }
 0x69b   :  { %v6528_v20 = vpop.f32.mrb[37].mxu0  ;;  %v6565_v51 = vadd.f32 %v6558_v26, %v6526_v45 }
 0x69c   :  { %v6530_v5 = vpop.f32.mrb[38].mxu0  ;;  %v6566_v56 = vadd.f32 %v6562_v36, %v6528_v20 }
 0x69d   :  { %v6567_v53 = vadd.f32 %v6558_v26, %v6530_v5  ;;  %v6532_v49 = vpop.f32.mrb[39].mxu0 }
 0x69e   :  { %v6568_v22 = vadd.f32 %v6562_v36, %v6532_v49 }
 0x69f   :  { %v6575_v33 = vadd.f32 %v6567_v53, %v6565_v51 }
 0x6a0   :  { %v6584_v60 = vadd.f32 %v6568_v22, %v6566_v56 }
 0x6a2   :  { %v6536_v15 = vpop.f32.mrb[40].mxu0 }
 0x6a3   :  { %v6569_v40 = vadd.f32 %v6558_v26, %v6536_v15  ;;  %v6538_v2 = vpop.f32.mrb[41].mxu0 }
 0x6a4   :  { %v6570_v12 = vadd.f32 %v6562_v36, %v6538_v2  ;;  %v6540_v4 = vpop.f32.mrb[42].mxu0 }
 0x6a5   :  { %v6576_v57 = vadd.f32 %v6575_v33, %v6569_v40  ;;  %v6571_v37 = vadd.f32 %v6558_v26, %v6540_v4  ;;  %v6542_v17 = vpop.f32.mrb[43].mxu0 }
 0x6a6   :  { %v6585_v39 = vadd.f32 %v6584_v60, %v6570_v12  ;;  %v6572_v14 = vadd.f32 %v6562_v36, %v6542_v17 }
 0x6a7   :  { %v6577_v48 = vadd.f32 %v6576_v57, %v6571_v37 }
 0x6a8   :  { %v6586_v13 = vadd.f32 %v6585_v39, %v6572_v14  ;;  %v6573_v39 = vld [vmem:[%s21529_s7] sm:$0x3] }
 0x6a9   :  { %v6578_v18 = vrot.slane %v6577_v48, 4 }
 0x6aa   :  { %v6587_v52 = vrot.slane %v6586_v13, 4 }
 0x6ab   :  { %v6579_v6 = vadd.f32 %v6578_v18, %v6577_v48  ;;  %v6644_v48 = vrot.slane %v6573_v39, %v19590_v61 }
 0x6ac   :  { %v6588_v23 = vadd.f32 %v6587_v52, %v6586_v13  ;;  %v6574_v13 = vld [vmem:[%s21530_s8] sm:$0x3] }
 0x6ad   :  { %v6580_v44 = vrot.slane %v6579_v6, 2  ;;  %v6669_v38 = vrot.slane %v6574_v13, %v19581_v16 }
 0x6ae   :  { %v6589_v7 = vrot.slane %v6588_v23, 2 }
 0x6af   :  { %v6581_v43 = vadd.f32 %v6580_v44, %v6579_v6  ;;  %v6673_v44 = vrot.slane %v6574_v13, %v19590_v61  ;;  %v15872_v13 = vld [vmem:[%s21532_s10 + $0x2e4] ss:$16 sps:$4 sm:$0xff]  }
 0x6b0   :  { %v6590_v30 = vadd.f32 %v6589_v7, %v6588_v23 }
 0x6b1   :  { %v6582_v8 = vrot.slane %v6581_v43, 1 }
 0x6b2   :  { %v6591_v55 = vrot.slane %v6590_v30, 1 }
 0x6b3   :  { %v6583_v27 = vadd.f32 %v6582_v8, %v6581_v43 }
 0x6b4   :  { %v6592_v63 = vadd.f32 %v6591_v55, %v6590_v30 }
 0x6b5   :  { %v6594_v32 = vmul.f32 0.03125, %v6583_v27 }
 0x6b6   :  { %v6595_v28 = vmul.f32 0.03125, %v6592_v63 }
 0x6b7   :  { %v6596_v9 = vsub.f32 %v6565_v51, %v6594_v32  ;;  %v6598_v29 = vsub.f32 %v6567_v53, %v6594_v32  ;;  %v6600_v21 = vsub.f32 %v6569_v40, %v6594_v32  ;;  %v6602_v46 = vsub.f32 %v6571_v37, %v6594_v32 }
 0x6b8   :  { %v6597_v58 = vsub.f32 %v6566_v56, %v6595_v28  ;;  %v6599_v47 = vsub.f32 %v6568_v22, %v6595_v28  ;;  %v6601_v50 = vsub.f32 %v6570_v12, %v6595_v28  ;;  %v6603_v0 = vsub.f32 %v6572_v14, %v6595_v28 }
 0x6b9   :  { %v6604_v42 = vmul.f32 %v6596_v9, %v6596_v9  ;;  %v6606_v19 = vmul.f32 %v6598_v29, %v6598_v29  ;;  %v6608_v54 = vmul.f32 %v6600_v21, %v6600_v21  ;;  %v6610_v31 = vmul.f32 %v6602_v46, %v6602_v46 }
 0x6ba   :  { %v6605_v1 = vmul.f32 %v6597_v58, %v6597_v58  ;;  %v6607_v26 = vmul.f32 %v6599_v47, %v6599_v47  ;;  %v6609_v36 = vmul.f32 %v6601_v50, %v6601_v50  ;;  %v6611_v49 = vmul.f32 %v6603_v0, %v6603_v0 }
 0x6bb   :  { %v6612_v45 = vadd.f32 %v6606_v19, %v6604_v42  ;;  %v6640_v14 = vrot.slane %v6573_v39, %v19581_v16  ;;  %v15860_v39 = vld [vmem:[%s21532_s10 + $0x2a4] ss:$16 sps:$4 sm:$0xff]  }
 0x6bc   :  { %v6621_v20 = vadd.f32 %v6607_v26, %v6605_v1 }
 0x6bd   :  { %v6613_v5 = vadd.f32 %v6612_v45, %v6608_v54 }
 0x6be   :  { %v6622_v24 = vadd.f32 %v6621_v20, %v6609_v36 }
 0x6bf   :  { %v6614_v51 = vadd.f32 %v6613_v5, %v6610_v31 }
 0x6c0   :  { %v6623_v53 = vadd.f32 %v6622_v24, %v6611_v49 }
 0x6c1   :  { %v6615_v33 = vrot.slane %v6614_v51, 4 }
 0x6c2   :  { %v6624_v59 = vrot.slane %v6623_v53, 4 }
 0x6c3   :  { %v6616_v56 = vadd.f32 %v6615_v33, %v6614_v51 }
 0x6c4   :  { %v6625_v22 = vadd.f32 %v6624_v59, %v6623_v53 }
 0x6c5   :  { %v6617_v60 = vrot.slane %v6616_v56, 2 }
 0x6c6   :  { %v6626_v11 = vrot.slane %v6625_v22, 2 }
 0x6c7   :  { %v6618_v15 = vadd.f32 %v6617_v60, %v6616_v56  ;;  %v6712_v60 = vld [vmem:[%s21531_s9] sm:$0xf] }
 0x6c8   :  { %v6627_v40 = vadd.f32 %v6626_v11, %v6625_v22  ;;  %v15830_v11 = vld [vmem:[%s21532_s10 + $0x204] ss:$16 sps:$4 sm:$0xff]  }
 0x6c9   :  { %v6619_v2 = vrot.slane %v6618_v15, 1 }
 0x6ca   :  { %v6628_v10 = vrot.slane %v6627_v40, 1 }
 0x6cb   :  { %v6620_v12 = vadd.f32 %v6619_v2, %v6618_v15  ;;  %v12532_v15 = vld [vmem:[%s21531_s9 + $0x4] sm:$0xf] }
 0x6cc   :  { %v6629_v4 = vadd.f32 %v6628_v10, %v6627_v40  ;;  %v15828_v40 = vld [vmem:[%s21532_s10 + $0x200] ss:$16 sps:$4 sm:$0xff]   ;;  %v15836_v2 = vld [vmem:[%s21532_s10 + $0x224] ss:$16 sps:$4 sm:$0xff]  }
 0x6cd   :  { %v6630_v57 = vmul.f32 0.03125, %v6620_v12  ;;  %v15834_v10 = vld [vmem:[%s21532_s10 + $0x220] ss:$16 sps:$4 sm:$0xff]   ;;  %v15842_v12 = vld [vmem:[%s21532_s10 + $0x244] ss:$16 sps:$4 sm:$0xff]  }
 0x6ce   :  { %v6631_v37 = vmul.f32 0.03125, %v6629_v4  ;;  %v15840_v4 = vld [vmem:[%s21532_s10 + $0x240] ss:$16 sps:$4 sm:$0xff]  }
 0x6cf   :  { %v6632_v17 = vadd.f32 1e-05, %v6630_v57  ;;  %v15848_v57 = vld [vmem:[%s21532_s10 + $0x264] ss:$16 sps:$4 sm:$0xff]  }
 0x6d0   :  { %v6633_v34 = vadd.f32 1e-05, %v6631_v37  ;;  %v15846_v37 = vld [vmem:[%s21532_s10 + $0x260] ss:$16 sps:$4 sm:$0xff]  }
 0x6d1   :  { %16692 = vrsqrt.f32 %v6632_v17  ;;  %v15854_v17 = vld [vmem:[%s21532_s10 + $0x284] ss:$16 sps:$4 sm:$0xff]  }
 0x6d2   :  { %16694 = vrsqrt.f32 %v6633_v34  ;;  %v15852_v34 = vld [vmem:[%s21532_s10 + $0x280] ss:$16 sps:$4 sm:$0xff]  }
 0x6db   :  { %v16693_v62 = vpop.eup %16692 }
 0x6dc   :  { %v16695_v18 = vpop.eup %16694  ;;  %v6647_v35 = vmul.f32 %v16693_v62, %v6640_v14  ;;  %v15858_v14 = vld [vmem:[%s21532_s10 + $0x2a0] ss:$16 sps:$4 sm:$0xff]  }
 0x6dd   :  { %v6648_v52 = vmul.f32 %v16695_v18, %v6644_v48  ;;  %v15866_v48 = vld [vmem:[%s21532_s10 + $0x2c4] ss:$16 sps:$4 sm:$0xff]   ;;  %v15864_v62 = vld [vmem:[%s21532_s10 + $0x2c0] ss:$16 sps:$4 sm:$0xff]  }
 0x6de   :  { %v6652_v6 = vrot.slane %v6647_v35, %v19581_v16  ;;  %v15870_v18 = vld [vmem:[%s21532_s10 + $0x2e0] ss:$16 sps:$4 sm:$0xff]   ;;  %v15878_v35 = vld [vmem:[%s21532_s10 + $0x304] ss:$16 sps:$4 sm:$0xff]  }
 0x6df   :  { %v6656_v23 = vrot.slane %v6648_v52, %v19581_v16  ;;  %v15876_v52 = vld [vmem:[%s21532_s10 + $0x300] ss:$16 sps:$4 sm:$0xff]  }
 0x6e0   :  { %v6657_v25 = vmul.f32 %v6652_v6, %v6596_v9  ;;  %v6659_v7 = vmul.f32 %v6652_v6, %v6598_v29  ;;  %v6661_v43 = vmul.f32 %v6652_v6, %v6600_v21  ;;  %v6663_v30 = vmul.f32 %v6652_v6, %v6602_v46  ;;  %v15884_v6 = vld [vmem:[%s21532_s10 + $0x324] ss:$16 sps:$4 sm:$0xff]  }
 0x6e1   :  { %v6658_v8 = vmul.f32 %v6656_v23, %v6597_v58  ;;  %v6660_v55 = vmul.f32 %v6656_v23, %v6599_v47  ;;  %v6662_v27 = vmul.f32 %v6656_v23, %v6601_v50  ;;  %v6664_v63 = vmul.f32 %v6656_v23, %v6603_v0  ;;  %v15890_v23 = vld [vmem:[%s21532_s10 + $0x344] ss:$16 sps:$4 sm:$0xff]  }
 0x6e2   :  { %v6676_v32 = vadd.f32 %v6669_v38, %v6657_v25  ;;  %v6678_v28 = vadd.f32 %v6669_v38, %v6659_v7  ;;  %v6680_v42 = vadd.f32 %v6669_v38, %v6661_v43  ;;  %v6682_v19 = vadd.f32 %v6669_v38, %v6663_v30  ;;  %v15882_v38 = vld [vmem:[%s21532_s10 + $0x320] ss:$16 sps:$4 sm:$0xff]   ;;  %v15896_v25 = vld [vmem:[%s21532_s10 + $0x364] ss:$16 sps:$4 sm:$0xff]  }
 0x6e3   :  { %v6677_v1 = vadd.f32 %v6673_v44, %v6658_v8  ;;  %v6679_v26 = vadd.f32 %v6673_v44, %v6660_v55  ;;  %v6681_v54 = vadd.f32 %v6673_v44, %v6662_v27  ;;  %v6683_v45 = vadd.f32 %v6673_v44, %v6664_v63  ;;  %v15888_v44 = vld [vmem:[%s21532_s10 + $0x340] ss:$16 sps:$4 sm:$0xff]   ;;  %v15902_v43 = vld [vmem:[%s21532_s10 + $0x384] ss:$16 sps:$4 sm:$0xff]   ;;  %v15911_v55 = vld [vmem:[%s21532_s10 + $0x3ac] ss:$16 sps:$4 sm:$0xff]  }
 0x6e4   :  { %vm6684_vm0 = vcmp.ge.f32.partialorder %v6676_v32, 0.0  ;;  %vm6686_vm1 = vcmp.ge.f32.partialorder %v6678_v28, 0.0  ;;  %vm6688_vm2 = vcmp.ge.f32.partialorder %v6680_v42, 0.0  ;;  %vm6690_vm3 = vcmp.ge.f32.partialorder %v6682_v19, 0.0  ;;  %v15894_v7 = vld [vmem:[%s21532_s10 + $0x360] ss:$16 sps:$4 sm:$0xff]   ;;  %7324 = vmatprep.subr.bf16.mxu0 %v15911_v55 }
 0x6e5   :  { %v6692_v9 = vmul.f32 0.2, %v6676_v32  ;;  %v6694_v29 = vmul.f32 0.2, %v6678_v28  ;;  %v6696_v21 = vmul.f32 0.2, %v6680_v42 }
 0x6e6   :  { %v6698_v46 = vmul.f32 0.2, %v6682_v19  ;;  %vm6685_vm4 = vcmp.ge.f32.partialorder %v6677_v1, 0.0  ;;  %vm6687_vm5 = vcmp.ge.f32.partialorder %v6679_v26, 0.0  ;;  %vm6689_vm6 = vcmp.ge.f32.partialorder %v6681_v54, 0.0 }
 0x6e7   :  { %v6700_v58 = vsel %vm6684_vm0, %v6676_v32, %v6692_v9  ;;  %v6702_v47 = vsel %vm6686_vm1, %v6678_v28, %v6694_v29  ;;  %v6704_v50 = vsel %vm6688_vm2, %v6680_v42, %v6696_v21  ;;  %vm6691_vm7 = vcmp.ge.f32.partialorder %v6683_v45, 0.0  ;;  %v15900_v30 = vld [vmem:[%s21532_s10 + $0x380] ss:$16 sps:$4 sm:$0xff]   ;;  %v15908_v8 = vld [vmem:[%s21532_s10 + $0x3a4] ss:$16 sps:$4 sm:$0xff]  }
 0x6e8   :  { %v6706_v0 = vsel %vm6690_vm3, %v6682_v19, %v6698_v46  ;;  %v19642_v36 = vpack.c.bf16 %v6702_v47, %v6700_v58  ;;  %v6693_v20 = vmul.f32 0.2, %v6677_v1  ;;  %v6695_v31 = vmul.f32 0.2, %v6679_v26  ;;  %v15906_v27 = vld [vmem:[%s21532_s10 + $0x3a0] ss:$16 sps:$4 sm:$0xff]  }
 0x6e9   :  { %v19644_v5 = vpack.c.bf16 %v6706_v0, %v6704_v50  ;;  %v6697_v49 = vmul.f32 0.2, %v6681_v54  ;;  %v6699_v24 = vmul.f32 0.2, %v6683_v45  ;;  %v15909_v63 = vld [vmem:[%s21532_s10 + $0x3a8] ss:$16 sps:$4 sm:$0xff]  }
 0x6ea   :  { %v6701_v51 = vsel %vm6685_vm4, %v6677_v1, %v6693_v20  ;;  %v6703_v53 = vsel %vm6687_vm5, %v6679_v26, %v6695_v31  ;;  %7325 = vmatpush1.bf16.msra.mxu0 %v15909_v63  ;;  %v15912_v32 = vld [vmem:[%s21532_s10 + $0x3c0] ss:$16 sps:$4 sm:$0xff]   ;;  %v15914_v28 = vld [vmem:[%s21532_s10 + $0x3c4] ss:$16 sps:$4 sm:$0xff]   ;;  %v15915_v42 = vld [vmem:[%s21532_s10 + $0x3c8] ss:$16 sps:$4 sm:$0xff]  }
 0x6eb   :  { %v6705_v33 = vsel %vm6689_vm6, %v6681_v54, %v6697_v49  ;;  %v6707_v59 = vsel %vm6691_vm7, %v6683_v45, %v6699_v24  ;;  %v19646_v56 = vpack.c.bf16 %v6703_v53, %v6701_v51  ;;  %v15917_v19 = vld [vmem:[%s21532_s10 + $0x3cc] ss:$16 sps:$4 sm:$0xff]   ;;  %v15920_v1 = vld [vmem:[%s21532_s10 + $0x3e4] ss:$16 sps:$4 sm:$0xff]   ;;  %v15918_v54 = vld [vmem:[%s21532_s10 + $0x3e0] ss:$16 sps:$4 sm:$0xff]  }
 0x6ec   :  { %v19648_v22 = vpack.c.bf16 %v6707_v59, %v6705_v33  ;;  %7326 = vmatprep.subr.bf16.mxu0 %v15917_v19  ;;  %v15923_v26 = vld [vmem:[%s21532_s10 + $0x3ec] ss:$16 sps:$4 sm:$0xff]   ;;  %v15921_v45 = vld [vmem:[%s21532_s10 + $0x3e8] ss:$16 sps:$4 sm:$0xff]   ;;  %v15926_v9 = vld [vmem:[%s21532_s10 + $0x4] ss:$16 sps:$4 sm:$0xff]  }
 0x6ed   :  { %6717 = vmatprep.subr.bf16.mxu1 %v19646_v56  ;;  %v15929_v29 = vld [vmem:[%s21532_s10 + $0xc] ss:$16 sps:$4 sm:$0xff]   ;;  %v15924_v49 = vld [vmem:[%s21532_s10] ss:$16 sps:$4 sm:$0xff]   ;;  %v15927_v24 = vld [vmem:[%s21532_s10 + $0x8] ss:$16 sps:$4 sm:$0xff]  }
 0x6ee   :  { %6718 = vmatpush1.bf16.msra.mxu1 %v19642_v36  ;;  %7327 = vmatpush1.bf16.msra.mxu0 %v15915_v42  ;;  %v15932_v33 = vld [vmem:[%s21532_s10 + $0x24] ss:$16 sps:$4 sm:$0xff]   ;;  %v15935_v59 = vld [vmem:[%s21532_s10 + $0x2c] ss:$16 sps:$4 sm:$0xff]   ;;  %v15972_v55 = vld [vmem:[%s21532_s10 + $0x100] ss:$16 sps:$4 sm:$0xff]  }
 0x6ef   :  { %6719 = vmatprep.subr.bf16.mxu1 %v19648_v22  ;;  %7328 = vmatprep.subr.bf16.mxu0 %v15923_v26  ;;  %v15980_v63 = vld [vmem:[%s21532_s10 + $0x124] ss:$16 sps:$4 sm:$0xff]   ;;  %v15981_v42 = vld [vmem:[%s21532_s10 + $0x128] ss:$16 sps:$4 sm:$0xff]   ;;  %v15984_v26 = vld [vmem:[%s21532_s10 + $0x140] ss:$16 sps:$4 sm:$0xff]  }
 0x6f0   :  { %v15986_v19 = vld [vmem:[%s21532_s10 + $0x144] ss:$16 sps:$4 sm:$0xff]  }
 0x6f2   :  { %6720 = vmatpush1.bf16.msra.mxu1 %v19644_v5  ;;  %7329 = vmatpush1.bf16.msra.mxu0 %v15921_v45  ;;  %v15992_v45 = vld [vmem:[%s21532_s10 + $0x164] ss:$16 sps:$4 sm:$0xff]  }
 0x6f3   :  { %6829 = vmatprep.subr.bf16.mxu1 %v19646_v56  ;;  %7700 = vmatprep.subr.bf16.mxu0 %v15929_v29  ;;  %v15990_v29 = vld [vmem:[%s21532_s10 + $0x160] ss:$16 sps:$4 sm:$0xff]  }
 0x6f5   :  { %12531 = vmatmul.mubr.msk.bf16.vlgmr.msra.gmra.mrb[64].mxu1 %vm6713_vm8, %v6712_v60 }
 0x6f6   :  { %6830 = vmatpush1.bf16.msra.mxu1 %v19642_v36  ;;  %6861 = vmatprep.mubr.bf16.mxu1 %v16831_v41 }
 0x6f7   :  { %6831 = vmatprep.subr.bf16.mxu1 %v19648_v22 }
 0x6fa   :  { %6832 = vmatpush1.bf16.msra.mxu1 %v19644_v5 }
 0x6fb   :  { %7257 = vmatprep.subr.bf16.mxu1 %v15830_v11  ;;  %v15930_v11 = vld [vmem:[%s21532_s10 + $0x20] ss:$16 sps:$4 sm:$0xff]  }
 0x6fd   :  { %12533 = vmatmul.mubr.msk.bf16.vlgmr.msra.gmra.mrb[68].mxu1 %vm6713_vm8, %v12532_v15  ;;  %v15933_v15 = vld [vmem:[%s21532_s10 + $0x28] ss:$16 sps:$4 sm:$0xff]  }
 0x6fe   :  { %7258 = vmatpush1.bf16.msra.mxu1 %v15828_v40  ;;  %v15938_v40 = vld [vmem:[%s21532_s10 + $0x44] ss:$16 sps:$4 sm:$0xff]  }
 0x6ff   :  { %7259 = vmatprep.subr.bf16.mxu1 %v15836_v2  ;;  %v15941_v2 = vld [vmem:[%s21532_s10 + $0x4c] ss:$16 sps:$4 sm:$0xff]  }
 0x702   :  { %7260 = vmatpush1.bf16.msra.mxu1 %v15834_v10  ;;  %v15936_v10 = vld [vmem:[%s21532_s10 + $0x40] ss:$16 sps:$4 sm:$0xff]  }
 0x703   :  { %7261 = vmatprep.subr.bf16.mxu1 %v15842_v12  ;;  %v15939_v12 = vld [vmem:[%s21532_s10 + $0x48] ss:$16 sps:$4 sm:$0xff]  }
 0x706   :  { %7262 = vmatpush1.bf16.msra.mxu1 %v15840_v4  ;;  %v15944_v4 = vld [vmem:[%s21532_s10 + $0x64] ss:$16 sps:$4 sm:$0xff]  }
 0x707   :  { %7263 = vmatprep.subr.bf16.mxu1 %v15848_v57  ;;  %v15947_v57 = vld [vmem:[%s21532_s10 + $0x6c] ss:$16 sps:$4 sm:$0xff]  }
 0x70a   :  { %7264 = vmatpush1.bf16.msra.mxu1 %v15846_v37  ;;  %v15942_v37 = vld [vmem:[%s21532_s10 + $0x60] ss:$16 sps:$4 sm:$0xff]  }
 0x70b   :  { %7265 = vmatprep.subr.bf16.mxu1 %v15854_v17  ;;  %v15945_v17 = vld [vmem:[%s21532_s10 + $0x68] ss:$16 sps:$4 sm:$0xff]  }
 0x70e   :  { %7266 = vmatpush1.bf16.msra.mxu1 %v15852_v34  ;;  %v15950_v34 = vld [vmem:[%s21532_s10 + $0x84] ss:$16 sps:$4 sm:$0xff]  }
 0x70f   :  { %7267 = vmatprep.subr.bf16.mxu1 %v15860_v39  ;;  %v15953_v39 = vld [vmem:[%s21532_s10 + $0x8c] ss:$16 sps:$4 sm:$0xff]  }
 0x712   :  { %7268 = vmatpush1.bf16.msra.mxu1 %v15858_v14  ;;  %v15948_v14 = vld [vmem:[%s21532_s10 + $0x80] ss:$16 sps:$4 sm:$0xff]  }
 0x713   :  { %7269 = vmatprep.subr.bf16.mxu1 %v15866_v48  ;;  %v15951_v48 = vld [vmem:[%s21532_s10 + $0x88] ss:$16 sps:$4 sm:$0xff]  }
 0x716   :  { %7270 = vmatpush1.bf16.msra.mxu1 %v15864_v62  ;;  %v15956_v62 = vld [vmem:[%s21532_s10 + $0xa4] ss:$16 sps:$4 sm:$0xff]  }
 0x717   :  { %7271 = vmatprep.subr.bf16.mxu1 %v15872_v13  ;;  %v15959_v13 = vld [vmem:[%s21532_s10 + $0xac] ss:$16 sps:$4 sm:$0xff]  }
 0x71a   :  { %7272 = vmatpush1.bf16.msra.mxu1 %v15870_v18  ;;  %v15954_v18 = vld [vmem:[%s21532_s10 + $0xa0] ss:$16 sps:$4 sm:$0xff]  }
 0x71b   :  { %7273 = vmatprep.subr.bf16.mxu1 %v15878_v35  ;;  %v15957_v35 = vld [vmem:[%s21532_s10 + $0xa8] ss:$16 sps:$4 sm:$0xff]  }
 0x71e   :  { %7274 = vmatpush1.bf16.msra.mxu1 %v15876_v52  ;;  %v15962_v52 = vld [vmem:[%s21532_s10 + $0xc4] ss:$16 sps:$4 sm:$0xff]  }
 0x71f   :  { %7275 = vmatprep.subr.bf16.mxu1 %v15884_v6  ;;  %v15965_v6 = vld [vmem:[%s21532_s10 + $0xcc] ss:$16 sps:$4 sm:$0xff]  }
 0x722   :  { %7276 = vmatpush1.bf16.msra.mxu1 %v15882_v38  ;;  %v15960_v38 = vld [vmem:[%s21532_s10 + $0xc0] ss:$16 sps:$4 sm:$0xff]  }
 0x723   :  { %7277 = vmatprep.subr.bf16.mxu1 %v15890_v23  ;;  %v15963_v23 = vld [vmem:[%s21532_s10 + $0xc8] ss:$16 sps:$4 sm:$0xff]  }
 0x726   :  { %7278 = vmatpush1.bf16.msra.mxu1 %v15888_v44  ;;  %v15968_v44 = vld [vmem:[%s21532_s10 + $0xe4] ss:$16 sps:$4 sm:$0xff]  }
 0x727   :  { %7279 = vmatprep.subr.bf16.mxu1 %v15896_v25  ;;  %v15971_v25 = vld [vmem:[%s21532_s10 + $0xec] ss:$16 sps:$4 sm:$0xff]  }
 0x72a   :  { %7280 = vmatpush1.bf16.msra.mxu1 %v15894_v7  ;;  %v15966_v7 = vld [vmem:[%s21532_s10 + $0xe0] ss:$16 sps:$4 sm:$0xff]  }
 0x72b   :  { %7281 = vmatprep.subr.bf16.mxu1 %v15902_v43  ;;  %v15969_v43 = vld [vmem:[%s21532_s10 + $0xe8] ss:$16 sps:$4 sm:$0xff]  }
 0x72e   :  { %7282 = vmatpush1.bf16.msra.mxu1 %v15900_v30  ;;  %v15974_v30 = vld [vmem:[%s21532_s10 + $0x104] ss:$16 sps:$4 sm:$0xff]  }
 0x72f   :  { %7283 = vmatprep.subr.bf16.mxu1 %v15908_v8  ;;  %v15977_v8 = vld [vmem:[%s21532_s10 + $0x10c] ss:$16 sps:$4 sm:$0xff]  }
 0x732   :  { %7284 = vmatpush1.bf16.msra.mxu1 %v15906_v27  ;;  %v15975_v27 = vld [vmem:[%s21532_s10 + $0x108] ss:$16 sps:$4 sm:$0xff]  }
 0x733   :  { %7285 = vmatprep.subr.bf16.mxu1 %v15914_v28  ;;  %v15978_v28 = vld [vmem:[%s21532_s10 + $0x120] ss:$16 sps:$4 sm:$0xff]  }
 0x736   :  { %7286 = vmatpush1.bf16.msra.mxu1 %v15912_v32  ;;  %v15983_v32 = vld [vmem:[%s21532_s10 + $0x12c] ss:$16 sps:$4 sm:$0xff]  }
 0x737   :  { %7287 = vmatprep.subr.bf16.mxu1 %v15920_v1  ;;  %v15989_v1 = vld [vmem:[%s21532_s10 + $0x14c] ss:$16 sps:$4 sm:$0xff]  }
 0x73a   :  { %7288 = vmatpush1.bf16.msra.mxu1 %v15918_v54  ;;  %v15987_v54 = vld [vmem:[%s21532_s10 + $0x148] ss:$16 sps:$4 sm:$0xff]  }
 0x73b   :  { %7659 = vmatprep.subr.bf16.mxu1 %v15926_v9  ;;  %v15995_v9 = vld [vmem:[%s21532_s10 + $0x16c] ss:$16 sps:$4 sm:$0xff]  }
 0x7c8   :  { %v19787_v21 = vpop.f32.mrb[64].mxu1 }
 0x7c9   :  { %v6753_v46 = vpop.f32.mrb[65].mxu1 }
 0x7ca   :  { %v6755_v58 = vpop.f32.mrb[66].mxu1  ;;  %v6759_v60 = vpack.c.bf16 %v6753_v46, %v6753_v46  ;;  %v15993_v46 = vld [vmem:[%s21532_s10 + $0x168] ss:$16 sps:$4 sm:$0xff]  }
 0x7cb   :  { %v6756_v47 = vpop.f32.mrb[67].mxu1  ;;  %v15998_v58 = vld [vmem:[%s21532_s10 + $0x184] ss:$16 sps:$4 sm:$0xff]  }
 0x7cc   :  { %v16001_v47 = vld [vmem:[%s21532_s10 + $0x18c] ss:$16 sps:$4 sm:$0xff]  }
 0x7d0   :  { %v6863_v50 = vpop.f32.mrb[68].mxu1 }
 0x7d1   :  { %v6865_v0 = vpop.f32.mrb[69].mxu1  ;;  %v6870_v51 = vpack.c.bf16 %v6863_v50, %v6863_v50  ;;  %v15996_v50 = vld [vmem:[%s21532_s10 + $0x180] ss:$16 sps:$4 sm:$0xff]  }
 0x7d2   :  { %v6871_v20 = vpack.c.bf16 %v6865_v0, %v6865_v0  ;;  %v6867_v31 = vpop.f32.mrb[70].mxu1  ;;  %v15999_v0 = vld [vmem:[%s21532_s10 + $0x188] ss:$16 sps:$4 sm:$0xff]  }
 0x7d3   :  { %v6868_v53 = vpop.f32.mrb[71].mxu1  ;;  %v16007_v31 = vld [vmem:[%s21532_s10 + $0x1ac] ss:$16 sps:$4 sm:$0xff]  }
 0x7d4   :  { %7289 = vmatprep.mubr.bf16.mxu1 %v6871_v20  ;;  %7330 = vmatprep.mubr.bf16.mxu0 %v6871_v20  ;;  %v16004_v20 = vld [vmem:[%s21532_s10 + $0x1a4] ss:$16 sps:$4 sm:$0xff]   ;;  %v16013_v53 = vld [vmem:[%s21532_s10 + $0x1cc] ss:$16 sps:$4 sm:$0xff]  }
 0x7d5   :  { %7290 = vmatmul.mubr.bf16.vlgmr.msra.gmra.mrb[72].mxu1 %v6870_v51  ;;  %7331 = vmatmul.mubr.bf16.vlgmr.msra.gmra.mrb[44].mxu0 %v6870_v51  ;;  %v16010_v51 = vld [vmem:[%s21532_s10 + $0x1c4] ss:$16 sps:$4 sm:$0xff]  }
 0x7d6   :  { %7660 = vmatpush1.bf16.msra.mxu1 %v15924_v49  ;;  %7701 = vmatpush1.bf16.msra.mxu0 %v15927_v24  ;;  %v16002_v49 = vld [vmem:[%s21532_s10 + $0x1a0] ss:$16 sps:$4 sm:$0xff]   ;;  %v16005_v24 = vld [vmem:[%s21532_s10 + $0x1a8] ss:$16 sps:$4 sm:$0xff]  }
 0x7d7   :  { %7691 = vmatprep.mubr.bf16.mxu1 %v6759_v60  ;;  %7732 = vmatprep.mubr.bf16.mxu0 %v6759_v60  ;;  %v16016_v60 = vld [vmem:[%s21532_s10 + $0x1e4] ss:$16 sps:$4 sm:$0xff]  }
 0x7d8   :  { %7661 = vmatprep.subr.bf16.mxu1 %v15932_v33  ;;  %7702 = vmatprep.subr.bf16.mxu0 %v15935_v59  ;;  %v16008_v33 = vld [vmem:[%s21532_s10 + $0x1c0] ss:$16 sps:$4 sm:$0xff]   ;;  %v16011_v59 = vld [vmem:[%s21532_s10 + $0x1c8] ss:$16 sps:$4 sm:$0xff]  }
 0x7da   :  { %7662 = vmatpush1.bf16.msra.mxu1 %v15930_v11  ;;  %7703 = vmatpush1.bf16.msra.mxu0 %v15933_v15  ;;  %v16019_v11 = vld [vmem:[%s21532_s10 + $0x1ec] ss:$16 sps:$4 sm:$0xff]   ;;  %v16014_v15 = vld [vmem:[%s21532_s10 + $0x1e0] ss:$16 sps:$4 sm:$0xff]  }
 0x7db   :  { %7663 = vmatprep.subr.bf16.mxu1 %v15938_v40  ;;  %7704 = vmatprep.subr.bf16.mxu0 %v15941_v2  ;;  %v16017_v40 = vld [vmem:[%s21532_s10 + $0x1e8] ss:$16 sps:$4 sm:$0xff]   ;;  %v6758_v2 = vpack.c.bf16 %v19787_v21, %v19787_v21 }
 0x7dc   :  { %v12726_v21 = vld [vmem:[%s21531_s9 + $0x8] sm:$0xf] }
 0x7de   :  { %7664 = vmatpush1.bf16.msra.mxu1 %v15936_v10  ;;  %7705 = vmatpush1.bf16.msra.mxu0 %v15939_v12  ;;  %v16022_v10 = vld [vmem:[%s21532_s10 + $0x404] ss:$16 sps:$4 sm:$0xff]   ;;  %v16020_v12 = vld [vmem:[%s21532_s10 + $0x400] ss:$16 sps:$4 sm:$0xff]  }
 0x7df   :  { %7665 = vmatprep.subr.bf16.mxu1 %v15944_v4  ;;  %7706 = vmatprep.subr.bf16.mxu0 %v15947_v57  ;;  %v16025_v4 = vld [vmem:[%s21532_s10 + $0x424] ss:$16 sps:$4 sm:$0xff]   ;;  %v16023_v57 = vld [vmem:[%s21532_s10 + $0x420] ss:$16 sps:$4 sm:$0xff]  }
 0x7e2   :  { %7666 = vmatpush1.bf16.msra.mxu1 %v15942_v37  ;;  %7707 = vmatpush1.bf16.msra.mxu0 %v15945_v17  ;;  %v16028_v37 = vld [vmem:[%s21532_s10 + $0x444] ss:$16 sps:$4 sm:$0xff]   ;;  %v16026_v17 = vld [vmem:[%s21532_s10 + $0x440] ss:$16 sps:$4 sm:$0xff]  }
 0x7e3   :  { %7667 = vmatprep.subr.bf16.mxu1 %v15950_v34  ;;  %7708 = vmatprep.subr.bf16.mxu0 %v15953_v39  ;;  %v16031_v34 = vld [vmem:[%s21532_s10 + $0x464] ss:$16 sps:$4 sm:$0xff]   ;;  %v16029_v39 = vld [vmem:[%s21532_s10 + $0x460] ss:$16 sps:$4 sm:$0xff]  }
 0x7e6   :  { %7668 = vmatpush1.bf16.msra.mxu1 %v15948_v14  ;;  %7709 = vmatpush1.bf16.msra.mxu0 %v15951_v48  ;;  %v16034_v14 = vld [vmem:[%s21532_s10 + $0x484] ss:$16 sps:$4 sm:$0xff]   ;;  %v16032_v48 = vld [vmem:[%s21532_s10 + $0x480] ss:$16 sps:$4 sm:$0xff]  }
 0x7e7   :  { %7669 = vmatprep.subr.bf16.mxu1 %v15956_v62  ;;  %7710 = vmatprep.subr.bf16.mxu0 %v15959_v13  ;;  %v16037_v62 = vld [vmem:[%s21532_s10 + $0x4a4] ss:$16 sps:$4 sm:$0xff]   ;;  %v16068_v13 = vld [vmem:[%s21532_s10 + $0x408] ss:$16 sps:$4 sm:$0xff]  }
 0x7ea   :  { %7670 = vmatpush1.bf16.msra.mxu1 %v15954_v18  ;;  %7711 = vmatpush1.bf16.msra.mxu0 %v15957_v35  ;;  %v16070_v18 = vld [vmem:[%s21532_s10 + $0x40c] ss:$16 sps:$4 sm:$0xff]  }
 0x7eb   :  { %7671 = vmatprep.subr.bf16.mxu1 %v15962_v52  ;;  %7712 = vmatprep.subr.bf16.mxu0 %v15965_v6  ;;  %v16073_v35 = vld [vmem:[%s21532_s10 + $0x42c] ss:$16 sps:$4 sm:$0xff]   ;;  %v16035_v52 = vld [vmem:[%s21532_s10 + $0x4a0] ss:$16 sps:$4 sm:$0xff]   ;;  %v16071_v6 = vld [vmem:[%s21532_s10 + $0x428] ss:$16 sps:$4 sm:$0xff]  }
 0x7ee   :  { %7672 = vmatpush1.bf16.msra.mxu1 %v15960_v38  ;;  %7713 = vmatpush1.bf16.msra.mxu0 %v15963_v23  ;;  %v16040_v38 = vld [vmem:[%s21532_s10 + $0x4c4] ss:$16 sps:$4 sm:$0xff]   ;;  %v16076_v23 = vld [vmem:[%s21532_s10 + $0x44c] ss:$16 sps:$4 sm:$0xff]  }
 0x7ef   :  { %7673 = vmatprep.subr.bf16.mxu1 %v15968_v44  ;;  %7714 = vmatprep.subr.bf16.mxu0 %v15971_v25  ;;  %v16038_v44 = vld [vmem:[%s21532_s10 + $0x4c0] ss:$16 sps:$4 sm:$0xff]   ;;  %v16074_v25 = vld [vmem:[%s21532_s10 + $0x448] ss:$16 sps:$4 sm:$0xff]  }
 0x7f2   :  { %7674 = vmatpush1.bf16.msra.mxu1 %v15966_v7  ;;  %7715 = vmatpush1.bf16.msra.mxu0 %v15969_v43  ;;  %v16043_v7 = vld [vmem:[%s21532_s10 + $0x4e4] ss:$16 sps:$4 sm:$0xff]   ;;  %v16079_v43 = vld [vmem:[%s21532_s10 + $0x46c] ss:$16 sps:$4 sm:$0xff]  }
 0x7f3   :  { %7675 = vmatprep.subr.bf16.mxu1 %v15974_v30  ;;  %7716 = vmatprep.subr.bf16.mxu0 %v15977_v8  ;;  %v16041_v30 = vld [vmem:[%s21532_s10 + $0x4e0] ss:$16 sps:$4 sm:$0xff]   ;;  %v16077_v8 = vld [vmem:[%s21532_s10 + $0x468] ss:$16 sps:$4 sm:$0xff]  }
 0x7f6   :  { %7676 = vmatpush1.bf16.msra.mxu1 %v15972_v55  ;;  %7717 = vmatpush1.bf16.msra.mxu0 %v15975_v27  ;;  %v16046_v55 = vld [vmem:[%s21532_s10 + $0x504] ss:$16 sps:$4 sm:$0xff]   ;;  %v16082_v27 = vld [vmem:[%s21532_s10 + $0x48c] ss:$16 sps:$4 sm:$0xff]  }
 0x7f7   :  { %7677 = vmatprep.subr.bf16.mxu1 %v15980_v63  ;;  %7718 = vmatprep.subr.bf16.mxu0 %v15983_v32  ;;  %v16044_v63 = vld [vmem:[%s21532_s10 + $0x500] ss:$16 sps:$4 sm:$0xff]   ;;  %v16080_v32 = vld [vmem:[%s21532_s10 + $0x488] ss:$16 sps:$4 sm:$0xff]  }
 0x7fa   :  { %7678 = vmatpush1.bf16.msra.mxu1 %v15978_v28  ;;  %7719 = vmatpush1.bf16.msra.mxu0 %v15981_v42  ;;  %v16049_v28 = vld [vmem:[%s21532_s10 + $0x524] ss:$16 sps:$4 sm:$0xff]   ;;  %v16085_v42 = vld [vmem:[%s21532_s10 + $0x4ac] ss:$16 sps:$4 sm:$0xff]  }
 0x7fb   :  { %7679 = vmatprep.subr.bf16.mxu1 %v15986_v19  ;;  %7720 = vmatprep.subr.bf16.mxu0 %v15989_v1  ;;  %v16047_v19 = vld [vmem:[%s21532_s10 + $0x520] ss:$16 sps:$4 sm:$0xff]   ;;  %v16083_v1 = vld [vmem:[%s21532_s10 + $0x4a8] ss:$16 sps:$4 sm:$0xff]  }
 0x7fe   :  { %7680 = vmatpush1.bf16.msra.mxu1 %v15984_v26  ;;  %7721 = vmatpush1.bf16.msra.mxu0 %v15987_v54  ;;  %v16052_v26 = vld [vmem:[%s21532_s10 + $0x544] ss:$16 sps:$4 sm:$0xff]   ;;  %v16088_v54 = vld [vmem:[%s21532_s10 + $0x4cc] ss:$16 sps:$4 sm:$0xff]  }
 0x7ff   :  { %7681 = vmatprep.subr.bf16.mxu1 %v15992_v45  ;;  %7722 = vmatprep.subr.bf16.mxu0 %v15995_v9  ;;  %v16050_v45 = vld [vmem:[%s21532_s10 + $0x540] ss:$16 sps:$4 sm:$0xff]   ;;  %v16086_v9 = vld [vmem:[%s21532_s10 + $0x4c8] ss:$16 sps:$4 sm:$0xff]  }
 0x802   :  { %7682 = vmatpush1.bf16.msra.mxu1 %v15990_v29  ;;  %7723 = vmatpush1.bf16.msra.mxu0 %v15993_v46  ;;  %v16055_v29 = vld [vmem:[%s21532_s10 + $0x564] ss:$16 sps:$4 sm:$0xff]   ;;  %v16091_v46 = vld [vmem:[%s21532_s10 + $0x4ec] ss:$16 sps:$4 sm:$0xff]  }
 0x803   :  { %7683 = vmatprep.subr.bf16.mxu1 %v15998_v58  ;;  %7724 = vmatprep.subr.bf16.mxu0 %v16001_v47  ;;  %v16053_v58 = vld [vmem:[%s21532_s10 + $0x560] ss:$16 sps:$4 sm:$0xff]   ;;  %v16089_v47 = vld [vmem:[%s21532_s10 + $0x4e8] ss:$16 sps:$4 sm:$0xff]  }
 0x806   :  { %7684 = vmatpush1.bf16.msra.mxu1 %v15996_v50  ;;  %7725 = vmatpush1.bf16.msra.mxu0 %v15999_v0  ;;  %v16058_v50 = vld [vmem:[%s21532_s10 + $0x584] ss:$16 sps:$4 sm:$0xff]   ;;  %v16094_v0 = vld [vmem:[%s21532_s10 + $0x50c] ss:$16 sps:$4 sm:$0xff]  }
 0x807   :  { %7685 = vmatprep.subr.bf16.mxu1 %v16004_v20  ;;  %7726 = vmatprep.subr.bf16.mxu0 %v16007_v31  ;;  %v16056_v20 = vld [vmem:[%s21532_s10 + $0x580] ss:$16 sps:$4 sm:$0xff]   ;;  %v16092_v31 = vld [vmem:[%s21532_s10 + $0x508] ss:$16 sps:$4 sm:$0xff]  }
 0x80a   :  { %7686 = vmatpush1.bf16.msra.mxu1 %v16002_v49  ;;  %7727 = vmatpush1.bf16.msra.mxu0 %v16005_v24  ;;  %v16061_v49 = vld [vmem:[%s21532_s10 + $0x5a4] ss:$16 sps:$4 sm:$0xff]   ;;  %v16097_v24 = vld [vmem:[%s21532_s10 + $0x52c] ss:$16 sps:$4 sm:$0xff]  }
 0x80b   :  { %7687 = vmatprep.subr.bf16.mxu1 %v16010_v51  ;;  %7728 = vmatprep.subr.bf16.mxu0 %v16013_v53  ;;  %v16059_v51 = vld [vmem:[%s21532_s10 + $0x5a0] ss:$16 sps:$4 sm:$0xff]   ;;  %v16095_v53 = vld [vmem:[%s21532_s10 + $0x528] ss:$16 sps:$4 sm:$0xff]  }
 0x80e   :  { %7688 = vmatpush1.bf16.msra.mxu1 %v16008_v33  ;;  %7729 = vmatpush1.bf16.msra.mxu0 %v16011_v59  ;;  %v16064_v33 = vld [vmem:[%s21532_s10 + $0x5c4] ss:$16 sps:$4 sm:$0xff]   ;;  %v16100_v59 = vld [vmem:[%s21532_s10 + $0x54c] ss:$16 sps:$4 sm:$0xff]  }
 0x80f   :  { %7689 = vmatprep.subr.bf16.mxu1 %v16016_v60  ;;  %7730 = vmatprep.subr.bf16.mxu0 %v16019_v11  ;;  %v16062_v60 = vld [vmem:[%s21532_s10 + $0x5c0] ss:$16 sps:$4 sm:$0xff]   ;;  %v16098_v11 = vld [vmem:[%s21532_s10 + $0x548] ss:$16 sps:$4 sm:$0xff]  }
 0x812   :  { %7690 = vmatpush1.bf16.msra.mxu1 %v16014_v15  ;;  %7731 = vmatpush1.bf16.msra.mxu0 %v16017_v40  ;;  %v16067_v15 = vld [vmem:[%s21532_s10 + $0x5e4] ss:$16 sps:$4 sm:$0xff]   ;;  %v16103_v40 = vld [vmem:[%s21532_s10 + $0x56c] ss:$16 sps:$4 sm:$0xff]  }
 0x813   :  { %7746 = vmatprep.subr.bf16.mxu1 %v19646_v56  ;;  %8215 = vmatprep.subr.bf16.mxu0 %v16070_v18 }
 0x815   :  { %7692 = vmatmul.mubr.bf16.vlgmr.msra.gmra.mrb[76].mxu1 %v6758_v2  ;;  %7733 = vmatmul.mubr.bf16.vlgmr.msra.gmra.mrb[48].mxu0 %v6758_v2  ;;  %v16065_v2 = vld [vmem:[%s21532_s10 + $0x5e0] ss:$16 sps:$4 sm:$0xff]  }
 0x816   :  { %7747 = vmatpush1.bf16.msra.mxu1 %v19642_v36  ;;  %7778 = vmatprep.mubr.bf16.mxu1 %v16831_v41 }
 0x817   :  { %7748 = vmatprep.subr.bf16.mxu1 %v19648_v22  ;;  %8216 = vmatpush1.bf16.msra.mxu0 %v16068_v13 }
 0x818   :  { %8217 = vmatprep.subr.bf16.mxu0 %v16073_v35 }
 0x81a   :  { %7749 = vmatpush1.bf16.msra.mxu1 %v19644_v5 }
 0x81b   :  { %8174 = vmatprep.subr.bf16.mxu1 %v16022_v10  ;;  %8218 = vmatpush1.bf16.msra.mxu0 %v16071_v6  ;;  %v16101_v10 = vld [vmem:[%s21532_s10 + $0x568] ss:$16 sps:$4 sm:$0xff]  }
 0x81c   :  { %8219 = vmatprep.subr.bf16.mxu0 %v16076_v23 }
 0x81d   :  { %12727 = vmatmul.mubr.msk.bf16.vlgmr.msra.gmra.mrb[80].mxu1 %vm6713_vm8, %v12726_v21  ;;  %v16106_v21 = vld [vmem:[%s21532_s10 + $0x58c] ss:$16 sps:$4 sm:$0xff]  }
 0x81e   :  { %8175 = vmatpush1.bf16.msra.mxu1 %v16020_v12  ;;  %v16104_v12 = vld [vmem:[%s21532_s10 + $0x588] ss:$16 sps:$4 sm:$0xff]  }
 0x81f   :  { %8176 = vmatprep.subr.bf16.mxu1 %v16025_v4  ;;  %8220 = vmatpush1.bf16.msra.mxu0 %v16074_v25  ;;  %v16109_v4 = vld [vmem:[%s21532_s10 + $0x5ac] ss:$16 sps:$4 sm:$0xff]  }
 0x820   :  { %8221 = vmatprep.subr.bf16.mxu0 %v16079_v43 }
 0x822   :  { %8177 = vmatpush1.bf16.msra.mxu1 %v16023_v57  ;;  %v16107_v57 = vld [vmem:[%s21532_s10 + $0x5a8] ss:$16 sps:$4 sm:$0xff]  }
 0x823   :  { %8178 = vmatprep.subr.bf16.mxu1 %v16028_v37  ;;  %8222 = vmatpush1.bf16.msra.mxu0 %v16077_v8  ;;  %v16110_v37 = vld [vmem:[%s21532_s10 + $0x5c8] ss:$16 sps:$4 sm:$0xff]  }
 0x824   :  { %8223 = vmatprep.subr.bf16.mxu0 %v16082_v27 }
 0x826   :  { %8179 = vmatpush1.bf16.msra.mxu1 %v16026_v17  ;;  %v16112_v17 = vld [vmem:[%s21532_s10 + $0x5cc] ss:$16 sps:$4 sm:$0xff]  }
 0x827   :  { %8180 = vmatprep.subr.bf16.mxu1 %v16031_v34  ;;  %8224 = vmatpush1.bf16.msra.mxu0 %v16080_v32  ;;  %v16115_v34 = vld [vmem:[%s21532_s10 + $0x5ec] ss:$16 sps:$4 sm:$0xff]  }
 0x828   :  { %8225 = vmatprep.subr.bf16.mxu0 %v16085_v42 }
 0x82a   :  { %8181 = vmatpush1.bf16.msra.mxu1 %v16029_v39  ;;  %v16113_v39 = vld [vmem:[%s21532_s10 + $0x5e8] ss:$16 sps:$4 sm:$0xff]  }
 0x82b   :  { %8182 = vmatprep.subr.bf16.mxu1 %v16034_v14  ;;  %8226 = vmatpush1.bf16.msra.mxu0 %v16083_v1 }
 0x82c   :  { %8227 = vmatprep.subr.bf16.mxu0 %v16088_v54 }
 0x82e   :  { %8183 = vmatpush1.bf16.msra.mxu1 %v16032_v48 }
 0x82f   :  { %8184 = vmatprep.subr.bf16.mxu1 %v16037_v62  ;;  %8228 = vmatpush1.bf16.msra.mxu0 %v16086_v9  ;;  %v16164_v9 = vld [vmem:[%s21532_s10 + $0x608] ss:$16 sps:$4 sm:$0xff]  }
 0x830   :  { %8229 = vmatprep.subr.bf16.mxu0 %v16091_v46  ;;  %v16118_v46 = vld [vmem:[%s21532_s10 + $0x604] ss:$16 sps:$4 sm:$0xff]  }
 0x832   :  { %8185 = vmatpush1.bf16.msra.mxu1 %v16035_v52 }
 0x833   :  { %8186 = vmatprep.subr.bf16.mxu1 %v16040_v38  ;;  %8230 = vmatpush1.bf16.msra.mxu0 %v16089_v47  ;;  %v16166_v38 = vld [vmem:[%s21532_s10 + $0x60c] ss:$16 sps:$4 sm:$0xff]  }
 0x834   :  { %8231 = vmatprep.subr.bf16.mxu0 %v16094_v0  ;;  %v16172_v47 = vld [vmem:[%s21532_s10 + $0x64c] ss:$16 sps:$4 sm:$0xff]  }
 0x835   :  { %v12856_v0 = vld [vmem:[%s21531_s9 + $0xc] sm:$0xf] }
 0x836   :  { %8187 = vmatpush1.bf16.msra.mxu1 %v16038_v44 }
 0x837   :  { %8188 = vmatprep.subr.bf16.mxu1 %v16043_v7  ;;  %8232 = vmatpush1.bf16.msra.mxu0 %v16092_v31  ;;  %v16170_v31 = vld [vmem:[%s21532_s10 + $0x648] ss:$16 sps:$4 sm:$0xff]  }
 0x838   :  { %8233 = vmatprep.subr.bf16.mxu0 %v16097_v24  ;;  %v16119_v24 = vld [vmem:[%s21532_s10 + $0x620] ss:$16 sps:$4 sm:$0xff]  }
 0x83a   :  { %8189 = vmatpush1.bf16.msra.mxu1 %v16041_v30 }
 0x83b   :  { %8190 = vmatprep.subr.bf16.mxu1 %v16046_v55  ;;  %8234 = vmatpush1.bf16.msra.mxu0 %v16095_v53  ;;  %v16173_v53 = vld [vmem:[%s21532_s10 + $0x668] ss:$16 sps:$4 sm:$0xff]  }
 0x83c   :  { %8235 = vmatprep.subr.bf16.mxu0 %v16100_v59  ;;  %v16122_v59 = vld [vmem:[%s21532_s10 + $0x640] ss:$16 sps:$4 sm:$0xff]  }
 0x83e   :  { %8191 = vmatpush1.bf16.msra.mxu1 %v16044_v63 }
 0x83f   :  { %8192 = vmatprep.subr.bf16.mxu1 %v16049_v28  ;;  %8236 = vmatpush1.bf16.msra.mxu0 %v16098_v11  ;;  %v16176_v11 = vld [vmem:[%s21532_s10 + $0x688] ss:$16 sps:$4 sm:$0xff]  }
 0x840   :  { %8237 = vmatprep.subr.bf16.mxu0 %v16103_v40  ;;  %v16125_v40 = vld [vmem:[%s21532_s10 + $0x660] ss:$16 sps:$4 sm:$0xff]  }
 0x842   :  { %8193 = vmatpush1.bf16.msra.mxu1 %v16047_v19 }
 0x843   :  { %8194 = vmatprep.subr.bf16.mxu1 %v16052_v26  ;;  %8238 = vmatpush1.bf16.msra.mxu0 %v16101_v10  ;;  %v16179_v10 = vld [vmem:[%s21532_s10 + $0x6a8] ss:$16 sps:$4 sm:$0xff]  }
 0x844   :  { %8239 = vmatprep.subr.bf16.mxu0 %v16106_v21  ;;  %v16184_v21 = vld [vmem:[%s21532_s10 + $0x6cc] ss:$16 sps:$4 sm:$0xff]  }
 0x846   :  { %8195 = vmatpush1.bf16.msra.mxu1 %v16050_v45 }
 0x847   :  { %8196 = vmatprep.subr.bf16.mxu1 %v16055_v29  ;;  %8240 = vmatpush1.bf16.msra.mxu0 %v16104_v12  ;;  %v16169_v29 = vld [vmem:[%s21532_s10 + $0x62c] ss:$16 sps:$4 sm:$0xff]   ;;  %v16128_v12 = vld [vmem:[%s21532_s10 + $0x680] ss:$16 sps:$4 sm:$0xff]  }
 0x848   :  { %8241 = vmatprep.subr.bf16.mxu0 %v16109_v4  ;;  %v16133_v4 = vld [vmem:[%s21532_s10 + $0x6a4] ss:$16 sps:$4 sm:$0xff]  }
 0x84a   :  { %8197 = vmatpush1.bf16.msra.mxu1 %v16053_v58  ;;  %v16167_v58 = vld [vmem:[%s21532_s10 + $0x628] ss:$16 sps:$4 sm:$0xff]  }
 0x84b   :  { %8198 = vmatprep.subr.bf16.mxu1 %v16058_v50  ;;  %8242 = vmatpush1.bf16.msra.mxu0 %v16107_v57  ;;  %v16116_v50 = vld [vmem:[%s21532_s10 + $0x600] ss:$16 sps:$4 sm:$0xff]   ;;  %v16182_v57 = vld [vmem:[%s21532_s10 + $0x6c8] ss:$16 sps:$4 sm:$0xff]  }
 0x84c   :  { %8243 = vmatprep.subr.bf16.mxu0 %v16112_v17  ;;  %v16131_v17 = vld [vmem:[%s21532_s10 + $0x6a0] ss:$16 sps:$4 sm:$0xff]  }
 0x84e   :  { %8199 = vmatpush1.bf16.msra.mxu1 %v16056_v20  ;;  %v16121_v20 = vld [vmem:[%s21532_s10 + $0x624] ss:$16 sps:$4 sm:$0xff]  }
 0x84f   :  { %8200 = vmatprep.subr.bf16.mxu1 %v16061_v49  ;;  %8244 = vmatpush1.bf16.msra.mxu0 %v16110_v37  ;;  %v16175_v49 = vld [vmem:[%s21532_s10 + $0x66c] ss:$16 sps:$4 sm:$0xff]  }
 0x850   :  { %8245 = vmatprep.subr.bf16.mxu0 %v16115_v34  ;;  %v16187_v37 = vld [vmem:[%s21532_s10 + $0x6ec] ss:$16 sps:$4 sm:$0xff]   ;;  %v16136_v34 = vld [vmem:[%s21532_s10 + $0x6c4] ss:$16 sps:$4 sm:$0xff]  }
 0x852   :  { %8201 = vmatpush1.bf16.msra.mxu1 %v16059_v51  ;;  %v16124_v51 = vld [vmem:[%s21532_s10 + $0x644] ss:$16 sps:$4 sm:$0xff]  }
 0x853   :  { %8202 = vmatprep.subr.bf16.mxu1 %v16064_v33  ;;  %8246 = vmatpush1.bf16.msra.mxu0 %v16113_v39  ;;  %v16178_v33 = vld [vmem:[%s21532_s10 + $0x68c] ss:$16 sps:$4 sm:$0xff]   ;;  %v16185_v39 = vld [vmem:[%s21532_s10 + $0x6e8] ss:$16 sps:$4 sm:$0xff]  }
 0x854   :  { %8734 = vmatprep.subr.bf16.mxu0 %v16166_v38  ;;  %v16196_v38 = vld [vmem:[%s21532_s10 + $0x74c] ss:$16 sps:$4 sm:$0xff]  }
 0x856   :  { %8203 = vmatpush1.bf16.msra.mxu1 %v16062_v60  ;;  %v16127_v60 = vld [vmem:[%s21532_s10 + $0x664] ss:$16 sps:$4 sm:$0xff]  }
 0x857   :  { %8204 = vmatprep.subr.bf16.mxu1 %v16067_v15  ;;  %v16181_v15 = vld [vmem:[%s21532_s10 + $0x6ac] ss:$16 sps:$4 sm:$0xff]  }
 0x85a   :  { %8205 = vmatpush1.bf16.msra.mxu1 %v16065_v2  ;;  %v16130_v2 = vld [vmem:[%s21532_s10 + $0x684] ss:$16 sps:$4 sm:$0xff]  }
 0x85b   :  { %8265 = vmatprep.subr.bf16.mxu1 %v19646_v56 }
 0x8a8   :  { %v7291_v14 = vpop.f32.mrb[72].mxu1  ;;  %v7332_v48 = vpop.f32.mrb[44].mxu0 }
 0x8a9   :  { %v7293_v62 = vpop.f32.mrb[73].mxu1  ;;  %v7334_v13 = vpop.f32.mrb[45].mxu0 }
 0x8aa   :  { %v7295_v18 = vpop.f32.mrb[74].mxu1  ;;  %v7336_v35 = vpop.f32.mrb[46].mxu0 }
 0x8ab   :  { %v7296_v52 = vpop.f32.mrb[75].mxu1  ;;  %v7337_v6 = vpop.f32.mrb[47].mxu0  ;;  %v16193_v18 = vld [vmem:[%s21532_s10 + $0x72c] ss:$16 sps:$4 sm:$0xff]   ;;  %v16137_v35 = vld [vmem:[%s21532_s10 + $0x6e0] ss:$16 sps:$4 sm:$0xff]  }
 0x8ac   :  { %v16142_v52 = vld [vmem:[%s21532_s10 + $0x704] ss:$16 sps:$4 sm:$0xff]   ;;  %v16191_v6 = vld [vmem:[%s21532_s10 + $0x728] ss:$16 sps:$4 sm:$0xff]  }
 0x8e8   :  { %v7693_v23 = vpop.f32.mrb[76].mxu1  ;;  %v7734_v44 = vpop.f32.mrb[48].mxu0 }
 0x8e9   :  { %v20182_v25 = vadd.f32 %v7693_v23, %v7291_v14  ;;  %v20184_v7 = vadd.f32 %v7734_v44, %v7332_v48  ;;  %v7695_v43 = vpop.f32.mrb[77].mxu1  ;;  %v7736_v30 = vpop.f32.mrb[49].mxu0  ;;  %v16190_v14 = vld [vmem:[%s21532_s10 + $0x70c] ss:$16 sps:$4 sm:$0xff]   ;;  %v16134_v48 = vld [vmem:[%s21532_s10 + $0x6c0] ss:$16 sps:$4 sm:$0xff]  }
 0x8ea   :  { %v20186_v8 = vadd.f32 %v7695_v43, %v7293_v62  ;;  %v20188_v55 = vadd.f32 %v7736_v30, %v7334_v13  ;;  %v7697_v27 = vpop.f32.mrb[78].mxu1  ;;  %v7738_v63 = vpop.f32.mrb[50].mxu0  ;;  %v16139_v62 = vld [vmem:[%s21532_s10 + $0x6e4] ss:$16 sps:$4 sm:$0xff]   ;;  %v16188_v13 = vld [vmem:[%s21532_s10 + $0x708] ss:$16 sps:$4 sm:$0xff]  }
 0x8eb   :  { %v7698_v32 = vpop.f32.mrb[79].mxu1  ;;  %v7739_v28 = vpop.f32.mrb[51].mxu0  ;;  %v16140_v23 = vld [vmem:[%s21532_s10 + $0x700] ss:$16 sps:$4 sm:$0xff]   ;;  %v16145_v44 = vld [vmem:[%s21532_s10 + $0x724] ss:$16 sps:$4 sm:$0xff]  }
 0x8ec   :  { %v16194_v43 = vld [vmem:[%s21532_s10 + $0x748] ss:$16 sps:$4 sm:$0xff]   ;;  %v16199_v30 = vld [vmem:[%s21532_s10 + $0x76c] ss:$16 sps:$4 sm:$0xff]   ;;  %v16143_v27 = vld [vmem:[%s21532_s10 + $0x720] ss:$16 sps:$4 sm:$0xff]  }
 0x8ed   :  { %v16148_v63 = vld [vmem:[%s21532_s10 + $0x744] ss:$16 sps:$4 sm:$0xff]   ;;  %v16197_v32 = vld [vmem:[%s21532_s10 + $0x768] ss:$16 sps:$4 sm:$0xff]   ;;  %v16202_v28 = vld [vmem:[%s21532_s10 + $0x78c] ss:$16 sps:$4 sm:$0xff]  }
 0x8f0   :  { %v7780_v42 = vpop.f32.mrb[80].mxu1 }
 0x8f1   :  { %v7782_v19 = vpop.f32.mrb[81].mxu1  ;;  %v7787_v54 = vpack.c.bf16 %v7780_v42, %v7780_v42  ;;  %v16146_v42 = vld [vmem:[%s21532_s10 + $0x740] ss:$16 sps:$4 sm:$0xff]  }
 0x8f2   :  { %v7788_v1 = vpack.c.bf16 %v7782_v19, %v7782_v19  ;;  %v7784_v26 = vpop.f32.mrb[82].mxu1  ;;  %v16151_v19 = vld [vmem:[%s21532_s10 + $0x764] ss:$16 sps:$4 sm:$0xff]  }
 0x8f3   :  { %v7785_v45 = vpop.f32.mrb[83].mxu1  ;;  %v16149_v26 = vld [vmem:[%s21532_s10 + $0x760] ss:$16 sps:$4 sm:$0xff]  }
 0x8f4   :  { %8206 = vmatprep.mubr.bf16.mxu1 %v7788_v1  ;;  %8247 = vmatprep.mubr.bf16.mxu0 %v7788_v1  ;;  %v16200_v1 = vld [vmem:[%s21532_s10 + $0x788] ss:$16 sps:$4 sm:$0xff]   ;;  %v16152_v45 = vld [vmem:[%s21532_s10 + $0x780] ss:$16 sps:$4 sm:$0xff]  }
 0x8f5   :  { %8207 = vmatmul.mubr.bf16.vlgmr.msra.gmra.mrb[84].mxu1 %v7787_v54  ;;  %8248 = vmatmul.mubr.bf16.vlgmr.msra.gmra.mrb[52].mxu0 %v7787_v54  ;;  %v16154_v54 = vld [vmem:[%s21532_s10 + $0x784] ss:$16 sps:$4 sm:$0xff]  }
 0x8f6   :  { %8266 = vmatpush1.bf16.msra.mxu1 %v19642_v36  ;;  %8297 = vmatprep.mubr.bf16.mxu1 %v16831_v41 }
 0x8f7   :  { %8267 = vmatprep.subr.bf16.mxu1 %v19648_v22  ;;  %8735 = vmatpush1.bf16.msra.mxu0 %v16164_v9  ;;  %v16157_v9 = vld [vmem:[%s21532_s10 + $0x7a4] ss:$16 sps:$4 sm:$0xff]  }
 0x8f8   :  { %8736 = vmatprep.subr.bf16.mxu0 %v16169_v29  ;;  %v16155_v29 = vld [vmem:[%s21532_s10 + $0x7a0] ss:$16 sps:$4 sm:$0xff]  }
 0x8fa   :  { %8268 = vmatpush1.bf16.msra.mxu1 %v19644_v5 }
 0x8fb   :  { %8693 = vmatprep.subr.bf16.mxu1 %v16118_v46  ;;  %8737 = vmatpush1.bf16.msra.mxu0 %v16167_v58  ;;  %v16160_v46 = vld [vmem:[%s21532_s10 + $0x7c4] ss:$16 sps:$4 sm:$0xff]   ;;  %v16158_v58 = vld [vmem:[%s21532_s10 + $0x7c0] ss:$16 sps:$4 sm:$0xff]  }
 0x8fc   :  { %8738 = vmatprep.subr.bf16.mxu0 %v16172_v47  ;;  %v16163_v47 = vld [vmem:[%s21532_s10 + $0x7e4] ss:$16 sps:$4 sm:$0xff]  }
 0x8fd   :  { %12857 = vmatmul.mubr.msk.bf16.vlgmr.msra.gmra.mrb[88].mxu1 %vm6713_vm8, %v12856_v0  ;;  %v16205_v0 = vld [vmem:[%s21532_s10 + $0x7ac] ss:$16 sps:$4 sm:$0xff]  }
 0x8fe   :  { %8694 = vmatpush1.bf16.msra.mxu1 %v16116_v50  ;;  %v16161_v50 = vld [vmem:[%s21532_s10 + $0x7e0] ss:$16 sps:$4 sm:$0xff]  }
 0x8ff   :  { %8695 = vmatprep.subr.bf16.mxu1 %v16121_v20  ;;  %8739 = vmatpush1.bf16.msra.mxu0 %v16170_v31  ;;  %v16203_v20 = vld [vmem:[%s21532_s10 + $0x7a8] ss:$16 sps:$4 sm:$0xff]  }
 0x900   :  { %8740 = vmatprep.subr.bf16.mxu0 %v16175_v49  ;;  %v16206_v31 = vld [vmem:[%s21532_s10 + $0x7c8] ss:$16 sps:$4 sm:$0xff]   ;;  %v16208_v49 = vld [vmem:[%s21532_s10 + $0x7cc] ss:$16 sps:$4 sm:$0xff]  }
 0x902   :  { %8696 = vmatpush1.bf16.msra.mxu1 %v16119_v24  ;;  %v16211_v24 = vld [vmem:[%s21532_s10 + $0x7ec] ss:$16 sps:$4 sm:$0xff]  }
 0x903   :  { %8697 = vmatprep.subr.bf16.mxu1 %v16124_v51  ;;  %8741 = vmatpush1.bf16.msra.mxu0 %v16173_v53  ;;  %v16209_v51 = vld [vmem:[%s21532_s10 + $0x7e8] ss:$16 sps:$4 sm:$0xff]   ;;  %v16262_v53 = vld [vmem:[%s21532_s10 + $0x80c] ss:$16 sps:$4 sm:$0xff]  }
 0x904   :  { %8742 = vmatprep.subr.bf16.mxu0 %v16178_v33 }
 0x906   :  { %8698 = vmatpush1.bf16.msra.mxu1 %v16122_v59 }
 0x907   :  { %8699 = vmatprep.subr.bf16.mxu1 %v16127_v60  ;;  %8743 = vmatpush1.bf16.msra.mxu0 %v16176_v11 }
 0x908   :  { %8744 = vmatprep.subr.bf16.mxu0 %v16181_v15 }
 0x90a   :  { %8700 = vmatpush1.bf16.msra.mxu1 %v16125_v40 }
 0x90b   :  { %8701 = vmatprep.subr.bf16.mxu1 %v16130_v2  ;;  %8745 = vmatpush1.bf16.msra.mxu0 %v16179_v10 }
 0x90c   :  { %8746 = vmatprep.subr.bf16.mxu0 %v16184_v21 }
 0x90e   :  { %8702 = vmatpush1.bf16.msra.mxu1 %v16128_v12 }
 0x90f   :  { %8703 = vmatprep.subr.bf16.mxu1 %v16133_v4  ;;  %8747 = vmatpush1.bf16.msra.mxu0 %v16182_v57 }
 0x910   :  { %8748 = vmatprep.subr.bf16.mxu0 %v16187_v37 }
 0x912   :  { %8704 = vmatpush1.bf16.msra.mxu1 %v16131_v17 }
 0x913   :  { %8705 = vmatprep.subr.bf16.mxu1 %v16136_v34  ;;  %8749 = vmatpush1.bf16.msra.mxu0 %v16185_v39 }
 0x914   :  { %8750 = vmatprep.subr.bf16.mxu0 %v16190_v14 }
 0x916   :  { %8706 = vmatpush1.bf16.msra.mxu1 %v16134_v48  ;;  %v16263_v48 = vld [vmem:[%s21532_s10 + $0x828] ss:$16 sps:$4 sm:$0xff]  }
 0x917   :  { %8707 = vmatprep.subr.bf16.mxu1 %v16139_v62  ;;  %8751 = vmatpush1.bf16.msra.mxu0 %v16188_v13  ;;  %v16268_v62 = vld [vmem:[%s21532_s10 + $0x84c] ss:$16 sps:$4 sm:$0xff]   ;;  %v16212_v13 = vld [vmem:[%s21532_s10 + $0x800] ss:$16 sps:$4 sm:$0xff]  }
 0x918   :  { %8752 = vmatprep.subr.bf16.mxu0 %v16193_v18  ;;  %v12986_v18 = vld [vmem:[%s21531_s9 + $0x10] sm:$0xf] }
 0x91a   :  { %8708 = vmatpush1.bf16.msra.mxu1 %v16137_v35  ;;  %v16217_v35 = vld [vmem:[%s21532_s10 + $0x824] ss:$16 sps:$4 sm:$0xff]  }
 0x91b   :  { %8709 = vmatprep.subr.bf16.mxu1 %v16142_v52  ;;  %8753 = vmatpush1.bf16.msra.mxu0 %v16191_v6  ;;  %v16266_v52 = vld [vmem:[%s21532_s10 + $0x848] ss:$16 sps:$4 sm:$0xff]   ;;  %v16271_v6 = vld [vmem:[%s21532_s10 + $0x86c] ss:$16 sps:$4 sm:$0xff]  }
 0x91c   :  { %8754 = vmatprep.subr.bf16.mxu0 %v16196_v38  ;;  %v16215_v38 = vld [vmem:[%s21532_s10 + $0x820] ss:$16 sps:$4 sm:$0xff]  }
 0x91e   :  { %8710 = vmatpush1.bf16.msra.mxu1 %v16140_v23  ;;  %v16220_v23 = vld [vmem:[%s21532_s10 + $0x844] ss:$16 sps:$4 sm:$0xff]  }
 0x91f   :  { %8711 = vmatprep.subr.bf16.mxu1 %v16145_v44  ;;  %8755 = vmatpush1.bf16.msra.mxu0 %v16194_v43  ;;  %v16269_v44 = vld [vmem:[%s21532_s10 + $0x868] ss:$16 sps:$4 sm:$0xff]   ;;  %v16274_v43 = vld [vmem:[%s21532_s10 + $0x88c] ss:$16 sps:$4 sm:$0xff]  }
 0x920   :  { %8756 = vmatprep.subr.bf16.mxu0 %v16199_v30  ;;  %v16218_v30 = vld [vmem:[%s21532_s10 + $0x840] ss:$16 sps:$4 sm:$0xff]  }
 0x922   :  { %8712 = vmatpush1.bf16.msra.mxu1 %v16143_v27  ;;  %v16223_v27 = vld [vmem:[%s21532_s10 + $0x864] ss:$16 sps:$4 sm:$0xff]  }
 0x923   :  { %8713 = vmatprep.subr.bf16.mxu1 %v16148_v63  ;;  %8757 = vmatpush1.bf16.msra.mxu0 %v16197_v32  ;;  %v16272_v63 = vld [vmem:[%s21532_s10 + $0x888] ss:$16 sps:$4 sm:$0xff]   ;;  %v16277_v32 = vld [vmem:[%s21532_s10 + $0x8ac] ss:$16 sps:$4 sm:$0xff]  }
 0x924   :  { %8758 = vmatprep.subr.bf16.mxu0 %v16202_v28  ;;  %v16221_v28 = vld [vmem:[%s21532_s10 + $0x860] ss:$16 sps:$4 sm:$0xff]  }
 0x926   :  { %8714 = vmatpush1.bf16.msra.mxu1 %v16146_v42  ;;  %v16226_v42 = vld [vmem:[%s21532_s10 + $0x884] ss:$16 sps:$4 sm:$0xff]  }
 0x927   :  { %8715 = vmatprep.subr.bf16.mxu1 %v16151_v19  ;;  %8759 = vmatpush1.bf16.msra.mxu0 %v16200_v1  ;;  %v16275_v19 = vld [vmem:[%s21532_s10 + $0x8a8] ss:$16 sps:$4 sm:$0xff]   ;;  %v16280_v1 = vld [vmem:[%s21532_s10 + $0x8cc] ss:$16 sps:$4 sm:$0xff]  }
 0x928   :  { %8760 = vmatprep.subr.bf16.mxu0 %v16205_v0  ;;  %v16235_v0 = vld [vmem:[%s21532_s10 + $0x8e4] ss:$16 sps:$4 sm:$0xff]  }
 0x92a   :  { %8716 = vmatpush1.bf16.msra.mxu1 %v16149_v26  ;;  %v16224_v26 = vld [vmem:[%s21532_s10 + $0x880] ss:$16 sps:$4 sm:$0xff]  }
 0x92b   :  { %8717 = vmatprep.subr.bf16.mxu1 %v16154_v54  ;;  %8761 = vmatpush1.bf16.msra.mxu0 %v16203_v20  ;;  %v16229_v54 = vld [vmem:[%s21532_s10 + $0x8a4] ss:$16 sps:$4 sm:$0xff]   ;;  %v16284_v20 = vld [vmem:[%s21532_s10 + $0x908] ss:$16 sps:$4 sm:$0xff]  }
 0x92c   :  { %8762 = vmatprep.subr.bf16.mxu0 %v16208_v49  ;;  %v16233_v49 = vld [vmem:[%s21532_s10 + $0x8e0] ss:$16 sps:$4 sm:$0xff]  }
 0x92e   :  { %8718 = vmatpush1.bf16.msra.mxu1 %v16152_v45  ;;  %v16278_v45 = vld [vmem:[%s21532_s10 + $0x8c8] ss:$16 sps:$4 sm:$0xff]  }
 0x92f   :  { %8719 = vmatprep.subr.bf16.mxu1 %v16157_v9  ;;  %8763 = vmatpush1.bf16.msra.mxu0 %v16206_v31  ;;  %v16283_v9 = vld [vmem:[%s21532_s10 + $0x8ec] ss:$16 sps:$4 sm:$0xff]  }
 0x930   :  { %8764 = vmatprep.subr.bf16.mxu0 %v16211_v24  ;;  %v16289_v31 = vld [vmem:[%s21532_s10 + $0x92c] ss:$16 sps:$4 sm:$0xff]   ;;  %v16238_v24 = vld [vmem:[%s21532_s10 + $0x904] ss:$16 sps:$4 sm:$0xff]  }
 0x932   :  { %8720 = vmatpush1.bf16.msra.mxu1 %v16155_v29  ;;  %v16227_v29 = vld [vmem:[%s21532_s10 + $0x8a0] ss:$16 sps:$4 sm:$0xff]  }
 0x933   :  { %8721 = vmatprep.subr.bf16.mxu1 %v16160_v46  ;;  %8765 = vmatpush1.bf16.msra.mxu0 %v16209_v51  ;;  %v16232_v46 = vld [vmem:[%s21532_s10 + $0x8c4] ss:$16 sps:$4 sm:$0xff]   ;;  %v16287_v51 = vld [vmem:[%s21532_s10 + $0x928] ss:$16 sps:$4 sm:$0xff]  }
 0x934   :  { %9253 = vmatprep.subr.bf16.mxu0 %v16262_v53  ;;  %v16292_v53 = vld [vmem:[%s21532_s10 + $0x94c] ss:$16 sps:$4 sm:$0xff]  }
 0x936   :  { %8722 = vmatpush1.bf16.msra.mxu1 %v16158_v58  ;;  %v16281_v58 = vld [vmem:[%s21532_s10 + $0x8e8] ss:$16 sps:$4 sm:$0xff]  }
 0x937   :  { %8723 = vmatprep.subr.bf16.mxu1 %v16163_v47  ;;  %v16286_v47 = vld [vmem:[%s21532_s10 + $0x90c] ss:$16 sps:$4 sm:$0xff]  }
 0x93a   :  { %8724 = vmatpush1.bf16.msra.mxu1 %v16161_v50  ;;  %v16230_v50 = vld [vmem:[%s21532_s10 + $0x8c0] ss:$16 sps:$4 sm:$0xff]  }
 0x93b   :  { %8784 = vmatprep.subr.bf16.mxu1 %v19646_v56 }
 0x9c8   :  { %v8208_v33 = vpop.f32.mrb[84].mxu1  ;;  %v8249_v59 = vpop.f32.mrb[52].mxu0 }
 0x9c9   :  { %v20392_v60 = vadd.f32 %v8208_v33, %v20182_v25  ;;  %v20395_v11 = vadd.f32 %v8249_v59, %v20184_v7  ;;  %v8210_v15 = vpop.f32.mrb[85].mxu1  ;;  %v8251_v40 = vpop.f32.mrb[53].mxu0  ;;  %v16260_v7 = vld [vmem:[%s21532_s10 + $0x808] ss:$16 sps:$4 sm:$0xff]   ;;  %v16236_v33 = vld [vmem:[%s21532_s10 + $0x900] ss:$16 sps:$4 sm:$0xff]  }
 0x9ca   :  { %v20398_v2 = vadd.f32 %v8210_v15, %v20186_v8  ;;  %v20401_v10 = vadd.f32 %v8251_v40, %v20188_v55  ;;  %v8212_v21 = vpop.f32.mrb[86].mxu1  ;;  %v8253_v12 = vpop.f32.mrb[54].mxu0  ;;  %v16265_v8 = vld [vmem:[%s21532_s10 + $0x82c] ss:$16 sps:$4 sm:$0xff]   ;;  %v16214_v55 = vld [vmem:[%s21532_s10 + $0x804] ss:$16 sps:$4 sm:$0xff]  }
 0x9cb   :  { %v8213_v4 = vpop.f32.mrb[87].mxu1  ;;  %v8254_v57 = vpop.f32.mrb[55].mxu0  ;;  %v16241_v59 = vld [vmem:[%s21532_s10 + $0x924] ss:$16 sps:$4 sm:$0xff]   ;;  %v16290_v15 = vld [vmem:[%s21532_s10 + $0x948] ss:$16 sps:$4 sm:$0xff]  }
 0x9cc   :  { %v16295_v40 = vld [vmem:[%s21532_s10 + $0x96c] ss:$16 sps:$4 sm:$0xff]   ;;  %v16239_v21 = vld [vmem:[%s21532_s10 + $0x920] ss:$16 sps:$4 sm:$0xff]   ;;  %v16244_v12 = vld [vmem:[%s21532_s10 + $0x944] ss:$16 sps:$4 sm:$0xff]  }
 0x9cd   :  { %v16293_v4 = vld [vmem:[%s21532_s10 + $0x968] ss:$16 sps:$4 sm:$0xff]   ;;  %v16298_v57 = vld [vmem:[%s21532_s10 + $0x98c] ss:$16 sps:$4 sm:$0xff]  }
 0x9d0   :  { %v8299_v37 = vpop.f32.mrb[88].mxu1 }
 0x9d1   :  { %v8301_v17 = vpop.f32.mrb[89].mxu1  ;;  %v8306_v39 = vpack.c.bf16 %v8299_v37, %v8299_v37  ;;  %v16242_v37 = vld [vmem:[%s21532_s10 + $0x940] ss:$16 sps:$4 sm:$0xff]  }
 0x9d2   :  { %v8307_v34 = vpack.c.bf16 %v8301_v17, %v8301_v17  ;;  %v8303_v25 = vpop.f32.mrb[90].mxu1  ;;  %v16247_v17 = vld [vmem:[%s21532_s10 + $0x964] ss:$16 sps:$4 sm:$0xff]  }
 0x9d3   :  { %v8304_v14 = vpop.f32.mrb[91].mxu1  ;;  %v16245_v25 = vld [vmem:[%s21532_s10 + $0x960] ss:$16 sps:$4 sm:$0xff]  }
 0x9d4   :  { %8725 = vmatprep.mubr.bf16.mxu1 %v8307_v34  ;;  %8766 = vmatprep.mubr.bf16.mxu0 %v8307_v34  ;;  %v16296_v34 = vld [vmem:[%s21532_s10 + $0x988] ss:$16 sps:$4 sm:$0xff]   ;;  %v16248_v14 = vld [vmem:[%s21532_s10 + $0x980] ss:$16 sps:$4 sm:$0xff]  }
 0x9d5   :  { %8726 = vmatmul.mubr.bf16.vlgmr.msra.gmra.mrb[92].mxu1 %v8306_v39  ;;  %8767 = vmatmul.mubr.bf16.vlgmr.msra.gmra.mrb[56].mxu0 %v8306_v39  ;;  %v16250_v39 = vld [vmem:[%s21532_s10 + $0x984] ss:$16 sps:$4 sm:$0xff]  }
 0x9d6   :  { %8785 = vmatpush1.bf16.msra.mxu1 %v19642_v36  ;;  %8816 = vmatprep.mubr.bf16.mxu1 %v16831_v41 }
 0x9d7   :  { %8786 = vmatprep.subr.bf16.mxu1 %v19648_v22  ;;  %9254 = vmatpush1.bf16.msra.mxu0 %v16260_v7  ;;  %v16253_v7 = vld [vmem:[%s21532_s10 + $0x9a4] ss:$16 sps:$4 sm:$0xff]  }
 0x9d8   :  { %9255 = vmatprep.subr.bf16.mxu0 %v16265_v8  ;;  %v16251_v8 = vld [vmem:[%s21532_s10 + $0x9a0] ss:$16 sps:$4 sm:$0xff]  }
 0x9da   :  { %8787 = vmatpush1.bf16.msra.mxu1 %v19644_v5 }
 0x9db   :  { %9212 = vmatprep.subr.bf16.mxu1 %v16214_v55  ;;  %9256 = vmatpush1.bf16.msra.mxu0 %v16263_v48  ;;  %v16256_v55 = vld [vmem:[%s21532_s10 + $0x9c4] ss:$16 sps:$4 sm:$0xff]   ;;  %v16254_v48 = vld [vmem:[%s21532_s10 + $0x9c0] ss:$16 sps:$4 sm:$0xff]  }
 0x9dc   :  { %9257 = vmatprep.subr.bf16.mxu0 %v16268_v62  ;;  %v16259_v62 = vld [vmem:[%s21532_s10 + $0x9e4] ss:$16 sps:$4 sm:$0xff]  }
 0x9dd   :  { %12987 = vmatmul.mubr.msk.bf16.vlgmr.msra.gmra.mrb[96].mxu1 %vm6713_vm8, %v12986_v18  ;;  %v16301_v18 = vld [vmem:[%s21532_s10 + $0x9ac] ss:$16 sps:$4 sm:$0xff]  }
 0x9de   :  { %9213 = vmatpush1.bf16.msra.mxu1 %v16212_v13  ;;  %v16257_v13 = vld [vmem:[%s21532_s10 + $0x9e0] ss:$16 sps:$4 sm:$0xff]  }
 0x9df   :  { %9214 = vmatprep.subr.bf16.mxu1 %v16217_v35  ;;  %9258 = vmatpush1.bf16.msra.mxu0 %v16266_v52  ;;  %v16299_v35 = vld [vmem:[%s21532_s10 + $0x9a8] ss:$16 sps:$4 sm:$0xff]  }
 0x9e0   :  { %9259 = vmatprep.subr.bf16.mxu0 %v16271_v6  ;;  %v16302_v52 = vld [vmem:[%s21532_s10 + $0x9c8] ss:$16 sps:$4 sm:$0xff]   ;;  %v16304_v6 = vld [vmem:[%s21532_s10 + $0x9cc] ss:$16 sps:$4 sm:$0xff]  }
 0x9e2   :  { %9215 = vmatpush1.bf16.msra.mxu1 %v16215_v38  ;;  %v16307_v38 = vld [vmem:[%s21532_s10 + $0x9ec] ss:$16 sps:$4 sm:$0xff]  }
 0x9e3   :  { %9216 = vmatprep.subr.bf16.mxu1 %v16220_v23  ;;  %9260 = vmatpush1.bf16.msra.mxu0 %v16269_v44  ;;  %v16305_v23 = vld [vmem:[%s21532_s10 + $0x9e8] ss:$16 sps:$4 sm:$0xff]   ;;  %v16358_v44 = vld [vmem:[%s21532_s10 + $0xa0c] ss:$16 sps:$4 sm:$0xff]  }
 0x9e4   :  { %9261 = vmatprep.subr.bf16.mxu0 %v16274_v43 }
 0x9e6   :  { %9217 = vmatpush1.bf16.msra.mxu1 %v16218_v30 }
 0x9e7   :  { %9218 = vmatprep.subr.bf16.mxu1 %v16223_v27  ;;  %9262 = vmatpush1.bf16.msra.mxu0 %v16272_v63 }
 0x9e8   :  { %9263 = vmatprep.subr.bf16.mxu0 %v16277_v32 }
 0x9ea   :  { %9219 = vmatpush1.bf16.msra.mxu1 %v16221_v28 }
 0x9eb   :  { %9220 = vmatprep.subr.bf16.mxu1 %v16226_v42  ;;  %9264 = vmatpush1.bf16.msra.mxu0 %v16275_v19 }
 0x9ec   :  { %9265 = vmatprep.subr.bf16.mxu0 %v16280_v1 }
 0x9ee   :  { %9221 = vmatpush1.bf16.msra.mxu1 %v16224_v26 }
 0x9ef   :  { %9222 = vmatprep.subr.bf16.mxu1 %v16229_v54  ;;  %9266 = vmatpush1.bf16.msra.mxu0 %v16278_v45 }
 0x9f0   :  { %9267 = vmatprep.subr.bf16.mxu0 %v16283_v9 }
 0x9f2   :  { %9223 = vmatpush1.bf16.msra.mxu1 %v16227_v29 }
 0x9f3   :  { %9224 = vmatprep.subr.bf16.mxu1 %v16232_v46  ;;  %9268 = vmatpush1.bf16.msra.mxu0 %v16281_v58 }
 0x9f4   :  { %9269 = vmatprep.subr.bf16.mxu0 %v16286_v47 }
 0x9f6   :  { %9225 = vmatpush1.bf16.msra.mxu1 %v16230_v50  ;;  %v16359_v50 = vld [vmem:[%s21532_s10 + $0xa28] ss:$16 sps:$4 sm:$0xff]  }
 0x9f7   :  { %9226 = vmatprep.subr.bf16.mxu1 %v16235_v0  ;;  %9270 = vmatpush1.bf16.msra.mxu0 %v16284_v20  ;;  %v16364_v0 = vld [vmem:[%s21532_s10 + $0xa4c] ss:$16 sps:$4 sm:$0xff]   ;;  %v16308_v20 = vld [vmem:[%s21532_s10 + $0xa00] ss:$16 sps:$4 sm:$0xff]  }
 0x9f8   :  { %9271 = vmatprep.subr.bf16.mxu0 %v16289_v31  ;;  %v13116_v31 = vld [vmem:[%s21531_s9 + $0x14] sm:$0xf] }
 0x9fa   :  { %9227 = vmatpush1.bf16.msra.mxu1 %v16233_v49  ;;  %v16313_v49 = vld [vmem:[%s21532_s10 + $0xa24] ss:$16 sps:$4 sm:$0xff]  }
 0x9fb   :  { %9228 = vmatprep.subr.bf16.mxu1 %v16238_v24  ;;  %9272 = vmatpush1.bf16.msra.mxu0 %v16287_v51  ;;  %v16362_v24 = vld [vmem:[%s21532_s10 + $0xa48] ss:$16 sps:$4 sm:$0xff]   ;;  %v16367_v51 = vld [vmem:[%s21532_s10 + $0xa6c] ss:$16 sps:$4 sm:$0xff]  }
 0x9fc   :  { %9273 = vmatprep.subr.bf16.mxu0 %v16292_v53  ;;  %v16311_v53 = vld [vmem:[%s21532_s10 + $0xa20] ss:$16 sps:$4 sm:$0xff]  }
 0x9fe   :  { %9229 = vmatpush1.bf16.msra.mxu1 %v16236_v33  ;;  %v16316_v33 = vld [vmem:[%s21532_s10 + $0xa44] ss:$16 sps:$4 sm:$0xff]  }
 0x9ff   :  { %9230 = vmatprep.subr.bf16.mxu1 %v16241_v59  ;;  %9274 = vmatpush1.bf16.msra.mxu0 %v16290_v15  ;;  %v16365_v59 = vld [vmem:[%s21532_s10 + $0xa68] ss:$16 sps:$4 sm:$0xff]   ;;  %v16370_v15 = vld [vmem:[%s21532_s10 + $0xa8c] ss:$16 sps:$4 sm:$0xff]  }
 0xa00   :  { %9275 = vmatprep.subr.bf16.mxu0 %v16295_v40  ;;  %v16314_v40 = vld [vmem:[%s21532_s10 + $0xa40] ss:$16 sps:$4 sm:$0xff]  }
 0xa02   :  { %9231 = vmatpush1.bf16.msra.mxu1 %v16239_v21  ;;  %v16319_v21 = vld [vmem:[%s21532_s10 + $0xa64] ss:$16 sps:$4 sm:$0xff]  }
 0xa03   :  { %9232 = vmatprep.subr.bf16.mxu1 %v16244_v12  ;;  %9276 = vmatpush1.bf16.msra.mxu0 %v16293_v4  ;;  %v16368_v12 = vld [vmem:[%s21532_s10 + $0xa88] ss:$16 sps:$4 sm:$0xff]   ;;  %v16373_v4 = vld [vmem:[%s21532_s10 + $0xaac] ss:$16 sps:$4 sm:$0xff]  }
 0xa04   :  { %9277 = vmatprep.subr.bf16.mxu0 %v16298_v57  ;;  %v16317_v57 = vld [vmem:[%s21532_s10 + $0xa60] ss:$16 sps:$4 sm:$0xff]  }
 0xa06   :  { %9233 = vmatpush1.bf16.msra.mxu1 %v16242_v37  ;;  %v16322_v37 = vld [vmem:[%s21532_s10 + $0xa84] ss:$16 sps:$4 sm:$0xff]  }
 0xa07   :  { %9234 = vmatprep.subr.bf16.mxu1 %v16247_v17  ;;  %9278 = vmatpush1.bf16.msra.mxu0 %v16296_v34  ;;  %v16371_v17 = vld [vmem:[%s21532_s10 + $0xaa8] ss:$16 sps:$4 sm:$0xff]   ;;  %v16376_v34 = vld [vmem:[%s21532_s10 + $0xacc] ss:$16 sps:$4 sm:$0xff]  }
 0xa08   :  { %9279 = vmatprep.subr.bf16.mxu0 %v16301_v18  ;;  %v16331_v18 = vld [vmem:[%s21532_s10 + $0xae4] ss:$16 sps:$4 sm:$0xff]  }
 0xa0a   :  { %9235 = vmatpush1.bf16.msra.mxu1 %v16245_v25  ;;  %v16320_v25 = vld [vmem:[%s21532_s10 + $0xa80] ss:$16 sps:$4 sm:$0xff]  }
 0xa0b   :  { %9236 = vmatprep.subr.bf16.mxu1 %v16250_v39  ;;  %9280 = vmatpush1.bf16.msra.mxu0 %v16299_v35  ;;  %v16325_v39 = vld [vmem:[%s21532_s10 + $0xaa4] ss:$16 sps:$4 sm:$0xff]   ;;  %v16380_v35 = vld [vmem:[%s21532_s10 + $0xb08] ss:$16 sps:$4 sm:$0xff]  }
 0xa0c   :  { %9281 = vmatprep.subr.bf16.mxu0 %v16304_v6  ;;  %v16329_v6 = vld [vmem:[%s21532_s10 + $0xae0] ss:$16 sps:$4 sm:$0xff]  }
 0xa0e   :  { %9237 = vmatpush1.bf16.msra.mxu1 %v16248_v14  ;;  %v16374_v14 = vld [vmem:[%s21532_s10 + $0xac8] ss:$16 sps:$4 sm:$0xff]  }
 0xa0f   :  { %9238 = vmatprep.subr.bf16.mxu1 %v16253_v7  ;;  %9282 = vmatpush1.bf16.msra.mxu0 %v16302_v52  ;;  %v16379_v7 = vld [vmem:[%s21532_s10 + $0xaec] ss:$16 sps:$4 sm:$0xff]  }
 0xa10   :  { %9283 = vmatprep.subr.bf16.mxu0 %v16307_v38  ;;  %v16385_v52 = vld [vmem:[%s21532_s10 + $0xb2c] ss:$16 sps:$4 sm:$0xff]   ;;  %v16334_v38 = vld [vmem:[%s21532_s10 + $0xb04] ss:$16 sps:$4 sm:$0xff]  }
 0xa12   :  { %9239 = vmatpush1.bf16.msra.mxu1 %v16251_v8  ;;  %v16323_v8 = vld [vmem:[%s21532_s10 + $0xaa0] ss:$16 sps:$4 sm:$0xff]  }
 0xa13   :  { %9240 = vmatprep.subr.bf16.mxu1 %v16256_v55  ;;  %9284 = vmatpush1.bf16.msra.mxu0 %v16305_v23  ;;  %v16328_v55 = vld [vmem:[%s21532_s10 + $0xac4] ss:$16 sps:$4 sm:$0xff]   ;;  %v16383_v23 = vld [vmem:[%s21532_s10 + $0xb28] ss:$16 sps:$4 sm:$0xff]  }
 0xa14   :  { %9772 = vmatprep.subr.bf16.mxu0 %v16358_v44  ;;  %v16388_v44 = vld [vmem:[%s21532_s10 + $0xb4c] ss:$16 sps:$4 sm:$0xff]  }
 0xa16   :  { %9241 = vmatpush1.bf16.msra.mxu1 %v16254_v48  ;;  %v16377_v48 = vld [vmem:[%s21532_s10 + $0xae8] ss:$16 sps:$4 sm:$0xff]  }
 0xa17   :  { %9242 = vmatprep.subr.bf16.mxu1 %v16259_v62  ;;  %v16382_v62 = vld [vmem:[%s21532_s10 + $0xb0c] ss:$16 sps:$4 sm:$0xff]  }
 0xa1a   :  { %9243 = vmatpush1.bf16.msra.mxu1 %v16257_v13  ;;  %v16326_v13 = vld [vmem:[%s21532_s10 + $0xac0] ss:$16 sps:$4 sm:$0xff]  }
 0xa1b   :  { %9303 = vmatprep.subr.bf16.mxu1 %v19646_v56 }
 0xaa8   :  { %v8727_v43 = vpop.f32.mrb[92].mxu1  ;;  %v8768_v30 = vpop.f32.mrb[56].mxu0 }
 0xaa9   :  { %v20605_v27 = vadd.f32 %v8727_v43, %v20392_v60  ;;  %v20608_v63 = vadd.f32 %v8768_v30, %v20395_v11  ;;  %v8729_v32 = vpop.f32.mrb[93].mxu1  ;;  %v8770_v28 = vpop.f32.mrb[57].mxu0  ;;  %v16356_v11 = vld [vmem:[%s21532_s10 + $0xa08] ss:$16 sps:$4 sm:$0xff]   ;;  %v16332_v43 = vld [vmem:[%s21532_s10 + $0xb00] ss:$16 sps:$4 sm:$0xff]  }
 0xaaa   :  { %v20611_v42 = vadd.f32 %v8729_v32, %v20398_v2  ;;  %v20614_v19 = vadd.f32 %v8770_v28, %v20401_v10  ;;  %v8731_v1 = vpop.f32.mrb[94].mxu1  ;;  %v8772_v26 = vpop.f32.mrb[58].mxu0  ;;  %v16361_v2 = vld [vmem:[%s21532_s10 + $0xa2c] ss:$16 sps:$4 sm:$0xff]   ;;  %v16310_v10 = vld [vmem:[%s21532_s10 + $0xa04] ss:$16 sps:$4 sm:$0xff]  }
 0xaab   :  { %v8732_v54 = vpop.f32.mrb[95].mxu1  ;;  %v8773_v45 = vpop.f32.mrb[59].mxu0  ;;  %v16337_v30 = vld [vmem:[%s21532_s10 + $0xb24] ss:$16 sps:$4 sm:$0xff]   ;;  %v16386_v32 = vld [vmem:[%s21532_s10 + $0xb48] ss:$16 sps:$4 sm:$0xff]  }
 0xaac   :  { %v16391_v28 = vld [vmem:[%s21532_s10 + $0xb6c] ss:$16 sps:$4 sm:$0xff]   ;;  %v16335_v1 = vld [vmem:[%s21532_s10 + $0xb20] ss:$16 sps:$4 sm:$0xff]   ;;  %v16340_v26 = vld [vmem:[%s21532_s10 + $0xb44] ss:$16 sps:$4 sm:$0xff]  }
 0xaad   :  { %v16389_v54 = vld [vmem:[%s21532_s10 + $0xb68] ss:$16 sps:$4 sm:$0xff]   ;;  %v16394_v45 = vld [vmem:[%s21532_s10 + $0xb8c] ss:$16 sps:$4 sm:$0xff]  }
 0xab0   :  { %v8818_v9 = vpop.f32.mrb[96].mxu1 }
 0xab1   :  { %v8820_v29 = vpop.f32.mrb[97].mxu1  ;;  %v8825_v58 = vpack.c.bf16 %v8818_v9, %v8818_v9  ;;  %v16338_v9 = vld [vmem:[%s21532_s10 + $0xb40] ss:$16 sps:$4 sm:$0xff]  }
 0xab2   :  { %v8826_v46 = vpack.c.bf16 %v8820_v29, %v8820_v29  ;;  %v8822_v60 = vpop.f32.mrb[98].mxu1  ;;  %v16343_v29 = vld [vmem:[%s21532_s10 + $0xb64] ss:$16 sps:$4 sm:$0xff]  }
 0xab3   :  { %v8823_v47 = vpop.f32.mrb[99].mxu1  ;;  %v16341_v60 = vld [vmem:[%s21532_s10 + $0xb60] ss:$16 sps:$4 sm:$0xff]  }
 0xab4   :  { %9244 = vmatprep.mubr.bf16.mxu1 %v8826_v46  ;;  %9285 = vmatprep.mubr.bf16.mxu0 %v8826_v46  ;;  %v16392_v46 = vld [vmem:[%s21532_s10 + $0xb88] ss:$16 sps:$4 sm:$0xff]   ;;  %v16344_v47 = vld [vmem:[%s21532_s10 + $0xb80] ss:$16 sps:$4 sm:$0xff]  }
 0xab5   :  { %9245 = vmatmul.mubr.bf16.vlgmr.msra.gmra.mrb[100].mxu1 %v8825_v58  ;;  %9286 = vmatmul.mubr.bf16.vlgmr.msra.gmra.mrb[60].mxu0 %v8825_v58  ;;  %v16346_v58 = vld [vmem:[%s21532_s10 + $0xb84] ss:$16 sps:$4 sm:$0xff]  }
 0xab6   :  { %9304 = vmatpush1.bf16.msra.mxu1 %v19642_v36  ;;  %9335 = vmatprep.mubr.bf16.mxu1 %v16831_v41 }
 0xab7   :  { %9305 = vmatprep.subr.bf16.mxu1 %v19648_v22  ;;  %9773 = vmatpush1.bf16.msra.mxu0 %v16356_v11  ;;  %v16349_v11 = vld [vmem:[%s21532_s10 + $0xba4] ss:$16 sps:$4 sm:$0xff]  }
 0xab8   :  { %9774 = vmatprep.subr.bf16.mxu0 %v16361_v2  ;;  %v16347_v2 = vld [vmem:[%s21532_s10 + $0xba0] ss:$16 sps:$4 sm:$0xff]  }
 0xaba   :  { %9306 = vmatpush1.bf16.msra.mxu1 %v19644_v5 }
 0xabb   :  { %9731 = vmatprep.subr.bf16.mxu1 %v16310_v10  ;;  %9775 = vmatpush1.bf16.msra.mxu0 %v16359_v50  ;;  %v16352_v10 = vld [vmem:[%s21532_s10 + $0xbc4] ss:$16 sps:$4 sm:$0xff]   ;;  %v16350_v50 = vld [vmem:[%s21532_s10 + $0xbc0] ss:$16 sps:$4 sm:$0xff]  }
 0xabc   :  { %9776 = vmatprep.subr.bf16.mxu0 %v16364_v0  ;;  %v16355_v0 = vld [vmem:[%s21532_s10 + $0xbe4] ss:$16 sps:$4 sm:$0xff]  }
 0xabd   :  { %13117 = vmatmul.mubr.msk.bf16.vlgmr.msra.gmra.mrb[104].mxu1 %vm6713_vm8, %v13116_v31  ;;  %v16397_v31 = vld [vmem:[%s21532_s10 + $0xbac] ss:$16 sps:$4 sm:$0xff]  }
 0xabe   :  { %9732 = vmatpush1.bf16.msra.mxu1 %v16308_v20  ;;  %v16353_v20 = vld [vmem:[%s21532_s10 + $0xbe0] ss:$16 sps:$4 sm:$0xff]  }
 0xabf   :  { %9733 = vmatprep.subr.bf16.mxu1 %v16313_v49  ;;  %9777 = vmatpush1.bf16.msra.mxu0 %v16362_v24  ;;  %v16395_v49 = vld [vmem:[%s21532_s10 + $0xba8] ss:$16 sps:$4 sm:$0xff]  }
 0xac0   :  { %9778 = vmatprep.subr.bf16.mxu0 %v16367_v51  ;;  %v16398_v24 = vld [vmem:[%s21532_s10 + $0xbc8] ss:$16 sps:$4 sm:$0xff]   ;;  %v16400_v51 = vld [vmem:[%s21532_s10 + $0xbcc] ss:$16 sps:$4 sm:$0xff]  }
 0xac2   :  { %9734 = vmatpush1.bf16.msra.mxu1 %v16311_v53  ;;  %v16403_v53 = vld [vmem:[%s21532_s10 + $0xbec] ss:$16 sps:$4 sm:$0xff]  }
 0xac3   :  { %9735 = vmatprep.subr.bf16.mxu1 %v16316_v33  ;;  %9779 = vmatpush1.bf16.msra.mxu0 %v16365_v59  ;;  %v16401_v33 = vld [vmem:[%s21532_s10 + $0xbe8] ss:$16 sps:$4 sm:$0xff]   ;;  %v16454_v59 = vld [vmem:[%s21532_s10 + $0xc0c] ss:$16 sps:$4 sm:$0xff]  }
 0xac4   :  { %9780 = vmatprep.subr.bf16.mxu0 %v16370_v15 }
 0xac6   :  { %9736 = vmatpush1.bf16.msra.mxu1 %v16314_v40 }
 0xac7   :  { %9737 = vmatprep.subr.bf16.mxu1 %v16319_v21  ;;  %9781 = vmatpush1.bf16.msra.mxu0 %v16368_v12 }
 0xac8   :  { %9782 = vmatprep.subr.bf16.mxu0 %v16373_v4 }
 0xaca   :  { %9738 = vmatpush1.bf16.msra.mxu1 %v16317_v57 }
 0xacb   :  { %9739 = vmatprep.subr.bf16.mxu1 %v16322_v37  ;;  %9783 = vmatpush1.bf16.msra.mxu0 %v16371_v17 }
 0xacc   :  { %9784 = vmatprep.subr.bf16.mxu0 %v16376_v34 }
 0xace   :  { %9740 = vmatpush1.bf16.msra.mxu1 %v16320_v25 }
 0xacf   :  { %9741 = vmatprep.subr.bf16.mxu1 %v16325_v39  ;;  %9785 = vmatpush1.bf16.msra.mxu0 %v16374_v14 }
 0xad0   :  { %9786 = vmatprep.subr.bf16.mxu0 %v16379_v7 }
 0xad2   :  { %9742 = vmatpush1.bf16.msra.mxu1 %v16323_v8 }
 0xad3   :  { %9743 = vmatprep.subr.bf16.mxu1 %v16328_v55  ;;  %9787 = vmatpush1.bf16.msra.mxu0 %v16377_v48 }
 0xad4   :  { %9788 = vmatprep.subr.bf16.mxu0 %v16382_v62 }
 0xad6   :  { %9744 = vmatpush1.bf16.msra.mxu1 %v16326_v13  ;;  %v16455_v13 = vld [vmem:[%s21532_s10 + $0xc28] ss:$16 sps:$4 sm:$0xff]  }
 0xad7   :  { %9745 = vmatprep.subr.bf16.mxu1 %v16331_v18  ;;  %9789 = vmatpush1.bf16.msra.mxu0 %v16380_v35  ;;  %v16460_v18 = vld [vmem:[%s21532_s10 + $0xc4c] ss:$16 sps:$4 sm:$0xff]   ;;  %v16404_v35 = vld [vmem:[%s21532_s10 + $0xc00] ss:$16 sps:$4 sm:$0xff]  }
 0xad8   :  { %9790 = vmatprep.subr.bf16.mxu0 %v16385_v52  ;;  %v13246_v52 = vld [vmem:[%s21531_s9 + $0x18] sm:$0xf] }
 0xada   :  { %9746 = vmatpush1.bf16.msra.mxu1 %v16329_v6  ;;  %v16409_v6 = vld [vmem:[%s21532_s10 + $0xc24] ss:$16 sps:$4 sm:$0xff]  }
 0xadb   :  { %9747 = vmatprep.subr.bf16.mxu1 %v16334_v38  ;;  %9791 = vmatpush1.bf16.msra.mxu0 %v16383_v23  ;;  %v16458_v38 = vld [vmem:[%s21532_s10 + $0xc48] ss:$16 sps:$4 sm:$0xff]   ;;  %v16463_v23 = vld [vmem:[%s21532_s10 + $0xc6c] ss:$16 sps:$4 sm:$0xff]  }
 0xadc   :  { %9792 = vmatprep.subr.bf16.mxu0 %v16388_v44  ;;  %v16407_v44 = vld [vmem:[%s21532_s10 + $0xc20] ss:$16 sps:$4 sm:$0xff]  }
 0xade   :  { %9748 = vmatpush1.bf16.msra.mxu1 %v16332_v43  ;;  %v16412_v43 = vld [vmem:[%s21532_s10 + $0xc44] ss:$16 sps:$4 sm:$0xff]  }
 0xadf   :  { %9749 = vmatprep.subr.bf16.mxu1 %v16337_v30  ;;  %9793 = vmatpush1.bf16.msra.mxu0 %v16386_v32  ;;  %v16461_v30 = vld [vmem:[%s21532_s10 + $0xc68] ss:$16 sps:$4 sm:$0xff]   ;;  %v16466_v32 = vld [vmem:[%s21532_s10 + $0xc8c] ss:$16 sps:$4 sm:$0xff]  }
 0xae0   :  { %9794 = vmatprep.subr.bf16.mxu0 %v16391_v28  ;;  %v16410_v28 = vld [vmem:[%s21532_s10 + $0xc40] ss:$16 sps:$4 sm:$0xff]  }
 0xae2   :  { %9750 = vmatpush1.bf16.msra.mxu1 %v16335_v1  ;;  %v16415_v1 = vld [vmem:[%s21532_s10 + $0xc64] ss:$16 sps:$4 sm:$0xff]  }
 0xae3   :  { %9751 = vmatprep.subr.bf16.mxu1 %v16340_v26  ;;  %9795 = vmatpush1.bf16.msra.mxu0 %v16389_v54  ;;  %v16464_v26 = vld [vmem:[%s21532_s10 + $0xc88] ss:$16 sps:$4 sm:$0xff]   ;;  %v16469_v54 = vld [vmem:[%s21532_s10 + $0xcac] ss:$16 sps:$4 sm:$0xff]  }
 0xae4   :  { %9796 = vmatprep.subr.bf16.mxu0 %v16394_v45  ;;  %v16413_v45 = vld [vmem:[%s21532_s10 + $0xc60] ss:$16 sps:$4 sm:$0xff]  }
 0xae6   :  { %9752 = vmatpush1.bf16.msra.mxu1 %v16338_v9  ;;  %v16418_v9 = vld [vmem:[%s21532_s10 + $0xc84] ss:$16 sps:$4 sm:$0xff]  }
 0xae7   :  { %9753 = vmatprep.subr.bf16.mxu1 %v16343_v29  ;;  %9797 = vmatpush1.bf16.msra.mxu0 %v16392_v46  ;;  %v16467_v29 = vld [vmem:[%s21532_s10 + $0xca8] ss:$16 sps:$4 sm:$0xff]   ;;  %v16472_v46 = vld [vmem:[%s21532_s10 + $0xccc] ss:$16 sps:$4 sm:$0xff]  }
 0xae8   :  { %9798 = vmatprep.subr.bf16.mxu0 %v16397_v31  ;;  %v16427_v31 = vld [vmem:[%s21532_s10 + $0xce4] ss:$16 sps:$4 sm:$0xff]  }
 0xaea   :  { %9754 = vmatpush1.bf16.msra.mxu1 %v16341_v60  ;;  %v16416_v60 = vld [vmem:[%s21532_s10 + $0xc80] ss:$16 sps:$4 sm:$0xff]  }
 0xaeb   :  { %9755 = vmatprep.subr.bf16.mxu1 %v16346_v58  ;;  %9799 = vmatpush1.bf16.msra.mxu0 %v16395_v49  ;;  %v16421_v58 = vld [vmem:[%s21532_s10 + $0xca4] ss:$16 sps:$4 sm:$0xff]   ;;  %v16476_v49 = vld [vmem:[%s21532_s10 + $0xd08] ss:$16 sps:$4 sm:$0xff]  }
 0xaec   :  { %9800 = vmatprep.subr.bf16.mxu0 %v16400_v51  ;;  %v16425_v51 = vld [vmem:[%s21532_s10 + $0xce0] ss:$16 sps:$4 sm:$0xff]  }
 0xaee   :  { %9756 = vmatpush1.bf16.msra.mxu1 %v16344_v47  ;;  %v16470_v47 = vld [vmem:[%s21532_s10 + $0xcc8] ss:$16 sps:$4 sm:$0xff]  }
 0xaef   :  { %9757 = vmatprep.subr.bf16.mxu1 %v16349_v11  ;;  %9801 = vmatpush1.bf16.msra.mxu0 %v16398_v24  ;;  %v16475_v11 = vld [vmem:[%s21532_s10 + $0xcec] ss:$16 sps:$4 sm:$0xff]  }
 0xaf0   :  { %9802 = vmatprep.subr.bf16.mxu0 %v16403_v53  ;;  %v16481_v24 = vld [vmem:[%s21532_s10 + $0xd2c] ss:$16 sps:$4 sm:$0xff]   ;;  %v16430_v53 = vld [vmem:[%s21532_s10 + $0xd04] ss:$16 sps:$4 sm:$0xff]  }
 0xaf2   :  { %9758 = vmatpush1.bf16.msra.mxu1 %v16347_v2  ;;  %v16419_v2 = vld [vmem:[%s21532_s10 + $0xca0] ss:$16 sps:$4 sm:$0xff]  }
 0xaf3   :  { %9759 = vmatprep.subr.bf16.mxu1 %v16352_v10  ;;  %9803 = vmatpush1.bf16.msra.mxu0 %v16401_v33  ;;  %v16424_v10 = vld [vmem:[%s21532_s10 + $0xcc4] ss:$16 sps:$4 sm:$0xff]   ;;  %v16479_v33 = vld [vmem:[%s21532_s10 + $0xd28] ss:$16 sps:$4 sm:$0xff]  }
 0xaf4   :  { %10291 = vmatprep.subr.bf16.mxu0 %v16454_v59  ;;  %v16484_v59 = vld [vmem:[%s21532_s10 + $0xd4c] ss:$16 sps:$4 sm:$0xff]  }
 0xaf6   :  { %9760 = vmatpush1.bf16.msra.mxu1 %v16350_v50  ;;  %v16473_v50 = vld [vmem:[%s21532_s10 + $0xce8] ss:$16 sps:$4 sm:$0xff]  }
 0xaf7   :  { %9761 = vmatprep.subr.bf16.mxu1 %v16355_v0  ;;  %v16478_v0 = vld [vmem:[%s21532_s10 + $0xd0c] ss:$16 sps:$4 sm:$0xff]  }
 0xafa   :  { %9762 = vmatpush1.bf16.msra.mxu1 %v16353_v20  ;;  %v16422_v20 = vld [vmem:[%s21532_s10 + $0xcc0] ss:$16 sps:$4 sm:$0xff]  }
 0xafb   :  { %9822 = vmatprep.subr.bf16.mxu1 %v19646_v56 }
 0xb88   :  { %v9246_v15 = vpop.f32.mrb[100].mxu1  ;;  %v9287_v40 = vpop.f32.mrb[60].mxu0 }
 0xb89   :  { %v20818_v21 = vadd.f32 %v9246_v15, %v20605_v27  ;;  %v20821_v12 = vadd.f32 %v9287_v40, %v20608_v63  ;;  %v9248_v4 = vpop.f32.mrb[101].mxu1  ;;  %v9289_v57 = vpop.f32.mrb[61].mxu0  ;;  %v16452_v63 = vld [vmem:[%s21532_s10 + $0xc08] ss:$16 sps:$4 sm:$0xff]   ;;  %v16428_v15 = vld [vmem:[%s21532_s10 + $0xd00] ss:$16 sps:$4 sm:$0xff]  }
 0xb8a   :  { %v20824_v37 = vadd.f32 %v9248_v4, %v20611_v42  ;;  %v20827_v17 = vadd.f32 %v9289_v57, %v20614_v19  ;;  %v9250_v34 = vpop.f32.mrb[102].mxu1  ;;  %v9291_v25 = vpop.f32.mrb[62].mxu0  ;;  %v16457_v42 = vld [vmem:[%s21532_s10 + $0xc2c] ss:$16 sps:$4 sm:$0xff]   ;;  %v16406_v19 = vld [vmem:[%s21532_s10 + $0xc04] ss:$16 sps:$4 sm:$0xff]  }
 0xb8b   :  { %v9251_v39 = vpop.f32.mrb[103].mxu1  ;;  %v9292_v14 = vpop.f32.mrb[63].mxu0  ;;  %v16433_v40 = vld [vmem:[%s21532_s10 + $0xd24] ss:$16 sps:$4 sm:$0xff]   ;;  %v16482_v4 = vld [vmem:[%s21532_s10 + $0xd48] ss:$16 sps:$4 sm:$0xff]  }
 0xb8c   :  { %v16487_v57 = vld [vmem:[%s21532_s10 + $0xd6c] ss:$16 sps:$4 sm:$0xff]   ;;  %v16431_v34 = vld [vmem:[%s21532_s10 + $0xd20] ss:$16 sps:$4 sm:$0xff]   ;;  %v16436_v25 = vld [vmem:[%s21532_s10 + $0xd44] ss:$16 sps:$4 sm:$0xff]  }
 0xb8d   :  { %v16485_v39 = vld [vmem:[%s21532_s10 + $0xd68] ss:$16 sps:$4 sm:$0xff]   ;;  %v16490_v14 = vld [vmem:[%s21532_s10 + $0xd8c] ss:$16 sps:$4 sm:$0xff]  }
 0xb90   :  { %v9337_v7 = vpop.f32.mrb[104].mxu1 }
 0xb91   :  { %v9339_v8 = vpop.f32.mrb[105].mxu1  ;;  %v9344_v48 = vpack.c.bf16 %v9337_v7, %v9337_v7  ;;  %v16434_v7 = vld [vmem:[%s21532_s10 + $0xd40] ss:$16 sps:$4 sm:$0xff]  }
 0xb92   :  { %v9345_v55 = vpack.c.bf16 %v9339_v8, %v9339_v8  ;;  %v9341_v27 = vpop.f32.mrb[106].mxu1  ;;  %v16439_v8 = vld [vmem:[%s21532_s10 + $0xd64] ss:$16 sps:$4 sm:$0xff]  }
 0xb93   :  { %v9342_v62 = vpop.f32.mrb[107].mxu1  ;;  %v16437_v27 = vld [vmem:[%s21532_s10 + $0xd60] ss:$16 sps:$4 sm:$0xff]  }
 0xb94   :  { %9763 = vmatprep.mubr.bf16.mxu1 %v9345_v55  ;;  %9804 = vmatprep.mubr.bf16.mxu0 %v9345_v55  ;;  %v16488_v55 = vld [vmem:[%s21532_s10 + $0xd88] ss:$16 sps:$4 sm:$0xff]   ;;  %v16440_v62 = vld [vmem:[%s21532_s10 + $0xd80] ss:$16 sps:$4 sm:$0xff]  }
 0xb95   :  { %9764 = vmatmul.mubr.bf16.vlgmr.msra.gmra.mrb[108].mxu1 %v9344_v48  ;;  %9805 = vmatmul.mubr.bf16.vlgmr.msra.gmra.mrb[64].mxu0 %v9344_v48  ;;  %v16442_v48 = vld [vmem:[%s21532_s10 + $0xd84] ss:$16 sps:$4 sm:$0xff]  }
 0xb96   :  { %9823 = vmatpush1.bf16.msra.mxu1 %v19642_v36  ;;  %9854 = vmatprep.mubr.bf16.mxu1 %v16831_v41 }
 0xb97   :  { %9824 = vmatprep.subr.bf16.mxu1 %v19648_v22  ;;  %10292 = vmatpush1.bf16.msra.mxu0 %v16452_v63  ;;  %v16445_v63 = vld [vmem:[%s21532_s10 + $0xda4] ss:$16 sps:$4 sm:$0xff]  }
 0xb98   :  { %10293 = vmatprep.subr.bf16.mxu0 %v16457_v42  ;;  %v16443_v42 = vld [vmem:[%s21532_s10 + $0xda0] ss:$16 sps:$4 sm:$0xff]  }
 0xb9a   :  { %9825 = vmatpush1.bf16.msra.mxu1 %v19644_v5 }
 0xb9b   :  { %10250 = vmatprep.subr.bf16.mxu1 %v16406_v19  ;;  %10294 = vmatpush1.bf16.msra.mxu0 %v16455_v13  ;;  %v16448_v19 = vld [vmem:[%s21532_s10 + $0xdc4] ss:$16 sps:$4 sm:$0xff]   ;;  %v16446_v13 = vld [vmem:[%s21532_s10 + $0xdc0] ss:$16 sps:$4 sm:$0xff]  }
 0xb9c   :  { %10295 = vmatprep.subr.bf16.mxu0 %v16460_v18  ;;  %v16451_v18 = vld [vmem:[%s21532_s10 + $0xde4] ss:$16 sps:$4 sm:$0xff]  }
 0xb9d   :  { %13247 = vmatmul.mubr.msk.bf16.vlgmr.msra.gmra.mrb[112].mxu1 %vm6713_vm8, %v13246_v52  ;;  %v16493_v52 = vld [vmem:[%s21532_s10 + $0xdac] ss:$16 sps:$4 sm:$0xff]  }
 0xb9e   :  { %10251 = vmatpush1.bf16.msra.mxu1 %v16404_v35  ;;  %v16449_v35 = vld [vmem:[%s21532_s10 + $0xde0] ss:$16 sps:$4 sm:$0xff]  }
 0xb9f   :  { %10252 = vmatprep.subr.bf16.mxu1 %v16409_v6  ;;  %10296 = vmatpush1.bf16.msra.mxu0 %v16458_v38  ;;  %v16491_v6 = vld [vmem:[%s21532_s10 + $0xda8] ss:$16 sps:$4 sm:$0xff]  }
 0xba0   :  { %10297 = vmatprep.subr.bf16.mxu0 %v16463_v23  ;;  %v16494_v38 = vld [vmem:[%s21532_s10 + $0xdc8] ss:$16 sps:$4 sm:$0xff]   ;;  %v16496_v23 = vld [vmem:[%s21532_s10 + $0xdcc] ss:$16 sps:$4 sm:$0xff]  }
 0xba2   :  { %10253 = vmatpush1.bf16.msra.mxu1 %v16407_v44  ;;  %v16499_v44 = vld [vmem:[%s21532_s10 + $0xdec] ss:$16 sps:$4 sm:$0xff]  }
 0xba3   :  { %10254 = vmatprep.subr.bf16.mxu1 %v16412_v43  ;;  %10298 = vmatpush1.bf16.msra.mxu0 %v16461_v30  ;;  %v16497_v43 = vld [vmem:[%s21532_s10 + $0xde8] ss:$16 sps:$4 sm:$0xff]   ;;  %v16502_v30 = vld [vmem:[%s21532_s10 + $0xe04] ss:$16 sps:$4 sm:$0xff]  }
 0xba4   :  { %10299 = vmatprep.subr.bf16.mxu0 %v16466_v32 }
 0xba6   :  { %10255 = vmatpush1.bf16.msra.mxu1 %v16410_v28 }
 0xba7   :  { %10256 = vmatprep.subr.bf16.mxu1 %v16415_v1  ;;  %10300 = vmatpush1.bf16.msra.mxu0 %v16464_v26 }
 0xba8   :  { %10301 = vmatprep.subr.bf16.mxu0 %v16469_v54 }
 0xbaa   :  { %10257 = vmatpush1.bf16.msra.mxu1 %v16413_v45 }
 0xbab   :  { %10258 = vmatprep.subr.bf16.mxu1 %v16418_v9  ;;  %10302 = vmatpush1.bf16.msra.mxu0 %v16467_v29 }
 0xbac   :  { %10303 = vmatprep.subr.bf16.mxu0 %v16472_v46 }
 0xbae   :  { %10259 = vmatpush1.bf16.msra.mxu1 %v16416_v60 }
 0xbaf   :  { %10260 = vmatprep.subr.bf16.mxu1 %v16421_v58  ;;  %10304 = vmatpush1.bf16.msra.mxu0 %v16470_v47 }
 0xbb0   :  { %10305 = vmatprep.subr.bf16.mxu0 %v16475_v11 }
 0xbb2   :  { %10261 = vmatpush1.bf16.msra.mxu1 %v16419_v2 }
 0xbb3   :  { %10262 = vmatprep.subr.bf16.mxu1 %v16424_v10  ;;  %10306 = vmatpush1.bf16.msra.mxu0 %v16473_v50 }
 0xbb4   :  { %10307 = vmatprep.subr.bf16.mxu0 %v16478_v0 }
 0xbb6   :  { %10263 = vmatpush1.bf16.msra.mxu1 %v16422_v20  ;;  %v16508_v20 = vld [vmem:[%s21532_s10 + $0xe44] ss:$16 sps:$4 sm:$0xff]  }
 0xbb7   :  { %10264 = vmatprep.subr.bf16.mxu1 %v16427_v31  ;;  %10308 = vmatpush1.bf16.msra.mxu0 %v16476_v49  ;;  %v16550_v31 = vld [vmem:[%s21532_s10 + $0xe0c] ss:$16 sps:$4 sm:$0xff]   ;;  %v16506_v49 = vld [vmem:[%s21532_s10 + $0xe40] ss:$16 sps:$4 sm:$0xff]  }
 0xbb8   :  { %10309 = vmatprep.subr.bf16.mxu0 %v16481_v24  ;;  %v13376_v24 = vld [vmem:[%s21531_s9 + $0x1c] sm:$0xf] }
 0xbba   :  { %10265 = vmatpush1.bf16.msra.mxu1 %v16425_v51  ;;  %v16548_v51 = vld [vmem:[%s21532_s10 + $0xe08] ss:$16 sps:$4 sm:$0xff]  }
 0xbbb   :  { %10266 = vmatprep.subr.bf16.mxu1 %v16430_v53  ;;  %10310 = vmatpush1.bf16.msra.mxu0 %v16479_v33  ;;  %v16511_v53 = vld [vmem:[%s21532_s10 + $0xe64] ss:$16 sps:$4 sm:$0xff]   ;;  %v16553_v33 = vld [vmem:[%s21532_s10 + $0xe2c] ss:$16 sps:$4 sm:$0xff]  }
 0xbbc   :  { %10311 = vmatprep.subr.bf16.mxu0 %v16484_v59  ;;  %v16509_v59 = vld [vmem:[%s21532_s10 + $0xe60] ss:$16 sps:$4 sm:$0xff]  }
 0xbbe   :  { %10267 = vmatpush1.bf16.msra.mxu1 %v16428_v15  ;;  %v16551_v15 = vld [vmem:[%s21532_s10 + $0xe28] ss:$16 sps:$4 sm:$0xff]  }
 0xbbf   :  { %10268 = vmatprep.subr.bf16.mxu1 %v16433_v40  ;;  %10312 = vmatpush1.bf16.msra.mxu0 %v16482_v4  ;;  %v16514_v40 = vld [vmem:[%s21532_s10 + $0xe84] ss:$16 sps:$4 sm:$0xff]   ;;  %v16556_v4 = vld [vmem:[%s21532_s10 + $0xe4c] ss:$16 sps:$4 sm:$0xff]  }
 0xbc0   :  { %10313 = vmatprep.subr.bf16.mxu0 %v16487_v57  ;;  %v16512_v57 = vld [vmem:[%s21532_s10 + $0xe80] ss:$16 sps:$4 sm:$0xff]  }
 0xbc2   :  { %10269 = vmatpush1.bf16.msra.mxu1 %v16431_v34  ;;  %v16554_v34 = vld [vmem:[%s21532_s10 + $0xe48] ss:$16 sps:$4 sm:$0xff]  }
 0xbc3   :  { %10270 = vmatprep.subr.bf16.mxu1 %v16436_v25  ;;  %10314 = vmatpush1.bf16.msra.mxu0 %v16485_v39  ;;  %v16517_v25 = vld [vmem:[%s21532_s10 + $0xea4] ss:$16 sps:$4 sm:$0xff]   ;;  %v16559_v39 = vld [vmem:[%s21532_s10 + $0xe6c] ss:$16 sps:$4 sm:$0xff]  }
 0xbc4   :  { %10315 = vmatprep.subr.bf16.mxu0 %v16490_v14  ;;  %v16515_v14 = vld [vmem:[%s21532_s10 + $0xea0] ss:$16 sps:$4 sm:$0xff]  }
 0xbc6   :  { %10271 = vmatpush1.bf16.msra.mxu1 %v16434_v7  ;;  %v16557_v7 = vld [vmem:[%s21532_s10 + $0xe68] ss:$16 sps:$4 sm:$0xff]  }
 0xbc7   :  { %10272 = vmatprep.subr.bf16.mxu1 %v16439_v8  ;;  %10316 = vmatpush1.bf16.msra.mxu0 %v16488_v55  ;;  %v16520_v8 = vld [vmem:[%s21532_s10 + $0xec4] ss:$16 sps:$4 sm:$0xff]   ;;  %v16562_v55 = vld [vmem:[%s21532_s10 + $0xe8c] ss:$16 sps:$4 sm:$0xff]  }
 0xbc8   :  { %10317 = vmatprep.subr.bf16.mxu0 %v16493_v52  ;;  %v16566_v52 = vld [vmem:[%s21532_s10 + $0xec8] ss:$16 sps:$4 sm:$0xff]  }
 0xbca   :  { %10273 = vmatpush1.bf16.msra.mxu1 %v16437_v27  ;;  %v16518_v27 = vld [vmem:[%s21532_s10 + $0xec0] ss:$16 sps:$4 sm:$0xff]  }
 0xbcb   :  { %10274 = vmatprep.subr.bf16.mxu1 %v16442_v48  ;;  %10318 = vmatpush1.bf16.msra.mxu0 %v16491_v6  ;;  %v16560_v48 = vld [vmem:[%s21532_s10 + $0xe88] ss:$16 sps:$4 sm:$0xff]   ;;  %v16529_v6 = vld [vmem:[%s21532_s10 + $0xf24] ss:$16 sps:$4 sm:$0xff]  }
 0xbcc   :  { %10319 = vmatprep.subr.bf16.mxu0 %v16496_v23  ;;  %v16527_v23 = vld [vmem:[%s21532_s10 + $0xf20] ss:$16 sps:$4 sm:$0xff]  }
 0xbce   :  { %10275 = vmatpush1.bf16.msra.mxu1 %v16440_v62  ;;  %v16523_v62 = vld [vmem:[%s21532_s10 + $0xee4] ss:$16 sps:$4 sm:$0xff]  }
 0xbcf   :  { %10276 = vmatprep.subr.bf16.mxu1 %v16445_v63  ;;  %10320 = vmatpush1.bf16.msra.mxu0 %v16494_v38  ;;  %v16565_v63 = vld [vmem:[%s21532_s10 + $0xeac] ss:$16 sps:$4 sm:$0xff]  }
 0xbd0   :  { %10321 = vmatprep.subr.bf16.mxu0 %v16499_v44  ;;  %v16571_v38 = vld [vmem:[%s21532_s10 + $0xeec] ss:$16 sps:$4 sm:$0xff]   ;;  %v16569_v44 = vld [vmem:[%s21532_s10 + $0xee8] ss:$16 sps:$4 sm:$0xff]  }
 0xbd2   :  { %10277 = vmatpush1.bf16.msra.mxu1 %v16443_v42  ;;  %v16521_v42 = vld [vmem:[%s21532_s10 + $0xee0] ss:$16 sps:$4 sm:$0xff]  }
 0xbd3   :  { %10278 = vmatprep.subr.bf16.mxu1 %v16448_v19  ;;  %10322 = vmatpush1.bf16.msra.mxu0 %v16497_v43  ;;  %v16563_v19 = vld [vmem:[%s21532_s10 + $0xea8] ss:$16 sps:$4 sm:$0xff]   ;;  %v16532_v43 = vld [vmem:[%s21532_s10 + $0xf44] ss:$16 sps:$4 sm:$0xff]  }
 0xbd4   :  { %10769 = vmatprep.subr.bf16.mxu0 %v16502_v30  ;;  %v16574_v30 = vld [vmem:[%s21532_s10 + $0xf0c] ss:$16 sps:$4 sm:$0xff]  }
 0xbd6   :  { %10279 = vmatpush1.bf16.msra.mxu1 %v16446_v13  ;;  %v16526_v13 = vld [vmem:[%s21532_s10 + $0xf04] ss:$16 sps:$4 sm:$0xff]  }
 0xbd7   :  { %10280 = vmatprep.subr.bf16.mxu1 %v16451_v18  ;;  %v16568_v18 = vld [vmem:[%s21532_s10 + $0xecc] ss:$16 sps:$4 sm:$0xff]  }
 0xbda   :  { %10281 = vmatpush1.bf16.msra.mxu1 %v16449_v35  ;;  %v16524_v35 = vld [vmem:[%s21532_s10 + $0xf00] ss:$16 sps:$4 sm:$0xff]  }
 0xbdb   :  { %10341 = vmatprep.subr.bf16.mxu1 %v19646_v56 }
 0xc68   :  { %v9765_v32 = vpop.f32.mrb[108].mxu1  ;;  %v9806_v28 = vpop.f32.mrb[64].mxu0 }
 0xc69   :  { %v21031_v1 = vadd.f32 %v9765_v32, %v20818_v21  ;;  %v21034_v26 = vadd.f32 %v9806_v28, %v20821_v12  ;;  %v9767_v54 = vpop.f32.mrb[109].mxu1  ;;  %v9808_v45 = vpop.f32.mrb[65].mxu0  ;;  %v16500_v12 = vld [vmem:[%s21532_s10 + $0xe00] ss:$16 sps:$4 sm:$0xff]   ;;  %v16572_v28 = vld [vmem:[%s21532_s10 + $0xf08] ss:$16 sps:$4 sm:$0xff]  }
 0xc6a   :  { %v21037_v9 = vadd.f32 %v9767_v54, %v20824_v37  ;;  %v21040_v29 = vadd.f32 %v9808_v45, %v20827_v17  ;;  %v9769_v46 = vpop.f32.mrb[110].mxu1  ;;  %v9810_v60 = vpop.f32.mrb[66].mxu0  ;;  %v16505_v37 = vld [vmem:[%s21532_s10 + $0xe24] ss:$16 sps:$4 sm:$0xff]   ;;  %v16503_v17 = vld [vmem:[%s21532_s10 + $0xe20] ss:$16 sps:$4 sm:$0xff]  }
 0xc6b   :  { %v9770_v58 = vpop.f32.mrb[111].mxu1  ;;  %v9811_v47 = vpop.f32.mrb[67].mxu0  ;;  %v16530_v32 = vld [vmem:[%s21532_s10 + $0xf40] ss:$16 sps:$4 sm:$0xff]   ;;  %v16535_v54 = vld [vmem:[%s21532_s10 + $0xf64] ss:$16 sps:$4 sm:$0xff]  }
 0xc6c   :  { %v16577_v45 = vld [vmem:[%s21532_s10 + $0xf2c] ss:$16 sps:$4 sm:$0xff]   ;;  %v16533_v46 = vld [vmem:[%s21532_s10 + $0xf60] ss:$16 sps:$4 sm:$0xff]   ;;  %v16575_v60 = vld [vmem:[%s21532_s10 + $0xf28] ss:$16 sps:$4 sm:$0xff]  }
 0xc6d   :  { %v16538_v58 = vld [vmem:[%s21532_s10 + $0xf84] ss:$16 sps:$4 sm:$0xff]   ;;  %v16580_v47 = vld [vmem:[%s21532_s10 + $0xf4c] ss:$16 sps:$4 sm:$0xff]  }
 0xc70   :  { %v9856_v11 = vpop.f32.mrb[112].mxu1 }
 0xc71   :  { %v9858_v2 = vpop.f32.mrb[113].mxu1  ;;  %v9863_v50 = vpack.c.bf16 %v9856_v11, %v9856_v11  ;;  %v16536_v11 = vld [vmem:[%s21532_s10 + $0xf80] ss:$16 sps:$4 sm:$0xff]  }
 0xc72   :  { %v9864_v10 = vpack.c.bf16 %v9858_v2, %v9858_v2  ;;  %v9860_v21 = vpop.f32.mrb[114].mxu1  ;;  %v16578_v2 = vld [vmem:[%s21532_s10 + $0xf48] ss:$16 sps:$4 sm:$0xff]  }
 0xc73   :  { %v9861_v0 = vpop.f32.mrb[115].mxu1  ;;  %v16583_v21 = vld [vmem:[%s21532_s10 + $0xf6c] ss:$16 sps:$4 sm:$0xff]  }
 0xc74   :  { %10282 = vmatprep.mubr.bf16.mxu1 %v9864_v10  ;;  %10323 = vmatprep.mubr.bf16.mxu0 %v9864_v10  ;;  %v16541_v10 = vld [vmem:[%s21532_s10 + $0xfa4] ss:$16 sps:$4 sm:$0xff]  }
 0xc75   :  { %10283 = vmatmul.mubr.bf16.vlgmr.msra.gmra.mrb[116].mxu1 %v9863_v50  ;;  %10324 = vmatmul.mubr.bf16.vlgmr.msra.gmra.mrb[68].mxu0 %v9863_v50  ;;  %v16581_v50 = vld [vmem:[%s21532_s10 + $0xf68] ss:$16 sps:$4 sm:$0xff]   ;;  %v16544_v0 = vld [vmem:[%s21532_s10 + $0xfc4] ss:$16 sps:$4 sm:$0xff]  }
 0xc76   :  { %10342 = vmatpush1.bf16.msra.mxu1 %v19642_v36  ;;  %10770 = vmatpush1.bf16.msra.mxu0 %v16500_v12  ;;  %v16539_v12 = vld [vmem:[%s21532_s10 + $0xfa0] ss:$16 sps:$4 sm:$0xff]  }
 0xc77   :  { %10343 = vmatprep.subr.bf16.mxu1 %v19648_v22  ;;  %10771 = vmatprep.subr.bf16.mxu0 %v16505_v37  ;;  %v16586_v37 = vld [vmem:[%s21532_s10 + $0xf8c] ss:$16 sps:$4 sm:$0xff]  }
 0xc78   :  { %10373 = vmatprep.mubr.bf16.mxu1 %v16831_v41 }
 0xc7a   :  { %10344 = vmatpush1.bf16.msra.mxu1 %v19644_v5  ;;  %10772 = vmatpush1.bf16.msra.mxu0 %v16503_v17  ;;  %v16542_v17 = vld [vmem:[%s21532_s10 + $0xfc0] ss:$16 sps:$4 sm:$0xff]  }
 0xc7b   :  { %10773 = vmatprep.subr.bf16.mxu0 %v16508_v20  ;;  %10810 = vmatprep.subr.bf16.mxu1 %v16550_v31  ;;  %v16584_v20 = vld [vmem:[%s21532_s10 + $0xf88] ss:$16 sps:$4 sm:$0xff]   ;;  %v16547_v31 = vld [vmem:[%s21532_s10 + $0xfe4] ss:$16 sps:$4 sm:$0xff]  }
 0xc7d   :  { %13377 = vmatmul.mubr.msk.bf16.vlgmr.msra.gmra.mrb[120].mxu1 %vm6713_vm8, %v13376_v24  ;;  %v16589_v24 = vld [vmem:[%s21532_s10 + $0xfac] ss:$16 sps:$4 sm:$0xff]  }
 0xc7e   :  { %10774 = vmatpush1.bf16.msra.mxu0 %v16506_v49  ;;  %10811 = vmatpush1.bf16.msra.mxu1 %v16548_v51  ;;  %v16545_v49 = vld [vmem:[%s21532_s10 + $0xfe0] ss:$16 sps:$4 sm:$0xff]   ;;  %v16587_v51 = vld [vmem:[%s21532_s10 + $0xfa8] ss:$16 sps:$4 sm:$0xff]  }
 0xc7f   :  { %10775 = vmatprep.subr.bf16.mxu0 %v16511_v53  ;;  %10812 = vmatprep.subr.bf16.mxu1 %v16553_v33  ;;  %v16590_v53 = vld [vmem:[%s21532_s10 + $0xfc8] ss:$16 sps:$4 sm:$0xff]   ;;  %v16592_v33 = vld [vmem:[%s21532_s10 + $0xfcc] ss:$16 sps:$4 sm:$0xff]  }
 0xc82   :  { %10776 = vmatpush1.bf16.msra.mxu0 %v16509_v59  ;;  %10813 = vmatpush1.bf16.msra.mxu1 %v16551_v15  ;;  %v16593_v59 = vld [vmem:[%s21532_s10 + $0xfe8] ss:$16 sps:$4 sm:$0xff]   ;;  %v16598_v15 = vld [vmem:[%s21532_s10 + $0x1004] ss:$16 sps:$4 sm:$0xff]  }
 0xc83   :  { %10777 = vmatprep.subr.bf16.mxu0 %v16514_v40  ;;  %10814 = vmatprep.subr.bf16.mxu1 %v16556_v4 }
 0xc86   :  { %10778 = vmatpush1.bf16.msra.mxu0 %v16512_v57  ;;  %10815 = vmatpush1.bf16.msra.mxu1 %v16554_v34 }
 0xc87   :  { %10779 = vmatprep.subr.bf16.mxu0 %v16517_v25  ;;  %10816 = vmatprep.subr.bf16.mxu1 %v16559_v39 }
 0xc8a   :  { %10780 = vmatpush1.bf16.msra.mxu0 %v16515_v14  ;;  %10817 = vmatpush1.bf16.msra.mxu1 %v16557_v7 }
 0xc8b   :  { %10781 = vmatprep.subr.bf16.mxu0 %v16520_v8  ;;  %10818 = vmatprep.subr.bf16.mxu1 %v16562_v55 }
 0xc8e   :  { %10782 = vmatpush1.bf16.msra.mxu0 %v16518_v27  ;;  %10819 = vmatpush1.bf16.msra.mxu1 %v16560_v48 }
 0xc8f   :  { %10783 = vmatprep.subr.bf16.mxu0 %v16523_v62  ;;  %10820 = vmatprep.subr.bf16.mxu1 %v16565_v63 }
 0xc92   :  { %10784 = vmatpush1.bf16.msra.mxu0 %v16521_v42  ;;  %10821 = vmatpush1.bf16.msra.mxu1 %v16563_v19 }
 0xc93   :  { %10785 = vmatprep.subr.bf16.mxu0 %v16526_v13  ;;  %10822 = vmatprep.subr.bf16.mxu1 %v16568_v18  ;;  %v16602_v18 = vld [vmem:[%s21532_s10 + $0x1020] ss:$16 sps:$4 sm:$0xff]  }
 0xc96   :  { %10786 = vmatpush1.bf16.msra.mxu0 %v16524_v35  ;;  %10823 = vmatpush1.bf16.msra.mxu1 %v16566_v52  ;;  %v16610_v35 = vld [vmem:[%s21532_s10 + $0x1044] ss:$16 sps:$4 sm:$0xff]   ;;  %v16608_v52 = vld [vmem:[%s21532_s10 + $0x1040] ss:$16 sps:$4 sm:$0xff]  }
 0xc97   :  { %10787 = vmatprep.subr.bf16.mxu0 %v16529_v6  ;;  %10824 = vmatprep.subr.bf16.mxu1 %v16571_v38  ;;  %v16605_v6 = vld [vmem:[%s21532_s10 + $0x1028] ss:$16 sps:$4 sm:$0xff]   ;;  %v16613_v38 = vld [vmem:[%s21532_s10 + $0x104c] ss:$16 sps:$4 sm:$0xff]  }
 0xc9a   :  { %10788 = vmatpush1.bf16.msra.mxu0 %v16527_v23  ;;  %10825 = vmatpush1.bf16.msra.mxu1 %v16569_v44  ;;  %v16614_v23 = vld [vmem:[%s21532_s10 + $0x1060] ss:$16 sps:$4 sm:$0xff]   ;;  %v16622_v44 = vld [vmem:[%s21532_s10 + $0x1084] ss:$16 sps:$4 sm:$0xff]  }
 0xc9b   :  { %10789 = vmatprep.subr.bf16.mxu0 %v16532_v43  ;;  %10826 = vmatprep.subr.bf16.mxu1 %v16574_v30  ;;  %v16611_v43 = vld [vmem:[%s21532_s10 + $0x1048] ss:$16 sps:$4 sm:$0xff]   ;;  %v16619_v30 = vld [vmem:[%s21532_s10 + $0x106c] ss:$16 sps:$4 sm:$0xff]  }
 0xc9e   :  { %10790 = vmatpush1.bf16.msra.mxu0 %v16530_v32  ;;  %10827 = vmatpush1.bf16.msra.mxu1 %v16572_v28  ;;  %v16620_v32 = vld [vmem:[%s21532_s10 + $0x1080] ss:$16 sps:$4 sm:$0xff]   ;;  %v16628_v28 = vld [vmem:[%s21532_s10 + $0x10a4] ss:$16 sps:$4 sm:$0xff]  }
 0xc9f   :  { %10791 = vmatprep.subr.bf16.mxu0 %v16535_v54  ;;  %10828 = vmatprep.subr.bf16.mxu1 %v16577_v45  ;;  %v16617_v54 = vld [vmem:[%s21532_s10 + $0x1068] ss:$16 sps:$4 sm:$0xff]   ;;  %v16625_v45 = vld [vmem:[%s21532_s10 + $0x108c] ss:$16 sps:$4 sm:$0xff]  }
 0xca2   :  { %10792 = vmatpush1.bf16.msra.mxu0 %v16533_v46  ;;  %10829 = vmatpush1.bf16.msra.mxu1 %v16575_v60  ;;  %v16626_v46 = vld [vmem:[%s21532_s10 + $0x10a0] ss:$16 sps:$4 sm:$0xff]   ;;  %v16634_v60 = vld [vmem:[%s21532_s10 + $0x10c4] ss:$16 sps:$4 sm:$0xff]  }
 0xca3   :  { %10793 = vmatprep.subr.bf16.mxu0 %v16538_v58  ;;  %10830 = vmatprep.subr.bf16.mxu1 %v16580_v47  ;;  %v16623_v58 = vld [vmem:[%s21532_s10 + $0x1088] ss:$16 sps:$4 sm:$0xff]   ;;  %v16631_v47 = vld [vmem:[%s21532_s10 + $0x10ac] ss:$16 sps:$4 sm:$0xff]  }
 0xca6   :  { %10794 = vmatpush1.bf16.msra.mxu0 %v16536_v11  ;;  %10831 = vmatpush1.bf16.msra.mxu1 %v16578_v2  ;;  %v16632_v11 = vld [vmem:[%s21532_s10 + $0x10c0] ss:$16 sps:$4 sm:$0xff]   ;;  %v16640_v2 = vld [vmem:[%s21532_s10 + $0x10e4] ss:$16 sps:$4 sm:$0xff]  }
 0xca7   :  { %10795 = vmatprep.subr.bf16.mxu0 %v16541_v10  ;;  %10832 = vmatprep.subr.bf16.mxu1 %v16583_v21  ;;  %v16629_v10 = vld [vmem:[%s21532_s10 + $0x10a8] ss:$16 sps:$4 sm:$0xff]   ;;  %v16637_v21 = vld [vmem:[%s21532_s10 + $0x10cc] ss:$16 sps:$4 sm:$0xff]  }
 0xcaa   :  { %10796 = vmatpush1.bf16.msra.mxu0 %v16539_v12  ;;  %10833 = vmatpush1.bf16.msra.mxu1 %v16581_v50  ;;  %v16638_v12 = vld [vmem:[%s21532_s10 + $0x10e0] ss:$16 sps:$4 sm:$0xff]   ;;  %v16646_v50 = vld [vmem:[%s21532_s10 + $0x1104] ss:$16 sps:$4 sm:$0xff]  }
 0xcab   :  { %10797 = vmatprep.subr.bf16.mxu0 %v16544_v0  ;;  %10834 = vmatprep.subr.bf16.mxu1 %v16586_v37  ;;  %v16635_v0 = vld [vmem:[%s21532_s10 + $0x10c8] ss:$16 sps:$4 sm:$0xff]   ;;  %v16643_v37 = vld [vmem:[%s21532_s10 + $0x10ec] ss:$16 sps:$4 sm:$0xff]  }
 0xcae   :  { %10798 = vmatpush1.bf16.msra.mxu0 %v16542_v17  ;;  %10835 = vmatpush1.bf16.msra.mxu1 %v16584_v20  ;;  %v16644_v17 = vld [vmem:[%s21532_s10 + $0x1100] ss:$16 sps:$4 sm:$0xff]   ;;  %v16652_v20 = vld [vmem:[%s21532_s10 + $0x1124] ss:$16 sps:$4 sm:$0xff]  }
 0xcaf   :  { %10799 = vmatprep.subr.bf16.mxu0 %v16547_v31  ;;  %10836 = vmatprep.subr.bf16.mxu1 %v16589_v24  ;;  %v16641_v31 = vld [vmem:[%s21532_s10 + $0x10e8] ss:$16 sps:$4 sm:$0xff]   ;;  %v16650_v24 = vld [vmem:[%s21532_s10 + $0x1120] ss:$16 sps:$4 sm:$0xff]  }
 0xcb2   :  { %10800 = vmatpush1.bf16.msra.mxu0 %v16545_v49  ;;  %10837 = vmatpush1.bf16.msra.mxu1 %v16587_v51  ;;  %v16649_v49 = vld [vmem:[%s21532_s10 + $0x110c] ss:$16 sps:$4 sm:$0xff]   ;;  %v16658_v51 = vld [vmem:[%s21532_s10 + $0x1144] ss:$16 sps:$4 sm:$0xff]  }
 0xcb3   :  { %10860 = vmatprep.subr.bf16.mxu0 %v19646_v56  ;;  %10838 = vmatprep.subr.bf16.mxu1 %v16592_v33  ;;  %v16595_v56 = vld [vmem:[%s21532_s10 + $0xfec] ss:$16 sps:$4 sm:$0xff]  }
 0xcb4   :  { %v16655_v33 = vld [vmem:[%s21532_s10 + $0x112c] ss:$16 sps:$4 sm:$0xff]  }
 0xcb6   :  { %10839 = vmatpush1.bf16.msra.mxu1 %v16590_v53  ;;  %v16647_v53 = vld [vmem:[%s21532_s10 + $0x1108] ss:$16 sps:$4 sm:$0xff]  }
 0xcb7   :  { %10840 = vmatprep.subr.bf16.mxu1 %v16595_v56  ;;  %v16656_v56 = vld [vmem:[%s21532_s10 + $0x1140] ss:$16 sps:$4 sm:$0xff]  }
 0xcba   :  { %10841 = vmatpush1.bf16.msra.mxu1 %v16593_v59  ;;  %v16664_v59 = vld [vmem:[%s21532_s10 + $0x1164] ss:$16 sps:$4 sm:$0xff]  }
 0xcbb   :  { %11288 = vmatprep.subr.bf16.mxu1 %v16598_v15  ;;  %v16653_v15 = vld [vmem:[%s21532_s10 + $0x1128] ss:$16 sps:$4 sm:$0xff]  }
 0xd48   :  { %v10284_v40 = vpop.f32.mrb[116].mxu1  ;;  %v10325_v4 = vpop.f32.mrb[68].mxu0 }
 0xd49   :  { %v21244_v57 = vadd.f32 %v10284_v40, %v21031_v1  ;;  %v21247_v34 = vadd.f32 %v10325_v4, %v21034_v26  ;;  %v10286_v25 = vpop.f32.mrb[117].mxu1  ;;  %v10327_v39 = vpop.f32.mrb[69].mxu0  ;;  %v16596_v26 = vld [vmem:[%s21532_s10 + $0x1000] ss:$16 sps:$4 sm:$0xff]   ;;  %v16661_v40 = vld [vmem:[%s21532_s10 + $0x114c] ss:$16 sps:$4 sm:$0xff]  }
 0xd4a   :  { %v21250_v14 = vadd.f32 %v10286_v25, %v21037_v9  ;;  %v21253_v7 = vadd.f32 %v10327_v39, %v21040_v29  ;;  %v10288_v8 = vpop.f32.mrb[118].mxu1  ;;  %v10329_v55 = vpop.f32.mrb[70].mxu0  ;;  %v16604_v9 = vld [vmem:[%s21532_s10 + $0x1024] ss:$16 sps:$4 sm:$0xff]   ;;  %v16601_v29 = vld [vmem:[%s21532_s10 + $0x100c] ss:$16 sps:$4 sm:$0xff]  }
 0xd4b   :  { %v10289_v27 = vpop.f32.mrb[119].mxu1  ;;  %v10330_v48 = vpop.f32.mrb[71].mxu0  ;;  %v16662_v4 = vld [vmem:[%s21532_s10 + $0x1160] ss:$16 sps:$4 sm:$0xff]   ;;  %v16670_v25 = vld [vmem:[%s21532_s10 + $0x1184] ss:$16 sps:$4 sm:$0xff]  }
 0xd4c   :  { %v16659_v39 = vld [vmem:[%s21532_s10 + $0x1148] ss:$16 sps:$4 sm:$0xff]   ;;  %v16667_v8 = vld [vmem:[%s21532_s10 + $0x116c] ss:$16 sps:$4 sm:$0xff]   ;;  %v16668_v55 = vld [vmem:[%s21532_s10 + $0x1180] ss:$16 sps:$4 sm:$0xff]  }
 0xd4d   :  { %v16665_v27 = vld [vmem:[%s21532_s10 + $0x1168] ss:$16 sps:$4 sm:$0xff]   ;;  %v16673_v48 = vld [vmem:[%s21532_s10 + $0x118c] ss:$16 sps:$4 sm:$0xff]  }
 0xd50   :  { %v10375_v62 = vpop.f32.mrb[120].mxu1 }
 0xd51   :  { %v10377_v63 = vpop.f32.mrb[121].mxu1  ;;  %v10382_v19 = vpack.c.bf16 %v10375_v62, %v10375_v62  ;;  %v16671_v62 = vld [vmem:[%s21532_s10 + $0x1188] ss:$16 sps:$4 sm:$0xff]  }
 0xd52   :  { %v10383_v42 = vpack.c.bf16 %v10377_v63, %v10377_v63  ;;  %v10379_v1 = vpop.f32.mrb[122].mxu1  ;;  %v16676_v63 = vld [vmem:[%s21532_s10 + $0x11a4] ss:$16 sps:$4 sm:$0xff]  }
 0xd53   :  { %v10380_v13 = vpop.f32.mrb[123].mxu1  ;;  %v16674_v1 = vld [vmem:[%s21532_s10 + $0x11a0] ss:$16 sps:$4 sm:$0xff]  }
 0xd54   :  { %10801 = vmatprep.mubr.bf16.mxu0 %v10383_v42  ;;  %10842 = vmatprep.mubr.bf16.mxu1 %v10383_v42  ;;  %v16679_v42 = vld [vmem:[%s21532_s10 + $0x11ac] ss:$16 sps:$4 sm:$0xff]   ;;  %v16680_v13 = vld [vmem:[%s21532_s10 + $0x11c0] ss:$16 sps:$4 sm:$0xff]  }
 0xd55   :  { %10802 = vmatmul.mubr.bf16.vlgmr.msra.gmra.mrb[72].mxu0 %v10382_v19  ;;  %10843 = vmatmul.mubr.bf16.vlgmr.msra.gmra.mrb[124].mxu1 %v10382_v19  ;;  %v16677_v19 = vld [vmem:[%s21532_s10 + $0x11a8] ss:$16 sps:$4 sm:$0xff]  }
 0xd56   :  { %10861 = vmatpush1.bf16.msra.mxu0 %v19642_v36  ;;  %10892 = vmatprep.mubr.bf16.mxu0 %v16831_v41  ;;  %v13506_v41 = vld [vmem:[%s21531_s9 + $0x20] sm:$0xf]  ;;  %v16599_v36 = vld [vmem:[%s21532_s10 + $0x1008] ss:$16 sps:$4 sm:$0xff]  }
 0xd57   :  { %10862 = vmatprep.subr.bf16.mxu0 %v19648_v22  ;;  %11289 = vmatpush1.bf16.msra.mxu1 %v16596_v26  ;;  %v16607_v22 = vld [vmem:[%s21532_s10 + $0x102c] ss:$16 sps:$4 sm:$0xff]   ;;  %v16682_v26 = vld [vmem:[%s21532_s10 + $0x11c4] ss:$16 sps:$4 sm:$0xff]  }
 0xd58   :  { %11290 = vmatprep.subr.bf16.mxu1 %v16604_v9  ;;  %v16683_v9 = vld [vmem:[%s21532_s10 + $0x11c8] ss:$16 sps:$4 sm:$0xff]  }
 0xd5a   :  { %10863 = vmatpush1.bf16.msra.mxu0 %v19644_v5  ;;  %v16616_v5 = vld [vmem:[%s21532_s10 + $0x1064] ss:$16 sps:$4 sm:$0xff]  }
 0xd5b   :  { %11329 = vmatprep.subr.bf16.mxu0 %v16601_v29  ;;  %11291 = vmatpush1.bf16.msra.mxu1 %v16602_v18  ;;  %v16685_v29 = vld [vmem:[%s21532_s10 + $0x11cc] ss:$16 sps:$4 sm:$0xff]   ;;  %v16688_v18 = vld [vmem:[%s21532_s10 + $0x11e4] ss:$16 sps:$4 sm:$0xff]  }
 0xd5c   :  { %11292 = vmatprep.subr.bf16.mxu1 %v16610_v35  ;;  %v16691_v35 = vld [vmem:[%s21532_s10 + $0x11ec] ss:$16 sps:$4 sm:$0xff]  }
 0xd5d   :  { %13507 = vmatmul.mubr.msk.bf16.vlgmr.msra.gmra.mrb[76].mxu0 %vm6713_vm8, %v13506_v41  ;;  %v16686_v41 = vld [vmem:[%s21532_s10 + $0x11e0] ss:$16 sps:$4 sm:$0xff]  }
 0xd5e   :  { %11330 = vmatpush1.bf16.msra.mxu0 %v16599_v36  ;;  %v16689_v36 = vld [vmem:[%s21532_s10 + $0x11e8] ss:$16 sps:$4 sm:$0xff]  }
 0xd5f   :  { %11331 = vmatprep.subr.bf16.mxu0 %v16607_v22  ;;  %11293 = vmatpush1.bf16.msra.mxu1 %v16608_v52 }
 0xd60   :  { %11294 = vmatprep.subr.bf16.mxu1 %v16616_v5 }
 0xd62   :  { %11332 = vmatpush1.bf16.msra.mxu0 %v16605_v6 }
 0xd63   :  { %11333 = vmatprep.subr.bf16.mxu0 %v16613_v38  ;;  %11295 = vmatpush1.bf16.msra.mxu1 %v16614_v23 }
 0xd64   :  { %11296 = vmatprep.subr.bf16.mxu1 %v16622_v44 }
 0xd66   :  { %11334 = vmatpush1.bf16.msra.mxu0 %v16611_v43 }
 0xd67   :  { %11335 = vmatprep.subr.bf16.mxu0 %v16619_v30  ;;  %11297 = vmatpush1.bf16.msra.mxu1 %v16620_v32 }
 0xd68   :  { %11298 = vmatprep.subr.bf16.mxu1 %v16628_v28 }
 0xd6a   :  { %11336 = vmatpush1.bf16.msra.mxu0 %v16617_v54 }
 0xd6b   :  { %11337 = vmatprep.subr.bf16.mxu0 %v16625_v45  ;;  %11299 = vmatpush1.bf16.msra.mxu1 %v16626_v46 }
 0xd6c   :  { %11300 = vmatprep.subr.bf16.mxu1 %v16634_v60 }
 0xd6e   :  { %11338 = vmatpush1.bf16.msra.mxu0 %v16623_v58 }
 0xd6f   :  { %11339 = vmatprep.subr.bf16.mxu0 %v16631_v47  ;;  %11301 = vmatpush1.bf16.msra.mxu1 %v16632_v11 }
 0xd70   :  { %11302 = vmatprep.subr.bf16.mxu1 %v16640_v2 }
 0xd72   :  { %11340 = vmatpush1.bf16.msra.mxu0 %v16629_v10 }
 0xd73   :  { %11341 = vmatprep.subr.bf16.mxu0 %v16637_v21  ;;  %11303 = vmatpush1.bf16.msra.mxu1 %v16638_v12 }
 0xd74   :  { %11304 = vmatprep.subr.bf16.mxu1 %v16646_v50 }
 0xd76   :  { %11342 = vmatpush1.bf16.msra.mxu0 %v16635_v0 }
 0xd77   :  { %11343 = vmatprep.subr.bf16.mxu0 %v16643_v37  ;;  %11305 = vmatpush1.bf16.msra.mxu1 %v16644_v17 }
 0xd78   :  { %11306 = vmatprep.subr.bf16.mxu1 %v16652_v20 }
 0xd7a   :  { %11344 = vmatpush1.bf16.msra.mxu0 %v16641_v31 }
 0xd7b   :  { %11345 = vmatprep.subr.bf16.mxu0 %v16649_v49  ;;  %11307 = vmatpush1.bf16.msra.mxu1 %v16650_v24 }
 0xd7c   :  { %11308 = vmatprep.subr.bf16.mxu1 %v16658_v51 }
 0xd7e   :  { %11346 = vmatpush1.bf16.msra.mxu0 %v16647_v53 }
 0xd7f   :  { %11347 = vmatprep.subr.bf16.mxu0 %v16655_v33  ;;  %11309 = vmatpush1.bf16.msra.mxu1 %v16656_v56 }
 0xd80   :  { %11310 = vmatprep.subr.bf16.mxu1 %v16664_v59 }
 0xd82   :  { %11348 = vmatpush1.bf16.msra.mxu0 %v16653_v15 }
 0xd83   :  { %11349 = vmatprep.subr.bf16.mxu0 %v16661_v40  ;;  %11311 = vmatpush1.bf16.msra.mxu1 %v16662_v4 }
 0xd84   :  { %11312 = vmatprep.subr.bf16.mxu1 %v16670_v25 }
 0xd86   :  { %11350 = vmatpush1.bf16.msra.mxu0 %v16659_v39 }
 0xd87   :  { %11351 = vmatprep.subr.bf16.mxu0 %v16667_v8  ;;  %11313 = vmatpush1.bf16.msra.mxu1 %v16668_v55 }
 0xd88   :  { %11314 = vmatprep.subr.bf16.mxu1 %v16676_v63 }
 0xd8a   :  { %11352 = vmatpush1.bf16.msra.mxu0 %v16665_v27 }
 0xd8b   :  { %11353 = vmatprep.subr.bf16.mxu0 %v16673_v48  ;;  %11315 = vmatpush1.bf16.msra.mxu1 %v16674_v1 }
 0xd8c   :  { %11316 = vmatprep.subr.bf16.mxu1 %v16682_v26 }
 0xd8e   :  { %11354 = vmatpush1.bf16.msra.mxu0 %v16671_v62 }
 0xd8f   :  { %11355 = vmatprep.subr.bf16.mxu0 %v16679_v42  ;;  %11317 = vmatpush1.bf16.msra.mxu1 %v16680_v13 }
 0xd90   :  { %11318 = vmatprep.subr.bf16.mxu1 %v16688_v18 }
 0xd92   :  { %11356 = vmatpush1.bf16.msra.mxu0 %v16677_v19 }
 0xd93   :  { %11357 = vmatprep.subr.bf16.mxu0 %v16685_v29  ;;  %11319 = vmatpush1.bf16.msra.mxu1 %v16686_v41 }
 0xd96   :  { %11358 = vmatpush1.bf16.msra.mxu0 %v16683_v9 }
 0xd97   :  { %11359 = vmatprep.subr.bf16.mxu0 %v16691_v35 }
 0xd9a   :  { %11360 = vmatpush1.bf16.msra.mxu0 %v16689_v36 }
 0xe28   :  { %v10803_v22 = vpop.f32.mrb[72].mxu0  ;;  %v10844_v52 = vpop.f32.mrb[124].mxu1 }
 0xe29   :  { %v10851_v5 = vadd.f32 %v10803_v22, %v21244_v57  ;;  %v10853_v6 = vadd.f32 %v10844_v52, %v21247_v34  ;;  %v10805_v38 = vpop.f32.mrb[73].mxu0  ;;  %v10846_v23 = vpop.f32.mrb[125].mxu1  ;;  %v16832_v57 = vmov 0.0   ;;  %v21458_v34 = vsub.s32 2, %v19572_v3 }
 0xe2a   :  { %v10852_v44 = vadd.f32 %v10805_v38, %v21250_v14  ;;  %v10854_v43 = vadd.f32 %v10846_v23, %v21253_v7  ;;  %v10807_v30 = vpop.f32.mrb[74].mxu0  ;;  %v10848_v32 = vpop.f32.mrb[126].mxu1  ;;  %v11374_v14 = vld [vmem:[%s21533_s11] sm:$0xf]  ;;  %v21464_v7 = vsub.s32 3, %v19572_v3 }
 0xe2b   :  { %v10808_v28 = vpop.f32.mrb[75].mxu0  ;;  %v10849_v54 = vpop.f32.mrb[127].mxu1  ;;  %v11379_v2 = vrot.slane %v11374_v14, %v19581_v16  ;;  %v11387_v10 = vrot.slane %v11374_v14, %v21458_v34  ;;  %v11383_v50 = vrot.slane %v11374_v14, %v19590_v61 }
 0xe2c   :  { %v11391_v0 = vrot.slane %v11374_v14, %v21464_v7 }
 0xe30   :  { %v10894_v45 = vpop.f32.mrb[76].mxu0 }
 0xe31   :  { %v10896_v46 = vpop.f32.mrb[77].mxu0  ;;  %v10901_v47 = vpack.c.bf16 %v10894_v45, %v10894_v45 }
 0xe32   :  { %v10902_v60 = vpack.c.bf16 %v10896_v46, %v10896_v46  ;;  %v10898_v58 = vpop.f32.mrb[78].mxu0 }
 0xe33   :  { %v10899_v11 = vpop.f32.mrb[79].mxu0 }
 0xe34   :  { %11320 = vmatprep.mubr.bf16.mxu1 %v10902_v60  ;;  %11361 = vmatprep.mubr.bf16.mxu0 %v10902_v60 }
 0xe35   :  { %11321 = vmatmul.mubr.bf16.vlgmr.msra.gmra.mrb[128].mxu1 %v10901_v47  ;;  %11362 = vmatmul.mubr.bf16.vlgmr.msra.gmra.mrb[80].mxu0 %v10901_v47 }
 0xe36   :  { %11634 = vmatprep.mubr.f32.mxu1 %v16832_v57 }
 0xf08   :  { %v11322_v21 = vpop.f32.mrb[128].mxu1  ;;  %v11363_v12 = vpop.f32.mrb[80].mxu0 }
 0xf09   :  { %v11370_v37 = vadd.f32 %v11322_v21, %v10851_v5  ;;  %v11372_v17 = vadd.f32 %v11363_v12, %v10853_v6  ;;  %v11324_v20 = vpop.f32.mrb[129].mxu1  ;;  %v11365_v31 = vpop.f32.mrb[81].mxu0 }
 0xf0a   :  { %v11371_v49 = vadd.f32 %v11324_v20, %v10852_v44  ;;  %v11373_v24 = vadd.f32 %v11365_v31, %v10854_v43  ;;  %v11326_v51 = vpop.f32.mrb[130].mxu1  ;;  %v11367_v53 = vpop.f32.mrb[82].mxu0 }
 0xf0b   :  { %v11396_v3 = vadd.f32 %v11379_v2, %v11370_v37  ;;  %v11398_v33 = vadd.f32 %v11387_v10, %v11372_v17  ;;  %v11327_v56 = vpop.f32.mrb[131].mxu1  ;;  %v11368_v59 = vpop.f32.mrb[83].mxu0 }
 0xf0c   :  { %v11397_v15 = vadd.f32 %v11383_v50, %v11371_v49  ;;  %v11399_v40 = vadd.f32 %v11391_v0, %v11373_v24 }
 0xf0d   :  { %v11402_v4 = vrot.slane %v11396_v3, 4  ;;  %v11414_v25 = vrot.slane %v11398_v33, 4 }
 0xf0e   :  { %v11408_v39 = vrot.slane %v11397_v15, 4  ;;  %v11420_v8 = vrot.slane %v11399_v40, 4 }
 0xf0f   :  { %v11403_v55 = vadd.f32 %v11402_v4, %v11396_v3  ;;  %v11415_v27 = vadd.f32 %v11414_v25, %v11398_v33 }
 0xf10   :  { %v11409_v48 = vadd.f32 %v11408_v39, %v11397_v15  ;;  %v11421_v62 = vadd.f32 %v11420_v8, %v11399_v40 }
 0xf11   :  { %v11404_v63 = vrot.slane %v11403_v55, 2  ;;  %v11416_v42 = vrot.slane %v11415_v27, 2 }
 0xf12   :  { %v11410_v1 = vrot.slane %v11409_v48, 2  ;;  %v11422_v19 = vrot.slane %v11421_v62, 2 }
 0xf13   :  { %v11405_v13 = vadd.f32 %v11404_v63, %v11403_v55  ;;  %v11417_v26 = vadd.f32 %v11416_v42, %v11415_v27  ;;  %v11400_v42 = vld [vmem:[%s21534_s12] sm:$0xf] }
 0xf14   :  { %v11411_v9 = vadd.f32 %v11410_v1, %v11409_v48  ;;  %v11423_v29 = vadd.f32 %v11422_v19, %v11421_v62  ;;  %v11479_v1 = vrot.slane %v11400_v42, %v19581_v16  ;;  %v11487_v19 = vrot.slane %v11400_v42, %v21458_v34 }
 0xf15   :  { %v11406_v18 = vrot.slane %v11405_v13, 1  ;;  %v11418_v35 = vrot.slane %v11417_v26, 1 }
 0xf16   :  { %v11412_v41 = vrot.slane %v11411_v9, 1  ;;  %v11424_v36 = vrot.slane %v11423_v29, 1 }
 0xf17   :  { %v11407_v22 = vadd.f32 %v11406_v18, %v11405_v13  ;;  %v11419_v52 = vadd.f32 %v11418_v35, %v11417_v26  ;;  %v11483_v13 = vrot.slane %v11400_v42, %v19590_v61 }
 0xf18   :  { %v11413_v5 = vadd.f32 %v11412_v41, %v11411_v9  ;;  %v11425_v6 = vadd.f32 %v11424_v36, %v11423_v29  ;;  %v11401_v9 = vld [vmem:[%s21535_s13] sm:$0xf]  ;;  %v11491_v29 = vrot.slane %v11400_v42, %v21464_v7 }
 0xf19   :  { %v11427_v38 = vmul.f32 0.125, %v11407_v22  ;;  %v11429_v23 = vmul.f32 0.125, %v11419_v52 }
 0xf1a   :  { %v11428_v44 = vmul.f32 0.125, %v11413_v5  ;;  %v11430_v43 = vmul.f32 0.125, %v11425_v6  ;;  %v11524_v5 = vrot.slane %v11401_v9, %v19581_v16 }
 0xf1b   :  { %v11431_v30 = vsub.f32 %v11396_v3, %v11427_v38  ;;  %v21470_v32 = vsub.f32 %v11398_v33, %v11429_v23  ;;  %v11532_v23 = vrot.slane %v11401_v9, %v21458_v34 }
 0xf1c   :  { %v21472_v28 = vsub.f32 %v11397_v15, %v11428_v44  ;;  %v21474_v54 = vsub.f32 %v11399_v40, %v11430_v43 }
 0xf1d   :  { %v11435_v45 = vmul.f32 %v11431_v30, %v11431_v30  ;;  %v11437_v46 = vmul.f32 %v21470_v32, %v21470_v32 }
 0xf1e   :  { %v11436_v60 = vmul.f32 %v21472_v28, %v21472_v28  ;;  %v11438_v58 = vmul.f32 %v21474_v54, %v21474_v54 }
 0xf1f   :  { %v11439_v47 = vrot.slane %v11435_v45, 4  ;;  %v11451_v11 = vrot.slane %v11437_v46, 4 }
 0xf20   :  { %v11445_v14 = vrot.slane %v11436_v60, 4  ;;  %v11457_v2 = vrot.slane %v11438_v58, 4 }
 0xf21   :  { %v11440_v10 = vadd.f32 %v11439_v47, %v11435_v45  ;;  %v11452_v21 = vadd.f32 %v11451_v11, %v11437_v46  ;;  %v11528_v46 = vrot.slane %v11401_v9, %v19590_v61  ;;  %v11536_v47 = vrot.slane %v11401_v9, %v21464_v7  ;;  %v11558_v61 = vld [vmem:[%s21536_s14 + $0x8] sm:$0xff]  ;;  %v11557_v7 = vld [vmem:[%s21536_s14] sm:$0xff] }
 0xf22   :  { %v11446_v12 = vadd.f32 %v11445_v14, %v11436_v60  ;;  %v11458_v50 = vadd.f32 %v11457_v2, %v11438_v58 }
 0xf23   :  { %v11441_v0 = vrot.slane %v11440_v10, 2  ;;  %v11453_v37 = vrot.slane %v11452_v21, 2 }
 0xf24   :  { %v11447_v17 = vrot.slane %v11446_v12, 2  ;;  %v11459_v20 = vrot.slane %v11458_v50, 2 }
 0xf25   :  { %v11442_v31 = vadd.f32 %v11441_v0, %v11440_v10  ;;  %v11454_v49 = vadd.f32 %v11453_v37, %v11452_v21 }
 0xf26   :  { %v11448_v24 = vadd.f32 %v11447_v17, %v11446_v12  ;;  %v11460_v51 = vadd.f32 %v11459_v20, %v11458_v50  ;;  %v11559_v20 = vld [vmem:[%s21536_s14 + $0x10] sm:$0xff] }
 0xf27   :  { %v11443_v53 = vrot.slane %v11442_v31, 1  ;;  %v11455_v3 = vrot.slane %v11454_v49, 1 }
 0xf28   :  { %v11449_v33 = vrot.slane %v11448_v24, 1  ;;  %v11461_v56 = vrot.slane %v11460_v51, 1 }
 0xf29   :  { %v11444_v59 = vadd.f32 %v11443_v53, %v11442_v31  ;;  %v11456_v15 = vadd.f32 %v11455_v3, %v11454_v49  ;;  %v11565_v49 = vld [vmem:[%s21537_s15] sm:$0x3] }
 0xf2a   :  { %v11450_v40 = vadd.f32 %v11449_v33, %v11448_v24  ;;  %v11462_v4 = vadd.f32 %v11461_v56, %v11460_v51 }
 0xf2b   :  { %v11463_v25 = vmul.f32 0.125, %v11444_v59  ;;  %v11465_v39 = vmul.f32 0.125, %v11456_v15 }
 0xf2c   :  { %v11464_v8 = vmul.f32 0.125, %v11450_v40  ;;  %v11466_v55 = vmul.f32 0.125, %v11462_v4 }
 0xf2d   :  { %v11467_v27 = vadd.f32 1e-05, %v11463_v25  ;;  %v11469_v48 = vadd.f32 1e-05, %v11465_v39 }
 0xf2e   :  { %v11468_v62 = vadd.f32 1e-05, %v11464_v8  ;;  %v11470_v63 = vadd.f32 1e-05, %v11466_v55  ;;  %v13638_v55 = vld [vmem:[#allocation2] ss:$0 sm:$0xff] }
 0xf2f   :  { %16696 = vrsqrt.f32 %v11467_v27 }
 0xf30   :  { %16698 = vrsqrt.f32 %v11469_v48 }
 0xf31   :  { %16700 = vrsqrt.f32 %v11468_v62 }
 0xf32   :  { %16702 = vrsqrt.f32 %v11470_v63 }
 0xf39   :  { %v16697_v26 = vpop.eup %16696 }
 0xf3a   :  { %v16699_v18 = vpop.eup %16698  ;;  %v11496_v35 = vmul.f32 %v16697_v26, %v11479_v1 }
 0xf3b   :  { %v16701_v41 = vpop.eup %16700  ;;  %v11498_v36 = vmul.f32 %v16699_v18, %v11487_v19 }
 0xf3c   :  { %v16703_v22 = vpop.eup %16702  ;;  %v11503_v52 = vrot.slane %v11496_v35, %v19581_v16  ;;  %v11497_v6 = vmul.f32 %v16701_v41, %v11483_v13 }
 0xf3d   :  { %v11511_v38 = vrot.slane %v11498_v36, %v19581_v16  ;;  %v11499_v44 = vmul.f32 %v16703_v22, %v11491_v29 }
 0xf3e   :  { %v11516_v43 = vmul.f32 %v11503_v52, %v11431_v30  ;;  %v11507_v45 = vrot.slane %v11497_v6, %v19581_v16 }
 0xf3f   :  { %v11518_v60 = vmul.f32 %v11511_v38, %v21470_v32  ;;  %v11515_v58 = vrot.slane %v11499_v44, %v19581_v16 }
 0xf40   :  { %v11541_v11 = vadd.f32 %v11524_v5, %v11516_v43  ;;  %v11517_v14 = vmul.f32 %v11507_v45, %v21472_v28 }
 0xf41   :  { %v11543_v2 = vadd.f32 %v11532_v23, %v11518_v60  ;;  %v11519_v10 = vmul.f32 %v11515_v58, %v21474_v54  ;;  %v11560_v54 = vld [vmem:[%s21536_s14 + $0x18] sm:$0xff] }
 0xf42   :  { %v11542_v21 = vadd.f32 %v11528_v46, %v11517_v14  ;;  %vm11545_vm9 = vcmp.ge.f32.partialorder %v11541_v11, 0.0  ;;  %v11549_v34 = vmul.f32 0.2, %v11541_v11 }
 0xf43   :  { %v11544_v30 = vadd.f32 %v11536_v47, %v11519_v10  ;;  %v11551_v12 = vmul.f32 0.2, %v11543_v2  ;;  %vm11547_vm11 = vcmp.ge.f32.partialorder %v11543_v2, 0.0 }
 0xf44   :  { %vm11546_vm10 = vcmp.ge.f32.partialorder %v11542_v21, 0.0  ;;  %v11550_v50 = vmul.f32 0.2, %v11542_v21  ;;  %v11553_v16 = vsel %vm11545_vm9, %v11541_v11, %v11549_v34 }
 0xf45   :  { %vm11548_vm12 = vcmp.ge.f32.partialorder %v11544_v30, 0.0  ;;  %v11552_v32 = vmul.f32 0.2, %v11544_v30  ;;  %v11555_v17 = vsel %vm11547_vm11, %v11543_v2, %v11551_v12  ;;  %v11561_v31 = vmul.f32 %v11557_v7, %v11553_v16 }
 0xf46   :  { %v11554_v28 = vsel %vm11546_vm10, %v11542_v21, %v11550_v50  ;;  %v11563_v51 = vmul.f32 %v11559_v20, %v11555_v17 }
 0xf47   :  { %v11562_v0 = vmul.f32 %v11558_v61, %v11554_v28  ;;  %v11556_v37 = vsel %vm11548_vm12, %v11544_v30, %v11552_v32 }
 0xf48   :  { %v11564_v24 = vmul.f32 %v11560_v54, %v11556_v37 }
 0xf49   :  { %11570 = vmatprep.subr.mxu1 %v11562_v0 }
 0xf4a   :  { %11571 = vmatpush1.msra.mxu1 %v11561_v31 }
 0xf4b   :  { %11641 = vmatprep.subr.mxu1 %v11564_v24  ;;  %13636 = vmatmul.mubr.msk.f32.vlgmr.msra.gmra.mrb[132].mxu1 %vm11566_vm13, %v11565_v49 }
 0xf4c   :  { %11642 = vmatpush1.msra.mxu1 %v11563_v51  ;;  %11705 = vmatprep.mubr.f32.mxu1 %v16832_v57 }
 0xf4f   :  { %13637 = vmatmul.mubr.msk.f32.vlgmr.msra.gmra.mrb[134].mxu1 %vm11566_vm13, %v11565_v49 }
0x101e   :  { %v11636_v53 = vpop.f32.mrb[132].mxu1 }
0x101f   :  { %v11713_v3 = vsel %vm11712_vm14, %v11636_v53, 0.0  ;;  %v11638_v33 = vpop.f32.mrb[133].mxu1 }
0x1020   :  { %v11714_v56 = vsel %vm11712_vm14, %v11638_v33, 0.0 }
0x1021   :  { %v11715_v59 = vadd.f32 %v11714_v56, %v11713_v3 }
0x1022   :  { %v11707_v15 = vpop.f32.mrb[134].mxu1 }
0x1023   :  { %v11716_v40 = vsel %vm11712_vm14, %v11707_v15, 0.0  ;;  %v11709_v4 = vpop.f32.mrb[135].mxu1 }
0x1024   :  { %v11717_v25 = vadd.f32 %v11716_v40, %v11715_v59  ;;  %v11718_v39 = vsel %vm11712_vm14, %v11709_v4, 0.0 }
0x1026   :  { %v11719_v8 = vadd.f32 %v11718_v39, %v11717_v25 }
0x1028   :  { %11720 = vadd.xlane.f32.xlu0 %v11719_v8 }
0x10b5   :  { %v11721_v27 = vpop.xlane.xlu0 %11720 }
0x10b6   :  { %v11729_v48 = vadd.f32 %v13638_v55, %v11721_v27 }
0x10b8   :  { %v11730_v62 = vsub.f32 0.0, %v11729_v48 }
0x10ba   :  { %v11731_v63 = vmul.f32 1.442695, %v11730_v62 }
0x10bc   :  { %16704 = vpow2.f32 %v11731_v63 }
0x10c6   :  { %v16705_v57 = vpop.eup %16704 }
0x10c7   :  { %v11733_v42 = vadd.f32 1.0, %v16705_v57 }
0x10c9   :  { %16706 = vrcp.f32 %v11733_v42 }
0x10d3   :  { %v16707_v1 = vpop.eup %16706 }
0x10d4   :  { %11737 = vst.msk [vmem:[%s21539_s17] sm:$0x3] %vm11736_vm15, %v16707_v1 }
0x10d5   :  { %11742 = vsyncpa [#allocation4], 1 }

</bundles_post_ra>
